<compile_context>
chip_gen: v7x
topology: tpu7x:2x2x1
jax: 0.10.0
libtpu: 0.0.40
codegen_flags: <defaults>
</compile_context>

<pallas_src>
import functools

import jax
import jax.numpy as jnp
from jax.experimental import pallas as pl
from jax.experimental.pallas import tpu as pltpu


# ---------------------------------------------------------------------------
# Kernel 1: conv_init (K=7, stride=1, pad=3) + folded BN + ReLU.
# In-kernel im2col: K shifted slices of the padded activation slab.
# ---------------------------------------------------------------------------
def _conv_init_kernel(x_ref, w_ref, scale_ref, bias_ref, o_ref, *, K):
    L_out = o_ref.shape[0]
    acc = jnp.dot(x_ref[pl.ds(0, L_out), :].astype(jnp.bfloat16), w_ref[0],
                  preferred_element_type=jnp.float32)
    for k in range(1, K):
        acc += jnp.dot(x_ref[pl.ds(k, L_out), :].astype(jnp.bfloat16), w_ref[k],
                       preferred_element_type=jnp.float32)
    out = jnp.maximum(acc * scale_ref[...] + bias_ref[...], 0.0)
    o_ref[...] = out.astype(o_ref.dtype)


def conv_init(x, w_kio, scale, bias):
    """x: (B, L, C_in) f32 channels-last.  w_kio: (K, C_in, C_out) bf16."""
    B, L, C_in = x.shape
    K, _, C_out = w_kio.shape
    pad = (K - 1) // 2
    x_pad = jnp.pad(x, ((0, 0), (pad, pad), (0, 0)))
    kern = functools.partial(_conv_init_kernel, K=K)
    # NOTE: C_out=64 (<128 lanes) is a property of the model; the HBM store is
    # masked but correct.  Folding this layer into block1 would hide it.
    return pl.pallas_call(
        kern,
        out_shape=jax.ShapeDtypeStruct((B, L, C_out), jnp.float32),
        grid_spec=pltpu.PrefetchScalarGridSpec(
            num_scalar_prefetch=0,
            grid=(B,),
            in_specs=[
                pl.BlockSpec((None, L + 2 * pad, C_in), lambda b: (b, 0, 0)),
                pl.BlockSpec((K, C_in, C_out), lambda b: (0, 0, 0)),
                pl.BlockSpec((1, C_out), lambda b: (0, 0)),
                pl.BlockSpec((1, C_out), lambda b: (0, 0)),
            ],
            out_specs=pl.BlockSpec((None, L, C_out), lambda b: (b, 0, 0)),
        ),
        compiler_params=pltpu.CompilerParams(dimension_semantics=("parallel",)),
    )(x_pad, w_kio, scale, bias)


# ---------------------------------------------------------------------------
# Kernel 2: one full residual block, fused.
#   h   = relu(bn1(conv1_s2(x)))        (conv1: K=3, stride=2, pad=1)
#   y   = bn2(conv2(h))                 (conv2: K=3, stride=1, pad=1)
#   out = relu(y + bn_skip(conv1x1_s2(x)))
# The stride-2 is pre-resolved by the wrapper's even/odd split, so every tap
# inside the kernel is a plain contiguous slice.
# ---------------------------------------------------------------------------
def _res_block_kernel(xe_ref, xo_ref,
                      w1_ref, s1_ref, b1_ref,
                      w2_ref, s2_ref, b2_ref,
                      ws_ref, ss_ref, bs_ref,
                      o_ref, hpad_ref):
    L_out, C_out = o_ref.shape

    def bdot(a_f32, w_bf16):
        # bf16 MXU operands, f32 accumulation.
        return jnp.dot(a_f32.astype(jnp.bfloat16), w_bf16,
                       preferred_element_type=jnp.float32)

    # conv1 (stride 2, pad 1) + BN1 + ReLU.
    #   out1[l] = x_pad[2l]W0 + x_pad[2l+1]W1 + x_pad[2l+2]W2
    #           = x_even[l]W0 + x_odd[l]W1 + x_even[l+1]W2
    a1 = bdot(xe_ref[pl.ds(0, L_out), :], w1_ref[0])
    a1 = a1 + bdot(xo_ref[...], w1_ref[1])
    a1 = a1 + bdot(xe_ref[pl.ds(1, L_out), :], w1_ref[2])
    h = jnp.maximum(a1 * s1_ref[...] + b1_ref[...], 0.0)      # f32 epilogue

    # Zero-pad h by 1 on each side into VMEM scratch so conv2's taps are
    # contiguous slices (intermediate never leaves VMEM).
    hpad_ref[...] = jnp.zeros_like(hpad_ref)
    hpad_ref[pl.ds(1, L_out), :] = h

    # conv2 (stride 1, pad 1) + BN2.
    a2 = bdot(hpad_ref[pl.ds(0, L_out), :], w2_ref[0])
    a2 = a2 + bdot(hpad_ref[pl.ds(1, L_out), :], w2_ref[1])
    a2 = a2 + bdot(hpad_ref[pl.ds(2, L_out), :], w2_ref[2])
    y = a2 * s2_ref[...] + b2_ref[...]

    # Skip path: 1x1 stride-2 conv + BN.  x[2l] == x_odd[l] (pad offset 1).
    sk = bdot(xo_ref[...], ws_ref[...]) * ss_ref[...] + bs_ref[...]

    o_ref[...] = jnp.maximum(y + sk, 0.0).astype(o_ref.dtype)


def residual_block(x, bp):
    """x: (B, L, C_in) f32.  Returns (B, L_out, C_out) f32."""
    B, L, C_in = x.shape
    C_out = bp["w1"].shape[2]
    L_out = (L - 1) // 2 + 1                       # conv1: K=3, stride=2, pad=1
    x_pad = jnp.pad(x, ((0, 0), (1, 1), (0, 0)))
    # Even/odd split of the padded input (strided slice, no gather, no dup):
    #   x_even[l] = x_pad[2l],  x_odd[l] = x_pad[2l+1] = x[2l]
    x_even = x_pad[:, 0:2 * L_out + 1:2, :]        # (B, L_out+1, C_in)
    x_odd = x_pad[:, 1:2 * L_out:2, :]             # (B, L_out,   C_in)

    return pl.pallas_call(
        _res_block_kernel,
        out_shape=jax.ShapeDtypeStruct((B, L_out, C_out), jnp.float32),
        grid_spec=pltpu.PrefetchScalarGridSpec(
            num_scalar_prefetch=0,
            grid=(B,),
            in_specs=[
                pl.BlockSpec((None, L_out + 1, C_in), lambda b: (b, 0, 0)),
                pl.BlockSpec((None, L_out, C_in), lambda b: (b, 0, 0)),
                pl.BlockSpec((3, C_in, C_out), lambda b: (0, 0, 0)),
                pl.BlockSpec((1, C_out), lambda b: (0, 0)),
                pl.BlockSpec((1, C_out), lambda b: (0, 0)),
                pl.BlockSpec((3, C_out, C_out), lambda b: (0, 0, 0)),
                pl.BlockSpec((1, C_out), lambda b: (0, 0)),
                pl.BlockSpec((1, C_out), lambda b: (0, 0)),
                pl.BlockSpec((C_in, C_out), lambda b: (0, 0)),
                pl.BlockSpec((1, C_out), lambda b: (0, 0)),
                pl.BlockSpec((1, C_out), lambda b: (0, 0)),
            ],
            out_specs=pl.BlockSpec((None, L_out, C_out), lambda b: (b, 0, 0)),
            scratch_shapes=[pltpu.VMEM((L_out + 2, C_out), jnp.float32)],
        ),
        compiler_params=pltpu.CompilerParams(dimension_semantics=("parallel",)),
    )(x_even, x_odd,
      bp["w1"], bp["s1"], bp["b1"],
      bp["w2"], bp["s2"], bp["b2"],
      bp["ws"], bp["ss"], bp["bs"])


# ---------------------------------------------------------------------------
# Kernel 3: head = global mean pool + fc1 + ReLU + (dropout=identity) + fc2.
# ---------------------------------------------------------------------------
def _head_kernel(x_ref, w1_ref, b1_ref, w2_ref, b2_ref, o_ref):
    pooled = jnp.mean(x_ref[...], axis=1)                      # (B, 512) f32
    h = jnp.dot(pooled.astype(jnp.bfloat16), w1_ref[...],
                preferred_element_type=jnp.float32) + b1_ref[...]
    h = jnp.maximum(h, 0.0)
    # TODO(synk): training-mode dropout (p=0.4) not implemented; eval = identity.
    out = jnp.dot(h.astype(jnp.bfloat16), w2_ref[...],
                  preferred_element_type=jnp.float32) + b2_ref[...]
    o_ref[...] = out.astype(o_ref.dtype)


def head(x, w1, b1, w2, b2):
    B = x.shape[0]
    ntp = w2.shape[1]
    return pl.pallas_call(
        _head_kernel,
        out_shape=jax.ShapeDtypeStruct((B, ntp), jnp.float32),
    )(x, w1, b1, w2, b2)


# ---------------------------------------------------------------------------
# One-time parameter preparation (weight relayout + eval-mode BN folding).
# ---------------------------------------------------------------------------
def _fold_bn(bn, conv_bias=None):
    gamma, beta, mu, var = bn
    eps = 1e-5
    scale = gamma / jnp.sqrt(var + eps)
    cb = conv_bias if conv_bias is not None else jnp.zeros_like(mu)
    bias = beta + (cb - mu) * scale
    C = scale.shape[0]
    return (scale.reshape(1, C).astype(jnp.float32),
            bias.reshape(1, C).astype(jnp.float32))


def _prep_conv_w(w):
    # PyTorch (C_out, C_in, K) -> (K, C_in, C_out), bf16 for the MXU.
    return jnp.transpose(w, (2, 1, 0)).astype(jnp.bfloat16)


def prepare_params(p):
    def block(bp):
        s1, b1 = _fold_bn(bp["bn1"])
        s2, b2 = _fold_bn(bp["bn2"])
        ss, bs = _fold_bn(bp["skip_bn"])
        return dict(
            w1=_prep_conv_w(bp["conv1_w"]), s1=s1, b1=b1,
            w2=_prep_conv_w(bp["conv2_w"]), s2=s2, b2=b2,
            ws=jnp.transpose(bp["skip_w"][:, :, 0], (1, 0)).astype(jnp.bfloat16),
            ss=ss, bs=bs,
        )

    s0, b0 = _fold_bn(p["bn_init"], p["conv_init_b"])
    hidden = p["fc1_w"].shape[0]
    ntp = p["fc2_w"].shape[0]
    return dict(
        conv_init_w=_prep_conv_w(p["conv_init_w"]), s0=s0, b0=b0,
        block1=block(p["block1"]),
        block2=block(p["block2"]),
        block3=block(p["block3"]),
        fc1_w=p["fc1_w"].T.astype(jnp.bfloat16),
        fc1_b=p["fc1_b"].reshape(1, hidden).astype(jnp.float32),
        fc2_w=p["fc2_w"].T.astype(jnp.bfloat16),
        fc2_b=p["fc2_b"].reshape(1, ntp).astype(jnp.float32),
    )


# ---------------------------------------------------------------------------
# Model: deterministic parameter init + forward.
# ---------------------------------------------------------------------------
def init_params(key, num_haplotypes, num_time_points, hidden_dim):
    keys = iter(jax.random.split(key, 64))

    def w(shape, s=0.05):
        return jax.random.normal(next(keys), shape, jnp.float32) * s

    def bn(c):
        gamma = jax.random.uniform(next(keys), (c,), jnp.float32, 0.8, 1.2)
        beta = w((c,))
        running_mean = w((c,))
        running_var = jax.random.uniform(next(keys), (c,), jnp.float32, 0.5, 1.5)
        return (gamma, beta, running_mean, running_var)

    def block(cin, cout):
        return dict(
            conv1_w=w((cout, cin, 3)), bn1=bn(cout),
            conv2_w=w((cout, cout, 3)), bn2=bn(cout),
            skip_w=w((cout, cin, 1)), skip_bn=bn(cout),
        )

    return {
        "conv_init_w": w((64, num_haplotypes, 7)),
        "conv_init_b": w((64,)),
        "bn_init": bn(64),
        "block1": block(64, 128),
        "block2": block(128, 256),
        "block3": block(256, 512),
        "fc1_w": w((hidden_dim, 512)), "fc1_b": w((hidden_dim,)),
        "fc2_w": w((num_time_points, hidden_dim)), "fc2_b": w((num_time_points,)),
    }


def cnn1d_deeper_forward(prep, x_ncl):
    # PyTorch NCL -> channels-last (B, L, C).
    x = jnp.transpose(x_ncl, (0, 2, 1)).astype(jnp.float32)
    x = conv_init(x, prep["conv_init_w"], prep["s0"], prep["b0"])
    x = residual_block(x, prep["block1"])
    x = residual_block(x, prep["block2"])
    x = residual_block(x, prep["block3"])
    return head(x, prep["fc1_w"], prep["fc1_b"], prep["fc2_w"], prep["fc2_b"])


if __name__ == "__main__":
    B = 2
    num_haplotypes = 4     # input channels
    max_variants = 16      # sequence length
    num_time_points = 8
    hidden_dim = 32

    key = jax.random.PRNGKey(0)
    pkey, xkey = jax.random.split(key)
    params = init_params(pkey, num_haplotypes, num_time_points, hidden_dim)
    prep = prepare_params(params)   # one-time weight/BN folding (not per-step)
    x = jax.random.normal(xkey, (B, num_haplotypes, max_variants), jnp.float32)

    fwd = jax.jit(cnn1d_deeper_forward)
    out = fwd(prep, x)
    jax.block_until_ready(out)
    assert out.shape == (B, num_time_points), out.shape
    print("KERNEL_OK")
</pallas_src>

<mosaic_0001>
module attributes {stable_mosaic.version = 11 : i64} {
  func.func @_conv_init_kernel(%arg0: i32, %arg1: memref<1x22x4xf32, #tpu.memory_space<vmem>>, %arg2: memref<7x4x64xbf16, #tpu.memory_space<vmem>>, %arg3: memref<1x64xf32, #tpu.memory_space<vmem>>, %arg4: memref<1x64xf32, #tpu.memory_space<vmem>>, %arg5: memref<1x16x64xf32, #tpu.memory_space<vmem>>) attributes {dimension_semantics = [#tpu.dimension_semantics<parallel>], iteration_bounds = array<i64: 2>, scalar_prefetch = 0 : i64, scratch_operands = 0 : i64, tpu.core_type = #tpu.core_type<tc>, window_params = [{transform_indices = @transform_0, window_bounds = array<i64: 1, 22, 4>}, {pipeline_mode = #tpu.pipeline_mode<synchronous>, transform_indices = @transform_1, window_bounds = array<i64: 7, 4, 64>}, {pipeline_mode = #tpu.pipeline_mode<synchronous>, transform_indices = @transform_2, window_bounds = array<i64: 1, 64>}, {pipeline_mode = #tpu.pipeline_mode<synchronous>, transform_indices = @transform_3, window_bounds = array<i64: 1, 64>}, {transform_indices = @transform_4, window_bounds = array<i64: 1, 16, 64>}]} {
    %c0 = arith.constant 0 : index
    %c0_0 = arith.constant 0 : index
    %c0_1 = arith.constant 0 : index
    %0 = vector.load %arg1[%c0, %c0_0, %c0_1] : memref<1x22x4xf32, #tpu.memory_space<vmem>>, vector<1x16x4xf32>
    %1 = vector.shape_cast %0 : vector<1x16x4xf32> to vector<16x4xf32>
    %2 = arith.truncf %1 : vector<16x4xf32> to vector<16x4xbf16>
    %c0_2 = arith.constant 0 : index
    %c0_3 = arith.constant 0 : index
    %c0_4 = arith.constant 0 : index
    %3 = vector.load %arg2[%c0_2, %c0_3, %c0_4] : memref<7x4x64xbf16, #tpu.memory_space<vmem>>, vector<1x4x64xbf16>
    %4 = vector.shape_cast %3 : vector<1x4x64xbf16> to vector<4x64xbf16>
    %cst = arith.constant dense<0.000000e+00> : vector<16x64xf32>
    %5 = tpu.matmul %2, %4, %cst {dimension_numbers = #tpu.dot_dimension_numbers<[1], [0], [0], [1], [0, 0, 1, 1], [], []>} : vector<16x4xbf16>, vector<4x64xbf16>, vector<16x64xf32> -> vector<16x64xf32>
    %c0_5 = arith.constant 0 : index
    %c1 = arith.constant 1 : index
    %c0_6 = arith.constant 0 : index
    %6 = vector.load %arg1[%c0_5, %c1, %c0_6] : memref<1x22x4xf32, #tpu.memory_space<vmem>>, vector<1x16x4xf32>
    %7 = vector.shape_cast %6 : vector<1x16x4xf32> to vector<16x4xf32>
    %8 = arith.truncf %7 : vector<16x4xf32> to vector<16x4xbf16>
    %c1_7 = arith.constant 1 : index
    %c0_8 = arith.constant 0 : index
    %c0_9 = arith.constant 0 : index
    %9 = vector.load %arg2[%c1_7, %c0_8, %c0_9] : memref<7x4x64xbf16, #tpu.memory_space<vmem>>, vector<1x4x64xbf16>
    %10 = vector.shape_cast %9 : vector<1x4x64xbf16> to vector<4x64xbf16>
    %cst_10 = arith.constant dense<0.000000e+00> : vector<16x64xf32>
    %11 = tpu.matmul %8, %10, %cst_10 {dimension_numbers = #tpu.dot_dimension_numbers<[1], [0], [0], [1], [0, 0, 1, 1], [], []>} : vector<16x4xbf16>, vector<4x64xbf16>, vector<16x64xf32> -> vector<16x64xf32>
    %12 = arith.addf %5, %11 : vector<16x64xf32>
    %c0_11 = arith.constant 0 : index
    %c2 = arith.constant 2 : index
    %c0_12 = arith.constant 0 : index
    %13 = vector.load %arg1[%c0_11, %c2, %c0_12] : memref<1x22x4xf32, #tpu.memory_space<vmem>>, vector<1x16x4xf32>
    %14 = vector.shape_cast %13 : vector<1x16x4xf32> to vector<16x4xf32>
    %15 = arith.truncf %14 : vector<16x4xf32> to vector<16x4xbf16>
    %c2_13 = arith.constant 2 : index
    %c0_14 = arith.constant 0 : index
    %c0_15 = arith.constant 0 : index
    %16 = vector.load %arg2[%c2_13, %c0_14, %c0_15] : memref<7x4x64xbf16, #tpu.memory_space<vmem>>, vector<1x4x64xbf16>
    %17 = vector.shape_cast %16 : vector<1x4x64xbf16> to vector<4x64xbf16>
    %cst_16 = arith.constant dense<0.000000e+00> : vector<16x64xf32>
    %18 = tpu.matmul %15, %17, %cst_16 {dimension_numbers = #tpu.dot_dimension_numbers<[1], [0], [0], [1], [0, 0, 1, 1], [], []>} : vector<16x4xbf16>, vector<4x64xbf16>, vector<16x64xf32> -> vector<16x64xf32>
    %19 = arith.addf %12, %18 : vector<16x64xf32>
    %c0_17 = arith.constant 0 : index
    %c3 = arith.constant 3 : index
    %c0_18 = arith.constant 0 : index
    %20 = vector.load %arg1[%c0_17, %c3, %c0_18] : memref<1x22x4xf32, #tpu.memory_space<vmem>>, vector<1x16x4xf32>
    %21 = vector.shape_cast %20 : vector<1x16x4xf32> to vector<16x4xf32>
    %22 = arith.truncf %21 : vector<16x4xf32> to vector<16x4xbf16>
    %c3_19 = arith.constant 3 : index
    %c0_20 = arith.constant 0 : index
    %c0_21 = arith.constant 0 : index
    %23 = vector.load %arg2[%c3_19, %c0_20, %c0_21] : memref<7x4x64xbf16, #tpu.memory_space<vmem>>, vector<1x4x64xbf16>
    %24 = vector.shape_cast %23 : vector<1x4x64xbf16> to vector<4x64xbf16>
    %cst_22 = arith.constant dense<0.000000e+00> : vector<16x64xf32>
    %25 = tpu.matmul %22, %24, %cst_22 {dimension_numbers = #tpu.dot_dimension_numbers<[1], [0], [0], [1], [0, 0, 1, 1], [], []>} : vector<16x4xbf16>, vector<4x64xbf16>, vector<16x64xf32> -> vector<16x64xf32>
    %26 = arith.addf %19, %25 : vector<16x64xf32>
    %c0_23 = arith.constant 0 : index
    %c4 = arith.constant 4 : index
    %c0_24 = arith.constant 0 : index
    %27 = vector.load %arg1[%c0_23, %c4, %c0_24] : memref<1x22x4xf32, #tpu.memory_space<vmem>>, vector<1x16x4xf32>
    %28 = vector.shape_cast %27 : vector<1x16x4xf32> to vector<16x4xf32>
    %29 = arith.truncf %28 : vector<16x4xf32> to vector<16x4xbf16>
    %c4_25 = arith.constant 4 : index
    %c0_26 = arith.constant 0 : index
    %c0_27 = arith.constant 0 : index
    %30 = vector.load %arg2[%c4_25, %c0_26, %c0_27] : memref<7x4x64xbf16, #tpu.memory_space<vmem>>, vector<1x4x64xbf16>
    %31 = vector.shape_cast %30 : vector<1x4x64xbf16> to vector<4x64xbf16>
    %cst_28 = arith.constant dense<0.000000e+00> : vector<16x64xf32>
    %32 = tpu.matmul %29, %31, %cst_28 {dimension_numbers = #tpu.dot_dimension_numbers<[1], [0], [0], [1], [0, 0, 1, 1], [], []>} : vector<16x4xbf16>, vector<4x64xbf16>, vector<16x64xf32> -> vector<16x64xf32>
    %33 = arith.addf %26, %32 : vector<16x64xf32>
    %c0_29 = arith.constant 0 : index
    %c5 = arith.constant 5 : index
    %c0_30 = arith.constant 0 : index
    %34 = vector.load %arg1[%c0_29, %c5, %c0_30] : memref<1x22x4xf32, #tpu.memory_space<vmem>>, vector<1x16x4xf32>
    %35 = vector.shape_cast %34 : vector<1x16x4xf32> to vector<16x4xf32>
    %36 = arith.truncf %35 : vector<16x4xf32> to vector<16x4xbf16>
    %c5_31 = arith.constant 5 : index
    %c0_32 = arith.constant 0 : index
    %c0_33 = arith.constant 0 : index
    %37 = vector.load %arg2[%c5_31, %c0_32, %c0_33] : memref<7x4x64xbf16, #tpu.memory_space<vmem>>, vector<1x4x64xbf16>
    %38 = vector.shape_cast %37 : vector<1x4x64xbf16> to vector<4x64xbf16>
    %cst_34 = arith.constant dense<0.000000e+00> : vector<16x64xf32>
    %39 = tpu.matmul %36, %38, %cst_34 {dimension_numbers = #tpu.dot_dimension_numbers<[1], [0], [0], [1], [0, 0, 1, 1], [], []>} : vector<16x4xbf16>, vector<4x64xbf16>, vector<16x64xf32> -> vector<16x64xf32>
    %40 = arith.addf %33, %39 : vector<16x64xf32>
    %c0_35 = arith.constant 0 : index
    %c6 = arith.constant 6 : index
    %c0_36 = arith.constant 0 : index
    %41 = vector.load %arg1[%c0_35, %c6, %c0_36] : memref<1x22x4xf32, #tpu.memory_space<vmem>>, vector<1x16x4xf32>
    %42 = vector.shape_cast %41 : vector<1x16x4xf32> to vector<16x4xf32>
    %43 = arith.truncf %42 : vector<16x4xf32> to vector<16x4xbf16>
    %c6_37 = arith.constant 6 : index
    %c0_38 = arith.constant 0 : index
    %c0_39 = arith.constant 0 : index
    %44 = vector.load %arg2[%c6_37, %c0_38, %c0_39] : memref<7x4x64xbf16, #tpu.memory_space<vmem>>, vector<1x4x64xbf16>
    %45 = vector.shape_cast %44 : vector<1x4x64xbf16> to vector<4x64xbf16>
    %cst_40 = arith.constant dense<0.000000e+00> : vector<16x64xf32>
    %46 = tpu.matmul %43, %45, %cst_40 {dimension_numbers = #tpu.dot_dimension_numbers<[1], [0], [0], [1], [0, 0, 1, 1], [], []>} : vector<16x4xbf16>, vector<4x64xbf16>, vector<16x64xf32> -> vector<16x64xf32>
    %47 = arith.addf %40, %46 : vector<16x64xf32>
    %c0_41 = arith.constant 0 : index
    %c0_42 = arith.constant 0 : index
    %48 = vector.load %arg3[%c0_41, %c0_42] : memref<1x64xf32, #tpu.memory_space<vmem>>, vector<1x64xf32>
    %49 = vector.broadcast %48 : vector<1x64xf32> to vector<16x64xf32>
    %50 = arith.mulf %47, %49 : vector<16x64xf32>
    %c0_43 = arith.constant 0 : index
    %c0_44 = arith.constant 0 : index
    %51 = vector.load %arg4[%c0_43, %c0_44] : memref<1x64xf32, #tpu.memory_space<vmem>>, vector<1x64xf32>
    %52 = vector.broadcast %51 : vector<1x64xf32> to vector<16x64xf32>
    %53 = arith.addf %50, %52 : vector<16x64xf32>
    %cst_45 = arith.constant 0.000000e+00 : f32
    %54 = vector.broadcast %cst_45 : f32 to vector<16x64xf32>
    %55 = arith.maximumf %53, %54 : vector<16x64xf32>
    %c0_46 = arith.constant 0 : index
    %c0_47 = arith.constant 0 : index
    %c0_48 = arith.constant 0 : index
    %56 = vector.load %arg5[%c0_46, %c0_47, %c0_48] : memref<1x16x64xf32, #tpu.memory_space<vmem>>, vector<1x16x64xf32>
    %57 = vector.shape_cast %56 : vector<1x16x64xf32> to vector<16x64xf32>
    %58 = vector.shape_cast %55 : vector<16x64xf32> to vector<1x16x64xf32>
    tpu.vector_store %arg5[%c0_46, %c0_47, %c0_48], %58 {strides = array<i32>} : memref<1x16x64xf32, #tpu.memory_space<vmem>>, vector<1x16x64xf32>,
    return
  }
  func.func @transform_0(%arg0: i32) -> (i32, i32, i32) {
    %c0_i32 = arith.constant 0 : i32
    %c0_i32_0 = arith.constant 0 : i32
    %c0_i32_1 = arith.constant 0 : i32
    return %arg0, %c0_i32, %c0_i32_0 : i32, i32, i32
  }
  func.func @transform_1(%arg0: i32) -> (i32, i32, i32) {
    %c0_i32 = arith.constant 0 : i32
    %c0_i32_0 = arith.constant 0 : i32
    %c0_i32_1 = arith.constant 0 : i32
    %c0_i32_2 = arith.constant 0 : i32
    return %c0_i32, %c0_i32_0, %c0_i32_1 : i32, i32, i32
  }
  func.func @transform_2(%arg0: i32) -> (i32, i32) {
    %c0_i32 = arith.constant 0 : i32
    %c0_i32_0 = arith.constant 0 : i32
    %c0_i32_1 = arith.constant 0 : i32
    return %c0_i32, %c0_i32_0 : i32, i32
  }
  func.func @transform_3(%arg0: i32) -> (i32, i32) {
    %c0_i32 = arith.constant 0 : i32
    %c0_i32_0 = arith.constant 0 : i32
    %c0_i32_1 = arith.constant 0 : i32
    return %c0_i32, %c0_i32_0 : i32, i32
  }
  func.func @transform_4(%arg0: i32) -> (i32, i32, i32) {
    %c0_i32 = arith.constant 0 : i32
    %c0_i32_0 = arith.constant 0 : i32
    %c0_i32_1 = arith.constant 0 : i32
    return %arg0, %c0_i32, %c0_i32_0 : i32, i32, i32
  }
}

module attributes {stable_mosaic.version = 11 : i64} {
  func.func @_res_block_kernel(%arg0: i32, %arg1: memref<1x9x64xf32, #tpu.memory_space<vmem>>, %arg2: memref<1x8x64xf32, #tpu.memory_space<vmem>>, %arg3: memref<3x64x128xbf16, #tpu.memory_space<vmem>>, %arg4: memref<1x128xf32, #tpu.memory_space<vmem>>, %arg5: memref<1x128xf32, #tpu.memory_space<vmem>>, %arg6: memref<3x128x128xbf16, #tpu.memory_space<vmem>>, %arg7: memref<1x128xf32, #tpu.memory_space<vmem>>, %arg8: memref<1x128xf32, #tpu.memory_space<vmem>>, %arg9: memref<64x128xbf16, #tpu.memory_space<vmem>>, %arg10: memref<1x128xf32, #tpu.memory_space<vmem>>, %arg11: memref<1x128xf32, #tpu.memory_space<vmem>>, %arg12: memref<1x8x128xf32, #tpu.memory_space<vmem>>, %arg13: memref<10x128xf32, #tpu.memory_space<vmem>>) attributes {dimension_semantics = [#tpu.dimension_semantics<parallel>], iteration_bounds = array<i64: 2>, scalar_prefetch = 0 : i64, scratch_operands = 1 : i64, tpu.core_type = #tpu.core_type<tc>, window_params = [{transform_indices = @transform_0, window_bounds = array<i64: 1, 9, 64>}, {transform_indices = @transform_1, window_bounds = array<i64: 1, 8, 64>}, {pipeline_mode = #tpu.pipeline_mode<synchronous>, transform_indices = @transform_2, window_bounds = array<i64: 3, 64, 128>}, {pipeline_mode = #tpu.pipeline_mode<synchronous>, transform_indices = @transform_3, window_bounds = array<i64: 1, 128>}, {pipeline_mode = #tpu.pipeline_mode<synchronous>, transform_indices = @transform_4, window_bounds = array<i64: 1, 128>}, {pipeline_mode = #tpu.pipeline_mode<synchronous>, transform_indices = @transform_5, window_bounds = array<i64: 3, 128, 128>}, {pipeline_mode = #tpu.pipeline_mode<synchronous>, transform_indices = @transform_6, window_bounds = array<i64: 1, 128>}, {pipeline_mode = #tpu.pipeline_mode<synchronous>, transform_indices = @transform_7, window_bounds = array<i64: 1, 128>}, {pipeline_mode = #tpu.pipeline_mode<synchronous>, transform_indices = @transform_8, window_bounds = array<i64: 64, 128>}, {pipeline_mode = #tpu.pipeline_mode<synchronous>, transform_indices = @transform_9, window_bounds = array<i64: 1, 128>}, {pipeline_mode = #tpu.pipeline_mode<synchronous>, transform_indices = @transform_10, window_bounds = array<i64: 1, 128>}, {transform_indices = @transform_11, window_bounds = array<i64: 1, 8, 128>}]} {
    %c0 = arith.constant 0 : index
    %c0_0 = arith.constant 0 : index
    %c0_1 = arith.constant 0 : index
    %0 = vector.load %arg1[%c0, %c0_0, %c0_1] : memref<1x9x64xf32, #tpu.memory_space<vmem>>, vector<1x8x64xf32>
    %1 = vector.shape_cast %0 : vector<1x8x64xf32> to vector<8x64xf32>
    %c0_2 = arith.constant 0 : index
    %c0_3 = arith.constant 0 : index
    %c0_4 = arith.constant 0 : index
    %2 = vector.load %arg3[%c0_2, %c0_3, %c0_4] : memref<3x64x128xbf16, #tpu.memory_space<vmem>>, vector<1x64x128xbf16>
    %3 = vector.shape_cast %2 : vector<1x64x128xbf16> to vector<64x128xbf16>
    %4 = arith.truncf %1 : vector<8x64xf32> to vector<8x64xbf16>
    %cst = arith.constant dense<0.000000e+00> : vector<8x128xf32>
    %5 = tpu.matmul %4, %3, %cst {dimension_numbers = #tpu.dot_dimension_numbers<[1], [0], [0], [1], [0, 0, 1, 1], [], []>} : vector<8x64xbf16>, vector<64x128xbf16>, vector<8x128xf32> -> vector<8x128xf32>
    %c0_5 = arith.constant 0 : index
    %c0_6 = arith.constant 0 : index
    %c0_7 = arith.constant 0 : index
    %6 = vector.load %arg2[%c0_5, %c0_6, %c0_7] : memref<1x8x64xf32, #tpu.memory_space<vmem>>, vector<1x8x64xf32>
    %7 = vector.shape_cast %6 : vector<1x8x64xf32> to vector<8x64xf32>
    %c1 = arith.constant 1 : index
    %c0_8 = arith.constant 0 : index
    %c0_9 = arith.constant 0 : index
    %8 = vector.load %arg3[%c1, %c0_8, %c0_9] : memref<3x64x128xbf16, #tpu.memory_space<vmem>>, vector<1x64x128xbf16>
    %9 = vector.shape_cast %8 : vector<1x64x128xbf16> to vector<64x128xbf16>
    %10 = arith.truncf %7 : vector<8x64xf32> to vector<8x64xbf16>
    %cst_10 = arith.constant dense<0.000000e+00> : vector<8x128xf32>
    %11 = tpu.matmul %10, %9, %cst_10 {dimension_numbers = #tpu.dot_dimension_numbers<[1], [0], [0], [1], [0, 0, 1, 1], [], []>} : vector<8x64xbf16>, vector<64x128xbf16>, vector<8x128xf32> -> vector<8x128xf32>
    %12 = arith.addf %5, %11 : vector<8x128xf32>
    %c0_11 = arith.constant 0 : index
    %c1_12 = arith.constant 1 : index
    %c0_13 = arith.constant 0 : index
    %13 = vector.load %arg1[%c0_11, %c1_12, %c0_13] : memref<1x9x64xf32, #tpu.memory_space<vmem>>, vector<1x8x64xf32>
    %14 = vector.shape_cast %13 : vector<1x8x64xf32> to vector<8x64xf32>
    %c2 = arith.constant 2 : index
    %c0_14 = arith.constant 0 : index
    %c0_15 = arith.constant 0 : index
    %15 = vector.load %arg3[%c2, %c0_14, %c0_15] : memref<3x64x128xbf16, #tpu.memory_space<vmem>>, vector<1x64x128xbf16>
    %16 = vector.shape_cast %15 : vector<1x64x128xbf16> to vector<64x128xbf16>
    %17 = arith.truncf %14 : vector<8x64xf32> to vector<8x64xbf16>
    %cst_16 = arith.constant dense<0.000000e+00> : vector<8x128xf32>
    %18 = tpu.matmul %17, %16, %cst_16 {dimension_numbers = #tpu.dot_dimension_numbers<[1], [0], [0], [1], [0, 0, 1, 1], [], []>} : vector<8x64xbf16>, vector<64x128xbf16>, vector<8x128xf32> -> vector<8x128xf32>
    %19 = arith.addf %12, %18 : vector<8x128xf32>
    %c0_17 = arith.constant 0 : index
    %c0_18 = arith.constant 0 : index
    %20 = vector.load %arg4[%c0_17, %c0_18] : memref<1x128xf32, #tpu.memory_space<vmem>>, vector<1x128xf32>
    %21 = vector.broadcast %20 : vector<1x128xf32> to vector<8x128xf32>
    %22 = arith.mulf %19, %21 : vector<8x128xf32>
    %c0_19 = arith.constant 0 : index
    %c0_20 = arith.constant 0 : index
    %23 = vector.load %arg5[%c0_19, %c0_20] : memref<1x128xf32, #tpu.memory_space<vmem>>, vector<1x128xf32>
    %24 = vector.broadcast %23 : vector<1x128xf32> to vector<8x128xf32>
    %25 = arith.addf %22, %24 : vector<8x128xf32>
    %cst_21 = arith.constant 0.000000e+00 : f32
    %26 = vector.broadcast %cst_21 : f32 to vector<8x128xf32>
    %27 = arith.maximumf %25, %26 : vector<8x128xf32>
    %cst_22 = arith.constant 0.000000e+00 : f32
    %28 = vector.broadcast %cst_22 : f32 to vector<10x128xf32>
    %c0_23 = arith.constant 0 : index
    %c0_24 = arith.constant 0 : index
    %29 = vector.load %arg13[%c0_23, %c0_24] : memref<10x128xf32, #tpu.memory_space<vmem>>, vector<10x128xf32>
    tpu.vector_store %arg13[%c0_23, %c0_24], %28 {strides = array<i32>} : memref<10x128xf32, #tpu.memory_space<vmem>>, vector<10x128xf32>,
    %c1_25 = arith.constant 1 : index
    %c0_26 = arith.constant 0 : index
    %30 = vector.load %arg13[%c1_25, %c0_26] : memref<10x128xf32, #tpu.memory_space<vmem>>, vector<8x128xf32>
    tpu.vector_store %arg13[%c1_25, %c0_26], %27 {strides = array<i32>} : memref<10x128xf32, #tpu.memory_space<vmem>>, vector<8x128xf32>,
    %c0_27 = arith.constant 0 : index
    %c0_28 = arith.constant 0 : index
    %31 = vector.load %arg13[%c0_27, %c0_28] : memref<10x128xf32, #tpu.memory_space<vmem>>, vector<8x128xf32>
    %c0_29 = arith.constant 0 : index
    %c0_30 = arith.constant 0 : index
    %c0_31 = arith.constant 0 : index
    %32 = vector.load %arg6[%c0_29, %c0_30, %c0_31] : memref<3x128x128xbf16, #tpu.memory_space<vmem>>, vector<1x128x128xbf16>
    %33 = vector.shape_cast %32 : vector<1x128x128xbf16> to vector<128x128xbf16>
    %34 = arith.truncf %31 : vector<8x128xf32> to vector<8x128xbf16>
    %cst_32 = arith.constant dense<0.000000e+00> : vector<8x128xf32>
    %35 = tpu.matmul %34, %33, %cst_32 {dimension_numbers = #tpu.dot_dimension_numbers<[1], [0], [0], [1], [0, 0, 1, 1], [], []>} : vector<8x128xbf16>, vector<128x128xbf16>, vector<8x128xf32> -> vector<8x128xf32>
    %c1_33 = arith.constant 1 : index
    %c0_34 = arith.constant 0 : index
    %36 = vector.load %arg13[%c1_33, %c0_34] : memref<10x128xf32, #tpu.memory_space<vmem>>, vector<8x128xf32>
    %c1_35 = arith.constant 1 : index
    %c0_36 = arith.constant 0 : index
    %c0_37 = arith.constant 0 : index
    %37 = vector.load %arg6[%c1_35, %c0_36, %c0_37] : memref<3x128x128xbf16, #tpu.memory_space<vmem>>, vector<1x128x128xbf16>
    %38 = vector.shape_cast %37 : vector<1x128x128xbf16> to vector<128x128xbf16>
    %39 = arith.truncf %36 : vector<8x128xf32> to vector<8x128xbf16>
    %cst_38 = arith.constant dense<0.000000e+00> : vector<8x128xf32>
    %40 = tpu.matmul %39, %38, %cst_38 {dimension_numbers = #tpu.dot_dimension_numbers<[1], [0], [0], [1], [0, 0, 1, 1], [], []>} : vector<8x128xbf16>, vector<128x128xbf16>, vector<8x128xf32> -> vector<8x128xf32>
    %41 = arith.addf %35, %40 : vector<8x128xf32>
    %c2_39 = arith.constant 2 : index
    %c0_40 = arith.constant 0 : index
    %42 = vector.load %arg13[%c2_39, %c0_40] : memref<10x128xf32, #tpu.memory_space<vmem>>, vector<8x128xf32>
    %c2_41 = arith.constant 2 : index
    %c0_42 = arith.constant 0 : index
    %c0_43 = arith.constant 0 : index
    %43 = vector.load %arg6[%c2_41, %c0_42, %c0_43] : memref<3x128x128xbf16, #tpu.memory_space<vmem>>, vector<1x128x128xbf16>
    %44 = vector.shape_cast %43 : vector<1x128x128xbf16> to vector<128x128xbf16>
    %45 = arith.truncf %42 : vector<8x128xf32> to vector<8x128xbf16>
    %cst_44 = arith.constant dense<0.000000e+00> : vector<8x128xf32>
    %46 = tpu.matmul %45, %44, %cst_44 {dimension_numbers = #tpu.dot_dimension_numbers<[1], [0], [0], [1], [0, 0, 1, 1], [], []>} : vector<8x128xbf16>, vector<128x128xbf16>, vector<8x128xf32> -> vector<8x128xf32>
    %47 = arith.addf %41, %46 : vector<8x128xf32>
    %c0_45 = arith.constant 0 : index
    %c0_46 = arith.constant 0 : index
    %48 = vector.load %arg7[%c0_45, %c0_46] : memref<1x128xf32, #tpu.memory_space<vmem>>, vector<1x128xf32>
    %49 = vector.broadcast %48 : vector<1x128xf32> to vector<8x128xf32>
    %50 = arith.mulf %47, %49 : vector<8x128xf32>
    %c0_47 = arith.constant 0 : index
    %c0_48 = arith.constant 0 : index
    %51 = vector.load %arg8[%c0_47, %c0_48] : memref<1x128xf32, #tpu.memory_space<vmem>>, vector<1x128xf32>
    %52 = vector.broadcast %51 : vector<1x128xf32> to vector<8x128xf32>
    %53 = arith.addf %50, %52 : vector<8x128xf32>
    %c0_49 = arith.constant 0 : index
    %c0_50 = arith.constant 0 : index
    %c0_51 = arith.constant 0 : index
    %54 = vector.load %arg2[%c0_49, %c0_50, %c0_51] : memref<1x8x64xf32, #tpu.memory_space<vmem>>, vector<1x8x64xf32>
    %55 = vector.shape_cast %54 : vector<1x8x64xf32> to vector<8x64xf32>
    %c0_52 = arith.constant 0 : index
    %c0_53 = arith.constant 0 : index
    %56 = vector.load %arg9[%c0_52, %c0_53] : memref<64x128xbf16, #tpu.memory_space<vmem>>, vector<64x128xbf16>
    %57 = arith.truncf %55 : vector<8x64xf32> to vector<8x64xbf16>
    %cst_54 = arith.constant dense<0.000000e+00> : vector<8x128xf32>
    %58 = tpu.matmul %57, %56, %cst_54 {dimension_numbers = #tpu.dot_dimension_numbers<[1], [0], [0], [1], [0, 0, 1, 1], [], []>} : vector<8x64xbf16>, vector<64x128xbf16>, vector<8x128xf32> -> vector<8x128xf32>
    %c0_55 = arith.constant 0 : index
    %c0_56 = arith.constant 0 : index
    %59 = vector.load %arg10[%c0_55, %c0_56] : memref<1x128xf32, #tpu.memory_space<vmem>>, vector<1x128xf32>
    %60 = vector.broadcast %59 : vector<1x128xf32> to vector<8x128xf32>
    %61 = arith.mulf %58, %60 : vector<8x128xf32>
    %c0_57 = arith.constant 0 : index
    %c0_58 = arith.constant 0 : index
    %62 = vector.load %arg11[%c0_57, %c0_58] : memref<1x128xf32, #tpu.memory_space<vmem>>, vector<1x128xf32>
    %63 = vector.broadcast %62 : vector<1x128xf32> to vector<8x128xf32>
    %64 = arith.addf %61, %63 : vector<8x128xf32>
    %65 = arith.addf %53, %64 : vector<8x128xf32>
    %cst_59 = arith.constant 0.000000e+00 : f32
    %66 = vector.broadcast %cst_59 : f32 to vector<8x128xf32>
    %67 = arith.maximumf %65, %66 : vector<8x128xf32>
    %c0_60 = arith.constant 0 : index
    %c0_61 = arith.constant 0 : index
    %c0_62 = arith.constant 0 : index
    %68 = vector.load %arg12[%c0_60, %c0_61, %c0_62] : memref<1x8x128xf32, #tpu.memory_space<vmem>>, vector<1x8x128xf32>
    %69 = vector.shape_cast %68 : vector<1x8x128xf32> to vector<8x128xf32>
    %70 = vector.shape_cast %67 : vector<8x128xf32> to vector<1x8x128xf32>
    tpu.vector_store %arg12[%c0_60, %c0_61, %c0_62], %70 {strides = array<i32>} : memref<1x8x128xf32, #tpu.memory_space<vmem>>, vector<1x8x128xf32>,
    return
  }
  func.func @transform_0(%arg0: i32) -> (i32, i32, i32) {
    %c0_i32 = arith.constant 0 : i32
    %c0_i32_0 = arith.constant 0 : i32
    %c0_i32_1 = arith.constant 0 : i32
    return %arg0, %c0_i32, %c0_i32_0 : i32, i32, i32
  }
  func.func @transform_1(%arg0: i32) -> (i32, i32, i32) {
    %c0_i32 = arith.constant 0 : i32
    %c0_i32_0 = arith.constant 0 : i32
    %c0_i32_1 = arith.constant 0 : i32
    return %arg0, %c0_i32, %c0_i32_0 : i32, i32, i32
  }
  func.func @transform_2(%arg0: i32) -> (i32, i32, i32) {
    %c0_i32 = arith.constant 0 : i32
    %c0_i32_0 = arith.constant 0 : i32
    %c0_i32_1 = arith.constant 0 : i32
    %c0_i32_2 = arith.constant 0 : i32
    return %c0_i32, %c0_i32_0, %c0_i32_1 : i32, i32, i32
  }
  func.func @transform_3(%arg0: i32) -> (i32, i32) {
    %c0_i32 = arith.constant 0 : i32
    %c0_i32_0 = arith.constant 0 : i32
    %c0_i32_1 = arith.constant 0 : i32
    return %c0_i32, %c0_i32_0 : i32, i32
  }
  func.func @transform_4(%arg0: i32) -> (i32, i32) {
    %c0_i32 = arith.constant 0 : i32
    %c0_i32_0 = arith.constant 0 : i32
    %c0_i32_1 = arith.constant 0 : i32
    return %c0_i32, %c0_i32_0 : i32, i32
  }
  func.func @transform_5(%arg0: i32) -> (i32, i32, i32) {
    %c0_i32 = arith.constant 0 : i32
    %c0_i32_0 = arith.constant 0 : i32
    %c0_i32_1 = arith.constant 0 : i32
    %c0_i32_2 = arith.constant 0 : i32
    return %c0_i32, %c0_i32_0, %c0_i32_1 : i32, i32, i32
  }
  func.func @transform_6(%arg0: i32) -> (i32, i32) {
    %c0_i32 = arith.constant 0 : i32
    %c0_i32_0 = arith.constant 0 : i32
    %c0_i32_1 = arith.constant 0 : i32
    return %c0_i32, %c0_i32_0 : i32, i32
  }
  func.func @transform_7(%arg0: i32) -> (i32, i32) {
    %c0_i32 = arith.constant 0 : i32
    %c0_i32_0 = arith.constant 0 : i32
    %c0_i32_1 = arith.constant 0 : i32
    return %c0_i32, %c0_i32_0 : i32, i32
  }
  func.func @transform_8(%arg0: i32) -> (i32, i32) {
    %c0_i32 = arith.constant 0 : i32
    %c0_i32_0 = arith.constant 0 : i32
    %c0_i32_1 = arith.constant 0 : i32
    return %c0_i32, %c0_i32_0 : i32, i32
  }
  func.func @transform_9(%arg0: i32) -> (i32, i32) {
    %c0_i32 = arith.constant 0 : i32
    %c0_i32_0 = arith.constant 0 : i32
    %c0_i32_1 = arith.constant 0 : i32
    return %c0_i32, %c0_i32_0 : i32, i32
  }
  func.func @transform_10(%arg0: i32) -> (i32, i32) {
    %c0_i32 = arith.constant 0 : i32
    %c0_i32_0 = arith.constant 0 : i32
    %c0_i32_1 = arith.constant 0 : i32
    return %c0_i32, %c0_i32_0 : i32, i32
  }
  func.func @transform_11(%arg0: i32) -> (i32, i32, i32) {
    %c0_i32 = arith.constant 0 : i32
    %c0_i32_0 = arith.constant 0 : i32
    %c0_i32_1 = arith.constant 0 : i32
    return %arg0, %c0_i32, %c0_i32_0 : i32, i32, i32
  }
}

module attributes {stable_mosaic.version = 11 : i64} {
  func.func @_res_block_kernel(%arg0: i32, %arg1: memref<1x5x128xf32, #tpu.memory_space<vmem>>, %arg2: memref<1x4x128xf32, #tpu.memory_space<vmem>>, %arg3: memref<3x128x256xbf16, #tpu.memory_space<vmem>>, %arg4: memref<1x256xf32, #tpu.memory_space<vmem>>, %arg5: memref<1x256xf32, #tpu.memory_space<vmem>>, %arg6: memref<3x256x256xbf16, #tpu.memory_space<vmem>>, %arg7: memref<1x256xf32, #tpu.memory_space<vmem>>, %arg8: memref<1x256xf32, #tpu.memory_space<vmem>>, %arg9: memref<128x256xbf16, #tpu.memory_space<vmem>>, %arg10: memref<1x256xf32, #tpu.memory_space<vmem>>, %arg11: memref<1x256xf32, #tpu.memory_space<vmem>>, %arg12: memref<1x4x256xf32, #tpu.memory_space<vmem>>, %arg13: memref<6x256xf32, #tpu.memory_space<vmem>>) attributes {dimension_semantics = [#tpu.dimension_semantics<parallel>], iteration_bounds = array<i64: 2>, scalar_prefetch = 0 : i64, scratch_operands = 1 : i64, tpu.core_type = #tpu.core_type<tc>, window_params = [{transform_indices = @transform_0, window_bounds = array<i64: 1, 5, 128>}, {transform_indices = @transform_1, window_bounds = array<i64: 1, 4, 128>}, {pipeline_mode = #tpu.pipeline_mode<synchronous>, transform_indices = @transform_2, window_bounds = array<i64: 3, 128, 256>}, {pipeline_mode = #tpu.pipeline_mode<synchronous>, transform_indices = @transform_3, window_bounds = array<i64: 1, 256>}, {pipeline_mode = #tpu.pipeline_mode<synchronous>, transform_indices = @transform_4, window_bounds = array<i64: 1, 256>}, {pipeline_mode = #tpu.pipeline_mode<synchronous>, transform_indices = @transform_5, window_bounds = array<i64: 3, 256, 256>}, {pipeline_mode = #tpu.pipeline_mode<synchronous>, transform_indices = @transform_6, window_bounds = array<i64: 1, 256>}, {pipeline_mode = #tpu.pipeline_mode<synchronous>, transform_indices = @transform_7, window_bounds = array<i64: 1, 256>}, {pipeline_mode = #tpu.pipeline_mode<synchronous>, transform_indices = @transform_8, window_bounds = array<i64: 128, 256>}, {pipeline_mode = #tpu.pipeline_mode<synchronous>, transform_indices = @transform_9, window_bounds = array<i64: 1, 256>}, {pipeline_mode = #tpu.pipeline_mode<synchronous>, transform_indices = @transform_10, window_bounds = array<i64: 1, 256>}, {transform_indices = @transform_11, window_bounds = array<i64: 1, 4, 256>}]} {
    %c0 = arith.constant 0 : index
    %c0_0 = arith.constant 0 : index
    %c0_1 = arith.constant 0 : index
    %0 = vector.load %arg1[%c0, %c0_0, %c0_1] : memref<1x5x128xf32, #tpu.memory_space<vmem>>, vector<1x4x128xf32>
    %1 = vector.shape_cast %0 : vector<1x4x128xf32> to vector<4x128xf32>
    %c0_2 = arith.constant 0 : index
    %c0_3 = arith.constant 0 : index
    %c0_4 = arith.constant 0 : index
    %2 = vector.load %arg3[%c0_2, %c0_3, %c0_4] : memref<3x128x256xbf16, #tpu.memory_space<vmem>>, vector<1x128x256xbf16>
    %3 = vector.shape_cast %2 : vector<1x128x256xbf16> to vector<128x256xbf16>
    %4 = arith.truncf %1 : vector<4x128xf32> to vector<4x128xbf16>
    %cst = arith.constant dense<0.000000e+00> : vector<4x256xf32>
    %5 = tpu.matmul %4, %3, %cst {dimension_numbers = #tpu.dot_dimension_numbers<[1], [0], [0], [1], [0, 0, 1, 1], [], []>} : vector<4x128xbf16>, vector<128x256xbf16>, vector<4x256xf32> -> vector<4x256xf32>
    %c0_5 = arith.constant 0 : index
    %c0_6 = arith.constant 0 : index
    %c0_7 = arith.constant 0 : index
    %6 = vector.load %arg2[%c0_5, %c0_6, %c0_7] : memref<1x4x128xf32, #tpu.memory_space<vmem>>, vector<1x4x128xf32>
    %7 = vector.shape_cast %6 : vector<1x4x128xf32> to vector<4x128xf32>
    %c1 = arith.constant 1 : index
    %c0_8 = arith.constant 0 : index
    %c0_9 = arith.constant 0 : index
    %8 = vector.load %arg3[%c1, %c0_8, %c0_9] : memref<3x128x256xbf16, #tpu.memory_space<vmem>>, vector<1x128x256xbf16>
    %9 = vector.shape_cast %8 : vector<1x128x256xbf16> to vector<128x256xbf16>
    %10 = arith.truncf %7 : vector<4x128xf32> to vector<4x128xbf16>
    %cst_10 = arith.constant dense<0.000000e+00> : vector<4x256xf32>
    %11 = tpu.matmul %10, %9, %cst_10 {dimension_numbers = #tpu.dot_dimension_numbers<[1], [0], [0], [1], [0, 0, 1, 1], [], []>} : vector<4x128xbf16>, vector<128x256xbf16>, vector<4x256xf32> -> vector<4x256xf32>
    %12 = arith.addf %5, %11 : vector<4x256xf32>
    %c0_11 = arith.constant 0 : index
    %c1_12 = arith.constant 1 : index
    %c0_13 = arith.constant 0 : index
    %13 = vector.load %arg1[%c0_11, %c1_12, %c0_13] : memref<1x5x128xf32, #tpu.memory_space<vmem>>, vector<1x4x128xf32>
    %14 = vector.shape_cast %13 : vector<1x4x128xf32> to vector<4x128xf32>
    %c2 = arith.constant 2 : index
    %c0_14 = arith.constant 0 : index
    %c0_15 = arith.constant 0 : index
    %15 = vector.load %arg3[%c2, %c0_14, %c0_15] : memref<3x128x256xbf16, #tpu.memory_space<vmem>>, vector<1x128x256xbf16>
    %16 = vector.shape_cast %15 : vector<1x128x256xbf16> to vector<128x256xbf16>
    %17 = arith.truncf %14 : vector<4x128xf32> to vector<4x128xbf16>
    %cst_16 = arith.constant dense<0.000000e+00> : vector<4x256xf32>
    %18 = tpu.matmul %17, %16, %cst_16 {dimension_numbers = #tpu.dot_dimension_numbers<[1], [0], [0], [1], [0, 0, 1, 1], [], []>} : vector<4x128xbf16>, vector<128x256xbf16>, vector<4x256xf32> -> vector<4x256xf32>
    %19 = arith.addf %12, %18 : vector<4x256xf32>
    %c0_17 = arith.constant 0 : index
    %c0_18 = arith.constant 0 : index
    %20 = vector.load %arg4[%c0_17, %c0_18] : memref<1x256xf32, #tpu.memory_space<vmem>>, vector<1x256xf32>
    %21 = vector.broadcast %20 : vector<1x256xf32> to vector<4x256xf32>
    %22 = arith.mulf %19, %21 : vector<4x256xf32>
    %c0_19 = arith.constant 0 : index
    %c0_20 = arith.constant 0 : index
    %23 = vector.load %arg5[%c0_19, %c0_20] : memref<1x256xf32, #tpu.memory_space<vmem>>, vector<1x256xf32>
    %24 = vector.broadcast %23 : vector<1x256xf32> to vector<4x256xf32>
    %25 = arith.addf %22, %24 : vector<4x256xf32>
    %cst_21 = arith.constant 0.000000e+00 : f32
    %26 = vector.broadcast %cst_21 : f32 to vector<4x256xf32>
    %27 = arith.maximumf %25, %26 : vector<4x256xf32>
    %cst_22 = arith.constant 0.000000e+00 : f32
    %28 = vector.broadcast %cst_22 : f32 to vector<6x256xf32>
    %c0_23 = arith.constant 0 : index
    %c0_24 = arith.constant 0 : index
    %29 = vector.load %arg13[%c0_23, %c0_24] : memref<6x256xf32, #tpu.memory_space<vmem>>, vector<6x256xf32>
    tpu.vector_store %arg13[%c0_23, %c0_24], %28 {strides = array<i32>} : memref<6x256xf32, #tpu.memory_space<vmem>>, vector<6x256xf32>,
    %c1_25 = arith.constant 1 : index
    %c0_26 = arith.constant 0 : index
    %30 = vector.load %arg13[%c1_25, %c0_26] : memref<6x256xf32, #tpu.memory_space<vmem>>, vector<4x256xf32>
    tpu.vector_store %arg13[%c1_25, %c0_26], %27 {strides = array<i32>} : memref<6x256xf32, #tpu.memory_space<vmem>>, vector<4x256xf32>,
    %c0_27 = arith.constant 0 : index
    %c0_28 = arith.constant 0 : index
    %31 = vector.load %arg13[%c0_27, %c0_28] : memref<6x256xf32, #tpu.memory_space<vmem>>, vector<4x256xf32>
    %c0_29 = arith.constant 0 : index
    %c0_30 = arith.constant 0 : index
    %c0_31 = arith.constant 0 : index
    %32 = vector.load %arg6[%c0_29, %c0_30, %c0_31] : memref<3x256x256xbf16, #tpu.memory_space<vmem>>, vector<1x256x256xbf16>
    %33 = vector.shape_cast %32 : vector<1x256x256xbf16> to vector<256x256xbf16>
    %34 = arith.truncf %31 : vector<4x256xf32> to vector<4x256xbf16>
    %cst_32 = arith.constant dense<0.000000e+00> : vector<4x256xf32>
    %35 = tpu.matmul %34, %33, %cst_32 {dimension_numbers = #tpu.dot_dimension_numbers<[1], [0], [0], [1], [0, 0, 1, 1], [], []>} : vector<4x256xbf16>, vector<256x256xbf16>, vector<4x256xf32> -> vector<4x256xf32>
    %c1_33 = arith.constant 1 : index
    %c0_34 = arith.constant 0 : index
    %36 = vector.load %arg13[%c1_33, %c0_34] : memref<6x256xf32, #tpu.memory_space<vmem>>, vector<4x256xf32>
    %c1_35 = arith.constant 1 : index
    %c0_36 = arith.constant 0 : index
    %c0_37 = arith.constant 0 : index
    %37 = vector.load %arg6[%c1_35, %c0_36, %c0_37] : memref<3x256x256xbf16, #tpu.memory_space<vmem>>, vector<1x256x256xbf16>
    %38 = vector.shape_cast %37 : vector<1x256x256xbf16> to vector<256x256xbf16>
    %39 = arith.truncf %36 : vector<4x256xf32> to vector<4x256xbf16>
    %cst_38 = arith.constant dense<0.000000e+00> : vector<4x256xf32>
    %40 = tpu.matmul %39, %38, %cst_38 {dimension_numbers = #tpu.dot_dimension_numbers<[1], [0], [0], [1], [0, 0, 1, 1], [], []>} : vector<4x256xbf16>, vector<256x256xbf16>, vector<4x256xf32> -> vector<4x256xf32>
    %41 = arith.addf %35, %40 : vector<4x256xf32>
    %c2_39 = arith.constant 2 : index
    %c0_40 = arith.constant 0 : index
    %42 = vector.load %arg13[%c2_39, %c0_40] : memref<6x256xf32, #tpu.memory_space<vmem>>, vector<4x256xf32>
    %c2_41 = arith.constant 2 : index
    %c0_42 = arith.constant 0 : index
    %c0_43 = arith.constant 0 : index
    %43 = vector.load %arg6[%c2_41, %c0_42, %c0_43] : memref<3x256x256xbf16, #tpu.memory_space<vmem>>, vector<1x256x256xbf16>
    %44 = vector.shape_cast %43 : vector<1x256x256xbf16> to vector<256x256xbf16>
    %45 = arith.truncf %42 : vector<4x256xf32> to vector<4x256xbf16>
    %cst_44 = arith.constant dense<0.000000e+00> : vector<4x256xf32>
    %46 = tpu.matmul %45, %44, %cst_44 {dimension_numbers = #tpu.dot_dimension_numbers<[1], [0], [0], [1], [0, 0, 1, 1], [], []>} : vector<4x256xbf16>, vector<256x256xbf16>, vector<4x256xf32> -> vector<4x256xf32>
    %47 = arith.addf %41, %46 : vector<4x256xf32>
    %c0_45 = arith.constant 0 : index
    %c0_46 = arith.constant 0 : index
    %48 = vector.load %arg7[%c0_45, %c0_46] : memref<1x256xf32, #tpu.memory_space<vmem>>, vector<1x256xf32>
    %49 = vector.broadcast %48 : vector<1x256xf32> to vector<4x256xf32>
    %50 = arith.mulf %47, %49 : vector<4x256xf32>
    %c0_47 = arith.constant 0 : index
    %c0_48 = arith.constant 0 : index
    %51 = vector.load %arg8[%c0_47, %c0_48] : memref<1x256xf32, #tpu.memory_space<vmem>>, vector<1x256xf32>
    %52 = vector.broadcast %51 : vector<1x256xf32> to vector<4x256xf32>
    %53 = arith.addf %50, %52 : vector<4x256xf32>
    %c0_49 = arith.constant 0 : index
    %c0_50 = arith.constant 0 : index
    %c0_51 = arith.constant 0 : index
    %54 = vector.load %arg2[%c0_49, %c0_50, %c0_51] : memref<1x4x128xf32, #tpu.memory_space<vmem>>, vector<1x4x128xf32>
    %55 = vector.shape_cast %54 : vector<1x4x128xf32> to vector<4x128xf32>
    %c0_52 = arith.constant 0 : index
    %c0_53 = arith.constant 0 : index
    %56 = vector.load %arg9[%c0_52, %c0_53] : memref<128x256xbf16, #tpu.memory_space<vmem>>, vector<128x256xbf16>
    %57 = arith.truncf %55 : vector<4x128xf32> to vector<4x128xbf16>
    %cst_54 = arith.constant dense<0.000000e+00> : vector<4x256xf32>
    %58 = tpu.matmul %57, %56, %cst_54 {dimension_numbers = #tpu.dot_dimension_numbers<[1], [0], [0], [1], [0, 0, 1, 1], [], []>} : vector<4x128xbf16>, vector<128x256xbf16>, vector<4x256xf32> -> vector<4x256xf32>
    %c0_55 = arith.constant 0 : index
    %c0_56 = arith.constant 0 : index
    %59 = vector.load %arg10[%c0_55, %c0_56] : memref<1x256xf32, #tpu.memory_space<vmem>>, vector<1x256xf32>
    %60 = vector.broadcast %59 : vector<1x256xf32> to vector<4x256xf32>
    %61 = arith.mulf %58, %60 : vector<4x256xf32>
    %c0_57 = arith.constant 0 : index
    %c0_58 = arith.constant 0 : index
    %62 = vector.load %arg11[%c0_57, %c0_58] : memref<1x256xf32, #tpu.memory_space<vmem>>, vector<1x256xf32>
    %63 = vector.broadcast %62 : vector<1x256xf32> to vector<4x256xf32>
    %64 = arith.addf %61, %63 : vector<4x256xf32>
    %65 = arith.addf %53, %64 : vector<4x256xf32>
    %cst_59 = arith.constant 0.000000e+00 : f32
    %66 = vector.broadcast %cst_59 : f32 to vector<4x256xf32>
    %67 = arith.maximumf %65, %66 : vector<4x256xf32>
    %c0_60 = arith.constant 0 : index
    %c0_61 = arith.constant 0 : index
    %c0_62 = arith.constant 0 : index
    %68 = vector.load %arg12[%c0_60, %c0_61, %c0_62] : memref<1x4x256xf32, #tpu.memory_space<vmem>>, vector<1x4x256xf32>
    %69 = vector.shape_cast %68 : vector<1x4x256xf32> to vector<4x256xf32>
    %70 = vector.shape_cast %67 : vector<4x256xf32> to vector<1x4x256xf32>
    tpu.vector_store %arg12[%c0_60, %c0_61, %c0_62], %70 {strides = array<i32>} : memref<1x4x256xf32, #tpu.memory_space<vmem>>, vector<1x4x256xf32>,
    return
  }
  func.func @transform_0(%arg0: i32) -> (i32, i32, i32) {
    %c0_i32 = arith.constant 0 : i32
    %c0_i32_0 = arith.constant 0 : i32
    %c0_i32_1 = arith.constant 0 : i32
    return %arg0, %c0_i32, %c0_i32_0 : i32, i32, i32
  }
  func.func @transform_1(%arg0: i32) -> (i32, i32, i32) {
    %c0_i32 = arith.constant 0 : i32
    %c0_i32_0 = arith.constant 0 : i32
    %c0_i32_1 = arith.constant 0 : i32
    return %arg0, %c0_i32, %c0_i32_0 : i32, i32, i32
  }
  func.func @transform_2(%arg0: i32) -> (i32, i32, i32) {
    %c0_i32 = arith.constant 0 : i32
    %c0_i32_0 = arith.constant 0 : i32
    %c0_i32_1 = arith.constant 0 : i32
    %c0_i32_2 = arith.constant 0 : i32
    return %c0_i32, %c0_i32_0, %c0_i32_1 : i32, i32, i32
  }
  func.func @transform_3(%arg0: i32) -> (i32, i32) {
    %c0_i32 = arith.constant 0 : i32
    %c0_i32_0 = arith.constant 0 : i32
    %c0_i32_1 = arith.constant 0 : i32
    return %c0_i32, %c0_i32_0 : i32, i32
  }
  func.func @transform_4(%arg0: i32) -> (i32, i32) {
    %c0_i32 = arith.constant 0 : i32
    %c0_i32_0 = arith.constant 0 : i32
    %c0_i32_1 = arith.constant 0 : i32
    return %c0_i32, %c0_i32_0 : i32, i32
  }
  func.func @transform_5(%arg0: i32) -> (i32, i32, i32) {
    %c0_i32 = arith.constant 0 : i32
    %c0_i32_0 = arith.constant 0 : i32
    %c0_i32_1 = arith.constant 0 : i32
    %c0_i32_2 = arith.constant 0 : i32
    return %c0_i32, %c0_i32_0, %c0_i32_1 : i32, i32, i32
  }
  func.func @transform_6(%arg0: i32) -> (i32, i32) {
    %c0_i32 = arith.constant 0 : i32
    %c0_i32_0 = arith.constant 0 : i32
    %c0_i32_1 = arith.constant 0 : i32
    return %c0_i32, %c0_i32_0 : i32, i32
  }
  func.func @transform_7(%arg0: i32) -> (i32, i32) {
    %c0_i32 = arith.constant 0 : i32
    %c0_i32_0 = arith.constant 0 : i32
    %c0_i32_1 = arith.constant 0 : i32
    return %c0_i32, %c0_i32_0 : i32, i32
  }
  func.func @transform_8(%arg0: i32) -> (i32, i32) {
    %c0_i32 = arith.constant 0 : i32
    %c0_i32_0 = arith.constant 0 : i32
    %c0_i32_1 = arith.constant 0 : i32
    return %c0_i32, %c0_i32_0 : i32, i32
  }
  func.func @transform_9(%arg0: i32) -> (i32, i32) {
    %c0_i32 = arith.constant 0 : i32
    %c0_i32_0 = arith.constant 0 : i32
    %c0_i32_1 = arith.constant 0 : i32
    return %c0_i32, %c0_i32_0 : i32, i32
  }
  func.func @transform_10(%arg0: i32) -> (i32, i32) {
    %c0_i32 = arith.constant 0 : i32
    %c0_i32_0 = arith.constant 0 : i32
    %c0_i32_1 = arith.constant 0 : i32
    return %c0_i32, %c0_i32_0 : i32, i32
  }
  func.func @transform_11(%arg0: i32) -> (i32, i32, i32) {
    %c0_i32 = arith.constant 0 : i32
    %c0_i32_0 = arith.constant 0 : i32
    %c0_i32_1 = arith.constant 0 : i32
    return %arg0, %c0_i32, %c0_i32_0 : i32, i32, i32
  }
}

module attributes {stable_mosaic.version = 11 : i64} {
  func.func @_res_block_kernel(%arg0: i32, %arg1: memref<1x3x256xf32, #tpu.memory_space<vmem>>, %arg2: memref<1x2x256xf32, #tpu.memory_space<vmem>>, %arg3: memref<3x256x512xbf16, #tpu.memory_space<vmem>>, %arg4: memref<1x512xf32, #tpu.memory_space<vmem>>, %arg5: memref<1x512xf32, #tpu.memory_space<vmem>>, %arg6: memref<3x512x512xbf16, #tpu.memory_space<vmem>>, %arg7: memref<1x512xf32, #tpu.memory_space<vmem>>, %arg8: memref<1x512xf32, #tpu.memory_space<vmem>>, %arg9: memref<256x512xbf16, #tpu.memory_space<vmem>>, %arg10: memref<1x512xf32, #tpu.memory_space<vmem>>, %arg11: memref<1x512xf32, #tpu.memory_space<vmem>>, %arg12: memref<1x2x512xf32, #tpu.memory_space<vmem>>, %arg13: memref<4x512xf32, #tpu.memory_space<vmem>>) attributes {dimension_semantics = [#tpu.dimension_semantics<parallel>], iteration_bounds = array<i64: 2>, scalar_prefetch = 0 : i64, scratch_operands = 1 : i64, tpu.core_type = #tpu.core_type<tc>, window_params = [{transform_indices = @transform_0, window_bounds = array<i64: 1, 3, 256>}, {transform_indices = @transform_1, window_bounds = array<i64: 1, 2, 256>}, {pipeline_mode = #tpu.pipeline_mode<synchronous>, transform_indices = @transform_2, window_bounds = array<i64: 3, 256, 512>}, {pipeline_mode = #tpu.pipeline_mode<synchronous>, transform_indices = @transform_3, window_bounds = array<i64: 1, 512>}, {pipeline_mode = #tpu.pipeline_mode<synchronous>, transform_indices = @transform_4, window_bounds = array<i64: 1, 512>}, {pipeline_mode = #tpu.pipeline_mode<synchronous>, transform_indices = @transform_5, window_bounds = array<i64: 3, 512, 512>}, {pipeline_mode = #tpu.pipeline_mode<synchronous>, transform_indices = @transform_6, window_bounds = array<i64: 1, 512>}, {pipeline_mode = #tpu.pipeline_mode<synchronous>, transform_indices = @transform_7, window_bounds = array<i64: 1, 512>}, {pipeline_mode = #tpu.pipeline_mode<synchronous>, transform_indices = @transform_8, window_bounds = array<i64: 256, 512>}, {pipeline_mode = #tpu.pipeline_mode<synchronous>, transform_indices = @transform_9, window_bounds = array<i64: 1, 512>}, {pipeline_mode = #tpu.pipeline_mode<synchronous>, transform_indices = @transform_10, window_bounds = array<i64: 1, 512>}, {transform_indices = @transform_11, window_bounds = array<i64: 1, 2, 512>}]} {
    %c0 = arith.constant 0 : index
    %c0_0 = arith.constant 0 : index
    %c0_1 = arith.constant 0 : index
    %0 = vector.load %arg1[%c0, %c0_0, %c0_1] : memref<1x3x256xf32, #tpu.memory_space<vmem>>, vector<1x2x256xf32>
    %1 = vector.shape_cast %0 : vector<1x2x256xf32> to vector<2x256xf32>
    %c0_2 = arith.constant 0 : index
    %c0_3 = arith.constant 0 : index
    %c0_4 = arith.constant 0 : index
    %2 = vector.load %arg3[%c0_2, %c0_3, %c0_4] : memref<3x256x512xbf16, #tpu.memory_space<vmem>>, vector<1x256x512xbf16>
    %3 = vector.shape_cast %2 : vector<1x256x512xbf16> to vector<256x512xbf16>
    %4 = arith.truncf %1 : vector<2x256xf32> to vector<2x256xbf16>
    %cst = arith.constant dense<0.000000e+00> : vector<2x512xf32>
    %5 = tpu.matmul %4, %3, %cst {dimension_numbers = #tpu.dot_dimension_numbers<[1], [0], [0], [1], [0, 0, 1, 1], [], []>} : vector<2x256xbf16>, vector<256x512xbf16>, vector<2x512xf32> -> vector<2x512xf32>
    %c0_5 = arith.constant 0 : index
    %c0_6 = arith.constant 0 : index
    %c0_7 = arith.constant 0 : index
    %6 = vector.load %arg2[%c0_5, %c0_6, %c0_7] : memref<1x2x256xf32, #tpu.memory_space<vmem>>, vector<1x2x256xf32>
    %7 = vector.shape_cast %6 : vector<1x2x256xf32> to vector<2x256xf32>
    %c1 = arith.constant 1 : index
    %c0_8 = arith.constant 0 : index
    %c0_9 = arith.constant 0 : index
    %8 = vector.load %arg3[%c1, %c0_8, %c0_9] : memref<3x256x512xbf16, #tpu.memory_space<vmem>>, vector<1x256x512xbf16>
    %9 = vector.shape_cast %8 : vector<1x256x512xbf16> to vector<256x512xbf16>
    %10 = arith.truncf %7 : vector<2x256xf32> to vector<2x256xbf16>
    %cst_10 = arith.constant dense<0.000000e+00> : vector<2x512xf32>
    %11 = tpu.matmul %10, %9, %cst_10 {dimension_numbers = #tpu.dot_dimension_numbers<[1], [0], [0], [1], [0, 0, 1, 1], [], []>} : vector<2x256xbf16>, vector<256x512xbf16>, vector<2x512xf32> -> vector<2x512xf32>
    %12 = arith.addf %5, %11 : vector<2x512xf32>
    %c0_11 = arith.constant 0 : index
    %c1_12 = arith.constant 1 : index
    %c0_13 = arith.constant 0 : index
    %13 = vector.load %arg1[%c0_11, %c1_12, %c0_13] : memref<1x3x256xf32, #tpu.memory_space<vmem>>, vector<1x2x256xf32>
    %14 = vector.shape_cast %13 : vector<1x2x256xf32> to vector<2x256xf32>
    %c2 = arith.constant 2 : index
    %c0_14 = arith.constant 0 : index
    %c0_15 = arith.constant 0 : index
    %15 = vector.load %arg3[%c2, %c0_14, %c0_15] : memref<3x256x512xbf16, #tpu.memory_space<vmem>>, vector<1x256x512xbf16>
    %16 = vector.shape_cast %15 : vector<1x256x512xbf16> to vector<256x512xbf16>
    %17 = arith.truncf %14 : vector<2x256xf32> to vector<2x256xbf16>
    %cst_16 = arith.constant dense<0.000000e+00> : vector<2x512xf32>
    %18 = tpu.matmul %17, %16, %cst_16 {dimension_numbers = #tpu.dot_dimension_numbers<[1], [0], [0], [1], [0, 0, 1, 1], [], []>} : vector<2x256xbf16>, vector<256x512xbf16>, vector<2x512xf32> -> vector<2x512xf32>
    %19 = arith.addf %12, %18 : vector<2x512xf32>
    %c0_17 = arith.constant 0 : index
    %c0_18 = arith.constant 0 : index
    %20 = vector.load %arg4[%c0_17, %c0_18] : memref<1x512xf32, #tpu.memory_space<vmem>>, vector<1x512xf32>
    %21 = vector.broadcast %20 : vector<1x512xf32> to vector<2x512xf32>
    %22 = arith.mulf %19, %21 : vector<2x512xf32>
    %c0_19 = arith.constant 0 : index
    %c0_20 = arith.constant 0 : index
    %23 = vector.load %arg5[%c0_19, %c0_20] : memref<1x512xf32, #tpu.memory_space<vmem>>, vector<1x512xf32>
    %24 = vector.broadcast %23 : vector<1x512xf32> to vector<2x512xf32>
    %25 = arith.addf %22, %24 : vector<2x512xf32>
    %cst_21 = arith.constant 0.000000e+00 : f32
    %26 = vector.broadcast %cst_21 : f32 to vector<2x512xf32>
    %27 = arith.maximumf %25, %26 : vector<2x512xf32>
    %cst_22 = arith.constant 0.000000e+00 : f32
    %28 = vector.broadcast %cst_22 : f32 to vector<4x512xf32>
    %c0_23 = arith.constant 0 : index
    %c0_24 = arith.constant 0 : index
    %29 = vector.load %arg13[%c0_23, %c0_24] : memref<4x512xf32, #tpu.memory_space<vmem>>, vector<4x512xf32>
    tpu.vector_store %arg13[%c0_23, %c0_24], %28 {strides = array<i32>} : memref<4x512xf32, #tpu.memory_space<vmem>>, vector<4x512xf32>,
    %c1_25 = arith.constant 1 : index
    %c0_26 = arith.constant 0 : index
    %30 = vector.load %arg13[%c1_25, %c0_26] : memref<4x512xf32, #tpu.memory_space<vmem>>, vector<2x512xf32>
    tpu.vector_store %arg13[%c1_25, %c0_26], %27 {strides = array<i32>} : memref<4x512xf32, #tpu.memory_space<vmem>>, vector<2x512xf32>,
    %c0_27 = arith.constant 0 : index
    %c0_28 = arith.constant 0 : index
    %31 = vector.load %arg13[%c0_27, %c0_28] : memref<4x512xf32, #tpu.memory_space<vmem>>, vector<2x512xf32>
    %c0_29 = arith.constant 0 : index
    %c0_30 = arith.constant 0 : index
    %c0_31 = arith.constant 0 : index
    %32 = vector.load %arg6[%c0_29, %c0_30, %c0_31] : memref<3x512x512xbf16, #tpu.memory_space<vmem>>, vector<1x512x512xbf16>
    %33 = vector.shape_cast %32 : vector<1x512x512xbf16> to vector<512x512xbf16>
    %34 = arith.truncf %31 : vector<2x512xf32> to vector<2x512xbf16>
    %cst_32 = arith.constant dense<0.000000e+00> : vector<2x512xf32>
    %35 = tpu.matmul %34, %33, %cst_32 {dimension_numbers = #tpu.dot_dimension_numbers<[1], [0], [0], [1], [0, 0, 1, 1], [], []>} : vector<2x512xbf16>, vector<512x512xbf16>, vector<2x512xf32> -> vector<2x512xf32>
    %c1_33 = arith.constant 1 : index
    %c0_34 = arith.constant 0 : index
    %36 = vector.load %arg13[%c1_33, %c0_34] : memref<4x512xf32, #tpu.memory_space<vmem>>, vector<2x512xf32>
    %c1_35 = arith.constant 1 : index
    %c0_36 = arith.constant 0 : index
    %c0_37 = arith.constant 0 : index
    %37 = vector.load %arg6[%c1_35, %c0_36, %c0_37] : memref<3x512x512xbf16, #tpu.memory_space<vmem>>, vector<1x512x512xbf16>
    %38 = vector.shape_cast %37 : vector<1x512x512xbf16> to vector<512x512xbf16>
    %39 = arith.truncf %36 : vector<2x512xf32> to vector<2x512xbf16>
    %cst_38 = arith.constant dense<0.000000e+00> : vector<2x512xf32>
    %40 = tpu.matmul %39, %38, %cst_38 {dimension_numbers = #tpu.dot_dimension_numbers<[1], [0], [0], [1], [0, 0, 1, 1], [], []>} : vector<2x512xbf16>, vector<512x512xbf16>, vector<2x512xf32> -> vector<2x512xf32>
    %41 = arith.addf %35, %40 : vector<2x512xf32>
    %c2_39 = arith.constant 2 : index
    %c0_40 = arith.constant 0 : index
    %42 = vector.load %arg13[%c2_39, %c0_40] : memref<4x512xf32, #tpu.memory_space<vmem>>, vector<2x512xf32>
    %c2_41 = arith.constant 2 : index
    %c0_42 = arith.constant 0 : index
    %c0_43 = arith.constant 0 : index
    %43 = vector.load %arg6[%c2_41, %c0_42, %c0_43] : memref<3x512x512xbf16, #tpu.memory_space<vmem>>, vector<1x512x512xbf16>
    %44 = vector.shape_cast %43 : vector<1x512x512xbf16> to vector<512x512xbf16>
    %45 = arith.truncf %42 : vector<2x512xf32> to vector<2x512xbf16>
    %cst_44 = arith.constant dense<0.000000e+00> : vector<2x512xf32>
    %46 = tpu.matmul %45, %44, %cst_44 {dimension_numbers = #tpu.dot_dimension_numbers<[1], [0], [0], [1], [0, 0, 1, 1], [], []>} : vector<2x512xbf16>, vector<512x512xbf16>, vector<2x512xf32> -> vector<2x512xf32>
    %47 = arith.addf %41, %46 : vector<2x512xf32>
    %c0_45 = arith.constant 0 : index
    %c0_46 = arith.constant 0 : index
    %48 = vector.load %arg7[%c0_45, %c0_46] : memref<1x512xf32, #tpu.memory_space<vmem>>, vector<1x512xf32>
    %49 = vector.broadcast %48 : vector<1x512xf32> to vector<2x512xf32>
    %50 = arith.mulf %47, %49 : vector<2x512xf32>
    %c0_47 = arith.constant 0 : index
    %c0_48 = arith.constant 0 : index
    %51 = vector.load %arg8[%c0_47, %c0_48] : memref<1x512xf32, #tpu.memory_space<vmem>>, vector<1x512xf32>
    %52 = vector.broadcast %51 : vector<1x512xf32> to vector<2x512xf32>
    %53 = arith.addf %50, %52 : vector<2x512xf32>
    %c0_49 = arith.constant 0 : index
    %c0_50 = arith.constant 0 : index
    %c0_51 = arith.constant 0 : index
    %54 = vector.load %arg2[%c0_49, %c0_50, %c0_51] : memref<1x2x256xf32, #tpu.memory_space<vmem>>, vector<1x2x256xf32>
    %55 = vector.shape_cast %54 : vector<1x2x256xf32> to vector<2x256xf32>
    %c0_52 = arith.constant 0 : index
    %c0_53 = arith.constant 0 : index
    %56 = vector.load %arg9[%c0_52, %c0_53] : memref<256x512xbf16, #tpu.memory_space<vmem>>, vector<256x512xbf16>
    %57 = arith.truncf %55 : vector<2x256xf32> to vector<2x256xbf16>
    %cst_54 = arith.constant dense<0.000000e+00> : vector<2x512xf32>
    %58 = tpu.matmul %57, %56, %cst_54 {dimension_numbers = #tpu.dot_dimension_numbers<[1], [0], [0], [1], [0, 0, 1, 1], [], []>} : vector<2x256xbf16>, vector<256x512xbf16>, vector<2x512xf32> -> vector<2x512xf32>
    %c0_55 = arith.constant 0 : index
    %c0_56 = arith.constant 0 : index
    %59 = vector.load %arg10[%c0_55, %c0_56] : memref<1x512xf32, #tpu.memory_space<vmem>>, vector<1x512xf32>
    %60 = vector.broadcast %59 : vector<1x512xf32> to vector<2x512xf32>
    %61 = arith.mulf %58, %60 : vector<2x512xf32>
    %c0_57 = arith.constant 0 : index
    %c0_58 = arith.constant 0 : index
    %62 = vector.load %arg11[%c0_57, %c0_58] : memref<1x512xf32, #tpu.memory_space<vmem>>, vector<1x512xf32>
    %63 = vector.broadcast %62 : vector<1x512xf32> to vector<2x512xf32>
    %64 = arith.addf %61, %63 : vector<2x512xf32>
    %65 = arith.addf %53, %64 : vector<2x512xf32>
    %cst_59 = arith.constant 0.000000e+00 : f32
    %66 = vector.broadcast %cst_59 : f32 to vector<2x512xf32>
    %67 = arith.maximumf %65, %66 : vector<2x512xf32>
    %c0_60 = arith.constant 0 : index
    %c0_61 = arith.constant 0 : index
    %c0_62 = arith.constant 0 : index
    %68 = vector.load %arg12[%c0_60, %c0_61, %c0_62] : memref<1x2x512xf32, #tpu.memory_space<vmem>>, vector<1x2x512xf32>
    %69 = vector.shape_cast %68 : vector<1x2x512xf32> to vector<2x512xf32>
    %70 = vector.shape_cast %67 : vector<2x512xf32> to vector<1x2x512xf32>
    tpu.vector_store %arg12[%c0_60, %c0_61, %c0_62], %70 {strides = array<i32>} : memref<1x2x512xf32, #tpu.memory_space<vmem>>, vector<1x2x512xf32>,
    return
  }
  func.func @transform_0(%arg0: i32) -> (i32, i32, i32) {
    %c0_i32 = arith.constant 0 : i32
    %c0_i32_0 = arith.constant 0 : i32
    %c0_i32_1 = arith.constant 0 : i32
    return %arg0, %c0_i32, %c0_i32_0 : i32, i32, i32
  }
  func.func @transform_1(%arg0: i32) -> (i32, i32, i32) {
    %c0_i32 = arith.constant 0 : i32
    %c0_i32_0 = arith.constant 0 : i32
    %c0_i32_1 = arith.constant 0 : i32
    return %arg0, %c0_i32, %c0_i32_0 : i32, i32, i32
  }
  func.func @transform_2(%arg0: i32) -> (i32, i32, i32) {
    %c0_i32 = arith.constant 0 : i32
    %c0_i32_0 = arith.constant 0 : i32
    %c0_i32_1 = arith.constant 0 : i32
    %c0_i32_2 = arith.constant 0 : i32
    return %c0_i32, %c0_i32_0, %c0_i32_1 : i32, i32, i32
  }
  func.func @transform_3(%arg0: i32) -> (i32, i32) {
    %c0_i32 = arith.constant 0 : i32
    %c0_i32_0 = arith.constant 0 : i32
    %c0_i32_1 = arith.constant 0 : i32
    return %c0_i32, %c0_i32_0 : i32, i32
  }
  func.func @transform_4(%arg0: i32) -> (i32, i32) {
    %c0_i32 = arith.constant 0 : i32
    %c0_i32_0 = arith.constant 0 : i32
    %c0_i32_1 = arith.constant 0 : i32
    return %c0_i32, %c0_i32_0 : i32, i32
  }
  func.func @transform_5(%arg0: i32) -> (i32, i32, i32) {
    %c0_i32 = arith.constant 0 : i32
    %c0_i32_0 = arith.constant 0 : i32
    %c0_i32_1 = arith.constant 0 : i32
    %c0_i32_2 = arith.constant 0 : i32
    return %c0_i32, %c0_i32_0, %c0_i32_1 : i32, i32, i32
  }
  func.func @transform_6(%arg0: i32) -> (i32, i32) {
    %c0_i32 = arith.constant 0 : i32
    %c0_i32_0 = arith.constant 0 : i32
    %c0_i32_1 = arith.constant 0 : i32
    return %c0_i32, %c0_i32_0 : i32, i32
  }
  func.func @transform_7(%arg0: i32) -> (i32, i32) {
    %c0_i32 = arith.constant 0 : i32
    %c0_i32_0 = arith.constant 0 : i32
    %c0_i32_1 = arith.constant 0 : i32
    return %c0_i32, %c0_i32_0 : i32, i32
  }
  func.func @transform_8(%arg0: i32) -> (i32, i32) {
    %c0_i32 = arith.constant 0 : i32
    %c0_i32_0 = arith.constant 0 : i32
    %c0_i32_1 = arith.constant 0 : i32
    return %c0_i32, %c0_i32_0 : i32, i32
  }
  func.func @transform_9(%arg0: i32) -> (i32, i32) {
    %c0_i32 = arith.constant 0 : i32
    %c0_i32_0 = arith.constant 0 : i32
    %c0_i32_1 = arith.constant 0 : i32
    return %c0_i32, %c0_i32_0 : i32, i32
  }
  func.func @transform_10(%arg0: i32) -> (i32, i32) {
    %c0_i32 = arith.constant 0 : i32
    %c0_i32_0 = arith.constant 0 : i32
    %c0_i32_1 = arith.constant 0 : i32
    return %c0_i32, %c0_i32_0 : i32, i32
  }
  func.func @transform_11(%arg0: i32) -> (i32, i32, i32) {
    %c0_i32 = arith.constant 0 : i32
    %c0_i32_0 = arith.constant 0 : i32
    %c0_i32_1 = arith.constant 0 : i32
    return %arg0, %c0_i32, %c0_i32_0 : i32, i32, i32
  }
}

module attributes {stable_mosaic.version = 11 : i64} {
  func.func @_head_kernel(%arg0: memref<2x2x512xf32, #tpu.memory_space<vmem>>, %arg1: memref<512x32xbf16, #tpu.memory_space<vmem>>, %arg2: memref<1x32xf32, #tpu.memory_space<vmem>>, %arg3: memref<32x8xbf16, #tpu.memory_space<vmem>>, %arg4: memref<1x8xf32, #tpu.memory_space<vmem>>, %arg5: memref<2x8xf32, #tpu.memory_space<vmem>>) attributes {dimension_semantics = [], scalar_prefetch = 0 : i64, scratch_operands = 0 : i64, tpu.core_type = #tpu.core_type<tc>} {
    %c0 = arith.constant 0 : index
    %c0_0 = arith.constant 0 : index
    %c0_1 = arith.constant 0 : index
    %0 = vector.load %arg0[%c0, %c0_0, %c0_1] : memref<2x2x512xf32, #tpu.memory_space<vmem>>, vector<2x2x512xf32>
    %cst = arith.constant dense<0.000000e+00> : vector<2x512xf32>
    %1 = vector.multi_reduction <add>, %0, %cst [1] : vector<2x2x512xf32> to vector<2x512xf32>
    %cst_2 = arith.constant 2.000000e+00 : f32
    %2 = vector.broadcast %cst_2 : f32 to vector<2x512xf32>
    %3 = arith.divf %1, %2 : vector<2x512xf32>
    %4 = arith.truncf %3 : vector<2x512xf32> to vector<2x512xbf16>
    %c0_3 = arith.constant 0 : index
    %c0_4 = arith.constant 0 : index
    %5 = vector.load %arg1[%c0_3, %c0_4] : memref<512x32xbf16, #tpu.memory_space<vmem>>, vector<512x32xbf16>
    %cst_5 = arith.constant dense<0.000000e+00> : vector<2x32xf32>
    %6 = tpu.matmul %4, %5, %cst_5 {dimension_numbers = #tpu.dot_dimension_numbers<[1], [0], [0], [1], [0, 0, 1, 1], [], []>} : vector<2x512xbf16>, vector<512x32xbf16>, vector<2x32xf32> -> vector<2x32xf32>
    %c0_6 = arith.constant 0 : index
    %c0_7 = arith.constant 0 : index
    %7 = vector.load %arg2[%c0_6, %c0_7] : memref<1x32xf32, #tpu.memory_space<vmem>>, vector<1x32xf32>
    %8 = vector.broadcast %7 : vector<1x32xf32> to vector<2x32xf32>
    %9 = arith.addf %6, %8 : vector<2x32xf32>
    %cst_8 = arith.constant 0.000000e+00 : f32
    %10 = vector.broadcast %cst_8 : f32 to vector<2x32xf32>
    %11 = arith.maximumf %9, %10 : vector<2x32xf32>
    %12 = arith.truncf %11 : vector<2x32xf32> to vector<2x32xbf16>
    %c0_9 = arith.constant 0 : index
    %c0_10 = arith.constant 0 : index
    %13 = vector.load %arg3[%c0_9, %c0_10] : memref<32x8xbf16, #tpu.memory_space<vmem>>, vector<32x8xbf16>
    %cst_11 = arith.constant dense<0.000000e+00> : vector<2x8xf32>
    %14 = tpu.matmul %12, %13, %cst_11 {dimension_numbers = #tpu.dot_dimension_numbers<[1], [0], [0], [1], [0, 0, 1, 1], [], []>} : vector<2x32xbf16>, vector<32x8xbf16>, vector<2x8xf32> -> vector<2x8xf32>
    %c0_12 = arith.constant 0 : index
    %c0_13 = arith.constant 0 : index
    %15 = vector.load %arg4[%c0_12, %c0_13] : memref<1x8xf32, #tpu.memory_space<vmem>>, vector<1x8xf32>
    %16 = vector.broadcast %15 : vector<1x8xf32> to vector<2x8xf32>
    %17 = arith.addf %14, %16 : vector<2x8xf32>
    %c0_14 = arith.constant 0 : index
    %c0_15 = arith.constant 0 : index
    %18 = vector.load %arg5[%c0_14, %c0_15] : memref<2x8xf32, #tpu.memory_space<vmem>>, vector<2x8xf32>
    tpu.vector_store %arg5[%c0_14, %c0_15], %17 {strides = array<i32>} : memref<2x8xf32, #tpu.memory_space<vmem>>, vector<2x8xf32>,
    return
  }
}

</mosaic_0001>

<bundles_post_ra>
// kernel: cnn1d_deeper_forward.5
= control target key start
LH: loop header
LB: loop body
LE: loop exit
PB: predicated region body
PF: predicated region fallthrough
CT: control target
= control target key end

     0   :  { %9 = vsyncpa [#allocation3], 0  ;;  %s1177_s0 = inlined_call_operand.vmem [shape: f32[2,22,4], index: 0, kind: input, shape index: {}]   ;;  %s1178_s1 = inlined_call_operand.hbm [shape: bf16[7,4,64], index: 1, kind: input, shape index: {}]   ;;  %s1179_s2 = inlined_call_operand.hbm [shape: f32[1,64], index: 2, kind: input, shape index: {}]   ;;  %s1180_s3 = inlined_call_operand.hbm [shape: f32[1,64], index: 3, kind: input, shape index: {}]   ;;  %s1181_s4 = inlined_call_operand.vmem [shape: f32[2,16,64], index: 4, kind: output, shape index: {}]  }
   0x1   :  { %10 = vsyncpa [#allocation5], 0  ;;  %s1003_s15 = smov 0  }
   0x2 LB: > { %s971_s16 = smov [#allocation4]   ;;  %s1009_s18 = sadd.s32 4294967295, %s969_s15   ;;  %s969_s15 = sphi %s1003_s15, %s16_s15  }
   0x3   : > { %s162_s17 = sshll.u32 %s971_s16, 4  ;;  %p725_p0 = scmp.ge.s32.totalorder %s969_s15, 1  ;;  %s163_s17 = int_to_ptr.vmem [resolvable:$true] %s162_s17 }
   0x4   : > { %p136_p1 = scmp.lt.s32.totalorder %s969_s15, 3  ;;  %p1182_p2 = scmp.eq.s32.totalorder %s1009_s18, 0 }
   0x5   : > { %s972_s20 = smov [#allocation2]   ;;  %s973_s23 = smov [#allocation6]  }
   0x6   : > { %p1014_p3 = pnand %p725_p0, %p136_p1  ;;  %s148_s21 = sshll.u32 %s972_s20, 4  ;;  %s1026_s21 = int_to_ptr.vmem [resolvable:$true] %s148_s21 }
   0x7   : > { %s173_s24 = sshll.u32 %s973_s23, 4  ;;  %s871_s27 = scalar_lea.hbm %s1179_s2, 16  ;;  %s1028_s24 = int_to_ptr.vmem [resolvable:$true] %s173_s24 }
   0x8   : > { %s1184_s19 = scalar_select %p1014_p3, 1, 0 }
   0x9   : > { %p840_p4 = pneg %p1014_p3  ;;  %p872_p6 = scmp.ne.s32.totalorder %s1179_s2, %s871_s27 }
   0xa   : > { %p878_p10 = scmp.lt.u32.totalorder %s871_s27, %s1179_s2 }
   0xb   : > { %p1022_p5 = pnand %p1182_p2, %p840_p4 }
   0xd   : > { %p1038_p7 = pneg %p1022_p5 }
   0xf   : > { %p874_p8 = pnand %p1038_p7, %p872_p6 }
  0x11   : > { %p875_p9 = pneg %p874_p8 }
  0x13   : > { %p880_p11 = pnand %p878_p10, %p875_p9 }
  0x15   : > { %883 = shalt.err (!%p880_p11)
}
  0x16   : > { %s884_s7 = scalar_lea.vmem %s163_s17, 16  ;;  %s891_s8 = scalar_lea.vmem %s163_s17, 32 }
  0x17   : > { %p885_p12 = scmp.ne.s32.totalorder %s163_s17, %s884_s7  ;;  %p892_p1 = scmp.lt.s32.totalorder %s163_s17, %s163_s17 }
  0x18   : > { %p893_p4 = scmp.lt.s32.totalorder %s891_s8, %s884_s7 }
  0x19   : > { %p887_p13 = pnand %p885_p12, %p1038_p7 }
  0x1a   : > { %p894_p2 = por %p893_p4, %p892_p1 }
  0x1b   : > { %p888_p0 = pneg %p887_p13 }
  0x1d   : > { %p895_p3 = pnand %p894_p2, %p888_p0 }
  0x1f   : > { %898 = shalt.err (!%p895_p3)
}
  0x20   : > { %846 = dma.hbm_to_vmem [thread:$0]  (!%p1022_p5), %s1179_s2, 16, %s163_s17, [#allocation5]  }
  0x21   : > { %s899_s13 = scalar_lea.hbm %s1178_s1, 224 }
  0x22   : > { %p900_p6 = scmp.ne.s32.totalorder %s1178_s1, %s899_s13  ;;  %p906_p2 = scmp.lt.u32.totalorder %s899_s13, %s1178_s1 }
  0x24   : > { %p902_p8 = pnand %p900_p6, %p1038_p7 }
  0x26   : > { %p903_p9 = pneg %p902_p8 }
  0x28   : > { %p908_p3 = pnand %p906_p2, %p903_p9 }
  0x2a   : > { %911 = shalt.err (!%p908_p3)
}
  0x2b   : > { %s912_s17 = scalar_lea.vmem %s1026_s21, 224  ;;  %p920_p13 = scmp.lt.s32.totalorder %s1026_s21, %s1026_s21 }
  0x2c   : > { %p913_p10 = scmp.ne.s32.totalorder %s1026_s21, %s912_s17  ;;  %p921_p0 = scmp.lt.s32.totalorder %s912_s17, %s912_s17 }
  0x2e   : > { %p915_p11 = pnand %p913_p10, %p1038_p7  ;;  %p922_p1 = por %p921_p0, %p920_p13 }
  0x30   : > { %p916_p12 = pneg %p915_p11 }
  0x32   : > { %p923_p4 = pnand %p922_p1, %p916_p12 }
  0x34   : > { %926 = shalt.err (!%p923_p4)
}
  0x35   : > { %s974_s25 = smov 32   ;;  %s975_s26 = smov 2  }
  0x36   : > { %843 = dma.hbm_to_vmem [thread:$0]  (!%p1022_p5), %s1178_s1, 224, %s1026_s21, [#allocation3], %s974_s25, %s974_s25, %s975_s26  }
  0x37   : > { %s927_s6 = scalar_lea.hbm %s1180_s3, 16 }
  0x38   : > { %p928_p6 = scmp.ne.s32.totalorder %s1180_s3, %s927_s6  ;;  %p934_p2 = scmp.lt.u32.totalorder %s927_s6, %s1180_s3 }
  0x3a   : > { %p930_p8 = pnand %p928_p6, %p1038_p7 }
  0x3c   : > { %p931_p9 = pneg %p930_p8 }
  0x3e   : > { %p936_p3 = pnand %p934_p2, %p931_p9 }
  0x40   : > { %939 = shalt.err (!%p936_p3)
}
  0x41   : > { %s940_s21 = scalar_lea.vmem %s1028_s24, 16  ;;  %s947_s11 = scalar_lea.vmem %s1028_s24, 32 }
  0x42   : > { %p941_p10 = scmp.ne.s32.totalorder %s1028_s24, %s940_s21  ;;  %p948_p13 = scmp.lt.s32.totalorder %s1028_s24, %s1028_s24 }
  0x43   : > { %p949_p0 = scmp.lt.s32.totalorder %s947_s11, %s940_s21 }
  0x44   : > { %p943_p11 = pnand %p941_p10, %p1038_p7 }
  0x45   : > { %p950_p1 = por %p949_p0, %p948_p13 }
  0x46   : > { %p944_p12 = pneg %p943_p11 }
  0x48   : > { %p951_p4 = pnand %p950_p1, %p944_p12 }
  0x4a   : > { %954 = shalt.err (!%p951_p4)
}
  0x4b   : > { %849 = dma.hbm_to_vmem [thread:$0]  (!%p1022_p5), %s1180_s3, 16, %s1028_s24, [#allocation5]  }
  0x4c   : > { %p1187_p6 = scmp.ne.s32.totalorder %s1184_s19, 0 }
  0x4d   : > { %p1188_p7 = scmp.eq.s32.totalorder (!%p1187_p6), %s1009_s18, 0 }
  0x4e   : > { %194 = sbr.rel (%p1187_p6) target bundleno = 358 (0x166), region = 36 }
  0x55   : > { %960 = dma.done.wait (%p1188_p7), [#allocation3], 224   ;;  %p1189_p8 = pmov %p1188_p7 }
  0x56   : > { %p1190_p9 = pmov %p1188_p7 }
  0x57   : > { %962 = vsyncadd (%p1189_p8), [#allocation3], 4294967072 }
  0x58   : > { %964 = dma.done.wait (%p1190_p9), [#allocation5], 32   ;;  %p1191_p2 = pmov %p1188_p7 }
  0x59   : > { %p228_p3 = scmp.lt.s32.totalorder %s1009_s18, 1  ;;  %v976_v0 = vmov 0.0   ;;  %vm977_vm0 = vmmov 0   ;;  %vm252_vm1 = vcmask 1041408   ;;  %v247_v1 = vld [vmem:[#allocation2 + $0x2] sm:$0x3] }
  0x5a   : > { %966 = vsyncadd (%p1191_p2), [#allocation5], 4294967264  ;;  %763 = vmatprep.subr.bf16.mxu1 %v976_v0  ;;  %781 = vmatprep.subr.bf16.mxu0 %v976_v0  ;;  %v402_v2 = vld [vmem:[#allocation2 + $0x6] sm:$0x3]  ;;  %v254_v4 = vsel %vm252_vm1, %v247_v1, 0  ;;  %vm248_vm2 = vcmask 31744  }
  0x5b   : > { %765 = vmatprep.mubr.msk.bf16.mxu1 %vm977_vm0, %v976_v0  ;;  %783 = vmatprep.mubr.msk.bf16.mxu0 %vm977_vm0, %v976_v0  ;;  %s1193_s18 = smov (!%p228_p3, %s1009_s18), 1  ;;  %v407_v5 = vsel %vm252_vm1, %v402_v2, 0  ;;  %v456_v11 = vld [vmem:[#allocation2 + $0x8] sm:$0x3]  ;;  %v242_v12 = vld [vmem:[#allocation2] sm:$0x3] }
  0x5c   : > { %s827_s19 = smul.u32 24, %s1193_s18  ;;  %764 = vmatpush3.bf16.msra.mxu1 %v254_v4  ;;  %782 = vmatpush3.bf16.msra.mxu0 %v407_v5  ;;  %v461_v13 = vsel %vm252_vm1, %v456_v11, 0  ;;  %v301_v14 = vsel %vm252_vm1, %v242_v12, 0  ;;  %v510_v19 = vld [vmem:[#allocation2 + $0xa] sm:$0x3]  ;;  %s748_s14 = sshll.u32 %s1193_s18, 4 }
  0x5d   : > { %787 = vmatprep.subr.bf16.mxu0 %v976_v0  ;;  %769 = vmatprep.subr.bf16.mxu1 %v976_v0  ;;  %v348_v20 = vld [vmem:[#allocation2 + $0x4] sm:$0x3]  ;;  %v515_v23 = vsel %vm252_vm1, %v510_v19, 0  ;;  %v564_v29 = vld [vmem:[#allocation2 + $0xc] sm:$0x3]  ;;  %s237_s23 = scalar_lea.vmem %s1181_s4, %s748_s14  ;;  %vm634_vm3 = vcmask 523264  }
  0x5e   : > { %s1125_s30 = scalar_lea.vmem %s1177_s0, %s827_s19  ;;  %v353_v24 = vsel %vm252_vm1, %v348_v20, 0  ;;  %v569_v32 = vsel %vm252_vm1, %v564_v29, 0  ;;  %v744_v41 = vld [vmem:[#allocation4] ss:$0 sm:$0xff]  ;;  %v745_v44 = vld [vmem:[#allocation6] ss:$0 sm:$0xff] }
  0x5f   : > { %v243_v3 = vld [vmem:[%s1125_s30 + $0x1] sm:$0xff]  ;;  %v244_v6 = vld [vmem:[%s1125_s30 + $0x9] sm:$0xff] }
  0x60   : > { %v398_v7 = vld [vmem:[%s1125_s30 + $0x3] sm:$0xff]  ;;  %v399_v8 = vld [vmem:[%s1125_s30 + $0xb] sm:$0xff]  ;;  %v245_v9 = vpack.c.bf16 %v244_v6, %v243_v3 }
  0x61   : > { %v400_v10 = vpack.c.bf16 %v399_v8, %v398_v7  ;;  %v239_v15 = vld [vmem:[%s1125_s30] sm:$0xff]  ;;  %v240_v16 = vld [vmem:[%s1125_s30 + $0x8] sm:$0xff] }
  0x62   : > { %766 = vmatmul.mubr.msk.bf16.vlgmr.msra.gmra.mrb[0].mxu1 %vm248_vm2, %v245_v9  ;;  %v452_v17 = vld [vmem:[%s1125_s30 + $0x4] sm:$0xff]  ;;  %v453_v18 = vld [vmem:[%s1125_s30 + $0xc] sm:$0xff]  ;;  %v241_v21 = vpack.c.bf16 %v240_v16, %v239_v15 }
  0x63   : > { %784 = vmatmul.mubr.msk.bf16.vlgmr.msra.gmra.mrb[0].mxu0 %vm248_vm2, %v400_v10  ;;  %770 = vmatpush3.bf16.msra.mxu1 %v301_v14  ;;  %v454_v22 = vpack.c.bf16 %v453_v18, %v452_v17  ;;  %v344_v25 = vld [vmem:[%s1125_s30 + $0x2] sm:$0xff]  ;;  %v345_v26 = vld [vmem:[%s1125_s30 + $0xa] sm:$0xff] }
  0x64   : > { %788 = vmatpush3.bf16.msra.mxu0 %v461_v13  ;;  %771 = vmatprep.mubr.msk.bf16.mxu1 %vm977_vm0, %v976_v0  ;;  %v506_v27 = vld [vmem:[%s1125_s30 + $0x5] sm:$0xff]  ;;  %v507_v28 = vld [vmem:[%s1125_s30 + $0xd] sm:$0xff]  ;;  %v346_v30 = vpack.c.bf16 %v345_v26, %v344_v25 }
  0x65   : > { %789 = vmatprep.mubr.msk.bf16.mxu0 %vm977_vm0, %v976_v0  ;;  %793 = vmatprep.subr.bf16.mxu0 %v976_v0  ;;  %v508_v31 = vpack.c.bf16 %v507_v28, %v506_v27  ;;  %v560_v33 = vld [vmem:[%s1125_s30 + $0x6] sm:$0xff]  ;;  %v561_v34 = vld [vmem:[%s1125_s30 + $0xe] sm:$0xff] }
  0x66   : > { %775 = vmatprep.subr.bf16.mxu1 %v976_v0  ;;  %v562_v35 = vpack.c.bf16 %v561_v34, %v560_v33 }
  0x6e   : > { %772 = vmatmul.mubr.msk.bf16.vlgmr.msra.gmra.mrb[0].mxu1 %vm248_vm2, %v241_v21 }
  0x6f   : > { %790 = vmatmul.mubr.msk.bf16.vlgmr.msra.gmra.mrb[0].mxu0 %vm248_vm2, %v454_v22  ;;  %776 = vmatpush3.bf16.msra.mxu1 %v353_v24 }
  0x70   : > { %794 = vmatpush3.bf16.msra.mxu0 %v515_v23  ;;  %777 = vmatprep.mubr.msk.bf16.mxu1 %vm977_vm0, %v976_v0 }
  0x71   : > { %795 = vmatprep.mubr.msk.bf16.mxu0 %vm977_vm0, %v976_v0  ;;  %799 = vmatprep.subr.bf16.mxu0 %v976_v0 }
  0x7a   : > { %778 = vmatmul.mubr.msk.bf16.vlgmr.msra.gmra.mrb[0].mxu1 %vm248_vm2, %v346_v30 }
  0x7b   : > { %796 = vmatmul.mubr.msk.bf16.vlgmr.msra.gmra.mrb[0].mxu0 %vm248_vm2, %v508_v31 }
  0x7c   : > { %800 = vmatpush3.bf16.msra.mxu0 %v569_v32  ;;  %801 = vmatprep.mubr.msk.bf16.mxu0 %vm977_vm0, %v976_v0 }
  0x87   : > { %802 = vmatmul.mubr.msk.bf16.vlgmr.msra.gmra.mrb[0].mxu0 %vm248_vm2, %v562_v35 }
 0x14d   : > { %v389_v36 = vpop.f32.mrb[0].mxu1 }
 0x14e   : > { %v779_v37 = vpop.f32.mrb[1].mxu1 }
 0x14f   : > { %v392_v38 = vpop.f32.mrb[2].mxu1 }
 0x150   : > { %v780_v39 = vpop.f32.mrb[3].mxu1 }
 0x15a   : > { %v605_v40 = vpop.f32.mrb[0].mxu0 }
 0x15b   : > { %v805_v42 = vadd.f32 %v605_v40, %v389_v36  ;;  %v803_v43 = vpop.f32.mrb[1].mxu0 }
 0x15c   : > { %v608_v45 = vpop.f32.mrb[2].mxu0 }
 0x15d   : > { %v621_v46 = vmul.f32 %v805_v42, %v744_v41  ;;  %v806_v47 = vadd.f32 %v608_v45, %v392_v38  ;;  %v804_v48 = vpop.f32.mrb[3].mxu0 }
 0x15f   : > { %v630_v49 = vadd.f32 %v745_v44, %v621_v46  ;;  %v622_v50 = vmul.f32 %v806_v47, %v744_v41 }
 0x161   : > { %v632_v51 = vmax.f32 %v630_v49, 0.0  ;;  %v631_v52 = vadd.f32 %v745_v44, %v622_v50 }
 0x163   : > { %635 = vst.msk [vmem:[%s237_s23] sm:$0xff] %vm634_vm3, %v632_v51  ;;  %v633_v53 = vmax.f32 %v631_v52, 0.0 }
 0x165   : > { %636 = vst.msk [vmem:[%s237_s23 + $0x8] sm:$0xff] %vm634_vm3, %v633_v53 }
 0x166 PF: > { %s16_s15 = sadd.s32 1, %s969_s15  }
 0x167   : > { %p13_p5 = scmp.ge.s32.totalorder %s16_s15, 4  }
 0x169   :  { %15 = sbr.rel (!%p13_p5) target bundleno = 2 (0x2), region = 85 }
 0x170   :  { %658 = vsyncpa [#allocation3], 1 }
 0x171   :  { %660 = vsyncpa [#allocation3 + $0x1], 1 }
 0x172   :  { %661 = vsyncpa [#allocation5], 1 }

// kernel: cnn1d_deeper_forward.6
= control target key start
LH: loop header
LB: loop body
LE: loop exit
PB: predicated region body
PF: predicated region fallthrough
CT: control target
= control target key end

     0   :  { %16 = vsyncpa [#allocation4], 0  ;;  %s2444_s0 = inlined_call_operand.vmem [shape: f32[2,9,64], index: 0, kind: input, shape index: {}]   ;;  %s2445_s1 = inlined_call_operand.vmem [shape: f32[2,8,64], index: 1, kind: input, shape index: {}]   ;;  %s2446_s2 = inlined_call_operand.hbm [shape: bf16[3,64,128], index: 2, kind: input, shape index: {}]   ;;  %s2447_s3 = inlined_call_operand.hbm [shape: f32[1,128], index: 3, kind: input, shape index: {}]   ;;  %s2448_s4 = inlined_call_operand.hbm [shape: f32[1,128], index: 4, kind: input, shape index: {}]   ;;  %s2449_s5 = inlined_call_operand.hbm [shape: bf16[3,128,128], index: 5, kind: input, shape index: {}]   ;;  %s2450_s6 = inlined_call_operand.hbm [shape: f32[1,128], index: 6, kind: input, shape index: {}]   ;;  %s2451_s7 = inlined_call_operand.hbm [shape: f32[1,128], index: 7, kind: input, shape index: {}]   ;;  %s2452_s8 = inlined_call_operand.hbm [shape: bf16[64,128], index: 8, kind: input, shape index: {}]   ;;  %s2453_s9 = inlined_call_operand.hbm [shape: f32[1,128], index: 9, kind: input, shape index: {}]   ;;  %s2454_s10 = inlined_call_operand.hbm [shape: f32[1,128], index: 10, kind: input, shape index: {}]   ;;  %s2455_s11 = inlined_call_operand.vmem [shape: f32[2,8,128], index: 11, kind: output, shape index: {}]  }
   0x1   :  { %17 = vsyncpa [#allocation6], 0 }
   0x2   :  { %18 = vsyncpa [#allocation9], 0 }
   0x3   :  { %19 = vsyncpa [#allocation12], 0 }
   0x4   :  { %20 = vsyncpa [#allocation15], 0  ;;  %s2110_s17 = smov 0  }
   0x5 LB: > { %s2037_s18 = smov [#allocation5]   ;;  %s2116_s20 = sadd.s32 4294967295, %s2035_s17   ;;  %s2035_s17 = sphi %s2110_s17, %s26_s17  }
   0x6   : > { %s324_s19 = sshll.u32 %s2037_s18, 4  ;;  %p1365_p0 = scmp.ge.s32.totalorder %s2035_s17, 1  ;;  %s2121_s19 = int_to_ptr.vmem [resolvable:$true] %s324_s19 }
   0x7   : > { %p298_p1 = scmp.lt.s32.totalorder %s2035_s17, 3  ;;  %p2456_p2 = scmp.eq.s32.totalorder %s2116_s20, 0 }
   0x8   : > { %s2038_s22 = smov [#allocation8]   ;;  %s2039_s25 = smov [#allocation11]  }
   0x9   : > { %p2123_p3 = pnand %p1365_p0, %p298_p1  ;;  %s345_s23 = sshll.u32 %s2038_s22, 4  ;;  %s2129_s23 = int_to_ptr.vmem [resolvable:$true] %s345_s23 }
   0xa   : > { %s370_s26 = sshll.u32 %s2039_s25, 4  ;;  %s2040_s27 = smov [#allocation14]   ;;  %s2137_s26 = int_to_ptr.vmem [resolvable:$true] %s370_s26 }
   0xb   : > { %s2461_s21 = scalar_select %p2123_p3, 1, 0 }
   0xc   : > { %p1650_p4 = pneg %p2123_p3  ;;  %s2139_s28 = sshll.u32 %s2040_s27, 4  ;;  %s395_s28 = int_to_ptr.vmem [resolvable:$true] %s2139_s28 }
   0xd   : > { %s1757_s12 = scalar_lea.hbm %s2447_s3, 16 }
   0xe   : > { %p2133_p5 = pnand %p2456_p2, %p1650_p4  ;;  %p1758_p6 = scmp.ne.s32.totalorder %s2447_s3, %s1757_s12 }
   0xf   : > { %p1764_p10 = scmp.lt.u32.totalorder %s1757_s12, %s2447_s3 }
  0x10   : > { %p2149_p7 = pneg %p2133_p5 }
  0x12   : > { %p1760_p8 = pnand %p2149_p7, %p1758_p6 }
  0x14   : > { %p1761_p9 = pneg %p1760_p8 }
  0x16   : > { %p1766_p11 = pnand %p1764_p10, %p1761_p9 }
  0x18   : > { %1769 = shalt.err (!%p1766_p11)
}
  0x19   : > { %s1770_s22 = scalar_lea.vmem %s2121_s19, 16  ;;  %s1777_s25 = scalar_lea.vmem %s2121_s19, 32 }
  0x1a   : > { %p1771_p12 = scmp.ne.s32.totalorder %s2121_s19, %s1770_s22  ;;  %p1778_p1 = scmp.lt.s32.totalorder %s2121_s19, %s2121_s19 }
  0x1b   : > { %p1779_p4 = scmp.lt.s32.totalorder %s1777_s25, %s1770_s22 }
  0x1c   : > { %p1773_p13 = pnand %p1771_p12, %p2149_p7 }
  0x1d   : > { %p1780_p6 = por %p1779_p4, %p1778_p1 }
  0x1e   : > { %p1774_p0 = pneg %p1773_p13 }
  0x20   : > { %p1781_p8 = pnand %p1780_p6, %p1774_p0 }
  0x22   : > { %1784 = shalt.err (!%p1781_p8)
}
  0x23   : > { %1656 = dma.hbm_to_vmem [thread:$0]  (!%p2133_p5), %s2447_s3, 16, %s2121_s19, [#allocation6]  }
  0x24   : > { %s1785_s13 = scalar_lea.hbm %s2449_s5, 3072 }
  0x25   : > { %p1786_p9 = scmp.ne.s32.totalorder %s2449_s5, %s1785_s13  ;;  %p1792_p12 = scmp.lt.u32.totalorder %s1785_s13, %s2449_s5 }
  0x27   : > { %p1788_p10 = pnand %p1786_p9, %p2149_p7 }
  0x29   : > { %p1789_p11 = pneg %p1788_p10 }
  0x2b   : > { %p1794_p13 = pnand %p1792_p12, %p1789_p11 }
  0x2d   : > { %1797 = shalt.err (!%p1794_p13)
}
  0x2e   : > { %s1798_s19 = scalar_lea.vmem %s2129_s23, 3072  ;;  %p1806_p6 = scmp.lt.s32.totalorder %s2129_s23, %s2129_s23 }
  0x2f   : > { %p1799_p0 = scmp.ne.s32.totalorder %s2129_s23, %s1798_s19  ;;  %p1807_p8 = scmp.lt.s32.totalorder %s1798_s19, %s1798_s19 }
  0x31   : > { %p1801_p1 = pnand %p1799_p0, %p2149_p7  ;;  %p1808_p9 = por %p1807_p8, %p1806_p6 }
  0x33   : > { %p1802_p4 = pneg %p1801_p1 }
  0x35   : > { %p1809_p10 = pnand %p1808_p9, %p1802_p4 }
  0x37   : > { %1812 = shalt.err (!%p1809_p10)
}
  0x38   : > { %s2458_s25 = smov 64   ;;  %s2460_s27 = smov 4  }
  0x39   : > { %1662 = dma.hbm_to_vmem [thread:$0]  (!%p2133_p5), %s2449_s5, 3072, %s2129_s23, [#allocation9], %s2458_s25, %s2458_s25, %s2460_s27  }
  0x3a   : > { %s1813_s14 = scalar_lea.hbm %s2451_s7, 16 }
  0x3b   : > { %p1814_p11 = scmp.ne.s32.totalorder %s2451_s7, %s1813_s14  ;;  %p1820_p0 = scmp.lt.u32.totalorder %s1813_s14, %s2451_s7 }
  0x3d   : > { %p1816_p12 = pnand %p1814_p11, %p2149_p7 }
  0x3f   : > { %p1817_p13 = pneg %p1816_p12 }
  0x41   : > { %p1822_p1 = pnand %p1820_p0, %p1817_p13 }
  0x43   : > { %1825 = shalt.err (!%p1822_p1)
}
  0x44   : > { %s1826_s23 = scalar_lea.vmem %s2137_s26, 16  ;;  %s1833_s29 = scalar_lea.vmem %s2137_s26, 32 }
  0x45   : > { %p1827_p4 = scmp.ne.s32.totalorder %s2137_s26, %s1826_s23  ;;  %p1834_p9 = scmp.lt.s32.totalorder %s2137_s26, %s2137_s26 }
  0x46   : > { %p1835_p10 = scmp.lt.s32.totalorder %s1833_s29, %s1826_s23 }
  0x47   : > { %p1829_p6 = pnand %p1827_p4, %p2149_p7 }
  0x48   : > { %p1836_p11 = por %p1835_p10, %p1834_p9 }
  0x49   : > { %p1830_p8 = pneg %p1829_p6 }
  0x4b   : > { %p1837_p12 = pnand %p1836_p11, %p1830_p8 }
  0x4d   : > { %1840 = shalt.err (!%p1837_p12)
}
  0x4e   : > { %1668 = dma.hbm_to_vmem [thread:$0]  (!%p2133_p5), %s2451_s7, 16, %s2137_s26, [#allocation12]  }
  0x4f   : > { %s1841_s16 = scalar_lea.hbm %s2453_s9, 16 }
  0x50   : > { %p1842_p13 = scmp.ne.s32.totalorder %s2453_s9, %s1841_s16  ;;  %p1848_p4 = scmp.lt.u32.totalorder %s1841_s16, %s2453_s9 }
  0x52   : > { %p1844_p0 = pnand %p1842_p13, %p2149_p7 }
  0x54   : > { %p1845_p1 = pneg %p1844_p0 }
  0x56   : > { %p1850_p6 = pnand %p1848_p4, %p1845_p1 }
  0x58   : > { %1853 = shalt.err (!%p1850_p6)
}
  0x59   : > { %s1854_s29 = scalar_lea.vmem %s395_s28, 16  ;;  %s1861_s26 = scalar_lea.vmem %s395_s28, 32 }
  0x5a   : > { %p1855_p8 = scmp.ne.s32.totalorder %s395_s28, %s1854_s29  ;;  %p1862_p11 = scmp.lt.s32.totalorder %s395_s28, %s395_s28 }
  0x5b   : > { %p1863_p12 = scmp.lt.s32.totalorder %s1861_s26, %s1854_s29 }
  0x5c   : > { %p1857_p9 = pnand %p1855_p8, %p2149_p7 }
  0x5d   : > { %p1864_p2 = por %p1863_p12, %p1862_p11 }
  0x5e   : > { %p1858_p10 = pneg %p1857_p9 }
  0x60   : > { %p1865_p3 = pnand %p1864_p2, %p1858_p10 }
  0x62   : > { %1868 = shalt.err (!%p1865_p3)
}
  0x63   : > { %1674 = dma.hbm_to_vmem [thread:$0]  (!%p2133_p5), %s2453_s9, 16, %s395_s28, [#allocation15]  }
  0x64   : > { %s2043_s13 = smov [#allocation3]   ;;  %s2044_s16 = smov [#allocation7]  }
  0x65   : > { %s310_s14 = sshll.u32 %s2043_s13, 4  ;;  %s335_s18 = sshll.u32 %s2044_s16, 4  ;;  %s311_s14 = int_to_ptr.vmem [resolvable:$true] %s310_s14  ;;  %s336_s18 = int_to_ptr.vmem [resolvable:$true] %s335_s18 }
  0x66   : > { %s1869_s23 = scalar_lea.hbm %s2446_s2, 1536 }
  0x67   : > { %p1870_p2 = scmp.ne.s32.totalorder %s2446_s2, %s1869_s23  ;;  %p1876_p0 = scmp.lt.u32.totalorder %s1869_s23, %s2446_s2 }
  0x69   : > { %p1872_p3 = pnand %p1870_p2, %p2149_p7 }
  0x6b   : > { %p1873_p13 = pneg %p1872_p3 }
  0x6d   : > { %p1878_p1 = pnand %p1876_p0, %p1873_p13 }
  0x6f   : > { %1881 = shalt.err (!%p1878_p1)
}
  0x70   : > { %s1882_s28 = scalar_lea.vmem %s311_s14, 1536  ;;  %p1890_p9 = scmp.lt.s32.totalorder %s311_s14, %s311_s14 }
  0x71   : > { %p1883_p4 = scmp.ne.s32.totalorder %s311_s14, %s1882_s28  ;;  %p1891_p10 = scmp.lt.s32.totalorder %s1882_s28, %s1882_s28 }
  0x73   : > { %p1885_p6 = pnand %p1883_p4, %p2149_p7  ;;  %p1892_p11 = por %p1891_p10, %p1890_p9 }
  0x75   : > { %p1886_p8 = pneg %p1885_p6 }
  0x77   : > { %p1893_p12 = pnand %p1892_p11, %p1886_p8 }
  0x79   : > { %1896 = shalt.err (!%p1893_p12)
}
  0x7a   : > { %s2464_s12 = smov 64   ;;  %s1897_s19 = scalar_lea.hbm %s2448_s4, 16 }
  0x7b   : > { %1653 = dma.hbm_to_vmem [thread:$0]  (!%p2133_p5), %s2446_s2, 1536, %s311_s14, [#allocation4], %s2464_s12, %s2464_s12, %s2460_s27  }
  0x7c   : > { %p1898_p2 = scmp.ne.s32.totalorder %s2448_s4, %s1897_s19  ;;  %p1904_p0 = scmp.lt.u32.totalorder %s1897_s19, %s2448_s4 }
  0x7e   : > { %p1900_p3 = pnand %p1898_p2, %p2149_p7 }
  0x80   : > { %p1901_p13 = pneg %p1900_p3 }
  0x82   : > { %p1906_p1 = pnand %p1904_p0, %p1901_p13 }
  0x84   : > { %1909 = shalt.err (!%p1906_p1)
}
  0x85   : > { %s1910_s28 = scalar_lea.vmem %s336_s18, 16  ;;  %s1917_s14 = scalar_lea.vmem %s336_s18, 32 }
  0x86   : > { %p1911_p4 = scmp.ne.s32.totalorder %s336_s18, %s1910_s28  ;;  %p1918_p9 = scmp.lt.s32.totalorder %s336_s18, %s336_s18 }
  0x87   : > { %p1919_p10 = scmp.lt.s32.totalorder %s1917_s14, %s1910_s28 }
  0x88   : > { %p1913_p6 = pnand %p1911_p4, %p2149_p7 }
  0x89   : > { %p1920_p11 = por %p1919_p10, %p1918_p9 }
  0x8a   : > { %p1914_p8 = pneg %p1913_p6 }
  0x8c   : > { %p1921_p12 = pnand %p1920_p11, %p1914_p8 }
  0x8e   : > { %1924 = shalt.err (!%p1921_p12)
}
  0x8f   : > { %1659 = dma.hbm_to_vmem [thread:$0]  (!%p2133_p5), %s2448_s4, 16, %s336_s18, [#allocation6]  }
  0x90   : > { %s2045_s16 = smov [#allocation10]   ;;  %s2046_s19 = smov [#allocation13]  }
  0x91   : > { %s359_s22 = sshll.u32 %s2045_s16, 4  ;;  %s380_s23 = sshll.u32 %s2046_s19, 4  ;;  %s360_s22 = int_to_ptr.vmem [resolvable:$true] %s359_s22  ;;  %s381_s23 = int_to_ptr.vmem [resolvable:$true] %s380_s23 }
  0x92   : > { %s1925_s30 = scalar_lea.hbm %s2450_s6, 16 }
  0x93   : > { %p1926_p2 = scmp.ne.s32.totalorder %s2450_s6, %s1925_s30  ;;  %p1932_p0 = scmp.lt.u32.totalorder %s1925_s30, %s2450_s6 }
  0x95   : > { %p1928_p3 = pnand %p1926_p2, %p2149_p7 }
  0x97   : > { %p1929_p13 = pneg %p1928_p3 }
  0x99   : > { %p1934_p1 = pnand %p1932_p0, %p1929_p13 }
  0x9b   : > { %1937 = shalt.err (!%p1934_p1)
}
  0x9c   : > { %s1938_s18 = scalar_lea.vmem %s360_s22, 16  ;;  %s1945_s13 = scalar_lea.vmem %s360_s22, 32 }
  0x9d   : > { %p1939_p4 = scmp.ne.s32.totalorder %s360_s22, %s1938_s18  ;;  %p1946_p9 = scmp.lt.s32.totalorder %s360_s22, %s360_s22 }
  0x9e   : > { %p1947_p10 = scmp.lt.s32.totalorder %s1945_s13, %s1938_s18 }
  0x9f   : > { %p1941_p6 = pnand %p1939_p4, %p2149_p7 }
  0xa0   : > { %p1948_p11 = por %p1947_p10, %p1946_p9 }
  0xa1   : > { %p1942_p8 = pneg %p1941_p6 }
  0xa3   : > { %p1949_p12 = pnand %p1948_p11, %p1942_p8 }
  0xa5   : > { %1952 = shalt.err (!%p1949_p12)
}
  0xa6   : > { %1665 = dma.hbm_to_vmem [thread:$0]  (!%p2133_p5), %s2450_s6, 16, %s360_s22, [#allocation9]  }
  0xa7   : > { %s1953_s26 = scalar_lea.hbm %s2452_s8, 512 }
  0xa8   : > { %p1954_p2 = scmp.ne.s32.totalorder %s2452_s8, %s1953_s26  ;;  %p1960_p0 = scmp.lt.u32.totalorder %s1953_s26, %s2452_s8 }
  0xaa   : > { %p1956_p3 = pnand %p1954_p2, %p2149_p7 }
  0xac   : > { %p1957_p13 = pneg %p1956_p3 }
  0xae   : > { %p1962_p1 = pnand %p1960_p0, %p1957_p13 }
  0xb0   : > { %1965 = shalt.err (!%p1962_p1)
}
  0xb1   : > { %s1966_s18 = scalar_lea.vmem %s381_s23, 512  ;;  %p1974_p9 = scmp.lt.s32.totalorder %s381_s23, %s381_s23 }
  0xb2   : > { %p1967_p4 = scmp.ne.s32.totalorder %s381_s23, %s1966_s18  ;;  %p1975_p10 = scmp.lt.s32.totalorder %s1966_s18, %s1966_s18 }
  0xb4   : > { %p1969_p6 = pnand %p1967_p4, %p2149_p7  ;;  %p1976_p11 = por %p1975_p10, %p1974_p9 }
  0xb6   : > { %p1970_p8 = pneg %p1969_p6 }
  0xb8   : > { %p1977_p12 = pnand %p1976_p11, %p1970_p8 }
  0xba   : > { %1980 = shalt.err (!%p1977_p12)
}
  0xbb   : > { %s2465_s22 = smov 4   ;;  %s2047_s19 = smov [#allocation16]  }
  0xbc   : > { %1671 = dma.hbm_to_vmem [thread:$0]  (!%p2133_p5), %s2452_s8, 512, %s381_s23, [#allocation12], %s2464_s12, %s2464_s12, %s2465_s22  }
  0xbd   : > { %s405_s27 = sshll.u32 %s2047_s19, 4  ;;  %s1981_s30 = scalar_lea.hbm %s2454_s10, 16  ;;  %s406_s27 = int_to_ptr.vmem [resolvable:$true] %s405_s27 }
  0xbe   : > { %p1982_p2 = scmp.ne.s32.totalorder %s2454_s10, %s1981_s30  ;;  %p1988_p0 = scmp.lt.u32.totalorder %s1981_s30, %s2454_s10 }
  0xc0   : > { %p1984_p3 = pnand %p1982_p2, %p2149_p7 }
  0xc2   : > { %p1985_p13 = pneg %p1984_p3 }
  0xc4   : > { %p1990_p1 = pnand %p1988_p0, %p1985_p13 }
  0xc6   : > { %1993 = shalt.err (!%p1990_p1)
}
  0xc7   : > { %s1994_s12 = scalar_lea.vmem %s406_s27, 16  ;;  %s2001_s23 = scalar_lea.vmem %s406_s27, 32 }
  0xc8   : > { %p1995_p4 = scmp.ne.s32.totalorder %s406_s27, %s1994_s12  ;;  %p2002_p9 = scmp.lt.s32.totalorder %s406_s27, %s406_s27 }
  0xc9   : > { %p2003_p10 = scmp.lt.s32.totalorder %s2001_s23, %s1994_s12 }
  0xca   : > { %p1997_p6 = pnand %p1995_p4, %p2149_p7 }
  0xcb   : > { %p2004_p11 = por %p2003_p10, %p2002_p9 }
  0xcc   : > { %p1998_p8 = pneg %p1997_p6 }
  0xce   : > { %p2005_p12 = pnand %p2004_p11, %p1998_p8 }
  0xd0   : > { %2008 = shalt.err (!%p2005_p12)
}
  0xd1   : > { %1677 = dma.hbm_to_vmem [thread:$0]  (!%p2133_p5), %s2454_s10, 16, %s406_s27, [#allocation15]  }
  0xd2   : > { %p2466_p2 = scmp.ne.s32.totalorder %s2461_s21, 0 }
  0xd3   : > { %p2467_p3 = scmp.eq.s32.totalorder (!%p2466_p2), %s2116_s20, 0 }
  0xd4   : > { %433 = sbr.rel (%p2466_p2) target bundleno = 788 (0x314), region = 64 }
  0xdb   : > { %2014 = dma.done.wait (%p2467_p3), [#allocation4], 1536   ;;  %p2468_p7 = pmov %p2467_p3 }
  0xdc   : > { %p2469_p13 = pmov %p2467_p3 }
  0xdd   : > { %2016 = vsyncadd (%p2468_p7), [#allocation4], 4294965760 }
  0xde   : > { %2018 = dma.done.wait (%p2469_p13), [#allocation6], 32   ;;  %p2470_p0 = pmov %p2467_p3 }
  0xe0   : > { %2020 = vsyncadd (%p2470_p0), [#allocation6], 4294967264  ;;  %p2471_p1 = pmov %p2470_p0 }
  0xe1   : > { %p2472_p5 = pmov %p2470_p0 }
  0xe2   : > { %2022 = dma.done.wait (%p2471_p1), [#allocation9], 3088  }
  0xe3   : > { %2024 = vsyncadd (%p2472_p5), [#allocation9], 4294964208  ;;  %p2473_p4 = pmov %p2470_p0 }
  0xe4   : > { %p2474_p6 = pmov %p2470_p0 }
  0xe5   : > { %2026 = dma.done.wait (%p2473_p4), [#allocation12], 528  }
  0xe6   : > { %2028 = vsyncadd (%p2474_p6), [#allocation12], 4294966768  ;;  %p2475_p8 = pmov %p2470_p0 }
  0xe7   : > { %p2476_p9 = pmov %p2470_p0 }
  0xe8   : > { %2030 = dma.done.wait (%p2475_p8), [#allocation15], 32  }
  0xe9   : > { %2032 = vsyncadd (%p2476_p9), [#allocation15], 4294967264  ;;  %v2048_v0 = vmov 0.0   ;;  %vm2049_vm0 = vmmov 0   ;;  %p508_p10 = scmp.lt.s32.totalorder %s2116_s20, 1  ;;  %v1717_v1 = vld [vmem:[#allocation3 + $0x20] sm:$0xff]  }
  0xea   : > { %1490 = vmatprep.subr.bf16.mxu0 %v2048_v0  ;;  %774 = vst [vmem:[#allocation2] sm:$0xff] %v2048_v0  ;;  %775 = vst [vmem:[#allocation2 + $0x8] sm:$0x3] %v2048_v0  ;;  %1498 = vmatprep.mubr.msk.bf16.mxu0 %vm2049_vm0, %v2048_v0  ;;  %v1718_v2 = vld [vmem:[#allocation3 + $0x28] sm:$0xff]   ;;  %v1719_v3 = vld [vmem:[#allocation3 + $0x30] sm:$0xff]   ;;  %vm567_vm1 = vcmask 523264  }
  0xeb   : > { %1526 = vmatprep.subr.bf16.mxu1 %v2048_v0  ;;  %1542 = vmatprep.mubr.msk.bf16.mxu1 %vm2049_vm0, %v2048_v0  ;;  %s2478_s20 = smov (!%p508_p10, %s2116_s20), 1  ;;  %v1720_v4 = vld [vmem:[#allocation3 + $0x38] sm:$0xff]   ;;  %v1729_v7 = vld [vmem:[#allocation8 + $0x40] sm:$0xff]   ;;  %v1730_v9 = vld [vmem:[#allocation8 + $0x48] sm:$0xff]  }
  0xec   : > { %1491 = vmatpush3.bf16.msra.mxu0 %v1717_v1  ;;  %s1388_s21 = sshll.u32 %s2478_s20, 3  ;;  %v1721_v8 = vld [vmem:[#allocation3] sm:$0xff]   ;;  %1527 = vmatpush3.bf16.msra.mxu1 %v1729_v7  ;;  %v1722_v10 = vld [vmem:[#allocation3 + $0x8] sm:$0xff]   ;;  %s1442_s19 = sshll.u32 %s2478_s20, 4  ;;  %v1731_v11 = vld [vmem:[#allocation8 + $0x50] sm:$0xff]  }
  0xed   : > { %1492 = vmatprep.subr.bf16.mxu0 %v2048_v0  ;;  %s516_s16 = scalar_lea.vmem %s2445_s1, %s1388_s21  ;;  %1528 = vmatprep.subr.bf16.mxu1 %v2048_v0  ;;  %v1723_v12 = vld [vmem:[#allocation3 + $0x10] sm:$0xff]   ;;  %s512_s26 = scalar_lea.vmem %s2444_s0, %s1442_s19  ;;  %v1732_v13 = vld [vmem:[#allocation8 + $0x58] sm:$0xff]   ;;  %v1726_v18 = vld [vmem:[#allocation3 + $0x48] sm:$0xff]  }
  0xee   : > { %v532_v5 = vld [vmem:[%s516_s16] sm:$0xff]  ;;  %v1724_v14 = vld [vmem:[#allocation3 + $0x18] sm:$0xff]   ;;  %v1725_v16 = vld [vmem:[#allocation3 + $0x40] sm:$0xff]   ;;  %s520_s14 = scalar_lea.vmem %s2455_s11, %s1388_s21 }
  0xef   : > { %v2379_v6 = vpack.c.bf16 %v532_v5, %v532_v5  ;;  %v522_v15 = vld [vmem:[%s512_s26] sm:$0xff]  ;;  %v1728_v20 = vld [vmem:[#allocation3 + $0x58] sm:$0xff]   ;;  %v1733_v23 = vld [vmem:[#allocation8 + $0x60] sm:$0xff]  }
  0xf0   : > { %1493 = vmatpush3.bf16.msra.mxu0 %v1718_v2  ;;  %1529 = vmatpush3.bf16.msra.mxu1 %v1730_v9  ;;  %v531_v17 = vpack.c.bf16 %v522_v15, %v522_v15  ;;  %v1727_v19 = vld [vmem:[#allocation3 + $0x50] sm:$0xff]   ;;  %v1736_v26 = vld [vmem:[#allocation8 + $0x78] sm:$0xff]   ;;  %v1749_v27 = vld [vmem:[#allocation13] sm:$0xff]  }
  0xf1   : > { %1494 = vmatprep.subr.bf16.mxu0 %v2048_v0  ;;  %1530 = vmatprep.subr.bf16.mxu1 %v2048_v0  ;;  %v678_v21 = vld [vmem:[%s512_s26 + $0x1] sm:$0xff]  ;;  %v1755_v30 = vld [vmem:[#allocation13 + $0x18] sm:$0xff]   ;;  %v1438_v2 = vld [vmem:[#allocation14] ss:$0 sm:$0xff] }
  0xf2   : > { %v688_v22 = vpack.c.bf16 %v678_v21, %v678_v21  ;;  %v1734_v24 = vld [vmem:[#allocation8 + $0x68] sm:$0xff]   ;;  %v1735_v25 = vld [vmem:[#allocation8 + $0x70] sm:$0xff]   ;;  %v1405_v31 = vld [vmem:[#allocation5] ss:$0 sm:$0xff] }
  0xf3   : > { %v1751_v28 = vld [vmem:[#allocation13 + $0x8] sm:$0xff]   ;;  %v1753_v29 = vld [vmem:[#allocation13 + $0x10] sm:$0xff]   ;;  %v1406_v33 = vld [vmem:[#allocation7] ss:$0 sm:$0xff] }
  0xf4   : > { %1495 = vmatpush3.bf16.msra.mxu0 %v1719_v3  ;;  %1531 = vmatpush3.bf16.msra.mxu1 %v1731_v11  ;;  %v1737_v40 = vld [vmem:[#allocation8] sm:$0xff]   ;;  %v1738_v42 = vld [vmem:[#allocation8 + $0x8] sm:$0xff]   ;;  %v1739_v43 = vld [vmem:[#allocation8 + $0x10] sm:$0xff]  }
  0xf5   : > { %1496 = vmatprep.subr.bf16.mxu0 %v2048_v0  ;;  %1532 = vmatprep.subr.bf16.mxu1 %v2048_v0  ;;  %v1740_v44 = vld [vmem:[#allocation8 + $0x18] sm:$0xff]   ;;  %v1741_v45 = vld [vmem:[#allocation8 + $0x20] sm:$0xff]   ;;  %v1742_v46 = vld [vmem:[#allocation8 + $0x28] sm:$0xff]  }
  0xf6   : > { %v1743_v47 = vld [vmem:[#allocation8 + $0x30] sm:$0xff]   ;;  %v1744_v48 = vld [vmem:[#allocation8 + $0x38] sm:$0xff]   ;;  %v1745_v50 = vld [vmem:[#allocation8 + $0x80] sm:$0xff]  }
  0xf7   : > { %v1746_v52 = vld [vmem:[#allocation8 + $0x88] sm:$0xff]   ;;  %v1747_v53 = vld [vmem:[#allocation8 + $0x90] sm:$0xff]   ;;  %v1748_v54 = vld [vmem:[#allocation8 + $0x98] sm:$0xff]  }
  0xf8   : > { %1497 = vmatpush3.bf16.msra.mxu0 %v1720_v4  ;;  %1533 = vmatpush3.bf16.msra.mxu1 %v1732_v13  ;;  %v1750_v55 = vld [vmem:[#allocation8 + $0xa0] sm:$0xff]   ;;  %v1752_v56 = vld [vmem:[#allocation8 + $0xa8] sm:$0xff]   ;;  %v1754_v57 = vld [vmem:[#allocation8 + $0xb0] sm:$0xff]  }
  0xf9   : > { %1502 = vmatprep.subr.bf16.mxu0 %v2048_v0  ;;  %1534 = vmatprep.subr.bf16.mxu1 %v2048_v0  ;;  %v1756_v58 = vld [vmem:[#allocation8 + $0xb8] sm:$0xff]   ;;  %v1439_v4 = vld [vmem:[#allocation16] ss:$0 sm:$0xff]  ;;  %v1431_v5 = vld [vmem:[#allocation10] ss:$0 sm:$0xff] }
  0xfa   : > { %v1432_v7 = vld [vmem:[#allocation11] ss:$0 sm:$0xff] }
  0xfb   : > { %1499 = vmatmul.mubr.msk.bf16.vlgmr.msra.gmra.mrb[0].mxu0 %vm567_vm1, %v2379_v6 }
  0xfc   : > { %1503 = vmatpush3.bf16.msra.mxu0 %v1721_v8  ;;  %1510 = vmatprep.mubr.msk.bf16.mxu0 %vm2049_vm0, %v2048_v0 }
  0xfd   : > { %1504 = vmatprep.subr.bf16.mxu0 %v2048_v0  ;;  %1535 = vmatpush3.bf16.msra.mxu1 %v1733_v23 }
  0xfe   : > { %1536 = vmatprep.subr.bf16.mxu1 %v2048_v0 }
 0x100   : > { %1505 = vmatpush3.bf16.msra.mxu0 %v1722_v10 }
 0x101   : > { %1506 = vmatprep.subr.bf16.mxu0 %v2048_v0  ;;  %1537 = vmatpush3.bf16.msra.mxu1 %v1734_v24 }
 0x102   : > { %1538 = vmatprep.subr.bf16.mxu1 %v2048_v0 }
 0x104   : > { %1507 = vmatpush3.bf16.msra.mxu0 %v1723_v12 }
 0x105   : > { %1508 = vmatprep.subr.bf16.mxu0 %v2048_v0  ;;  %1539 = vmatpush3.bf16.msra.mxu1 %v1735_v25 }
 0x106   : > { %1540 = vmatprep.subr.bf16.mxu1 %v2048_v0 }
 0x108   : > { %1509 = vmatpush3.bf16.msra.mxu0 %v1724_v14 }
 0x109   : > { %1514 = vmatprep.subr.bf16.mxu0 %v2048_v0  ;;  %1541 = vmatpush3.bf16.msra.mxu1 %v1736_v26 }
 0x10a   : > { %1546 = vmatprep.subr.bf16.mxu1 %v2048_v0 }
 0x10b   : > { %1511 = vmatmul.mubr.msk.bf16.vlgmr.msra.gmra.mrb[0].mxu0 %vm567_vm1, %v531_v17 }
 0x10c   : > { %1515 = vmatpush3.bf16.msra.mxu0 %v1725_v16  ;;  %1522 = vmatprep.mubr.msk.bf16.mxu0 %vm2049_vm0, %v2048_v0 }
 0x10d   : > { %1516 = vmatprep.subr.bf16.mxu0 %v2048_v0 }
 0x110   : > { %1517 = vmatpush3.bf16.msra.mxu0 %v1726_v18 }
 0x111   : > { %1518 = vmatprep.subr.bf16.mxu0 %v2048_v0 }
 0x114   : > { %1519 = vmatpush3.bf16.msra.mxu0 %v1727_v19 }
 0x115   : > { %1520 = vmatprep.subr.bf16.mxu0 %v2048_v0 }
 0x118   : > { %1521 = vmatpush3.bf16.msra.mxu0 %v1728_v20 }
 0x119   : > { %1586 = vmatprep.subr.bf16.mxu0 %v2048_v0 }
 0x11b   : > { %1523 = vmatmul.mubr.msk.bf16.vlgmr.msra.gmra.mrb[0].mxu0 %vm567_vm1, %v688_v22 }
 0x11c   : > { %1594 = vmatprep.mubr.msk.bf16.mxu0 %vm2049_vm0, %v2048_v0  ;;  %1587 = vmatpush3.bf16.msra.mxu0 %v1749_v27 }
 0x11d   : > { %1588 = vmatprep.subr.bf16.mxu0 %v2048_v0 }
 0x120   : > { %1589 = vmatpush3.bf16.msra.mxu0 %v1751_v28 }
 0x121   : > { %1590 = vmatprep.subr.bf16.mxu0 %v2048_v0 }
 0x124   : > { %1591 = vmatpush3.bf16.msra.mxu0 %v1753_v29 }
 0x125   : > { %1592 = vmatprep.subr.bf16.mxu0 %v2048_v0 }
 0x128   : > { %1593 = vmatpush3.bf16.msra.mxu0 %v1755_v30 }
 0x12b   : > { %1595 = vmatmul.mubr.msk.bf16.vlgmr.msra.gmra.mrb[4].mxu0 %vm567_vm1, %v2379_v6 }
 0x1ee   : > { %v750_v32 = vpop.f32.mrb[0].mxu0 }
 0x1ef   : > { %v764_v34 = vmul.f32 %v1405_v31, %v750_v32  ;;  %v1524_v35 = vpop.f32.mrb[1].mxu0 }
 0x1f0   : > { %v753_v36 = vpop.f32.mrb[2].mxu0 }
 0x1f1   : > { %v772_v37 = vadd.f32 %v1406_v33, %v764_v34  ;;  %v1525_v38 = vpop.f32.mrb[3].mxu0 }
 0x1f3   : > { %v773_v39 = vmax.f32 %v772_v37, 0.0 }
 0x1f5   : > { %776 = vst [vmem:[#allocation2 + $0x1] sm:$0xff] %v773_v39  ;;  %v813_v41 = vpack.c.bf16 %v773_v39, %v773_v39 }
 0x1f7   : > { %1543 = vmatmul.mubr.bf16.vlgmr.msra.gmra.mrb[0].mxu1 %v813_v41 }
 0x1f8   : > { %1547 = vmatpush3.bf16.msra.mxu1 %v1737_v40  ;;  %1562 = vmatprep.mubr.msk.bf16.mxu1 %vm2049_vm0, %v2048_v0 }
 0x1f9   : > { %1548 = vmatprep.subr.bf16.mxu1 %v2048_v0 }
 0x1fc   : > { %1549 = vmatpush3.bf16.msra.mxu1 %v1738_v42  ;;  %v777_v49 = vld [vmem:[#allocation2] sm:$0xff] }
 0x1fd   : > { %1550 = vmatprep.subr.bf16.mxu1 %v2048_v0  ;;  %v794_v51 = vpack.c.bf16 %v777_v49, %v777_v49  ;;  %v990_v59 = vld [vmem:[#allocation2 + $0x2] sm:$0xff] }
 0x1fe   : > { %v1008_v60 = vpack.c.bf16 %v990_v59, %v990_v59  ;;  %v1185_v61 = vpop.f32.mrb[4].mxu0 }
 0x1ff   : > { %v1596_v62 = vpop.f32.mrb[5].mxu0  ;;  %v1198_v3 = vmul.f32 %v1438_v2, %v1185_v61 }
 0x200   : > { %1551 = vmatpush3.bf16.msra.mxu1 %v1739_v43  ;;  %v1188_v63 = vpop.f32.mrb[6].mxu0 }
 0x201   : > { %1552 = vmatprep.subr.bf16.mxu1 %v2048_v0  ;;  %v1597_v1 = vpop.f32.mrb[7].mxu0  ;;  %v1206_v8 = vadd.f32 %v1439_v4, %v1198_v3 }
 0x204   : > { %1553 = vmatpush3.bf16.msra.mxu1 %v1740_v44 }
 0x205   : > { %1554 = vmatprep.subr.bf16.mxu1 %v2048_v0 }
 0x208   : > { %1555 = vmatpush3.bf16.msra.mxu1 %v1741_v45 }
 0x209   : > { %1556 = vmatprep.subr.bf16.mxu1 %v2048_v0 }
 0x20c   : > { %1557 = vmatpush3.bf16.msra.mxu1 %v1742_v46 }
 0x20d   : > { %1558 = vmatprep.subr.bf16.mxu1 %v2048_v0 }
 0x210   : > { %1559 = vmatpush3.bf16.msra.mxu1 %v1743_v47 }
 0x211   : > { %1560 = vmatprep.subr.bf16.mxu1 %v2048_v0 }
 0x214   : > { %1561 = vmatpush3.bf16.msra.mxu1 %v1744_v48 }
 0x215   : > { %1566 = vmatprep.subr.bf16.mxu1 %v2048_v0 }
 0x217   : > { %1563 = vmatmul.mubr.bf16.vlgmr.msra.gmra.mrb[0].mxu1 %v794_v51 }
 0x218   : > { %1567 = vmatpush3.bf16.msra.mxu1 %v1745_v50  ;;  %1582 = vmatprep.mubr.msk.bf16.mxu1 %vm2049_vm0, %v2048_v0 }
 0x219   : > { %1568 = vmatprep.subr.bf16.mxu1 %v2048_v0 }
 0x21c   : > { %1569 = vmatpush3.bf16.msra.mxu1 %v1746_v52 }
 0x21d   : > { %1570 = vmatprep.subr.bf16.mxu1 %v2048_v0 }
 0x220   : > { %1571 = vmatpush3.bf16.msra.mxu1 %v1747_v53 }
 0x221   : > { %1572 = vmatprep.subr.bf16.mxu1 %v2048_v0 }
 0x224   : > { %1573 = vmatpush3.bf16.msra.mxu1 %v1748_v54 }
 0x225   : > { %1574 = vmatprep.subr.bf16.mxu1 %v2048_v0 }
 0x228   : > { %1575 = vmatpush3.bf16.msra.mxu1 %v1750_v55 }
 0x229   : > { %1576 = vmatprep.subr.bf16.mxu1 %v2048_v0 }
 0x22c   : > { %1577 = vmatpush3.bf16.msra.mxu1 %v1752_v56 }
 0x22d   : > { %1578 = vmatprep.subr.bf16.mxu1 %v2048_v0 }
 0x230   : > { %1579 = vmatpush3.bf16.msra.mxu1 %v1754_v57 }
 0x231   : > { %1580 = vmatprep.subr.bf16.mxu1 %v2048_v0 }
 0x234   : > { %1581 = vmatpush3.bf16.msra.mxu1 %v1756_v58 }
 0x237   : > { %1583 = vmatmul.mubr.bf16.vlgmr.msra.gmra.mrb[0].mxu1 %v1008_v60 }
 0x30a   : > { %v1091_v6 = vpop.f32.mrb[0].mxu1 }
 0x30b   : > { %v1105_v9 = vmul.f32 %v1431_v5, %v1091_v6  ;;  %v1584_v10 = vpop.f32.mrb[1].mxu1 }
 0x30c   : > { %v1094_v11 = vpop.f32.mrb[2].mxu1 }
 0x30d   : > { %v1113_v0 = vadd.f32 %v1432_v7, %v1105_v9  ;;  %v1585_v12 = vpop.f32.mrb[3].mxu1 }
 0x30f   : > { %v1207_v13 = vadd.f32 %v1206_v8, %v1113_v0 }
 0x311   : > { %v1208_v14 = vmax.f32 %v1207_v13, 0.0 }
 0x313   : > { %1209 = vst [vmem:[%s520_s14] sm:$0xff] %v1208_v14 }
 0x314 PF: > { %s26_s17 = sadd.s32 1, %s2035_s17  }
 0x315   : > { %p23_p11 = scmp.ge.s32.totalorder %s26_s17, 4  }
 0x317   :  { %25 = sbr.rel (!%p23_p11) target bundleno = 5 (0x5), region = 138 }
 0x31e   :  { %1229 = vsyncpa [#allocation4], 1 }
 0x31f   :  { %1231 = vsyncpa [#allocation4 + $0x1], 1 }
 0x320   :  { %1232 = vsyncpa [#allocation6], 1 }
 0x321   :  { %1233 = vsyncpa [#allocation9], 1 }
 0x322   :  { %1234 = vsyncpa [#allocation12], 1 }
 0x323   :  { %1235 = vsyncpa [#allocation15], 1 }

// kernel: cnn1d_deeper_forward.7
= control target key start
LH: loop header
LB: loop body
LE: loop exit
PB: predicated region body
PF: predicated region fallthrough
CT: control target
= control target key end

     0   :  { %16 = vsyncpa [#allocation4], 0  ;;  %s3276_s0 = inlined_call_operand.vmem [shape: f32[2,5,128], index: 0, kind: input, shape index: {}]   ;;  %s3277_s1 = inlined_call_operand.vmem [shape: f32[2,4,128], index: 1, kind: input, shape index: {}]   ;;  %s3278_s2 = inlined_call_operand.hbm [shape: bf16[3,128,256], index: 2, kind: input, shape index: {}]   ;;  %s3279_s3 = inlined_call_operand.hbm [shape: f32[1,256], index: 3, kind: input, shape index: {}]   ;;  %s3280_s4 = inlined_call_operand.hbm [shape: f32[1,256], index: 4, kind: input, shape index: {}]   ;;  %s3281_s5 = inlined_call_operand.hbm [shape: bf16[3,256,256], index: 5, kind: input, shape index: {}]   ;;  %s3282_s6 = inlined_call_operand.hbm [shape: f32[1,256], index: 6, kind: input, shape index: {}]   ;;  %s3283_s7 = inlined_call_operand.hbm [shape: f32[1,256], index: 7, kind: input, shape index: {}]   ;;  %s3284_s8 = inlined_call_operand.hbm [shape: bf16[128,256], index: 8, kind: input, shape index: {}]   ;;  %s3285_s9 = inlined_call_operand.hbm [shape: f32[1,256], index: 9, kind: input, shape index: {}]   ;;  %s3286_s10 = inlined_call_operand.hbm [shape: f32[1,256], index: 10, kind: input, shape index: {}]   ;;  %s3287_s11 = inlined_call_operand.vmem [shape: f32[2,4,256], index: 11, kind: output, shape index: {}]  }
   0x1   :  { %17 = vsyncpa [#allocation6], 0 }
   0x2   :  { %18 = vsyncpa [#allocation9], 0 }
   0x3   :  { %19 = vsyncpa [#allocation12], 0 }
   0x4   :  { %20 = vsyncpa [#allocation15], 0  ;;  %s2980_s17 = smov 0  }
   0x5 LB: > { %s2907_s18 = smov [#allocation5]   ;;  %s2986_s20 = sadd.s32 4294967295, %s2905_s17   ;;  %s2905_s17 = sphi %s2980_s17, %s26_s17  }
   0x6   : > { %s324_s19 = sshll.u32 %s2907_s18, 4  ;;  %p2080_p0 = scmp.ge.s32.totalorder %s2905_s17, 1  ;;  %s2991_s19 = int_to_ptr.vmem [resolvable:$true] %s324_s19 }
   0x7   : > { %p298_p1 = scmp.lt.s32.totalorder %s2905_s17, 3  ;;  %p3288_p2 = scmp.eq.s32.totalorder %s2986_s20, 0 }
   0x8   : > { %s2908_s22 = smov [#allocation8]   ;;  %s2909_s25 = smov [#allocation11]  }
   0x9   : > { %p2993_p3 = pnand %p2080_p0, %p298_p1  ;;  %s345_s23 = sshll.u32 %s2908_s22, 4  ;;  %s2999_s23 = int_to_ptr.vmem [resolvable:$true] %s345_s23 }
   0xa   : > { %s370_s26 = sshll.u32 %s2909_s25, 4  ;;  %s2910_s27 = smov [#allocation14]   ;;  %s3007_s26 = int_to_ptr.vmem [resolvable:$true] %s370_s26 }
   0xb   : > { %s3293_s21 = scalar_select %p2993_p3, 1, 0 }
   0xc   : > { %p2320_p4 = pneg %p2993_p3  ;;  %s3009_s28 = sshll.u32 %s2910_s27, 4  ;;  %s395_s28 = int_to_ptr.vmem [resolvable:$true] %s3009_s28 }
   0xd   : > { %s2627_s12 = scalar_lea.hbm %s3279_s3, 32 }
   0xe   : > { %p3003_p5 = pnand %p3288_p2, %p2320_p4  ;;  %p2628_p6 = scmp.ne.s32.totalorder %s3279_s3, %s2627_s12 }
   0xf   : > { %p2634_p10 = scmp.lt.u32.totalorder %s2627_s12, %s3279_s3 }
  0x10   : > { %p3019_p7 = pneg %p3003_p5 }
  0x12   : > { %p2630_p8 = pnand %p3019_p7, %p2628_p6 }
  0x14   : > { %p2631_p9 = pneg %p2630_p8 }
  0x16   : > { %p2636_p11 = pnand %p2634_p10, %p2631_p9 }
  0x18   : > { %2639 = shalt.err (!%p2636_p11)
}
  0x19   : > { %s2640_s22 = scalar_lea.vmem %s2991_s19, 32  ;;  %p2648_p1 = scmp.lt.s32.totalorder %s2991_s19, %s2991_s19 }
  0x1a   : > { %p2641_p12 = scmp.ne.s32.totalorder %s2991_s19, %s2640_s22  ;;  %p2649_p4 = scmp.lt.s32.totalorder %s2640_s22, %s2640_s22 }
  0x1c   : > { %p2643_p13 = pnand %p2641_p12, %p3019_p7  ;;  %p2650_p6 = por %p2649_p4, %p2648_p1 }
  0x1e   : > { %p2644_p0 = pneg %p2643_p13 }
  0x20   : > { %p2651_p8 = pnand %p2650_p6, %p2644_p0 }
  0x22   : > { %2654 = shalt.err (!%p2651_p8)
}
  0x23   : > { %2326 = dma.hbm_to_vmem [thread:$0]  (!%p3003_p5), %s3279_s3, 32, %s2991_s19, [#allocation6]  }
  0x24   : > { %s2655_s12 = scalar_lea.hbm %s3281_s5, 12288 }
  0x25   : > { %p2656_p9 = scmp.ne.s32.totalorder %s3281_s5, %s2655_s12  ;;  %p2662_p12 = scmp.lt.u32.totalorder %s2655_s12, %s3281_s5 }
  0x27   : > { %p2658_p10 = pnand %p2656_p9, %p3019_p7 }
  0x29   : > { %p2659_p11 = pneg %p2658_p10 }
  0x2b   : > { %p2664_p13 = pnand %p2662_p12, %p2659_p11 }
  0x2d   : > { %2667 = shalt.err (!%p2664_p13)
}
  0x2e   : > { %s2668_s19 = scalar_lea.vmem %s2999_s23, 12288  ;;  %p2676_p6 = scmp.lt.s32.totalorder %s2999_s23, %s2999_s23 }
  0x2f   : > { %p2669_p0 = scmp.ne.s32.totalorder %s2999_s23, %s2668_s19  ;;  %p2677_p8 = scmp.lt.s32.totalorder %s2668_s19, %s2668_s19 }
  0x31   : > { %p2671_p1 = pnand %p2669_p0, %p3019_p7  ;;  %p2678_p9 = por %p2677_p8, %p2676_p6 }
  0x33   : > { %p2672_p4 = pneg %p2671_p1 }
  0x35   : > { %p2679_p10 = pnand %p2678_p9, %p2672_p4 }
  0x37   : > { %2682 = shalt.err (!%p2679_p10)
}
  0x38   : > { %s3290_s22 = smov 128   ;;  %s3292_s25 = smov 8  }
  0x39   : > { %2332 = dma.hbm_to_vmem [thread:$0]  (!%p3003_p5), %s3281_s5, 12288, %s2999_s23, [#allocation9], %s3290_s22, %s3290_s22, %s3292_s25  }
  0x3a   : > { %s2683_s13 = scalar_lea.hbm %s3283_s7, 32 }
  0x3b   : > { %p2684_p11 = scmp.ne.s32.totalorder %s3283_s7, %s2683_s13  ;;  %p2690_p0 = scmp.lt.u32.totalorder %s2683_s13, %s3283_s7 }
  0x3d   : > { %p2686_p12 = pnand %p2684_p11, %p3019_p7 }
  0x3f   : > { %p2687_p13 = pneg %p2686_p12 }
  0x41   : > { %p2692_p1 = pnand %p2690_p0, %p2687_p13 }
  0x43   : > { %2695 = shalt.err (!%p2692_p1)
}
  0x44   : > { %s2696_s23 = scalar_lea.vmem %s3007_s26, 32  ;;  %p2704_p9 = scmp.lt.s32.totalorder %s3007_s26, %s3007_s26 }
  0x45   : > { %p2697_p4 = scmp.ne.s32.totalorder %s3007_s26, %s2696_s23  ;;  %p2705_p10 = scmp.lt.s32.totalorder %s2696_s23, %s2696_s23 }
  0x47   : > { %p2699_p6 = pnand %p2697_p4, %p3019_p7  ;;  %p2706_p11 = por %p2705_p10, %p2704_p9 }
  0x49   : > { %p2700_p8 = pneg %p2699_p6 }
  0x4b   : > { %p2707_p12 = pnand %p2706_p11, %p2700_p8 }
  0x4d   : > { %2710 = shalt.err (!%p2707_p12)
}
  0x4e   : > { %2338 = dma.hbm_to_vmem [thread:$0]  (!%p3003_p5), %s3283_s7, 32, %s3007_s26, [#allocation12]  }
  0x4f   : > { %s2711_s13 = scalar_lea.hbm %s3285_s9, 32 }
  0x50   : > { %p2712_p13 = scmp.ne.s32.totalorder %s3285_s9, %s2711_s13  ;;  %p2718_p4 = scmp.lt.u32.totalorder %s2711_s13, %s3285_s9 }
  0x52   : > { %p2714_p0 = pnand %p2712_p13, %p3019_p7 }
  0x54   : > { %p2715_p1 = pneg %p2714_p0 }
  0x56   : > { %p2720_p6 = pnand %p2718_p4, %p2715_p1 }
  0x58   : > { %2723 = shalt.err (!%p2720_p6)
}
  0x59   : > { %s2724_s23 = scalar_lea.vmem %s395_s28, 32  ;;  %p2732_p11 = scmp.lt.s32.totalorder %s395_s28, %s395_s28 }
  0x5a   : > { %p2725_p8 = scmp.ne.s32.totalorder %s395_s28, %s2724_s23  ;;  %p2733_p12 = scmp.lt.s32.totalorder %s2724_s23, %s2724_s23 }
  0x5c   : > { %p2727_p9 = pnand %p2725_p8, %p3019_p7  ;;  %p2734_p2 = por %p2733_p12, %p2732_p11 }
  0x5e   : > { %p2728_p10 = pneg %p2727_p9 }
  0x60   : > { %p2735_p3 = pnand %p2734_p2, %p2728_p10 }
  0x62   : > { %2738 = shalt.err (!%p2735_p3)
}
  0x63   : > { %2344 = dma.hbm_to_vmem [thread:$0]  (!%p3003_p5), %s3285_s9, 32, %s395_s28, [#allocation15]  }
  0x64   : > { %s2913_s29 = smov [#allocation3]   ;;  %s2914_s12 = smov [#allocation7]  }
  0x65   : > { %s310_s30 = sshll.u32 %s2913_s29, 4  ;;  %s335_s13 = sshll.u32 %s2914_s12, 4  ;;  %s311_s30 = int_to_ptr.vmem [resolvable:$true] %s310_s30  ;;  %s336_s13 = int_to_ptr.vmem [resolvable:$true] %s335_s13 }
  0x66   : > { %s2739_s18 = scalar_lea.hbm %s3278_s2, 6144 }
  0x67   : > { %p2740_p2 = scmp.ne.s32.totalorder %s3278_s2, %s2739_s18  ;;  %p2746_p0 = scmp.lt.u32.totalorder %s2739_s18, %s3278_s2 }
  0x69   : > { %p2742_p3 = pnand %p2740_p2, %p3019_p7 }
  0x6b   : > { %p2743_p13 = pneg %p2742_p3 }
  0x6d   : > { %p2748_p1 = pnand %p2746_p0, %p2743_p13 }
  0x6f   : > { %2751 = shalt.err (!%p2748_p1)
}
  0x70   : > { %s2752_s28 = scalar_lea.vmem %s311_s30, 6144  ;;  %p2760_p9 = scmp.lt.s32.totalorder %s311_s30, %s311_s30 }
  0x71   : > { %p2753_p4 = scmp.ne.s32.totalorder %s311_s30, %s2752_s28  ;;  %p2761_p10 = scmp.lt.s32.totalorder %s2752_s28, %s2752_s28 }
  0x73   : > { %p2755_p6 = pnand %p2753_p4, %p3019_p7  ;;  %p2762_p11 = por %p2761_p10, %p2760_p9 }
  0x75   : > { %p2756_p8 = pneg %p2755_p6 }
  0x77   : > { %p2763_p12 = pnand %p2762_p11, %p2756_p8 }
  0x79   : > { %2766 = shalt.err (!%p2763_p12)
}
  0x7a   : > { %s3296_s27 = smov 128   ;;  %s2767_s16 = scalar_lea.hbm %s3280_s4, 32 }
  0x7b   : > { %2323 = dma.hbm_to_vmem [thread:$0]  (!%p3003_p5), %s3278_s2, 6144, %s311_s30, [#allocation4], %s3296_s27, %s3296_s27, %s3292_s25  }
  0x7c   : > { %p2768_p2 = scmp.ne.s32.totalorder %s3280_s4, %s2767_s16  ;;  %p2774_p0 = scmp.lt.u32.totalorder %s2767_s16, %s3280_s4 }
  0x7e   : > { %p2770_p3 = pnand %p2768_p2, %p3019_p7 }
  0x80   : > { %p2771_p13 = pneg %p2770_p3 }
  0x82   : > { %p2776_p1 = pnand %p2774_p0, %p2771_p13 }
  0x84   : > { %2779 = shalt.err (!%p2776_p1)
}
  0x85   : > { %s2780_s28 = scalar_lea.vmem %s336_s13, 32  ;;  %p2788_p9 = scmp.lt.s32.totalorder %s336_s13, %s336_s13 }
  0x86   : > { %p2781_p4 = scmp.ne.s32.totalorder %s336_s13, %s2780_s28  ;;  %p2789_p10 = scmp.lt.s32.totalorder %s2780_s28, %s2780_s28 }
  0x88   : > { %p2783_p6 = pnand %p2781_p4, %p3019_p7  ;;  %p2790_p11 = por %p2789_p10, %p2788_p9 }
  0x8a   : > { %p2784_p8 = pneg %p2783_p6 }
  0x8c   : > { %p2791_p12 = pnand %p2790_p11, %p2784_p8 }
  0x8e   : > { %2794 = shalt.err (!%p2791_p12)
}
  0x8f   : > { %2329 = dma.hbm_to_vmem [thread:$0]  (!%p3003_p5), %s3280_s4, 32, %s336_s13, [#allocation6]  }
  0x90   : > { %s2915_s29 = smov [#allocation10]   ;;  %s2916_s14 = smov [#allocation13]  }
  0x91   : > { %s359_s12 = sshll.u32 %s2915_s29, 4  ;;  %s380_s16 = sshll.u32 %s2916_s14, 4  ;;  %s360_s12 = int_to_ptr.vmem [resolvable:$true] %s359_s12  ;;  %s381_s16 = int_to_ptr.vmem [resolvable:$true] %s380_s16 }
  0x92   : > { %s2795_s23 = scalar_lea.hbm %s3282_s6, 32 }
  0x93   : > { %p2796_p2 = scmp.ne.s32.totalorder %s3282_s6, %s2795_s23  ;;  %p2802_p0 = scmp.lt.u32.totalorder %s2795_s23, %s3282_s6 }
  0x95   : > { %p2798_p3 = pnand %p2796_p2, %p3019_p7 }
  0x97   : > { %p2799_p13 = pneg %p2798_p3 }
  0x99   : > { %p2804_p1 = pnand %p2802_p0, %p2799_p13 }
  0x9b   : > { %2807 = shalt.err (!%p2804_p1)
}
  0x9c   : > { %s2808_s13 = scalar_lea.vmem %s360_s12, 32  ;;  %p2816_p9 = scmp.lt.s32.totalorder %s360_s12, %s360_s12 }
  0x9d   : > { %p2809_p4 = scmp.ne.s32.totalorder %s360_s12, %s2808_s13  ;;  %p2817_p10 = scmp.lt.s32.totalorder %s2808_s13, %s2808_s13 }
  0x9f   : > { %p2811_p6 = pnand %p2809_p4, %p3019_p7  ;;  %p2818_p11 = por %p2817_p10, %p2816_p9 }
  0xa1   : > { %p2812_p8 = pneg %p2811_p6 }
  0xa3   : > { %p2819_p12 = pnand %p2818_p11, %p2812_p8 }
  0xa5   : > { %2822 = shalt.err (!%p2819_p12)
}
  0xa6   : > { %2335 = dma.hbm_to_vmem [thread:$0]  (!%p3003_p5), %s3282_s6, 32, %s360_s12, [#allocation9]  }
  0xa7   : > { %s2823_s18 = scalar_lea.hbm %s3284_s8, 2048 }
  0xa8   : > { %p2824_p2 = scmp.ne.s32.totalorder %s3284_s8, %s2823_s18  ;;  %p2830_p0 = scmp.lt.u32.totalorder %s2823_s18, %s3284_s8 }
  0xaa   : > { %p2826_p3 = pnand %p2824_p2, %p3019_p7 }
  0xac   : > { %p2827_p13 = pneg %p2826_p3 }
  0xae   : > { %p2832_p1 = pnand %p2830_p0, %p2827_p13 }
  0xb0   : > { %2835 = shalt.err (!%p2832_p1)
}
  0xb1   : > { %s2836_s30 = scalar_lea.vmem %s381_s16, 2048  ;;  %p2844_p9 = scmp.lt.s32.totalorder %s381_s16, %s381_s16 }
  0xb2   : > { %p2837_p4 = scmp.ne.s32.totalorder %s381_s16, %s2836_s30  ;;  %p2845_p10 = scmp.lt.s32.totalorder %s2836_s30, %s2836_s30 }
  0xb4   : > { %p2839_p6 = pnand %p2837_p4, %p3019_p7  ;;  %p2846_p11 = por %p2845_p10, %p2844_p9 }
  0xb6   : > { %p2840_p8 = pneg %p2839_p6 }
  0xb8   : > { %p2847_p12 = pnand %p2846_p11, %p2840_p8 }
  0xba   : > { %2850 = shalt.err (!%p2847_p12)
}
  0xbb   : > { %s3297_s12 = smov 8   ;;  %s2917_s29 = smov [#allocation16]  }
  0xbc   : > { %2341 = dma.hbm_to_vmem [thread:$0]  (!%p3003_p5), %s3284_s8, 2048, %s381_s16, [#allocation12], %s3296_s27, %s3296_s27, %s3297_s12  }
  0xbd   : > { %s405_s25 = sshll.u32 %s2917_s29, 4  ;;  %s2851_s19 = scalar_lea.hbm %s3286_s10, 32  ;;  %s406_s25 = int_to_ptr.vmem [resolvable:$true] %s405_s25 }
  0xbe   : > { %p2852_p2 = scmp.ne.s32.totalorder %s3286_s10, %s2851_s19  ;;  %p2858_p0 = scmp.lt.u32.totalorder %s2851_s19, %s3286_s10 }
  0xc0   : > { %p2854_p3 = pnand %p2852_p2, %p3019_p7 }
  0xc2   : > { %p2855_p13 = pneg %p2854_p3 }
  0xc4   : > { %p2860_p1 = pnand %p2858_p0, %p2855_p13 }
  0xc6   : > { %2863 = shalt.err (!%p2860_p1)
}
  0xc7   : > { %s2864_s27 = scalar_lea.vmem %s406_s25, 32  ;;  %p2872_p9 = scmp.lt.s32.totalorder %s406_s25, %s406_s25 }
  0xc8   : > { %p2865_p4 = scmp.ne.s32.totalorder %s406_s25, %s2864_s27  ;;  %p2873_p10 = scmp.lt.s32.totalorder %s2864_s27, %s2864_s27 }
  0xca   : > { %p2867_p6 = pnand %p2865_p4, %p3019_p7  ;;  %p2874_p11 = por %p2873_p10, %p2872_p9 }
  0xcc   : > { %p2868_p8 = pneg %p2867_p6 }
  0xce   : > { %p2875_p12 = pnand %p2874_p11, %p2868_p8 }
  0xd0   : > { %2878 = shalt.err (!%p2875_p12)
}
  0xd1   : > { %2347 = dma.hbm_to_vmem [thread:$0]  (!%p3003_p5), %s3286_s10, 32, %s406_s25, [#allocation15]  }
  0xd2   : > { %p3298_p2 = scmp.ne.s32.totalorder %s3293_s21, 0 }
  0xd3   : > { %p3299_p3 = scmp.eq.s32.totalorder (!%p3298_p2), %s2986_s20, 0 }
  0xd4   : > { %432 = sbr.rel (%p3298_p2) target bundleno = 920 (0x398), region = 64 }
  0xdb   : > { %2884 = dma.done.wait (%p3299_p3), [#allocation4], 6144   ;;  %p3300_p7 = pmov %p3299_p3 }
  0xdc   : > { %p3301_p13 = pmov %p3299_p3 }
  0xdd   : > { %2886 = vsyncadd (%p3300_p7), [#allocation4], 4294961152 }
  0xde   : > { %2888 = dma.done.wait (%p3301_p13), [#allocation6], 64   ;;  %p3302_p0 = pmov %p3299_p3 }
  0xe0   : > { %2890 = vsyncadd (%p3302_p0), [#allocation6], 4294967232  ;;  %p3303_p1 = pmov %p3302_p0 }
  0xe1   : > { %p3304_p5 = pmov %p3302_p0 }
  0xe2   : > { %2892 = dma.done.wait (%p3303_p1), [#allocation9], 12320  }
  0xe3   : > { %2894 = vsyncadd (%p3304_p5), [#allocation9], 4294954976  ;;  %p3305_p4 = pmov %p3302_p0 }
  0xe4   : > { %p3306_p6 = pmov %p3302_p0 }
  0xe5   : > { %2896 = dma.done.wait (%p3305_p4), [#allocation12], 2080  }
  0xe6   : > { %2898 = vsyncadd (%p3306_p6), [#allocation12], 4294965216  ;;  %p3307_p8 = pmov %p3302_p0 }
  0xe7   : > { %p3308_p9 = pmov %p3302_p0 }
  0xe8   : > { %2900 = dma.done.wait (%p3307_p8), [#allocation15], 64  }
  0xe9   : > { %2902 = vsyncadd (%p3308_p9), [#allocation15], 4294967232  ;;  %v2918_v0 = vmov 0   ;;  %v2387_v1 = vld [vmem:[#allocation3 + $0x84] ss:$8 sps:$4 sm:$0xff]   ;;  %p507_p10 = scmp.lt.s32.totalorder %s2986_s20, 1 }
  0xea   : > { %670 = vmatprep.mubr.bf16.mxu0 %v2918_v0  ;;  %v2389_v2 = vld [vmem:[#allocation3 + $0x80] ss:$8 sps:$4 sm:$0xff]   ;;  %638 = vmatprep.subr.bf16.mxu0 %v2387_v1  ;;  %v2390_v3 = vld [vmem:[#allocation3 + $0x94] ss:$8 sps:$4 sm:$0xff]   ;;  %v2392_v4 = vld [vmem:[#allocation3 + $0x90] ss:$8 sps:$4 sm:$0xff]  }
  0xeb   : > { %639 = vmatpush1.bf16.msra.mxu0 %v2389_v2  ;;  %v2393_v5 = vld [vmem:[#allocation3 + $0xa4] ss:$8 sps:$4 sm:$0xff]   ;;  %v2395_v6 = vld [vmem:[#allocation3 + $0xa0] ss:$8 sps:$4 sm:$0xff]   ;;  %v2396_v7 = vld [vmem:[#allocation3 + $0xb4] ss:$8 sps:$4 sm:$0xff]  }
  0xec   : > { %640 = vmatprep.subr.bf16.mxu0 %v2390_v3  ;;  %v2398_v8 = vld [vmem:[#allocation3 + $0xb0] ss:$8 sps:$4 sm:$0xff]   ;;  %v2399_v9 = vld [vmem:[#allocation3 + $0xc4] ss:$8 sps:$4 sm:$0xff]   ;;  %v2401_v10 = vld [vmem:[#allocation3 + $0xc0] ss:$8 sps:$4 sm:$0xff]  }
  0xed   : > { %v2402_v11 = vld [vmem:[#allocation3 + $0xd4] ss:$8 sps:$4 sm:$0xff]   ;;  %s3310_s20 = smov (!%p507_p10, %s2986_s20), 1  ;;  %v2404_v12 = vld [vmem:[#allocation3 + $0xd0] ss:$8 sps:$4 sm:$0xff]  }
  0xee   : > { %v2405_v13 = vld [vmem:[#allocation3 + $0xe4] ss:$8 sps:$4 sm:$0xff]   ;;  %s2102_s21 = sshll.u32 %s3310_s20, 2  ;;  %v2407_v14 = vld [vmem:[#allocation3 + $0xe0] ss:$8 sps:$4 sm:$0xff]   ;;  %s2101_s22 = sshll.u32 %s3310_s20, 3 }
  0xef   : > { %641 = vmatpush1.bf16.msra.mxu0 %v2392_v4  ;;  %v2408_v15 = vld [vmem:[#allocation3 + $0xf4] ss:$8 sps:$4 sm:$0xff]   ;;  %s3235_s13 = scalar_lea.vmem %s3277_s1, %s2102_s21  ;;  %v2410_v16 = vld [vmem:[#allocation3 + $0xf0] ss:$8 sps:$4 sm:$0xff]   ;;  %v2413_v18 = vld [vmem:[#allocation3 + $0x4] ss:$8 sps:$4 sm:$0xff]   ;;  %s3245_s14 = scalar_lea.vmem %s3276_s0, %s2101_s22 }
  0xf0   : > { %642 = vmatprep.subr.bf16.mxu0 %v2393_v5  ;;  %v539_v17 = vld [vmem:[%s3235_s13] sm:$0xf]  ;;  %v2411_v20 = vld [vmem:[#allocation3] ss:$8 sps:$4 sm:$0xff]   ;;  %v2416_v21 = vld [vmem:[#allocation3 + $0x14] ss:$8 sps:$4 sm:$0xff]   ;;  %s519_s23 = scalar_lea.vmem %s3287_s11, %s2101_s22 }
  0xf1   : > { %v557_v19 = vpack.c.bf16 %v539_v17, %v539_v17  ;;  %v2459_v22 = vld [vmem:[#allocation8 + $0x104] ss:$8 sps:$4 sm:$0xff]   ;;  %v2461_v23 = vld [vmem:[#allocation8 + $0x100] ss:$8 sps:$4 sm:$0xff]   ;;  %v2462_v25 = vld [vmem:[#allocation8 + $0x114] ss:$8 sps:$4 sm:$0xff]  }
  0xf2   : > { %v2414_v24 = vld [vmem:[#allocation3 + $0x10] ss:$8 sps:$4 sm:$0xff]   ;;  %v2419_v26 = vld [vmem:[#allocation3 + $0x24] ss:$8 sps:$4 sm:$0xff]   ;;  %1231 = vmatprep.subr.bf16.mxu1 %v2459_v22  ;;  %v2464_v27 = vld [vmem:[#allocation8 + $0x110] ss:$8 sps:$4 sm:$0xff]  }
  0xf3   : > { %643 = vmatpush1.bf16.msra.mxu0 %v2395_v6  ;;  %1232 = vmatpush1.bf16.msra.mxu1 %v2461_v23  ;;  %v2465_v28 = vld [vmem:[#allocation8 + $0x124] ss:$8 sps:$4 sm:$0xff]   ;;  %v2422_v30 = vld [vmem:[#allocation3 + $0x34] ss:$8 sps:$4 sm:$0xff]   ;;  %v2467_v31 = vld [vmem:[#allocation8 + $0x120] ss:$8 sps:$4 sm:$0xff]  }
  0xf4   : > { %644 = vmatprep.subr.bf16.mxu0 %v2396_v7  ;;  %1233 = vmatprep.subr.bf16.mxu1 %v2462_v25  ;;  %v2417_v29 = vld [vmem:[#allocation3 + $0x20] ss:$8 sps:$4 sm:$0xff]   ;;  %v2420_v33 = vld [vmem:[#allocation3 + $0x30] ss:$8 sps:$4 sm:$0xff]   ;;  %v2425_v34 = vld [vmem:[#allocation3 + $0x44] ss:$8 sps:$4 sm:$0xff]   ;;  %v944_v25 = vlaneseq }
  0xf5   : > { %v2468_v32 = vld [vmem:[#allocation8 + $0x134] ss:$8 sps:$4 sm:$0xff]   ;;  %v2470_v36 = vld [vmem:[#allocation8 + $0x130] ss:$8 sps:$4 sm:$0xff]   ;;  %v2471_v38 = vld [vmem:[#allocation8 + $0x144] ss:$8 sps:$4 sm:$0xff]  }
  0xf6   : > { %v2423_v35 = vld [vmem:[#allocation3 + $0x40] ss:$8 sps:$4 sm:$0xff]   ;;  %v2428_v37 = vld [vmem:[#allocation3 + $0x54] ss:$8 sps:$4 sm:$0xff]   ;;  %v2473_v39 = vld [vmem:[#allocation8 + $0x140] ss:$8 sps:$4 sm:$0xff]  }
  0xf7   : > { %645 = vmatpush1.bf16.msra.mxu0 %v2398_v8  ;;  %1234 = vmatpush1.bf16.msra.mxu1 %v2464_v27  ;;  %v2474_v40 = vld [vmem:[#allocation8 + $0x154] ss:$8 sps:$4 sm:$0xff]   ;;  %v2431_v42 = vld [vmem:[#allocation3 + $0x64] ss:$8 sps:$4 sm:$0xff]   ;;  %v2476_v43 = vld [vmem:[#allocation8 + $0x150] ss:$8 sps:$4 sm:$0xff]  }
  0xf8   : > { %646 = vmatprep.subr.bf16.mxu0 %v2399_v9  ;;  %1235 = vmatprep.subr.bf16.mxu1 %v2465_v28  ;;  %v2426_v41 = vld [vmem:[#allocation3 + $0x50] ss:$8 sps:$4 sm:$0xff]   ;;  %v2429_v45 = vld [vmem:[#allocation3 + $0x60] ss:$8 sps:$4 sm:$0xff]   ;;  %v2434_v46 = vld [vmem:[#allocation3 + $0x74] ss:$8 sps:$4 sm:$0xff]  }
  0xf9   : > { %v2477_v44 = vld [vmem:[#allocation8 + $0x164] ss:$8 sps:$4 sm:$0xff]   ;;  %v2479_v47 = vld [vmem:[#allocation8 + $0x160] ss:$8 sps:$4 sm:$0xff]   ;;  %v2480_v48 = vld [vmem:[#allocation8 + $0x174] ss:$8 sps:$4 sm:$0xff]  }
  0xfa   : > { %v2432_v49 = vld [vmem:[#allocation3 + $0x70] ss:$8 sps:$4 sm:$0xff]   ;;  %v2437_v51 = vld [vmem:[#allocation3 + $0x104] ss:$8 sps:$4 sm:$0xff]   ;;  %v2482_v52 = vld [vmem:[#allocation8 + $0x170] ss:$8 sps:$4 sm:$0xff]  }
  0xfb   : > { %647 = vmatpush1.bf16.msra.mxu0 %v2401_v10  ;;  %1236 = vmatpush1.bf16.msra.mxu1 %v2467_v31  ;;  %v521_v50 = vld [vmem:[%s3245_s14] sm:$0xf]  ;;  %v2435_v54 = vld [vmem:[#allocation3 + $0x100] ss:$8 sps:$4 sm:$0xff]   ;;  %v2440_v56 = vld [vmem:[#allocation3 + $0x114] ss:$8 sps:$4 sm:$0xff]  }
  0xfc   : > { %648 = vmatprep.subr.bf16.mxu0 %v2402_v11  ;;  %1237 = vmatprep.subr.bf16.mxu1 %v2468_v32  ;;  %v2483_v53 = vld [vmem:[#allocation8 + $0x184] ss:$8 sps:$4 sm:$0xff]   ;;  %v538_v55 = vpack.c.bf16 %v521_v50, %v521_v50  ;;  %v2485_v57 = vld [vmem:[#allocation8 + $0x180] ss:$8 sps:$4 sm:$0xff]   ;;  %v2486_v58 = vld [vmem:[#allocation8 + $0x194] ss:$8 sps:$4 sm:$0xff]  }
  0xfd   : > { %v2438_v59 = vld [vmem:[#allocation3 + $0x110] ss:$8 sps:$4 sm:$0xff]   ;;  %v2443_v60 = vld [vmem:[#allocation3 + $0x124] ss:$8 sps:$4 sm:$0xff]   ;;  %v2488_v61 = vld [vmem:[#allocation8 + $0x190] ss:$8 sps:$4 sm:$0xff]  }
  0xfe   : > { %v2441_v62 = vld [vmem:[#allocation3 + $0x120] ss:$8 sps:$4 sm:$0xff]   ;;  %v2446_v63 = vld [vmem:[#allocation3 + $0x134] ss:$8 sps:$4 sm:$0xff]   ;;  %v2444_v1 = vld [vmem:[#allocation3 + $0x130] ss:$8 sps:$4 sm:$0xff]  }
  0xff   : > { %649 = vmatpush1.bf16.msra.mxu0 %v2404_v12  ;;  %1238 = vmatpush1.bf16.msra.mxu1 %v2470_v36  ;;  %v2449_v2 = vld [vmem:[#allocation3 + $0x144] ss:$8 sps:$4 sm:$0xff]   ;;  %v2447_v3 = vld [vmem:[#allocation3 + $0x140] ss:$8 sps:$4 sm:$0xff]   ;;  %v2452_v4 = vld [vmem:[#allocation3 + $0x154] ss:$8 sps:$4 sm:$0xff]  }
 0x100   : > { %650 = vmatprep.subr.bf16.mxu0 %v2405_v13  ;;  %1239 = vmatprep.subr.bf16.mxu1 %v2471_v38  ;;  %v2450_v5 = vld [vmem:[#allocation3 + $0x150] ss:$8 sps:$4 sm:$0xff]   ;;  %v2455_v6 = vld [vmem:[#allocation3 + $0x164] ss:$8 sps:$4 sm:$0xff]   ;;  %v2453_v7 = vld [vmem:[#allocation3 + $0x160] ss:$8 sps:$4 sm:$0xff]  }
 0x101   : > { %v2458_v8 = vld [vmem:[#allocation3 + $0x174] ss:$8 sps:$4 sm:$0xff]   ;;  %v2456_v9 = vld [vmem:[#allocation3 + $0x170] ss:$8 sps:$4 sm:$0xff]   ;;  %v2491_v13 = vld [vmem:[#allocation8 + $0x1a0] ss:$8 sps:$4 sm:$0xff]  }
 0x102   : > { %v800_v10 = vld [vmem:[%s3245_s14 + $0x1] sm:$0xf]  ;;  %v2504_v22 = vld [vmem:[#allocation8 + $0x1f4] ss:$8 sps:$4 sm:$0xff]   ;;  %v2587_v32 = vld [vmem:[#allocation13 + $0x14] ss:$8 sps:$4 sm:$0xff]  }
 0x103   : > { %651 = vmatpush1.bf16.msra.mxu0 %v2407_v14  ;;  %1240 = vmatpush1.bf16.msra.mxu1 %v2473_v39  ;;  %v818_v11 = vpack.c.bf16 %v800_v10, %v800_v10  ;;  %v2489_v12 = vld [vmem:[#allocation8 + $0x1a4] ss:$8 sps:$4 sm:$0xff]   ;;  %v2492_v14 = vld [vmem:[#allocation8 + $0x1b4] ss:$8 sps:$4 sm:$0xff]   ;;  %v2506_v23 = vld [vmem:[#allocation8 + $0x1f0] ss:$8 sps:$4 sm:$0xff]  }
 0x104   : > { %652 = vmatprep.subr.bf16.mxu0 %v2408_v15  ;;  %1241 = vmatprep.subr.bf16.mxu1 %v2474_v40  ;;  %v2494_v15 = vld [vmem:[#allocation8 + $0x1b0] ss:$8 sps:$4 sm:$0xff]   ;;  %v2495_v17 = vld [vmem:[#allocation8 + $0x1c4] ss:$8 sps:$4 sm:$0xff]  }
 0x105   : > { %v2581_v27 = vld [vmem:[#allocation13 + $0x4] ss:$8 sps:$4 sm:$0xff]   ;;  %v2579_v28 = vld [vmem:[#allocation13] ss:$8 sps:$4 sm:$0xff]  }
 0x106   : > { %v2591_v39 = vld [vmem:[#allocation13 + $0x20] ss:$8 sps:$4 sm:$0xff]  }
 0x107   : > { %653 = vmatpush1.bf16.msra.mxu0 %v2410_v16  ;;  %1242 = vmatpush1.bf16.msra.mxu1 %v2476_v43  ;;  %v2919_v16 = vmov 0.0  }
 0x108   : > { %759 = vmatprep.subr.bf16.mxu0 %v2413_v18  ;;  %1243 = vmatprep.subr.bf16.mxu1 %v2477_v44  ;;  %972 = vst [vmem:[#allocation2] sm:$0x3f] %v2919_v16  ;;  %973 = vst [vmem:[#allocation2 + $0x8] sm:$0x3f] %v2919_v16  ;;  %v2497_v18 = vld [vmem:[#allocation8 + $0x1c0] ss:$8 sps:$4 sm:$0xff]  }
 0x109   : > { %v2512_v16 = vld [vmem:[#allocation8 + $0x14] ss:$8 sps:$4 sm:$0xff]  }
 0x10a   : > { %671 = vmatmul.mubr.bf16.vlgmr.msra.gmra.mrb[0].mxu0 %v557_v19  ;;  %v2498_v19 = vld [vmem:[#allocation8 + $0x1d4] ss:$8 sps:$4 sm:$0xff]  }
 0x10b   : > { %760 = vmatpush1.bf16.msra.mxu0 %v2411_v20  ;;  %791 = vmatprep.mubr.bf16.mxu0 %v2918_v0  ;;  %v2500_v20 = vld [vmem:[#allocation8 + $0x1d0] ss:$8 sps:$4 sm:$0xff]  }
 0x10c   : > { %761 = vmatprep.subr.bf16.mxu0 %v2416_v21  ;;  %1244 = vmatpush1.bf16.msra.mxu1 %v2479_v47  ;;  %v2501_v21 = vld [vmem:[#allocation8 + $0x1e4] ss:$8 sps:$4 sm:$0xff]  }
 0x10d   : > { %1245 = vmatprep.subr.bf16.mxu1 %v2480_v48 }
 0x10f   : > { %762 = vmatpush1.bf16.msra.mxu0 %v2414_v24  ;;  %v2509_v24 = vld [vmem:[#allocation8 + $0x4] ss:$8 sps:$4 sm:$0xff]  }
 0x110   : > { %763 = vmatprep.subr.bf16.mxu0 %v2419_v26  ;;  %1246 = vmatpush1.bf16.msra.mxu1 %v2482_v52  ;;  %v945_v26 = vshrl.u32 %v944_v25, 7  ;;  %v2522_v25 = vld [vmem:[#allocation8 + $0x50] ss:$8 sps:$4 sm:$0xff]  }
 0x111   : > { %1247 = vmatprep.subr.bf16.mxu1 %v2483_v53  ;;  %v2605_v53 = vld [vmem:[#allocation13 + $0x44] ss:$8 sps:$4 sm:$0xff]  }
 0x112   : > { %v3253_v31 = vsub.s32 1, %v945_v26 }
 0x113   : > { %764 = vmatpush1.bf16.msra.mxu0 %v2417_v29  ;;  %v3251_v29 = vsub.s32 0, %v945_v26  ;;  %v2527_v26 = vld [vmem:[#allocation8 + $0x64] ss:$8 sps:$4 sm:$0xff]  }
 0x114   : > { %765 = vmatprep.subr.bf16.mxu0 %v2422_v30  ;;  %1248 = vmatpush1.bf16.msra.mxu1 %v2485_v57  ;;  %v942_v30 = vld [vmem:[#allocation5] sm:$0x3]  ;;  %v2611_v57 = vld [vmem:[#allocation13 + $0x54] ss:$8 sps:$4 sm:$0xff]  }
 0x115   : > { %1249 = vmatprep.subr.bf16.mxu1 %v2486_v58  ;;  %v951_v36 = vrot.slane %v942_v30, %v3253_v31  ;;  %v2609_v58 = vld [vmem:[#allocation13 + $0x50] ss:$8 sps:$4 sm:$0xff]  }
 0x117   : > { %766 = vmatpush1.bf16.msra.mxu0 %v2420_v33  ;;  %v2585_v33 = vld [vmem:[#allocation13 + $0x10] ss:$8 sps:$4 sm:$0xff]  }
 0x118   : > { %767 = vmatprep.subr.bf16.mxu0 %v2425_v34  ;;  %1250 = vmatpush1.bf16.msra.mxu1 %v2488_v61  ;;  %v956_v34 = vld [vmem:[#allocation7] sm:$0x3] }
 0x119   : > { %1251 = vmatprep.subr.bf16.mxu1 %v2489_v12  ;;  %v961_v38 = vrot.slane %v956_v34, %v3251_v29 }
 0x11b   : > { %768 = vmatpush1.bf16.msra.mxu0 %v2423_v35  ;;  %v947_v35 = vrot.slane %v942_v30, %v3251_v29  ;;  %v2528_v30 = vld [vmem:[#allocation8 + $0x70] ss:$8 sps:$4 sm:$0xff]  }
 0x11c   : > { %769 = vmatprep.subr.bf16.mxu0 %v2428_v37  ;;  %1252 = vmatpush1.bf16.msra.mxu1 %v2491_v13  ;;  %v2593_v37 = vld [vmem:[#allocation13 + $0x24] ss:$8 sps:$4 sm:$0xff]  }
 0x11d   : > { %1253 = vmatprep.subr.bf16.mxu1 %v2492_v14  ;;  %v2507_v14 = vld [vmem:[#allocation8] ss:$8 sps:$4 sm:$0xff]  }
 0x11f   : > { %770 = vmatpush1.bf16.msra.mxu0 %v2426_v41  ;;  %v965_v41 = vrot.slane %v956_v34, %v3253_v31  ;;  %v2536_v34 = vld [vmem:[#allocation8 + $0x94] ss:$8 sps:$4 sm:$0xff]  }
 0x120   : > { %771 = vmatprep.subr.bf16.mxu0 %v2431_v42  ;;  %1254 = vmatpush1.bf16.msra.mxu1 %v2494_v15 }
 0x121   : > { %1255 = vmatprep.subr.bf16.mxu1 %v2495_v17 }
 0x123   : > { %772 = vmatpush1.bf16.msra.mxu0 %v2429_v45 }
 0x124   : > { %773 = vmatprep.subr.bf16.mxu0 %v2434_v46  ;;  %1256 = vmatpush1.bf16.msra.mxu1 %v2497_v18  ;;  %v2599_v46 = vld [vmem:[#allocation13 + $0x34] ss:$8 sps:$4 sm:$0xff]  }
 0x125   : > { %1257 = vmatprep.subr.bf16.mxu1 %v2498_v19  ;;  %v2510_v18 = vld [vmem:[#allocation8 + $0x10] ss:$8 sps:$4 sm:$0xff]   ;;  %v2515_v19 = vld [vmem:[#allocation8 + $0x24] ss:$8 sps:$4 sm:$0xff]  }
 0x127   : > { %774 = vmatpush1.bf16.msra.mxu0 %v2432_v49  ;;  %v2597_v49 = vld [vmem:[#allocation13 + $0x30] ss:$8 sps:$4 sm:$0xff]  }
 0x128   : > { %899 = vmatprep.subr.bf16.mxu0 %v2437_v51  ;;  %1258 = vmatpush1.bf16.msra.mxu1 %v2500_v20  ;;  %v2513_v20 = vld [vmem:[#allocation8 + $0x20] ss:$8 sps:$4 sm:$0xff]  }
 0x129   : > { %1259 = vmatprep.subr.bf16.mxu1 %v2501_v21  ;;  %v2518_v21 = vld [vmem:[#allocation8 + $0x34] ss:$8 sps:$4 sm:$0xff]  }
 0x12a   : > { %792 = vmatmul.mubr.bf16.vlgmr.msra.gmra.mrb[0].mxu0 %v538_v55  ;;  %v2603_v55 = vld [vmem:[#allocation13 + $0x40] ss:$8 sps:$4 sm:$0xff]  }
 0x12b   : > { %900 = vmatpush1.bf16.msra.mxu0 %v2435_v54  ;;  %931 = vmatprep.mubr.bf16.mxu0 %v2918_v0 }
 0x12c   : > { %901 = vmatprep.subr.bf16.mxu0 %v2440_v56 }
 0x12f   : > { %902 = vmatpush1.bf16.msra.mxu0 %v2438_v59  ;;  %v2617_v59 = vld [vmem:[#allocation13 + $0x64] ss:$8 sps:$4 sm:$0xff]  }
 0x130   : > { %903 = vmatprep.subr.bf16.mxu0 %v2443_v60  ;;  %v2615_v60 = vld [vmem:[#allocation13 + $0x60] ss:$8 sps:$4 sm:$0xff]  }
 0x133   : > { %904 = vmatpush1.bf16.msra.mxu0 %v2441_v62  ;;  %v1747_v62 = vld [vmem:[%s3235_s13] sm:$0xf] }
 0x134   : > { %905 = vmatprep.subr.bf16.mxu0 %v2446_v63 }
 0x137   : > { %906 = vmatpush1.bf16.msra.mxu0 %v2444_v1 }
 0x138   : > { %907 = vmatprep.subr.bf16.mxu0 %v2449_v2 }
 0x13b   : > { %908 = vmatpush1.bf16.msra.mxu0 %v2447_v3  ;;  %v2623_v3 = vld [vmem:[#allocation13 + $0x74] ss:$8 sps:$4 sm:$0xff]  }
 0x13c   : > { %909 = vmatprep.subr.bf16.mxu0 %v2452_v4 }
 0x13f   : > { %910 = vmatpush1.bf16.msra.mxu0 %v2450_v5  ;;  %v2621_v5 = vld [vmem:[#allocation13 + $0x70] ss:$8 sps:$4 sm:$0xff]  }
 0x140   : > { %911 = vmatprep.subr.bf16.mxu0 %v2455_v6  ;;  %v1764_v6 = vpack.c.bf16 %v1747_v62, %v1747_v62  ;;  %v2567_v62 = vld [vmem:[#allocation8 + $0x240] ss:$8 sps:$4 sm:$0xff]  }
 0x143   : > { %912 = vmatpush1.bf16.msra.mxu0 %v2453_v7 }
 0x144   : > { %913 = vmatprep.subr.bf16.mxu0 %v2458_v8 }
 0x147   : > { %914 = vmatpush1.bf16.msra.mxu0 %v2456_v9 }
 0x148   : > { %1845 = vmatprep.subr.bf16.mxu0 %v2581_v27  ;;  %v2525_v27 = vld [vmem:[#allocation8 + $0x60] ss:$8 sps:$4 sm:$0xff]  }
 0x14a   : > { %932 = vmatmul.mubr.bf16.vlgmr.msra.gmra.mrb[0].mxu0 %v818_v11 }
 0x14b   : > { %1877 = vmatprep.mubr.bf16.mxu0 %v2918_v0  ;;  %v2503_v0 = vld [vmem:[#allocation8 + $0x1e0] ss:$8 sps:$4 sm:$0xff]   ;;  %1846 = vmatpush1.bf16.msra.mxu0 %v2579_v28  ;;  %v2530_v28 = vld [vmem:[#allocation8 + $0x74] ss:$8 sps:$4 sm:$0xff]  }
 0x14c   : > { %1260 = vmatpush1.bf16.msra.mxu1 %v2503_v0  ;;  %1847 = vmatprep.subr.bf16.mxu0 %v2587_v32  ;;  %v2516_v0 = vld [vmem:[#allocation8 + $0x30] ss:$8 sps:$4 sm:$0xff]   ;;  %v2533_v32 = vld [vmem:[#allocation8 + $0x84] ss:$8 sps:$4 sm:$0xff]  }
 0x14d   : > { %1261 = vmatprep.subr.bf16.mxu1 %v2504_v22  ;;  %v2521_v22 = vld [vmem:[#allocation8 + $0x44] ss:$8 sps:$4 sm:$0xff]  }
 0x14f   : > { %1848 = vmatpush1.bf16.msra.mxu0 %v2585_v33  ;;  %v2531_v33 = vld [vmem:[#allocation8 + $0x80] ss:$8 sps:$4 sm:$0xff]  }
 0x150   : > { %1262 = vmatpush1.bf16.msra.mxu1 %v2506_v23  ;;  %1849 = vmatprep.subr.bf16.mxu0 %v2593_v37  ;;  %v2519_v23 = vld [vmem:[#allocation8 + $0x40] ss:$8 sps:$4 sm:$0xff]  }
 0x151   : > { %1432 = vmatprep.subr.bf16.mxu1 %v2509_v24  ;;  %v2524_v24 = vld [vmem:[#allocation8 + $0x54] ss:$8 sps:$4 sm:$0xff]   ;;  %v2537_v37 = vld [vmem:[#allocation8 + $0xa0] ss:$8 sps:$4 sm:$0xff]  }
 0x153   : > { %1850 = vmatpush1.bf16.msra.mxu0 %v2591_v39  ;;  %v2540_v39 = vld [vmem:[#allocation8 + $0xb0] ss:$8 sps:$4 sm:$0xff]  }
 0x154   : > { %1851 = vmatprep.subr.bf16.mxu0 %v2599_v46  ;;  %v2554_v46 = vld [vmem:[#allocation8 + $0xf4] ss:$8 sps:$4 sm:$0xff]  }
 0x157   : > { %1852 = vmatpush1.bf16.msra.mxu0 %v2597_v49  ;;  %v2557_v49 = vld [vmem:[#allocation8 + $0x204] ss:$8 sps:$4 sm:$0xff]  }
 0x158   : > { %1853 = vmatprep.subr.bf16.mxu0 %v2605_v53 }
 0x15b   : > { %1854 = vmatpush1.bf16.msra.mxu0 %v2603_v55 }
 0x15c   : > { %1855 = vmatprep.subr.bf16.mxu0 %v2611_v57  ;;  %v2563_v57 = vld [vmem:[#allocation8 + $0x224] ss:$8 sps:$4 sm:$0xff]  }
 0x15f   : > { %1856 = vmatpush1.bf16.msra.mxu0 %v2609_v58  ;;  %v2561_v58 = vld [vmem:[#allocation8 + $0x220] ss:$8 sps:$4 sm:$0xff]  }
 0x160   : > { %1857 = vmatprep.subr.bf16.mxu0 %v2617_v59  ;;  %v2566_v59 = vld [vmem:[#allocation8 + $0x234] ss:$8 sps:$4 sm:$0xff]  }
 0x163   : > { %1858 = vmatpush1.bf16.msra.mxu0 %v2615_v60  ;;  %v2564_v60 = vld [vmem:[#allocation8 + $0x230] ss:$8 sps:$4 sm:$0xff]  }
 0x164   : > { %1859 = vmatprep.subr.bf16.mxu0 %v2623_v3  ;;  %v2573_v3 = vld [vmem:[#allocation8 + $0x260] ss:$8 sps:$4 sm:$0xff]  }
 0x167   : > { %1860 = vmatpush1.bf16.msra.mxu0 %v2621_v5  ;;  %v2576_v5 = vld [vmem:[#allocation8 + $0x270] ss:$8 sps:$4 sm:$0xff]  }
 0x16a   : > { %1878 = vmatmul.mubr.bf16.vlgmr.msra.gmra.mrb[4].mxu0 %v1764_v6  ;;  %v2584_v6 = vld [vmem:[#allocation8 + $0x284] ss:$8 sps:$4 sm:$0xff]  }
 0x21d   : > { %v933_v40 = vpop.f32.mrb[0].mxu0 }
 0x21e   : > { %v954_v42 = vmul.f32 %v947_v35, %v933_v40  ;;  %v935_v43 = vpop.f32.mrb[1].mxu0  ;;  %v2534_v35 = vld [vmem:[#allocation8 + $0x90] ss:$8 sps:$4 sm:$0xff]   ;;  %v2545_v40 = vld [vmem:[#allocation8 + $0xc4] ss:$8 sps:$4 sm:$0xff]  }
 0x21f   : > { %v955_v44 = vmul.f32 %v951_v36, %v935_v43  ;;  %v937_v45 = vpop.f32.mrb[2].mxu0  ;;  %v2539_v36 = vld [vmem:[#allocation8 + $0xa4] ss:$8 sps:$4 sm:$0xff]   ;;  %v2546_v43 = vld [vmem:[#allocation8 + $0xd0] ss:$8 sps:$4 sm:$0xff]  }
 0x220   : > { %v968_v47 = vadd.f32 %v961_v38, %v954_v42  ;;  %v938_v48 = vpop.f32.mrb[3].mxu0  ;;  %v2542_v38 = vld [vmem:[#allocation8 + $0xb4] ss:$8 sps:$4 sm:$0xff]   ;;  %v2549_v45 = vld [vmem:[#allocation8 + $0xe0] ss:$8 sps:$4 sm:$0xff]  }
 0x221   : > { %v969_v50 = vadd.f32 %v965_v41, %v955_v44  ;;  %v2543_v41 = vld [vmem:[#allocation8 + $0xc0] ss:$8 sps:$4 sm:$0xff]   ;;  %v2548_v42 = vld [vmem:[#allocation8 + $0xd4] ss:$8 sps:$4 sm:$0xff]   ;;  %v2551_v44 = vld [vmem:[#allocation8 + $0xe4] ss:$8 sps:$4 sm:$0xff]  }
 0x222   : > { %v970_v51 = vmax.f32 %v968_v47, 0.0  ;;  %v2552_v48 = vld [vmem:[#allocation8 + $0xf0] ss:$8 sps:$4 sm:$0xff]  }
 0x223   : > { %v971_v52 = vmax.f32 %v969_v50, 0.0 }
 0x224   : > { %v976_v54 = vrot.slane %v970_v51, 7 }
 0x225   : > { %v977_v56 = vrot.slane %v971_v52, 7  ;;  %v2555_v52 = vld [vmem:[#allocation8 + $0x200] ss:$8 sps:$4 sm:$0xff]  }
 0x226   : > { %980 = vst [vmem:[#allocation2] sm:$0x1e] %v976_v54  ;;  %v2560_v54 = vld [vmem:[#allocation8 + $0x214] ss:$8 sps:$4 sm:$0xff]  }
 0x227   : > { %981 = vst [vmem:[#allocation2 + $0x8] sm:$0x1e] %v977_v56  ;;  %v2558_v56 = vld [vmem:[#allocation8 + $0x210] ss:$8 sps:$4 sm:$0xff]  }
 0x22d   : > { %v1018_v61 = vld [vmem:[#allocation2] sm:$0x1e] }
 0x22e   : > { %v1019_v63 = vld [vmem:[#allocation2 + $0x8] sm:$0x1e]  ;;  %v1053_v1 = vpack.c.bf16 %v1018_v61, %v1018_v61  ;;  %v982_v50 = vld [vmem:[#allocation2] sm:$0xf] }
 0x22f   : > { %v1054_v2 = vpack.c.bf16 %v1019_v63, %v1019_v63  ;;  %v983_v12 = vld [vmem:[#allocation2 + $0x8] sm:$0xf]  ;;  %v1016_v53 = vpack.c.bf16 %v982_v50, %v982_v50  ;;  %v2569_v61 = vld [vmem:[#allocation8 + $0x244] ss:$8 sps:$4 sm:$0xff]  }
 0x230   : > { %v1058_v4 = vshll.u32 %v1053_v1, 16  ;;  %v1056_v11 = vshrl.u32 %v1053_v1, 16  ;;  %v1017_v17 = vpack.c.bf16 %v983_v12, %v983_v12  ;;  %v1474_v47 = vld [vmem:[#allocation2 + $0x8] sm:$0x3c] }
 0x231   : > { %v1065_v7 = vshll.u32 %v1054_v2, 16  ;;  %v1063_v9 = vshrl.u32 %v1054_v2, 16  ;;  %v1509_v51 = vpack.c.bf16 %v1474_v47, %v1474_v47  ;;  %v2572_v63 = vld [vmem:[#allocation8 + $0x254] ss:$8 sps:$4 sm:$0xff]   ;;  %v2570_v1 = vld [vmem:[#allocation8 + $0x250] ss:$8 sps:$4 sm:$0xff]  }
 0x232   : > { %v1060_v8 = vrot.slane %v1058_v4, 1  ;;  %v2575_v2 = vld [vmem:[#allocation8 + $0x264] ss:$8 sps:$4 sm:$0xff]   ;;  %v2578_v4 = vld [vmem:[#allocation8 + $0x274] ss:$8 sps:$4 sm:$0xff]  }
 0x233   : > { %v1067_v10 = vrot.slane %v1065_v7, 1  ;;  %v1513_v55 = vrot.slane %v1509_v51, 1  ;;  %v2582_v7 = vld [vmem:[#allocation8 + $0x280] ss:$8 sps:$4 sm:$0xff]   ;;  %v2602_v12 = vld [vmem:[#allocation8 + $0x2b4] ss:$8 sps:$4 sm:$0xff]  }
 0x234   : > { %v1061_v15 = vor.u32 %v1060_v8, %v1056_v11  ;;  %v2590_v8 = vld [vmem:[#allocation8 + $0x294] ss:$8 sps:$4 sm:$0xff]   ;;  %v2594_v11 = vld [vmem:[#allocation8 + $0x2a0] ss:$8 sps:$4 sm:$0xff]  }
 0x235   : > { %v1068_v13 = vor.u32 %v1067_v10, %v1063_v9  ;;  %v2588_v9 = vld [vmem:[#allocation8 + $0x290] ss:$8 sps:$4 sm:$0xff]   ;;  %v2596_v10 = vld [vmem:[#allocation8 + $0x2a4] ss:$8 sps:$4 sm:$0xff]  }
 0x237   : > { %1263 = vmatprep.mubr.bf16.mxu1 %v1068_v13  ;;  %v2600_v13 = vld [vmem:[#allocation8 + $0x2b0] ss:$8 sps:$4 sm:$0xff]  }
 0x238   : > { %1264 = vmatmul.mubr.bf16.vlgmr.msra.gmra.mrb[0].mxu1 %v1061_v15  ;;  %v2606_v15 = vld [vmem:[#allocation8 + $0x2c0] ss:$8 sps:$4 sm:$0xff]  }
 0x239   : > { %1433 = vmatpush1.bf16.msra.mxu1 %v2507_v14  ;;  %1464 = vmatprep.mubr.bf16.mxu1 %v1017_v17  ;;  %v2608_v14 = vld [vmem:[#allocation8 + $0x2c4] ss:$8 sps:$4 sm:$0xff]   ;;  %v2612_v17 = vld [vmem:[#allocation8 + $0x2d0] ss:$8 sps:$4 sm:$0xff]  }
 0x23a   : > { %1434 = vmatprep.subr.bf16.mxu1 %v2512_v16  ;;  %v2614_v16 = vld [vmem:[#allocation8 + $0x2d4] ss:$8 sps:$4 sm:$0xff]  }
 0x23d   : > { %1435 = vmatpush1.bf16.msra.mxu1 %v2510_v18  ;;  %v2620_v18 = vld [vmem:[#allocation8 + $0x2e4] ss:$8 sps:$4 sm:$0xff]  }
 0x23e   : > { %1436 = vmatprep.subr.bf16.mxu1 %v2515_v19  ;;  %v2618_v19 = vld [vmem:[#allocation8 + $0x2e0] ss:$8 sps:$4 sm:$0xff]  }
 0x241   : > { %1437 = vmatpush1.bf16.msra.mxu1 %v2513_v20  ;;  %v2626_v20 = vld [vmem:[#allocation8 + $0x2f4] ss:$8 sps:$4 sm:$0xff]  }
 0x242   : > { %1438 = vmatprep.subr.bf16.mxu1 %v2518_v21  ;;  %v1473_v21 = vld [vmem:[#allocation2] sm:$0x3c] }
 0x245   : > { %1439 = vmatpush1.bf16.msra.mxu1 %v2516_v0  ;;  %v2624_v0 = vld [vmem:[#allocation8 + $0x2f0] ss:$8 sps:$4 sm:$0xff]  }
 0x246   : > { %1440 = vmatprep.subr.bf16.mxu1 %v2521_v22  ;;  %v1508_v22 = vpack.c.bf16 %v1473_v21, %v1473_v21 }
 0x249   : > { %1441 = vmatpush1.bf16.msra.mxu1 %v2519_v23  ;;  %v1512_v23 = vrot.slane %v1508_v22, 1 }
 0x24a   : > { %1442 = vmatprep.subr.bf16.mxu1 %v2524_v24  ;;  %v1879_v24 = vpop.f32.mrb[4].mxu0 }
 0x24d   : > { %1443 = vmatpush1.bf16.msra.mxu1 %v2522_v25  ;;  %v1881_v25 = vpop.f32.mrb[5].mxu0 }
 0x24e   : > { %1444 = vmatprep.subr.bf16.mxu1 %v2527_v26  ;;  %v1883_v26 = vpop.f32.mrb[6].mxu0 }
 0x251   : > { %1445 = vmatpush1.bf16.msra.mxu1 %v2525_v27  ;;  %v1884_v27 = vpop.f32.mrb[7].mxu0 }
 0x252   : > { %1446 = vmatprep.subr.bf16.mxu1 %v2530_v28  ;;  %v1886_v28 = vld [vmem:[#allocation14] sm:$0x3] }
 0x255   : > { %1447 = vmatpush1.bf16.msra.mxu1 %v2528_v30  ;;  %v1891_v30 = vrot.slane %v1886_v28, %v3251_v29 }
 0x256   : > { %1448 = vmatprep.subr.bf16.mxu1 %v2533_v32  ;;  %v1900_v32 = vld [vmem:[#allocation16] sm:$0x3] }
 0x259   : > { %1449 = vmatpush1.bf16.msra.mxu1 %v2531_v33  ;;  %v1895_v33 = vrot.slane %v1886_v28, %v3253_v31 }
 0x25a   : > { %1450 = vmatprep.subr.bf16.mxu1 %v2536_v34  ;;  %v1719_v34 = vld [vmem:[#allocation10] sm:$0x3] }
 0x25d   : > { %1451 = vmatpush1.bf16.msra.mxu1 %v2534_v35  ;;  %v1733_v35 = vld [vmem:[#allocation11] sm:$0x3] }
 0x25e   : > { %1452 = vmatprep.subr.bf16.mxu1 %v2539_v36  ;;  %v1898_v36 = vmul.f32 %v1891_v30, %v1879_v24 }
 0x261   : > { %1453 = vmatpush1.bf16.msra.mxu1 %v2537_v37  ;;  %v1905_v37 = vrot.slane %v1900_v32, %v3251_v29 }
 0x262   : > { %1454 = vmatprep.subr.bf16.mxu1 %v2542_v38  ;;  %v1724_v38 = vrot.slane %v1719_v34, %v3251_v29 }
 0x265   : > { %1455 = vmatpush1.bf16.msra.mxu1 %v2540_v39  ;;  %v1899_v39 = vmul.f32 %v1895_v33, %v1881_v25 }
 0x266   : > { %1456 = vmatprep.subr.bf16.mxu1 %v2545_v40  ;;  %v1909_v40 = vrot.slane %v1900_v32, %v3253_v31 }
 0x269   : > { %1457 = vmatpush1.bf16.msra.mxu1 %v2543_v41  ;;  %v1728_v41 = vrot.slane %v1719_v34, %v3253_v31 }
 0x26a   : > { %1458 = vmatprep.subr.bf16.mxu1 %v2548_v42  ;;  %v1738_v42 = vrot.slane %v1733_v35, %v3251_v29 }
 0x26d   : > { %1459 = vmatpush1.bf16.msra.mxu1 %v2546_v43 }
 0x26e   : > { %1460 = vmatprep.subr.bf16.mxu1 %v2551_v44  ;;  %v1742_v44 = vrot.slane %v1733_v35, %v3253_v31 }
 0x271   : > { %1461 = vmatpush1.bf16.msra.mxu1 %v2549_v45  ;;  %v1912_v45 = vadd.f32 %v1905_v37, %v1898_v36 }
 0x272   : > { %1462 = vmatprep.subr.bf16.mxu1 %v2554_v46 }
 0x275   : > { %1463 = vmatpush1.bf16.msra.mxu1 %v2552_v48  ;;  %v1913_v48 = vadd.f32 %v1909_v40, %v1899_v39 }
 0x276   : > { %1676 = vmatprep.subr.bf16.mxu1 %v2557_v49 }
 0x278   : > { %1465 = vmatmul.mubr.bf16.vlgmr.msra.gmra.mrb[0].mxu1 %v1016_v53 }
 0x279   : > { %1677 = vmatpush1.bf16.msra.mxu1 %v2555_v52  ;;  %1708 = vmatprep.mubr.bf16.mxu1 %v1513_v55 }
 0x27a   : > { %1678 = vmatprep.subr.bf16.mxu1 %v2560_v54 }
 0x27d   : > { %1679 = vmatpush1.bf16.msra.mxu1 %v2558_v56 }
 0x27e   : > { %1680 = vmatprep.subr.bf16.mxu1 %v2563_v57 }
 0x281   : > { %1681 = vmatpush1.bf16.msra.mxu1 %v2561_v58 }
 0x282   : > { %1682 = vmatprep.subr.bf16.mxu1 %v2566_v59 }
 0x285   : > { %1683 = vmatpush1.bf16.msra.mxu1 %v2564_v60 }
 0x286   : > { %1684 = vmatprep.subr.bf16.mxu1 %v2569_v61 }
 0x289   : > { %1685 = vmatpush1.bf16.msra.mxu1 %v2567_v62 }
 0x28a   : > { %1686 = vmatprep.subr.bf16.mxu1 %v2572_v63 }
 0x28d   : > { %1687 = vmatpush1.bf16.msra.mxu1 %v2570_v1 }
 0x28e   : > { %1688 = vmatprep.subr.bf16.mxu1 %v2575_v2 }
 0x291   : > { %1689 = vmatpush1.bf16.msra.mxu1 %v2573_v3 }
 0x292   : > { %1690 = vmatprep.subr.bf16.mxu1 %v2578_v4 }
 0x295   : > { %1691 = vmatpush1.bf16.msra.mxu1 %v2576_v5 }
 0x296   : > { %1692 = vmatprep.subr.bf16.mxu1 %v2584_v6 }
 0x299   : > { %1693 = vmatpush1.bf16.msra.mxu1 %v2582_v7 }
 0x29a   : > { %1694 = vmatprep.subr.bf16.mxu1 %v2590_v8 }
 0x29d   : > { %1695 = vmatpush1.bf16.msra.mxu1 %v2588_v9 }
 0x29e   : > { %1696 = vmatprep.subr.bf16.mxu1 %v2596_v10 }
 0x2a1   : > { %1697 = vmatpush1.bf16.msra.mxu1 %v2594_v11 }
 0x2a2   : > { %1698 = vmatprep.subr.bf16.mxu1 %v2602_v12 }
 0x2a5   : > { %1699 = vmatpush1.bf16.msra.mxu1 %v2600_v13 }
 0x2a6   : > { %1700 = vmatprep.subr.bf16.mxu1 %v2608_v14 }
 0x2a9   : > { %1701 = vmatpush1.bf16.msra.mxu1 %v2606_v15 }
 0x2aa   : > { %1702 = vmatprep.subr.bf16.mxu1 %v2614_v16 }
 0x2ad   : > { %1703 = vmatpush1.bf16.msra.mxu1 %v2612_v17 }
 0x2ae   : > { %1704 = vmatprep.subr.bf16.mxu1 %v2620_v18 }
 0x2b1   : > { %1705 = vmatpush1.bf16.msra.mxu1 %v2618_v19 }
 0x2b2   : > { %1706 = vmatprep.subr.bf16.mxu1 %v2626_v20 }
 0x2b5   : > { %1707 = vmatpush1.bf16.msra.mxu1 %v2624_v0 }
 0x2b8   : > { %1709 = vmatmul.mubr.bf16.vlgmr.msra.gmra.mrb[0].mxu1 %v1512_v23 }
 0x38b   : > { %v1710_v43 = vpop.f32.mrb[0].mxu1 }
 0x38c   : > { %v1731_v46 = vmul.f32 %v1724_v38, %v1710_v43  ;;  %v1712_v47 = vpop.f32.mrb[1].mxu1 }
 0x38d   : > { %v1732_v49 = vmul.f32 %v1728_v41, %v1712_v47  ;;  %v1714_v50 = vpop.f32.mrb[2].mxu1 }
 0x38e   : > { %v1745_v51 = vadd.f32 %v1738_v42, %v1731_v46  ;;  %v1715_v52 = vpop.f32.mrb[3].mxu1 }
 0x38f   : > { %v1746_v53 = vadd.f32 %v1742_v44, %v1732_v49 }
 0x390   : > { %v1914_v54 = vadd.f32 %v1912_v45, %v1745_v51 }
 0x391   : > { %v1915_v55 = vadd.f32 %v1913_v48, %v1746_v53 }
 0x392   : > { %v1916_v56 = vmax.f32 %v1914_v54, 0.0 }
 0x393   : > { %v1917_v57 = vmax.f32 %v1915_v55, 0.0 }
 0x395   : > { %v1920_v29 = vcombine.low %v1916_v56, %v1917_v57 }
 0x397   : > { %1922 = vst [vmem:[%s519_s23] sm:$0xff] %v1920_v29 }
 0x398 PF: > { %s26_s17 = sadd.s32 1, %s2905_s17  }
 0x399   : > { %p23_p11 = scmp.ge.s32.totalorder %s26_s17, 4  }
 0x39b   :  { %25 = sbr.rel (!%p23_p11) target bundleno = 5 (0x5), region = 138 }
 0x3a2   :  { %1944 = vsyncpa [#allocation4], 1 }
 0x3a3   :  { %1946 = vsyncpa [#allocation4 + $0x1], 1 }
 0x3a4   :  { %1947 = vsyncpa [#allocation6], 1 }
 0x3a5   :  { %1948 = vsyncpa [#allocation9], 1 }
 0x3a6   :  { %1949 = vsyncpa [#allocation12], 1 }
 0x3a7   :  { %1950 = vsyncpa [#allocation15], 1 }

// kernel: cnn1d_deeper_forward.9
= control target key start
LH: loop header
LB: loop body
LE: loop exit
PB: predicated region body
PF: predicated region fallthrough
CT: control target
= control target key end

     0   :  { %v30_v28 = vlaneseq  ;;  %v755_v36 = vmov 1983009808   ;;  %s927_s0 = inlined_call_operand.vmem [shape: f32[2,2,512], index: 0, kind: input, shape index: {}]   ;;  %s928_s1 = inlined_call_operand.vmem [shape: bf16[512,32], index: 1, kind: input, shape index: {}]   ;;  %s929_s2 = inlined_call_operand.vmem [shape: f32[1,32], index: 2, kind: input, shape index: {}]   ;;  %s930_s3 = inlined_call_operand.vmem [shape: bf16[32,8], index: 3, kind: input, shape index: {}]   ;;  %s931_s4 = inlined_call_operand.vmem [shape: f32[1,8], index: 4, kind: input, shape index: {}]   ;;  %s932_s5 = inlined_call_operand.hbm [shape: f32[2,8], index: 5, kind: output, shape index: {}]  }
   0x1   :  { %v695_v0 = vld [vmem:[%s928_s1 + $0x40] sm:$0xff]   ;;  %v699_v4 = vld [vmem:[%s928_s1 + $0x48] sm:$0xff]   ;;  %v703_v8 = vld [vmem:[%s928_s1 + $0x50] sm:$0xff]   ;;  %v28_v37 = vunpack.c.l.s4 %v755_v36 }
   0x2   :  { %v696_v1 = vld [vmem:[%s928_s1 + $0xc0] sm:$0xff]   ;;  %636 = vmatprep.subr.bf16.mxu0 %v695_v0  ;;  %v700_v5 = vld [vmem:[%s928_s1 + $0xc8] sm:$0xff]   ;;  %v704_v9 = vld [vmem:[%s928_s1 + $0xd0] sm:$0xff]   ;;  %v31_v33 = vshrl.u32 %v30_v28, 7 }
   0x3   :  { %v697_v2 = vld [vmem:[%s928_s1] sm:$0xff]   ;;  %658 = vmatprep.subr.bf16.mxu1 %v696_v1  ;;  %v701_v6 = vld [vmem:[%s928_s1 + $0x8] sm:$0xff]   ;;  %v705_v10 = vld [vmem:[%s928_s1 + $0x10] sm:$0xff]  }
   0x4   :  { %v698_v3 = vld [vmem:[%s928_s1 + $0x80] sm:$0xff]   ;;  %637 = vmatpush3.bf16.msra.mxu0 %v697_v2  ;;  %v702_v7 = vld [vmem:[%s928_s1 + $0x88] sm:$0xff]   ;;  %v706_v11 = vld [vmem:[%s928_s1 + $0x90] sm:$0xff]  }
   0x5   :  { %659 = vmatpush3.bf16.msra.mxu1 %v698_v3  ;;  %638 = vmatprep.subr.bf16.mxu0 %v699_v4  ;;  %v707_v12 = vld [vmem:[%s928_s1 + $0x58] sm:$0xff]   ;;  %v711_v16 = vld [vmem:[%s928_s1 + $0x60] sm:$0xff]   ;;  %v715_v20 = vld [vmem:[%s928_s1 + $0x68] sm:$0xff]  }
   0x6   :  { %660 = vmatprep.subr.bf16.mxu1 %v700_v5  ;;  %v708_v13 = vld [vmem:[%s928_s1 + $0xd8] sm:$0xff]   ;;  %v712_v17 = vld [vmem:[%s928_s1 + $0xe0] sm:$0xff]   ;;  %v716_v21 = vld [vmem:[%s928_s1 + $0xe8] sm:$0xff]  }
   0x7   :  { %v709_v14 = vld [vmem:[%s928_s1 + $0x18] sm:$0xff]   ;;  %v713_v18 = vld [vmem:[%s928_s1 + $0x20] sm:$0xff]   ;;  %v717_v22 = vld [vmem:[%s928_s1 + $0x28] sm:$0xff]  }
   0x8   :  { %639 = vmatpush3.bf16.msra.mxu0 %v701_v6  ;;  %v710_v15 = vld [vmem:[%s928_s1 + $0x98] sm:$0xff]   ;;  %v714_v19 = vld [vmem:[%s928_s1 + $0xa0] sm:$0xff]   ;;  %v718_v23 = vld [vmem:[%s928_s1 + $0xa8] sm:$0xff]  }
   0x9   :  { %661 = vmatpush3.bf16.msra.mxu1 %v702_v7  ;;  %640 = vmatprep.subr.bf16.mxu0 %v703_v8  ;;  %v719_v24 = vld [vmem:[%s928_s1 + $0x70] sm:$0xff]   ;;  %v723_v29 = vld [vmem:[%s928_s1 + $0x78] sm:$0xff]   ;;  %v22_v34 = vld [vmem:[%s927_s0] sm:$0xff] }
   0xa   :  { %662 = vmatprep.subr.bf16.mxu1 %v704_v9  ;;  %v720_v25 = vld [vmem:[%s928_s1 + $0xf0] sm:$0xff]   ;;  %v724_v30 = vld [vmem:[%s928_s1 + $0xf8] sm:$0xff]   ;;  %v23_v35 = vld [vmem:[%s927_s0 + $0x8] sm:$0xff] }
   0xb   :  { %v721_v26 = vld [vmem:[%s928_s1 + $0x30] sm:$0xff]   ;;  %v725_v31 = vld [vmem:[%s928_s1 + $0x38] sm:$0xff]  }
   0xc   :  { %641 = vmatpush3.bf16.msra.mxu0 %v705_v10  ;;  %v722_v27 = vld [vmem:[%s928_s1 + $0xb0] sm:$0xff]   ;;  %v726_v32 = vld [vmem:[%s928_s1 + $0xb8] sm:$0xff]  }
   0xd   :  { %663 = vmatpush3.bf16.msra.mxu1 %v706_v11  ;;  %642 = vmatprep.subr.bf16.mxu0 %v707_v12 }
   0xe   :  { %664 = vmatprep.subr.bf16.mxu1 %v708_v13 }
  0x10   :  { %643 = vmatpush3.bf16.msra.mxu0 %v709_v14 }
  0x11   :  { %665 = vmatpush3.bf16.msra.mxu1 %v710_v15  ;;  %644 = vmatprep.subr.bf16.mxu0 %v711_v16 }
  0x12   :  { %666 = vmatprep.subr.bf16.mxu1 %v712_v17 }
  0x14   :  { %645 = vmatpush3.bf16.msra.mxu0 %v713_v18 }
  0x15   :  { %667 = vmatpush3.bf16.msra.mxu1 %v714_v19  ;;  %646 = vmatprep.subr.bf16.mxu0 %v715_v20 }
  0x16   :  { %668 = vmatprep.subr.bf16.mxu1 %v716_v21 }
  0x18   :  { %647 = vmatpush3.bf16.msra.mxu0 %v717_v22 }
  0x19   :  { %669 = vmatpush3.bf16.msra.mxu1 %v718_v23  ;;  %648 = vmatprep.subr.bf16.mxu0 %v719_v24 }
  0x1a   :  { %670 = vmatprep.subr.bf16.mxu1 %v720_v25 }
  0x1c   :  { %649 = vmatpush3.bf16.msra.mxu0 %v721_v26 }
  0x1d   :  { %671 = vmatpush3.bf16.msra.mxu1 %v722_v27  ;;  %650 = vmatprep.subr.bf16.mxu0 %v723_v29 }
  0x1e   :  { %672 = vmatprep.subr.bf16.mxu1 %v724_v30 }
  0x20   :  { %651 = vmatpush3.bf16.msra.mxu0 %v725_v31 }
  0x21   :  { %673 = vmatpush3.bf16.msra.mxu1 %v726_v32 }
  0x22   :  { %10 = vsyncpa [#allocation3], 0  ;;  %v29_v38 = vunpack.c.0.s8 %v28_v37  ;;  %v26_v39 = vcombine.high %v22_v34, %v22_v34  ;;  %v43_v40 = vcombine.high %v23_v35, %v23_v35  ;;  %vm68_vm0 = vcmask 1041408   ;;  %s758_s16 = smov [#allocation2]  }
  0x23   :  { %vm229_vm1 = vcmask 1041409   ;;  %vm757_vm2 = vmmov 0   ;;  %vm539_vm3 = vcmask 261120   ;;  %vm583_vm4 = vcmask 58368  }
  0x24   :  { %v32_v41 = vsub.s32 %v29_v38, %v31_v33 }
  0x26   :  { %v33_v42 = vrot.slane %v22_v34, %v32_v41  ;;  %v50_v43 = vrot.slane %v23_v35, %v32_v41  ;;  %v40_v44 = vrot.slane %v26_v39, %v32_v41  ;;  %v57_v45 = vrot.slane %v43_v40, %v32_v41 }
  0x28   :  { %v41_v46 = vcombine.high %v33_v42, %v33_v42  ;;  %v58_v47 = vcombine.high %v50_v43, %v50_v43  ;;  %v42_v48 = vcombine.high %v40_v44, %v40_v44  ;;  %v59_v49 = vcombine.high %v57_v45, %v57_v45 }
  0x29   :  { %v69_v50 = vsel %vm68_vm0, %v33_v42, 0.0  ;;  %v97_v51 = vsel %vm68_vm0, %v50_v43, 0.0  ;;  %v83_v52 = vsel %vm68_vm0, %v40_v44, 0.0  ;;  %v111_v53 = vsel %vm68_vm0, %v57_v45, 0.0 }
  0x2a   :  { %v76_v54 = vsel %vm68_vm0, %v41_v46, 0.0  ;;  %v104_v55 = vsel %vm68_vm0, %v58_v47, 0.0  ;;  %v90_v56 = vsel %vm68_vm0, %v42_v48, 0.0  ;;  %v118_v57 = vsel %vm68_vm0, %v59_v49, 0.0 }
  0x2b   :  { %v77_v58 = vrot.slane %v76_v54, 4  ;;  %v105_v59 = vrot.slane %v104_v55, 4  ;;  %v91_v60 = vrot.slane %v90_v56, 4  ;;  %v119_v61 = vrot.slane %v118_v57, 4 }
  0x2c   :  { %v70_v62 = vrot.slane %v69_v50, 4  ;;  %v98_v63 = vrot.slane %v97_v51, 4  ;;  %v84_v0 = vrot.slane %v83_v52, 4  ;;  %v112_v1 = vrot.slane %v111_v53, 4 }
  0x2d   :  { %v78_v2 = vadd.f32 %v77_v58, %v76_v54  ;;  %v106_v3 = vadd.f32 %v105_v59, %v104_v55  ;;  %v92_v4 = vadd.f32 %v91_v60, %v90_v56  ;;  %v120_v5 = vadd.f32 %v119_v61, %v118_v57 }
  0x2e   :  { %v71_v6 = vadd.f32 %v70_v62, %v69_v50  ;;  %v99_v7 = vadd.f32 %v98_v63, %v97_v51  ;;  %v85_v8 = vadd.f32 %v84_v0, %v83_v52  ;;  %v113_v9 = vadd.f32 %v112_v1, %v111_v53 }
  0x2f   :  { %v79_v10 = vrot.slane %v78_v2, 2  ;;  %v107_v11 = vrot.slane %v106_v3, 2  ;;  %v93_v12 = vrot.slane %v92_v4, 2  ;;  %v121_v13 = vrot.slane %v120_v5, 2 }
  0x30   :  { %v72_v14 = vrot.slane %v71_v6, 2  ;;  %v100_v15 = vrot.slane %v99_v7, 2  ;;  %v86_v16 = vrot.slane %v85_v8, 2  ;;  %v114_v17 = vrot.slane %v113_v9, 2 }
  0x31   :  { %v80_v18 = vadd.f32 %v79_v10, %v78_v2  ;;  %v108_v19 = vadd.f32 %v107_v11, %v106_v3  ;;  %v94_v20 = vadd.f32 %v93_v12, %v92_v4  ;;  %v122_v21 = vadd.f32 %v121_v13, %v120_v5  ;;  %v729_v10 = vld [vmem:[%s930_s3] sm:$0xff]   ;;  %v730_v12 = vld [vmem:[%s930_s3 + $0x8] sm:$0xff]  }
  0x32   :  { %v73_v22 = vadd.f32 %v72_v14, %v71_v6  ;;  %v101_v23 = vadd.f32 %v100_v15, %v99_v7  ;;  %v87_v24 = vadd.f32 %v86_v16, %v85_v8  ;;  %v115_v25 = vadd.f32 %v114_v17, %v113_v9  ;;  %v599_v15 = vld [vmem:[%s929_s2] ss:$0 sm:$0xff]  ;;  %s591_s2 = sshll.u32 %s758_s16, 4  ;;  %s592_s2 = int_to_ptr.vmem [resolvable:$true] %s591_s2 }
  0x33   :  { %v81_v26 = vrot.slane %v80_v18, 1  ;;  %v109_v27 = vrot.slane %v108_v19, 1  ;;  %v95_v28 = vrot.slane %v94_v20, 1  ;;  %v123_v29 = vrot.slane %v122_v21, 1  ;;  %s731_s17 = scalar_lea.vmem %s592_s2, 32  ;;  %p736_p1 = scmp.lt.s32.totalorder %s592_s2, %s592_s2 }
  0x34   :  { %v74_v30 = vrot.slane %v73_v22, 1  ;;  %v102_v31 = vrot.slane %v101_v23, 1  ;;  %v88_v32 = vrot.slane %v87_v24, 1  ;;  %v116_v33 = vrot.slane %v115_v25, 1  ;;  %p732_p0 = scmp.ne.s32.totalorder %s592_s2, %s731_s17  ;;  %p737_p2 = scmp.lt.s32.totalorder %s731_s17, %s731_s17 }
  0x35   :  { %v82_v34 = vadd.f32 %v81_v26, %v80_v18  ;;  %v110_v35 = vadd.f32 %v109_v27, %v108_v19  ;;  %v96_v36 = vadd.f32 %v95_v28, %v94_v20  ;;  %v124_v37 = vadd.f32 %v123_v29, %v122_v21  ;;  %v632_v28 = vld [vmem:[%s931_s4] ss:$0 sm:$0xff] }
  0x36   :  { %v75_v38 = vadd.f32 %v74_v30, %v73_v22  ;;  %v103_v39 = vadd.f32 %v102_v31, %v101_v23  ;;  %v89_v40 = vadd.f32 %v88_v32, %v87_v24  ;;  %v117_v41 = vadd.f32 %v116_v33, %v115_v25  ;;  %p738_p3 = por %p737_p2, %p736_p1 }
  0x37   :  { %v127_v42 = vmul.f32 0.5, %v82_v34  ;;  %v131_v43 = vmul.f32 0.5, %v110_v35  ;;  %v129_v44 = vmul.f32 0.5, %v96_v36  ;;  %v133_v45 = vmul.f32 0.5, %v124_v37 }
  0x38   :  { %v126_v46 = vmul.f32 0.5, %v75_v38  ;;  %v130_v47 = vmul.f32 0.5, %v103_v39  ;;  %v128_v48 = vmul.f32 0.5, %v89_v40  ;;  %v132_v49 = vmul.f32 0.5, %v117_v41  ;;  %p739_p4 = pnand %p738_p3, %p732_p0 }
  0x39   :  { %v135_v50 = vpack.c.bf16 %v127_v42, %v127_v42  ;;  %v139_v51 = vpack.c.bf16 %v131_v43, %v131_v43  ;;  %v137_v52 = vpack.c.bf16 %v129_v44, %v129_v44  ;;  %v141_v53 = vpack.c.bf16 %v133_v45, %v133_v45 }
  0x3a   :  { %v134_v54 = vpack.c.bf16 %v126_v46, %v126_v46  ;;  %v138_v55 = vpack.c.bf16 %v130_v47, %v130_v47  ;;  %v136_v56 = vpack.c.bf16 %v128_v48, %v128_v48  ;;  %v140_v57 = vpack.c.bf16 %v132_v49, %v132_v49 }
  0x3b   :  { %v222_v58 = vunpack.c.l.b16 %v135_v50  ;;  %v226_v59 = vunpack.c.l.b16 %v139_v51  ;;  %v224_v60 = vunpack.c.l.b16 %v137_v52  ;;  %v228_v61 = vunpack.c.l.b16 %v141_v53 }
  0x3c   :  { %v221_v62 = vunpack.c.l.b16 %v134_v54  ;;  %v225_v63 = vunpack.c.l.b16 %v138_v55  ;;  %v223_v0 = vunpack.c.l.b16 %v136_v56  ;;  %v227_v1 = vunpack.c.l.b16 %v140_v57 }
  0x3d   :  { %v231_v2 = vsel %vm229_vm1, %v226_v59, %v222_v58  ;;  %v233_v3 = vsel %vm229_vm1, %v228_v61, %v224_v60  ;;  %v756_v11 = vmov 0.0  }
  0x3e   :  { %v235_v4 = vpack.c.b16 %v231_v2, %v231_v2  ;;  %v237_v5 = vpack.c.b16 %v233_v3, %v233_v3  ;;  %v230_v6 = vsel %vm229_vm1, %v225_v63, %v221_v62  ;;  %v232_v7 = vsel %vm229_vm1, %v227_v1, %v223_v0  ;;  %683 = vmatprep.subr.bf16.mxu0 %v756_v11 }
  0x3f   :  { %v234_v8 = vpack.c.b16 %v230_v6, %v230_v6  ;;  %v236_v9 = vpack.c.b16 %v232_v7, %v232_v7 }
  0x40   :  { %466 = vmatprep.mubr.bf16.mxu0 %v235_v4  ;;  %506 = vmatprep.mubr.bf16.mxu1 %v237_v5 }
  0x41   :  { %467 = vmatmul.mubr.bf16.vlgmr.msra.gmra.mrb[0].mxu0 %v234_v8  ;;  %507 = vmatmul.mubr.bf16.vlgmr.msra.gmra.mrb[0].mxu1 %v236_v9 }
  0x42   :  { %684 = vmatpush3.bf16.msra.mxu0 %v729_v10  ;;  %687 = vmatprep.mubr.msk.bf16.mxu0 %vm757_vm2, %v756_v11 }
  0x43   :  { %685 = vmatprep.subr.bf16.mxu0 %v756_v11 }
  0x46   :  { %686 = vmatpush3.bf16.msra.mxu0 %v730_v12 }
 0x114   :  { %v652_v13 = vpop.f32.mrb[0].mxu0  ;;  %v674_v14 = vpop.f32.mrb[0].mxu1 }
 0x115   :  { %v653_v16 = vpop.f32.mrb[1].mxu0  ;;  %v675_v17 = vpop.f32.mrb[1].mxu1 }
 0x116   :  { %v654_v18 = vadd.f32 %v653_v16, %v652_v13  ;;  %v676_v19 = vadd.f32 %v675_v17, %v674_v14  ;;  %v655_v20 = vpop.f32.mrb[2].mxu0  ;;  %v677_v21 = vpop.f32.mrb[2].mxu1 }
 0x117   :  { %v656_v22 = vpop.f32.mrb[3].mxu0  ;;  %v678_v23 = vpop.f32.mrb[3].mxu1 }
 0x118   :  { %v469_v24 = vadd.f32 %v654_v18, %v599_v15 }
 0x11a   :  { %v509_v25 = vadd.f32 %v676_v19, %v469_v24 }
 0x11c   :  { %v514_v26 = vmax.f32 %v509_v25, 0.0 }
 0x11e   :  { %v515_v27 = vpack.c.bf16 %v514_v26, %v514_v26 }
 0x120   :  { %688 = vmatmul.mubr.msk.bf16.vlgmr.msra.gmra.mrb[4].mxu0 %vm539_vm3, %v515_v27 }
 0x1f3   :  { %v577_v29 = vpop.f32.mrb[4].mxu0 }
 0x1f4   :  { %v578_v30 = vadd.f32 %v632_v28, %v577_v29  ;;  %v689_v31 = vpop.f32.mrb[5].mxu0 }
 0x1f5   :  { %v580_v32 = vpop.f32.mrb[6].mxu0 }
 0x1f6   :  { %v690_v33 = vpop.f32.mrb[7].mxu0  ;;  %584 = vst.msk [vmem:[#allocation2] sm:$0x3] %vm583_vm4, %v578_v30 }
 0x1f7   :  { %742 = shalt.err (!%p739_p4)
}
 0x1f8   :  { %s743_s4 = scalar_lea.hbm %s932_s5, 32 }
 0x1f9   :  { %p744_p5 = scmp.ne.s32.totalorder %s932_s5, %s743_s4  ;;  %p747_p6 = scmp.lt.u32.totalorder %s743_s4, %s932_s5 }
 0x1fb   :  { %p749_p7 = pnand %p747_p6, %p744_p5 }
 0x1fd   :  { %752 = shalt.err (!%p749_p7)
}
 0x1fe   :  { %594 = dma.vmem_to_hbm [thread:$0]  %s592_s2, 32, %s932_s5, [#allocation3]  }
 0x1ff   :  { %753 = dma.done.wait [#allocation3], 32  }
 0x200   :  { %754 = vsyncadd [#allocation3], 4294967264 }
 0x201   :  { %598 = vsyncpa [#allocation3], 1 }

// kernel: cnn1d_deeper_forward.8
= control target key start
LH: loop header
LB: loop body
LE: loop exit
PB: predicated region body
PF: predicated region fallthrough
CT: control target
= control target key end

     0   :  { %16 = vsyncpa [#allocation4], 0  ;;  %s8833_s0 = inlined_call_operand.vmem [shape: f32[2,3,256], index: 0, kind: input, shape index: {}]   ;;  %s8834_s1 = inlined_call_operand.vmem [shape: f32[2,2,256], index: 1, kind: input, shape index: {}]   ;;  %s8835_s2 = inlined_call_operand.vmem [shape: bf16[3,256,512], index: 2, kind: input, shape index: {}]   ;;  %s8836_s3 = inlined_call_operand.hbm [shape: f32[1,512], index: 3, kind: input, shape index: {}]   ;;  %s8837_s4 = inlined_call_operand.hbm [shape: f32[1,512], index: 4, kind: input, shape index: {}]   ;;  %s8838_s5 = inlined_call_operand.hbm [shape: bf16[3,512,512], index: 5, kind: input, shape index: {}]   ;;  %s8839_s6 = inlined_call_operand.hbm [shape: f32[1,512], index: 6, kind: input, shape index: {}]   ;;  %s8840_s7 = inlined_call_operand.hbm [shape: f32[1,512], index: 7, kind: input, shape index: {}]   ;;  %s8841_s8 = inlined_call_operand.hbm [shape: bf16[256,512], index: 8, kind: input, shape index: {}]   ;;  %s8842_s9 = inlined_call_operand.hbm [shape: f32[1,512], index: 9, kind: input, shape index: {}]   ;;  %s8843_s10 = inlined_call_operand.hbm [shape: f32[1,512], index: 10, kind: input, shape index: {}]   ;;  %s8844_s11 = inlined_call_operand.vmem [shape: f32[2,2,512], index: 11, kind: output, shape index: {}]  }
   0x1   :  { %17 = vsyncpa [#allocation6], 0 }
   0x2   :  { %18 = vsyncpa [#allocation9], 0 }
   0x3   :  { %19 = vsyncpa [#allocation12], 0 }
   0x4   :  { %20 = vsyncpa [#allocation15], 0  ;;  %s7915_s17 = smov 0  }
   0x5 LB: > { %s7843_s18 = smov [#allocation5]   ;;  %s7921_s20 = sadd.s32 4294967295, %s7841_s17   ;;  %s7841_s17 = sphi %s7915_s17, %s26_s17  }
   0x6   : > { %s325_s19 = sshll.u32 %s7843_s18, 4  ;;  %p5673_p0 = scmp.ge.s32.totalorder %s7841_s17, 1  ;;  %s7926_s19 = int_to_ptr.vmem [resolvable:$true] %s325_s19 }
   0x7   : > { %p298_p1 = scmp.lt.s32.totalorder %s7841_s17, 3  ;;  %p8845_p2 = scmp.eq.s32.totalorder %s7921_s20, 0 }
   0x8   : > { %s7844_s22 = smov [#allocation8]   ;;  %s7845_s25 = smov [#allocation11]  }
   0x9   : > { %p7928_p3 = pnand %p5673_p0, %p298_p1  ;;  %s349_s23 = sshll.u32 %s7844_s22, 4  ;;  %s7934_s23 = int_to_ptr.vmem [resolvable:$true] %s349_s23 }
   0xa   : > { %s370_s26 = sshll.u32 %s7845_s25, 4  ;;  %s7846_s27 = smov [#allocation3]   ;;  %s7942_s26 = int_to_ptr.vmem [resolvable:$true] %s370_s26 }
   0xb   : > { %s8848_s21 = scalar_select %p7928_p3, 1, 0 }
   0xc   : > { %p6561_p4 = pneg %p7928_p3  ;;  %s7944_s28 = sshll.u32 %s7846_s27, 4  ;;  %s315_s28 = int_to_ptr.vmem [resolvable:$true] %s7944_s28 }
   0xd   : > { %s7591_s12 = scalar_lea.hbm %s8837_s4, 64 }
   0xe   : > { %p7938_p5 = pnand %p8845_p2, %p6561_p4  ;;  %p7592_p6 = scmp.ne.s32.totalorder %s8837_s4, %s7591_s12 }
   0xf   : > { %p7598_p10 = scmp.lt.u32.totalorder %s7591_s12, %s8837_s4 }
  0x10   : > { %p7954_p7 = pneg %p7938_p5 }
  0x12   : > { %p7594_p8 = pnand %p7954_p7, %p7592_p6 }
  0x14   : > { %p7595_p9 = pneg %p7594_p8 }
  0x16   : > { %p7600_p11 = pnand %p7598_p10, %p7595_p9 }
  0x18   : > { %7603 = shalt.err (!%p7600_p11)
}
  0x19   : > { %s7604_s22 = scalar_lea.vmem %s7926_s19, 64  ;;  %p7612_p1 = scmp.lt.s32.totalorder %s7926_s19, %s7926_s19 }
  0x1a   : > { %p7605_p12 = scmp.ne.s32.totalorder %s7926_s19, %s7604_s22  ;;  %p7613_p4 = scmp.lt.s32.totalorder %s7604_s22, %s7604_s22 }
  0x1c   : > { %p7607_p13 = pnand %p7605_p12, %p7954_p7  ;;  %p7614_p6 = por %p7613_p4, %p7612_p1 }
  0x1e   : > { %p7608_p0 = pneg %p7607_p13 }
  0x20   : > { %p7615_p8 = pnand %p7614_p6, %p7608_p0 }
  0x22   : > { %7618 = shalt.err (!%p7615_p8)
}
  0x23   : > { %6567 = dma.hbm_to_vmem [thread:$0]  (!%p7938_p5), %s8837_s4, 64, %s7926_s19, [#allocation6]  }
  0x24   : > { %s7619_s12 = scalar_lea.hbm %s8839_s6, 64 }
  0x25   : > { %p7620_p9 = scmp.ne.s32.totalorder %s8839_s6, %s7619_s12  ;;  %p7626_p12 = scmp.lt.u32.totalorder %s7619_s12, %s8839_s6 }
  0x27   : > { %p7622_p10 = pnand %p7620_p9, %p7954_p7 }
  0x29   : > { %p7623_p11 = pneg %p7622_p10 }
  0x2b   : > { %p7628_p13 = pnand %p7626_p12, %p7623_p11 }
  0x2d   : > { %7631 = shalt.err (!%p7628_p13)
}
  0x2e   : > { %s7632_s19 = scalar_lea.vmem %s7934_s23, 64  ;;  %p7640_p6 = scmp.lt.s32.totalorder %s7934_s23, %s7934_s23 }
  0x2f   : > { %p7633_p0 = scmp.ne.s32.totalorder %s7934_s23, %s7632_s19  ;;  %p7641_p8 = scmp.lt.s32.totalorder %s7632_s19, %s7632_s19 }
  0x31   : > { %p7635_p1 = pnand %p7633_p0, %p7954_p7  ;;  %p7642_p9 = por %p7641_p8, %p7640_p6 }
  0x33   : > { %p7636_p4 = pneg %p7635_p1 }
  0x35   : > { %p7643_p10 = pnand %p7642_p9, %p7636_p4 }
  0x37   : > { %7646 = shalt.err (!%p7643_p10)
}
  0x38   : > { %6573 = dma.hbm_to_vmem [thread:$0]  (!%p7938_p5), %s8839_s6, 64, %s7934_s23, [#allocation9]  }
  0x39   : > { %s7647_s30 = scalar_lea.hbm %s8841_s8, 8192 }
  0x3a   : > { %p7648_p11 = scmp.ne.s32.totalorder %s8841_s8, %s7647_s30  ;;  %p7654_p0 = scmp.lt.u32.totalorder %s7647_s30, %s8841_s8 }
  0x3c   : > { %p7650_p12 = pnand %p7648_p11, %p7954_p7 }
  0x3e   : > { %p7651_p13 = pneg %p7650_p12 }
  0x40   : > { %p7656_p1 = pnand %p7654_p0, %p7651_p13 }
  0x42   : > { %7659 = shalt.err (!%p7656_p1)
}
  0x43   : > { %s7660_s23 = scalar_lea.vmem %s7942_s26, 8192  ;;  %p7668_p9 = scmp.lt.s32.totalorder %s7942_s26, %s7942_s26 }
  0x44   : > { %p7661_p4 = scmp.ne.s32.totalorder %s7942_s26, %s7660_s23  ;;  %p7669_p10 = scmp.lt.s32.totalorder %s7660_s23, %s7660_s23 }
  0x46   : > { %p7663_p6 = pnand %p7661_p4, %p7954_p7  ;;  %p7670_p11 = por %p7669_p10, %p7668_p9 }
  0x48   : > { %p7664_p8 = pneg %p7663_p6 }
  0x4a   : > { %p7671_p12 = pnand %p7670_p11, %p7664_p8 }
  0x4c   : > { %7674 = shalt.err (!%p7671_p12)
}
  0x4d   : > { %s8847_s18 = smov 256   ;;  %s7848_s19 = smov 16  }
  0x4e   : > { %6579 = dma.hbm_to_vmem [thread:$0]  (!%p7938_p5), %s8841_s8, 8192, %s7942_s26, [#allocation12], %s8847_s18, %s8847_s18, %s7848_s19  }
  0x4f   : > { %s7675_s30 = scalar_lea.hbm %s8836_s3, 64 }
  0x50   : > { %p7676_p13 = scmp.ne.s32.totalorder %s8836_s3, %s7675_s30  ;;  %p7682_p4 = scmp.lt.u32.totalorder %s7675_s30, %s8836_s3 }
  0x52   : > { %p7678_p0 = pnand %p7676_p13, %p7954_p7 }
  0x54   : > { %p7679_p1 = pneg %p7678_p0 }
  0x56   : > { %p7684_p6 = pnand %p7682_p4, %p7679_p1 }
  0x58   : > { %7687 = shalt.err (!%p7684_p6)
}
  0x59   : > { %s7688_s23 = scalar_lea.vmem %s315_s28, 64  ;;  %p7696_p11 = scmp.lt.s32.totalorder %s315_s28, %s315_s28 }
  0x5a   : > { %p7689_p8 = scmp.ne.s32.totalorder %s315_s28, %s7688_s23  ;;  %p7697_p12 = scmp.lt.s32.totalorder %s7688_s23, %s7688_s23 }
  0x5c   : > { %p7691_p9 = pnand %p7689_p8, %p7954_p7  ;;  %p7698_p2 = por %p7697_p12, %p7696_p11 }
  0x5e   : > { %p7692_p10 = pneg %p7691_p9 }
  0x60   : > { %p7699_p3 = pnand %p7698_p2, %p7692_p10 }
  0x62   : > { %7702 = shalt.err (!%p7699_p3)
}
  0x63   : > { %6564 = dma.hbm_to_vmem [thread:$0]  (!%p7938_p5), %s8836_s3, 64, %s315_s28, [#allocation4]  }
  0x64   : > { %s7849_s25 = smov [#allocation7]   ;;  %s7850_s29 = smov [#allocation10]  }
  0x65   : > { %s335_s27 = sshll.u32 %s7849_s25, 4  ;;  %s360_s30 = sshll.u32 %s7850_s29, 4  ;;  %s336_s27 = int_to_ptr.vmem [resolvable:$true] %s335_s27  ;;  %s361_s30 = int_to_ptr.vmem [resolvable:$true] %s360_s30 }
  0x66   : > { %s7703_s14 = scalar_lea.hbm %s8838_s5, 49152 }
  0x67   : > { %p7704_p2 = scmp.ne.s32.totalorder %s8838_s5, %s7703_s14  ;;  %p7710_p0 = scmp.lt.u32.totalorder %s7703_s14, %s8838_s5 }
  0x69   : > { %p7706_p3 = pnand %p7704_p2, %p7954_p7 }
  0x6b   : > { %p7707_p13 = pneg %p7706_p3 }
  0x6d   : > { %p7712_p1 = pnand %p7710_p0, %p7707_p13 }
  0x6f   : > { %7715 = shalt.err (!%p7712_p1)
}
  0x70   : > { %s7716_s28 = scalar_lea.vmem %s336_s27, 49152  ;;  %p7724_p9 = scmp.lt.s32.totalorder %s336_s27, %s336_s27 }
  0x71   : > { %p7717_p4 = scmp.ne.s32.totalorder %s336_s27, %s7716_s28  ;;  %p7725_p10 = scmp.lt.s32.totalorder %s7716_s28, %s7716_s28 }
  0x73   : > { %p7719_p6 = pnand %p7717_p4, %p7954_p7  ;;  %p7726_p11 = por %p7725_p10, %p7724_p9 }
  0x75   : > { %p7720_p8 = pneg %p7719_p6 }
  0x77   : > { %p7727_p12 = pnand %p7726_p11, %p7720_p8 }
  0x79   : > { %7730 = shalt.err (!%p7727_p12)
}
  0x7a   : > { %s8851_s22 = smov 256   ;;  %s7731_s13 = scalar_lea.hbm %s8840_s7, 64 }
  0x7b   : > { %6570 = dma.hbm_to_vmem [thread:$0]  (!%p7938_p5), %s8838_s5, 49152, %s336_s27, [#allocation6], %s8851_s22, %s8851_s22, %s7848_s19  }
  0x7c   : > { %p7732_p2 = scmp.ne.s32.totalorder %s8840_s7, %s7731_s13  ;;  %p7738_p0 = scmp.lt.u32.totalorder %s7731_s13, %s8840_s7 }
  0x7e   : > { %p7734_p3 = pnand %p7732_p2, %p7954_p7 }
  0x80   : > { %p7735_p13 = pneg %p7734_p3 }
  0x82   : > { %p7740_p1 = pnand %p7738_p0, %p7735_p13 }
  0x84   : > { %7743 = shalt.err (!%p7740_p1)
}
  0x85   : > { %s7744_s28 = scalar_lea.vmem %s361_s30, 64  ;;  %p7752_p9 = scmp.lt.s32.totalorder %s361_s30, %s361_s30 }
  0x86   : > { %p7745_p4 = scmp.ne.s32.totalorder %s361_s30, %s7744_s28  ;;  %p7753_p10 = scmp.lt.s32.totalorder %s7744_s28, %s7744_s28 }
  0x88   : > { %p7747_p6 = pnand %p7745_p4, %p7954_p7  ;;  %p7754_p11 = por %p7753_p10, %p7752_p9 }
  0x8a   : > { %p7748_p8 = pneg %p7747_p6 }
  0x8c   : > { %p7755_p12 = pnand %p7754_p11, %p7748_p8 }
  0x8e   : > { %7758 = shalt.err (!%p7755_p12)
}
  0x8f   : > { %6576 = dma.hbm_to_vmem [thread:$0]  (!%p7938_p5), %s8840_s7, 64, %s361_s30, [#allocation9]  }
  0x90   : > { %s7851_s22 = smov [#allocation13]   ;;  %s7852_s25 = smov [#allocation14]  }
  0x91   : > { %s384_s18 = sshll.u32 %s7851_s22, 4  ;;  %s395_s29 = sshll.u32 %s7852_s25, 4  ;;  %s385_s18 = int_to_ptr.vmem [resolvable:$true] %s384_s18  ;;  %s396_s29 = int_to_ptr.vmem [resolvable:$true] %s395_s29 }
  0x92   : > { %s7759_s14 = scalar_lea.hbm %s8842_s9, 64 }
  0x93   : > { %p7760_p2 = scmp.ne.s32.totalorder %s8842_s9, %s7759_s14  ;;  %p7766_p0 = scmp.lt.u32.totalorder %s7759_s14, %s8842_s9 }
  0x95   : > { %p7762_p3 = pnand %p7760_p2, %p7954_p7 }
  0x97   : > { %p7763_p13 = pneg %p7762_p3 }
  0x99   : > { %p7768_p1 = pnand %p7766_p0, %p7763_p13 }
  0x9b   : > { %7771 = shalt.err (!%p7768_p1)
}
  0x9c   : > { %s7772_s30 = scalar_lea.vmem %s385_s18, 64  ;;  %p7780_p9 = scmp.lt.s32.totalorder %s385_s18, %s385_s18 }
  0x9d   : > { %p7773_p4 = scmp.ne.s32.totalorder %s385_s18, %s7772_s30  ;;  %p7781_p10 = scmp.lt.s32.totalorder %s7772_s30, %s7772_s30 }
  0x9f   : > { %p7775_p6 = pnand %p7773_p4, %p7954_p7  ;;  %p7782_p11 = por %p7781_p10, %p7780_p9 }
  0xa1   : > { %p7776_p8 = pneg %p7775_p6 }
  0xa3   : > { %p7783_p12 = pnand %p7782_p11, %p7776_p8 }
  0xa5   : > { %7786 = shalt.err (!%p7783_p12)
}
  0xa6   : > { %6582 = dma.hbm_to_vmem [thread:$0]  (!%p7938_p5), %s8842_s9, 64, %s385_s18, [#allocation12]  }
  0xa7   : > { %s7787_s12 = scalar_lea.hbm %s8843_s10, 64 }
  0xa8   : > { %p7788_p2 = scmp.ne.s32.totalorder %s8843_s10, %s7787_s12  ;;  %p7794_p0 = scmp.lt.u32.totalorder %s7787_s12, %s8843_s10 }
  0xaa   : > { %p7790_p3 = pnand %p7788_p2, %p7954_p7 }
  0xac   : > { %p7791_p13 = pneg %p7790_p3 }
  0xae   : > { %p7796_p1 = pnand %p7794_p0, %p7791_p13 }
  0xb0   : > { %7799 = shalt.err (!%p7796_p1)
}
  0xb1   : > { %s7800_s26 = scalar_lea.vmem %s396_s29, 64  ;;  %p7808_p9 = scmp.lt.s32.totalorder %s396_s29, %s396_s29 }
  0xb2   : > { %p7801_p4 = scmp.ne.s32.totalorder %s396_s29, %s7800_s26  ;;  %p7809_p10 = scmp.lt.s32.totalorder %s7800_s26, %s7800_s26 }
  0xb4   : > { %p7803_p6 = pnand %p7801_p4, %p7954_p7  ;;  %p7810_p11 = por %p7809_p10, %p7808_p9 }
  0xb6   : > { %p7804_p8 = pneg %p7803_p6 }
  0xb8   : > { %p7811_p12 = pnand %p7810_p11, %p7804_p8 }
  0xba   : > { %7814 = shalt.err (!%p7811_p12)
}
  0xbb   : > { %6585 = dma.hbm_to_vmem [thread:$0]  (!%p7938_p5), %s8843_s10, 64, %s396_s29, [#allocation15]  }
  0xbc   : > { %p8852_p2 = scmp.ne.s32.totalorder %s8848_s21, 0 }
  0xbd   : > { %p8853_p3 = scmp.eq.s32.totalorder (!%p8852_p2), %s7921_s20, 0 }
  0xbe   : > { %424 = sbr.rel (%p8852_p2) target bundleno = 1259 (0x4eb), region = 64 }
  0xc5   : > { %7820 = dma.done.wait (%p8853_p3), [#allocation4], 64   ;;  %p8854_p7 = pmov %p8853_p3 }
  0xc6   : > { %p8855_p13 = pmov %p8853_p3 }
  0xc7   : > { %7822 = vsyncadd (%p8854_p7), [#allocation4], 4294967232 }
  0xc8   : > { %7824 = dma.done.wait (%p8855_p13), [#allocation6], 49216   ;;  %p8856_p0 = pmov %p8853_p3 }
  0xca   : > { %7826 = vsyncadd (%p8856_p0), [#allocation6], 4294918080  ;;  %p8857_p1 = pmov %p8856_p0 }
  0xcb   : > { %p8858_p5 = pmov %p8856_p0 }
  0xcc   : > { %7828 = dma.done.wait (%p8857_p1), [#allocation9], 128  }
  0xcd   : > { %7830 = vsyncadd (%p8858_p5), [#allocation9], 4294967168  ;;  %p8859_p4 = pmov %p8856_p0 }
  0xce   : > { %p8860_p6 = pmov %p8856_p0 }
  0xcf   : > { %7832 = dma.done.wait (%p8859_p4), [#allocation12], 8256  }
  0xd0   : > { %7834 = vsyncadd (%p8860_p6), [#allocation12], 4294959040  ;;  %p8861_p8 = pmov %p8856_p0 }
  0xd1   : > { %p8862_p9 = pmov %p8856_p0 }
  0xd2   : > { %7836 = dma.done.wait (%p8861_p8), [#allocation15], 64  }
  0xd3   : > { %7838 = vsyncadd (%p8862_p9), [#allocation15], 4294967232  ;;  %v6622_v0 = vld [vmem:[%s8835_s2 + $0x204] ss:$16 sps:$4 sm:$0xff]   ;;  %v6624_v1 = vld [vmem:[%s8835_s2 + $0x20c] ss:$16 sps:$4 sm:$0xff]  }
  0xd4   : > { %981 = vmatprep.subr.bf16.mxu0 %v6622_v0  ;;  %v6626_v2 = vld [vmem:[%s8835_s2 + $0x200] ss:$16 sps:$4 sm:$0xff]   ;;  %v6627_v3 = vld [vmem:[%s8835_s2 + $0x208] ss:$16 sps:$4 sm:$0xff]   ;;  %1022 = vmatprep.subr.bf16.mxu1 %v6624_v1  ;;  %v6628_v4 = vld [vmem:[%s8835_s2 + $0x224] ss:$16 sps:$4 sm:$0xff]  }
  0xd5   : > { %982 = vmatpush1.bf16.msra.mxu0 %v6626_v2  ;;  %1023 = vmatpush1.bf16.msra.mxu1 %v6627_v3  ;;  %v6630_v5 = vld [vmem:[%s8835_s2 + $0x22c] ss:$16 sps:$4 sm:$0xff]   ;;  %v6632_v6 = vld [vmem:[%s8835_s2 + $0x220] ss:$16 sps:$4 sm:$0xff]   ;;  %v6633_v7 = vld [vmem:[%s8835_s2 + $0x228] ss:$16 sps:$4 sm:$0xff]  }
  0xd6   : > { %983 = vmatprep.subr.bf16.mxu0 %v6628_v4  ;;  %1024 = vmatprep.subr.bf16.mxu1 %v6630_v5  ;;  %v6634_v8 = vld [vmem:[%s8835_s2 + $0x244] ss:$16 sps:$4 sm:$0xff]   ;;  %v6636_v9 = vld [vmem:[%s8835_s2 + $0x24c] ss:$16 sps:$4 sm:$0xff]   ;;  %v6638_v10 = vld [vmem:[%s8835_s2 + $0x240] ss:$16 sps:$4 sm:$0xff]  }
  0xd7   : > { %v6639_v11 = vld [vmem:[%s8835_s2 + $0x248] ss:$16 sps:$4 sm:$0xff]   ;;  %v6640_v12 = vld [vmem:[%s8835_s2 + $0x264] ss:$16 sps:$4 sm:$0xff]   ;;  %v6642_v13 = vld [vmem:[%s8835_s2 + $0x26c] ss:$16 sps:$4 sm:$0xff]  }
  0xd8   : > { %v6644_v14 = vld [vmem:[%s8835_s2 + $0x260] ss:$16 sps:$4 sm:$0xff]   ;;  %v6645_v15 = vld [vmem:[%s8835_s2 + $0x268] ss:$16 sps:$4 sm:$0xff]   ;;  %v6646_v16 = vld [vmem:[%s8835_s2 + $0x284] ss:$16 sps:$4 sm:$0xff]  }
  0xd9   : > { %984 = vmatpush1.bf16.msra.mxu0 %v6632_v6  ;;  %1025 = vmatpush1.bf16.msra.mxu1 %v6633_v7  ;;  %v6648_v17 = vld [vmem:[%s8835_s2 + $0x28c] ss:$16 sps:$4 sm:$0xff]   ;;  %v6650_v18 = vld [vmem:[%s8835_s2 + $0x280] ss:$16 sps:$4 sm:$0xff]   ;;  %v6651_v19 = vld [vmem:[%s8835_s2 + $0x288] ss:$16 sps:$4 sm:$0xff]  }
  0xda   : > { %985 = vmatprep.subr.bf16.mxu0 %v6634_v8  ;;  %1026 = vmatprep.subr.bf16.mxu1 %v6636_v9  ;;  %v6652_v20 = vld [vmem:[%s8835_s2 + $0x2a4] ss:$16 sps:$4 sm:$0xff]   ;;  %v6654_v21 = vld [vmem:[%s8835_s2 + $0x2ac] ss:$16 sps:$4 sm:$0xff]   ;;  %v6656_v22 = vld [vmem:[%s8835_s2 + $0x2a0] ss:$16 sps:$4 sm:$0xff]  }
  0xdb   : > { %v6657_v23 = vld [vmem:[%s8835_s2 + $0x2a8] ss:$16 sps:$4 sm:$0xff]   ;;  %v6658_v24 = vld [vmem:[%s8835_s2 + $0x2c4] ss:$16 sps:$4 sm:$0xff]   ;;  %v6660_v25 = vld [vmem:[%s8835_s2 + $0x2cc] ss:$16 sps:$4 sm:$0xff]  }
  0xdc   : > { %v6662_v26 = vld [vmem:[%s8835_s2 + $0x2c0] ss:$16 sps:$4 sm:$0xff]   ;;  %v6663_v27 = vld [vmem:[%s8835_s2 + $0x2c8] ss:$16 sps:$4 sm:$0xff]   ;;  %v6664_v28 = vld [vmem:[%s8835_s2 + $0x2e4] ss:$16 sps:$4 sm:$0xff]  }
  0xdd   : > { %986 = vmatpush1.bf16.msra.mxu0 %v6638_v10  ;;  %1027 = vmatpush1.bf16.msra.mxu1 %v6639_v11  ;;  %v6666_v29 = vld [vmem:[%s8835_s2 + $0x2ec] ss:$16 sps:$4 sm:$0xff]   ;;  %v6668_v30 = vld [vmem:[%s8835_s2 + $0x2e0] ss:$16 sps:$4 sm:$0xff]   ;;  %v6669_v31 = vld [vmem:[%s8835_s2 + $0x2e8] ss:$16 sps:$4 sm:$0xff]  }
  0xde   : > { %987 = vmatprep.subr.bf16.mxu0 %v6640_v12  ;;  %1028 = vmatprep.subr.bf16.mxu1 %v6642_v13  ;;  %v6670_v32 = vld [vmem:[%s8835_s2 + $0x304] ss:$16 sps:$4 sm:$0xff]   ;;  %v6672_v33 = vld [vmem:[%s8835_s2 + $0x30c] ss:$16 sps:$4 sm:$0xff]   ;;  %p497_p10 = scmp.lt.s32.totalorder %s7921_s20, 1 }
  0xdf   : > { %v6674_v34 = vld [vmem:[%s8835_s2 + $0x300] ss:$16 sps:$4 sm:$0xff]   ;;  %v6675_v35 = vld [vmem:[%s8835_s2 + $0x308] ss:$16 sps:$4 sm:$0xff]   ;;  %v6676_v36 = vld [vmem:[%s8835_s2 + $0x324] ss:$16 sps:$4 sm:$0xff]  }
  0xe0   : > { %v6678_v37 = vld [vmem:[%s8835_s2 + $0x32c] ss:$16 sps:$4 sm:$0xff]   ;;  %s8864_s20 = smov (!%p497_p10, %s7921_s20), 1  ;;  %v6680_v38 = vld [vmem:[%s8835_s2 + $0x320] ss:$16 sps:$4 sm:$0xff]  }
  0xe1   : > { %988 = vmatpush1.bf16.msra.mxu0 %v6644_v14  ;;  %1029 = vmatpush1.bf16.msra.mxu1 %v6645_v15  ;;  %v6681_v39 = vld [vmem:[%s8835_s2 + $0x328] ss:$16 sps:$4 sm:$0xff]   ;;  %v6682_v40 = vld [vmem:[%s8835_s2 + $0x344] ss:$16 sps:$4 sm:$0xff]   ;;  %v6684_v41 = vld [vmem:[%s8835_s2 + $0x34c] ss:$16 sps:$4 sm:$0xff]  }
  0xe2   : > { %989 = vmatprep.subr.bf16.mxu0 %v6646_v16  ;;  %1030 = vmatprep.subr.bf16.mxu1 %v6648_v17  ;;  %s6471_s28 = sshll.u32 %s8864_s20, 2  ;;  %v6686_v42 = vld [vmem:[%s8835_s2 + $0x340] ss:$16 sps:$4 sm:$0xff]   ;;  %v6687_v43 = vld [vmem:[%s8835_s2 + $0x348] ss:$16 sps:$4 sm:$0xff]   ;;  %s6470_s30 = sshll.u32 %s8864_s20, 3 }
  0xe3   : > { %v6688_v44 = vld [vmem:[%s8835_s2 + $0x364] ss:$16 sps:$4 sm:$0xff]   ;;  %s8283_s25 = scalar_lea.vmem %s8834_s1, %s6471_s28  ;;  %v6690_v45 = vld [vmem:[%s8835_s2 + $0x36c] ss:$16 sps:$4 sm:$0xff]   ;;  %v6692_v47 = vld [vmem:[%s8835_s2 + $0x360] ss:$16 sps:$4 sm:$0xff]   ;;  %s8419_s26 = scalar_lea.vmem %s8833_s0, %s6470_s30 }
  0xe4   : > { %v5762_v46 = vld.sshfl [vmem:[%s8283_s25] sm:$0x33 pattern:$0x76325410]  ;;  %v6693_v48 = vld [vmem:[%s8835_s2 + $0x368] ss:$16 sps:$4 sm:$0xff]   ;;  %s511_s27 = scalar_lea.vmem %s8844_s11, %s6470_s30 }
  0xe5   : > { %990 = vmatpush1.bf16.msra.mxu0 %v6650_v18  ;;  %1031 = vmatpush1.bf16.msra.mxu1 %v6651_v19  ;;  %v656_v49 = vcombine.high %v5762_v46, %v5762_v46  ;;  %v6694_v50 = vld [vmem:[%s8835_s2 + $0x384] ss:$16 sps:$4 sm:$0xff]   ;;  %v6696_v51 = vld [vmem:[%s8835_s2 + $0x38c] ss:$16 sps:$4 sm:$0xff]   ;;  %v6698_v53 = vld [vmem:[%s8835_s2 + $0x380] ss:$16 sps:$4 sm:$0xff]   ;;  %v8349_v5 = vpack.c.bf16 %v5762_v46, %v5762_v46 }
  0xe6   : > { %991 = vmatprep.subr.bf16.mxu0 %v6652_v20  ;;  %1032 = vmatprep.subr.bf16.mxu1 %v6654_v21  ;;  %v6699_v54 = vld [vmem:[%s8835_s2 + $0x388] ss:$16 sps:$4 sm:$0xff]   ;;  %v6700_v55 = vld [vmem:[%s8835_s2 + $0x3a4] ss:$16 sps:$4 sm:$0xff]   ;;  %v6702_v56 = vld [vmem:[%s8835_s2 + $0x3ac] ss:$16 sps:$4 sm:$0xff]  }
  0xe7   : > { %v660_v52 = vpack.c.bf16 %v656_v49, %v656_v49  ;;  %v6704_v57 = vld [vmem:[%s8835_s2 + $0x3a0] ss:$16 sps:$4 sm:$0xff]   ;;  %v6705_v58 = vld [vmem:[%s8835_s2 + $0x3a8] ss:$16 sps:$4 sm:$0xff]   ;;  %v6706_v59 = vld [vmem:[%s8835_s2 + $0x3c4] ss:$16 sps:$4 sm:$0xff]  }
  0xe8   : > { %v6708_v60 = vld [vmem:[%s8835_s2 + $0x3cc] ss:$16 sps:$4 sm:$0xff]   ;;  %v6710_v61 = vld [vmem:[%s8835_s2 + $0x3c0] ss:$16 sps:$4 sm:$0xff]   ;;  %v6711_v62 = vld [vmem:[%s8835_s2 + $0x3c8] ss:$16 sps:$4 sm:$0xff]  }
  0xe9   : > { %992 = vmatpush1.bf16.msra.mxu0 %v6656_v22  ;;  %1033 = vmatpush1.bf16.msra.mxu1 %v6657_v23  ;;  %v6712_v63 = vld [vmem:[%s8835_s2 + $0x3e4] ss:$16 sps:$4 sm:$0xff]   ;;  %v6714_v0 = vld [vmem:[%s8835_s2 + $0x3ec] ss:$16 sps:$4 sm:$0xff]   ;;  %v6716_v1 = vld [vmem:[%s8835_s2 + $0x3e0] ss:$16 sps:$4 sm:$0xff]  }
  0xea   : > { %993 = vmatprep.subr.bf16.mxu0 %v6658_v24  ;;  %1034 = vmatprep.subr.bf16.mxu1 %v6660_v25  ;;  %v6717_v2 = vld [vmem:[%s8835_s2 + $0x3e8] ss:$16 sps:$4 sm:$0xff]   ;;  %v6720_v3 = vld [vmem:[%s8835_s2 + $0x4] ss:$16 sps:$4 sm:$0xff]   ;;  %v6723_v4 = vld [vmem:[%s8835_s2 + $0xc] ss:$16 sps:$4 sm:$0xff]  }
  0xeb   : > { %1013 = vmatprep.mubr.bf16.mxu0 %v660_v52  ;;  %1054 = vmatprep.mubr.bf16.mxu1 %v660_v52  ;;  %v6718_v6 = vld [vmem:[%s8835_s2] ss:$16 sps:$4 sm:$0xff]   ;;  %v6721_v7 = vld [vmem:[%s8835_s2 + $0x8] ss:$16 sps:$4 sm:$0xff]   ;;  %v6726_v8 = vld [vmem:[%s8835_s2 + $0x24] ss:$16 sps:$4 sm:$0xff]  }
  0xec   : > { %v6729_v9 = vld [vmem:[%s8835_s2 + $0x2c] ss:$16 sps:$4 sm:$0xff]   ;;  %v6724_v10 = vld [vmem:[%s8835_s2 + $0x20] ss:$16 sps:$4 sm:$0xff]   ;;  %v6727_v11 = vld [vmem:[%s8835_s2 + $0x28] ss:$16 sps:$4 sm:$0xff]  }
  0xed   : > { %994 = vmatpush1.bf16.msra.mxu0 %v6662_v26  ;;  %1035 = vmatpush1.bf16.msra.mxu1 %v6663_v27  ;;  %v6732_v12 = vld [vmem:[%s8835_s2 + $0x44] ss:$16 sps:$4 sm:$0xff]   ;;  %v6735_v13 = vld [vmem:[%s8835_s2 + $0x4c] ss:$16 sps:$4 sm:$0xff]   ;;  %v6730_v14 = vld [vmem:[%s8835_s2 + $0x40] ss:$16 sps:$4 sm:$0xff]  }
  0xee   : > { %995 = vmatprep.subr.bf16.mxu0 %v6664_v28  ;;  %1036 = vmatprep.subr.bf16.mxu1 %v6666_v29  ;;  %v6733_v15 = vld [vmem:[%s8835_s2 + $0x48] ss:$16 sps:$4 sm:$0xff]   ;;  %v6738_v16 = vld [vmem:[%s8835_s2 + $0x64] ss:$16 sps:$4 sm:$0xff]   ;;  %v6741_v17 = vld [vmem:[%s8835_s2 + $0x6c] ss:$16 sps:$4 sm:$0xff]  }
  0xef   : > { %v6736_v18 = vld [vmem:[%s8835_s2 + $0x60] ss:$16 sps:$4 sm:$0xff]   ;;  %v6739_v19 = vld [vmem:[%s8835_s2 + $0x68] ss:$16 sps:$4 sm:$0xff]   ;;  %v6744_v20 = vld [vmem:[%s8835_s2 + $0x84] ss:$16 sps:$4 sm:$0xff]  }
  0xf0   : > { %v6747_v21 = vld [vmem:[%s8835_s2 + $0x8c] ss:$16 sps:$4 sm:$0xff]   ;;  %v6742_v22 = vld [vmem:[%s8835_s2 + $0x80] ss:$16 sps:$4 sm:$0xff]   ;;  %v6745_v23 = vld [vmem:[%s8835_s2 + $0x88] ss:$16 sps:$4 sm:$0xff]  }
  0xf1   : > { %996 = vmatpush1.bf16.msra.mxu0 %v6668_v30  ;;  %1037 = vmatpush1.bf16.msra.mxu1 %v6669_v31  ;;  %v6750_v24 = vld [vmem:[%s8835_s2 + $0xa4] ss:$16 sps:$4 sm:$0xff]   ;;  %v6753_v25 = vld [vmem:[%s8835_s2 + $0xac] ss:$16 sps:$4 sm:$0xff]   ;;  %v6748_v26 = vld [vmem:[%s8835_s2 + $0xa0] ss:$16 sps:$4 sm:$0xff]  }
  0xf2   : > { %997 = vmatprep.subr.bf16.mxu0 %v6670_v32  ;;  %1038 = vmatprep.subr.bf16.mxu1 %v6672_v33  ;;  %v6751_v27 = vld [vmem:[%s8835_s2 + $0xa8] ss:$16 sps:$4 sm:$0xff]   ;;  %v6756_v28 = vld [vmem:[%s8835_s2 + $0xc4] ss:$16 sps:$4 sm:$0xff]   ;;  %v6759_v29 = vld [vmem:[%s8835_s2 + $0xcc] ss:$16 sps:$4 sm:$0xff]  }
  0xf3   : > { %v8434_v30 = vld [vmem:[%s8419_s26] sm:$0x33]  ;;  %v6757_v33 = vld [vmem:[%s8835_s2 + $0xc8] ss:$16 sps:$4 sm:$0xff]   ;;  %v6789_v52 = vld [vmem:[%s8835_s2 + $0x16c] ss:$16 sps:$4 sm:$0xff]  }
  0xf4   : > { %v578_v31 = vcombine.high %v8434_v30, %v8434_v30  ;;  %v6754_v32 = vld [vmem:[%s8835_s2 + $0xc0] ss:$16 sps:$4 sm:$0xff]   ;;  %v6775_v46 = vld [vmem:[%s8835_s2 + $0x128] ss:$16 sps:$4 sm:$0xff]  }
  0xf5   : > { %998 = vmatpush1.bf16.msra.mxu0 %v6674_v34  ;;  %1039 = vmatpush1.bf16.msra.mxu1 %v6675_v35  ;;  %v6762_v34 = vld [vmem:[%s8835_s2 + $0xe4] ss:$16 sps:$4 sm:$0xff]   ;;  %v6778_v49 = vld [vmem:[%s8835_s2 + $0x140] ss:$16 sps:$4 sm:$0xff]  }
  0xf6   : > { %999 = vmatprep.subr.bf16.mxu0 %v6676_v36  ;;  %1040 = vmatprep.subr.bf16.mxu1 %v6678_v37  ;;  %v581_v35 = vpack.c.bf16 %v578_v31, %v578_v31  ;;  %v6765_v36 = vld [vmem:[%s8835_s2 + $0xec] ss:$16 sps:$4 sm:$0xff]   ;;  %v6760_v37 = vld [vmem:[%s8835_s2 + $0xe0] ss:$16 sps:$4 sm:$0xff]   ;;  %v6836_v31 = vld [vmem:[%s8835_s2 + $0x468] ss:$16 sps:$4 sm:$0xff]  }
  0xf9   : > { %1000 = vmatpush1.bf16.msra.mxu0 %v6680_v38  ;;  %1041 = vmatpush1.bf16.msra.mxu1 %v6681_v39  ;;  %v6763_v38 = vld [vmem:[%s8835_s2 + $0xe8] ss:$16 sps:$4 sm:$0xff]   ;;  %v6768_v39 = vld [vmem:[%s8835_s2 + $0x104] ss:$16 sps:$4 sm:$0xff]  }
  0xfa   : > { %1001 = vmatprep.subr.bf16.mxu0 %v6682_v40  ;;  %1042 = vmatprep.subr.bf16.mxu1 %v6684_v41  ;;  %v6771_v40 = vld [vmem:[%s8835_s2 + $0x10c] ss:$16 sps:$4 sm:$0xff]   ;;  %v6766_v41 = vld [vmem:[%s8835_s2 + $0x100] ss:$16 sps:$4 sm:$0xff]  }
  0xfd   : > { %1002 = vmatpush1.bf16.msra.mxu0 %v6686_v42  ;;  %1043 = vmatpush1.bf16.msra.mxu1 %v6687_v43  ;;  %v6769_v42 = vld [vmem:[%s8835_s2 + $0x108] ss:$16 sps:$4 sm:$0xff]   ;;  %v6774_v43 = vld [vmem:[%s8835_s2 + $0x124] ss:$16 sps:$4 sm:$0xff]  }
  0xfe   : > { %1003 = vmatprep.subr.bf16.mxu0 %v6688_v44  ;;  %1044 = vmatprep.subr.bf16.mxu1 %v6690_v45  ;;  %v6777_v44 = vld [vmem:[%s8835_s2 + $0x12c] ss:$16 sps:$4 sm:$0xff]   ;;  %v6772_v45 = vld [vmem:[%s8835_s2 + $0x120] ss:$16 sps:$4 sm:$0xff]  }
 0x101   : > { %1004 = vmatpush1.bf16.msra.mxu0 %v6692_v47  ;;  %1045 = vmatpush1.bf16.msra.mxu1 %v6693_v48  ;;  %v6780_v47 = vld [vmem:[%s8835_s2 + $0x144] ss:$16 sps:$4 sm:$0xff]   ;;  %v6783_v48 = vld [vmem:[%s8835_s2 + $0x14c] ss:$16 sps:$4 sm:$0xff]  }
 0x102   : > { %1005 = vmatprep.subr.bf16.mxu0 %v6694_v50  ;;  %1046 = vmatprep.subr.bf16.mxu1 %v6696_v51  ;;  %v6781_v50 = vld [vmem:[%s8835_s2 + $0x148] ss:$16 sps:$4 sm:$0xff]   ;;  %v6786_v51 = vld [vmem:[%s8835_s2 + $0x164] ss:$16 sps:$4 sm:$0xff]  }
 0x105   : > { %1006 = vmatpush1.bf16.msra.mxu0 %v6698_v53  ;;  %1047 = vmatpush1.bf16.msra.mxu1 %v6699_v54  ;;  %v6784_v53 = vld [vmem:[%s8835_s2 + $0x160] ss:$16 sps:$4 sm:$0xff]   ;;  %v6787_v54 = vld [vmem:[%s8835_s2 + $0x168] ss:$16 sps:$4 sm:$0xff]  }
 0x106   : > { %1007 = vmatprep.subr.bf16.mxu0 %v6700_v55  ;;  %1048 = vmatprep.subr.bf16.mxu1 %v6702_v56  ;;  %v6792_v55 = vld [vmem:[%s8835_s2 + $0x184] ss:$16 sps:$4 sm:$0xff]   ;;  %v6795_v56 = vld [vmem:[%s8835_s2 + $0x18c] ss:$16 sps:$4 sm:$0xff]  }
 0x109   : > { %1008 = vmatpush1.bf16.msra.mxu0 %v6704_v57  ;;  %1049 = vmatpush1.bf16.msra.mxu1 %v6705_v58  ;;  %v6790_v57 = vld [vmem:[%s8835_s2 + $0x180] ss:$16 sps:$4 sm:$0xff]  }
 0x10a   : > { %1009 = vmatprep.subr.bf16.mxu0 %v6706_v59  ;;  %1050 = vmatprep.subr.bf16.mxu1 %v6708_v60  ;;  %v8514_v58 = vld [vmem:[%s8419_s26] sm:$0x66]  ;;  %v6793_v59 = vld [vmem:[%s8835_s2 + $0x188] ss:$16 sps:$4 sm:$0xff]  }
 0x10b   : > { %v6798_v60 = vld [vmem:[%s8835_s2 + $0x1a4] ss:$16 sps:$4 sm:$0xff]  }
 0x10d   : > { %1010 = vmatpush1.bf16.msra.mxu0 %v6710_v61  ;;  %1051 = vmatpush1.bf16.msra.mxu1 %v6711_v62  ;;  %v6801_v61 = vld [vmem:[%s8835_s2 + $0x1ac] ss:$16 sps:$4 sm:$0xff]   ;;  %v1532_v62 = vcombine.high %v8514_v58, %v8514_v58 }
 0x10e   : > { %1011 = vmatprep.subr.bf16.mxu0 %v6712_v63  ;;  %1052 = vmatprep.subr.bf16.mxu1 %v6714_v0  ;;  %v6796_v63 = vld [vmem:[%s8835_s2 + $0x1a0] ss:$16 sps:$4 sm:$0xff]   ;;  %v6799_v0 = vld [vmem:[%s8835_s2 + $0x1a8] ss:$16 sps:$4 sm:$0xff]  }
 0x111   : > { %1012 = vmatpush1.bf16.msra.mxu0 %v6716_v1  ;;  %1053 = vmatpush1.bf16.msra.mxu1 %v6717_v2  ;;  %v6804_v1 = vld [vmem:[%s8835_s2 + $0x1c4] ss:$16 sps:$4 sm:$0xff]   ;;  %v6807_v2 = vld [vmem:[%s8835_s2 + $0x1cc] ss:$16 sps:$4 sm:$0xff]  }
 0x112   : > { %1383 = vmatprep.subr.bf16.mxu0 %v6720_v3  ;;  %1424 = vmatprep.subr.bf16.mxu1 %v6723_v4  ;;  %v1535_v3 = vpack.c.bf16 %v1532_v62, %v1532_v62  ;;  %v6802_v4 = vld [vmem:[%s8835_s2 + $0x1c0] ss:$16 sps:$4 sm:$0xff]   ;;  %v6886_v62 = vld [vmem:[%s8835_s2 + $0x56c] ss:$16 sps:$4 sm:$0xff]  }
 0x114   : > { %1014 = vmatmul.mubr.bf16.vlgmr.msra.gmra.mrb[0].mxu0 %v8349_v5  ;;  %1055 = vmatmul.mubr.bf16.vlgmr.msra.gmra.mrb[0].mxu1 %v8349_v5 }
 0x115   : > { %1384 = vmatpush1.bf16.msra.mxu0 %v6718_v6  ;;  %1425 = vmatpush1.bf16.msra.mxu1 %v6721_v7  ;;  %v6805_v6 = vld [vmem:[%s8835_s2 + $0x1c8] ss:$16 sps:$4 sm:$0xff]   ;;  %v6810_v7 = vld [vmem:[%s8835_s2 + $0x1e4] ss:$16 sps:$4 sm:$0xff]  }
 0x116   : > { %1385 = vmatprep.subr.bf16.mxu0 %v6726_v8  ;;  %1426 = vmatprep.subr.bf16.mxu1 %v6729_v9  ;;  %v6813_v8 = vld [vmem:[%s8835_s2 + $0x1ec] ss:$16 sps:$4 sm:$0xff]   ;;  %v1546_v9 = vshll.u32 %v1535_v3, 16 }
 0x117   : > { %1415 = vmatprep.mubr.bf16.mxu0 %v581_v35  ;;  %1456 = vmatprep.mubr.bf16.mxu1 %v581_v35  ;;  %v6842_v35 = vld [vmem:[%s8835_s2 + $0x488] ss:$16 sps:$4 sm:$0xff]  }
 0x119   : > { %1386 = vmatpush1.bf16.msra.mxu0 %v6724_v10  ;;  %1427 = vmatpush1.bf16.msra.mxu1 %v6727_v11  ;;  %v6808_v10 = vld [vmem:[%s8835_s2 + $0x1e0] ss:$16 sps:$4 sm:$0xff]   ;;  %v6811_v11 = vld [vmem:[%s8835_s2 + $0x1e8] ss:$16 sps:$4 sm:$0xff]  }
 0x11a   : > { %1387 = vmatprep.subr.bf16.mxu0 %v6732_v12  ;;  %1428 = vmatprep.subr.bf16.mxu1 %v6735_v13  ;;  %v6817_v12 = vld [vmem:[%s8835_s2 + $0x404] ss:$16 sps:$4 sm:$0xff]   ;;  %v6820_v13 = vld [vmem:[%s8835_s2 + $0x40c] ss:$16 sps:$4 sm:$0xff]  }
 0x11d   : > { %1388 = vmatpush1.bf16.msra.mxu0 %v6730_v14  ;;  %1429 = vmatpush1.bf16.msra.mxu1 %v6733_v15  ;;  %v1544_v14 = vshrl.u32 %v1535_v3, 16  ;;  %v1548_v15 = vrot.slane %v1546_v9, 1  ;;  %v6887_v3 = vld [vmem:[%s8835_s2 + $0x580] ss:$16 sps:$4 sm:$0xff]   ;;  %v6896_v9 = vld [vmem:[%s8835_s2 + $0x5a8] ss:$16 sps:$4 sm:$0xff]  }
 0x11e   : > { %1389 = vmatprep.subr.bf16.mxu0 %v6738_v16  ;;  %1430 = vmatprep.subr.bf16.mxu1 %v6741_v17  ;;  %v580_v16 = vpack.c.bf16 %v8434_v30, %v8434_v30  ;;  %v6815_v17 = vld [vmem:[%s8835_s2 + $0x400] ss:$16 sps:$4 sm:$0xff]  }
 0x11f   : > { %v6833_v30 = vld [vmem:[%s8835_s2 + $0x460] ss:$16 sps:$4 sm:$0xff]  }
 0x121   : > { %1390 = vmatpush1.bf16.msra.mxu0 %v6736_v18  ;;  %1431 = vmatpush1.bf16.msra.mxu1 %v6739_v19  ;;  %v6818_v18 = vld [vmem:[%s8835_s2 + $0x408] ss:$16 sps:$4 sm:$0xff]   ;;  %v6823_v19 = vld [vmem:[%s8835_s2 + $0x424] ss:$16 sps:$4 sm:$0xff]  }
 0x122   : > { %1391 = vmatprep.subr.bf16.mxu0 %v6744_v20  ;;  %1432 = vmatprep.subr.bf16.mxu1 %v6747_v21  ;;  %v6826_v20 = vld [vmem:[%s8835_s2 + $0x42c] ss:$16 sps:$4 sm:$0xff]   ;;  %v1549_v21 = vor.u32 %v1548_v15, %v1544_v14  ;;  %v6907_v14 = vld [vmem:[%s8835_s2 + $0x5e4] ss:$16 sps:$4 sm:$0xff]  }
 0x123   : > { %v6910_v15 = vld [vmem:[%s8835_s2 + $0x5ec] ss:$16 sps:$4 sm:$0xff]  }
 0x125   : > { %1392 = vmatpush1.bf16.msra.mxu0 %v6742_v22  ;;  %1433 = vmatpush1.bf16.msra.mxu1 %v6745_v23  ;;  %v6821_v22 = vld [vmem:[%s8835_s2 + $0x420] ss:$16 sps:$4 sm:$0xff]   ;;  %v6824_v23 = vld [vmem:[%s8835_s2 + $0x428] ss:$16 sps:$4 sm:$0xff]  }
 0x126   : > { %1393 = vmatprep.subr.bf16.mxu0 %v6750_v24  ;;  %1434 = vmatprep.subr.bf16.mxu1 %v6753_v25  ;;  %v6829_v24 = vld [vmem:[%s8835_s2 + $0x444] ss:$16 sps:$4 sm:$0xff]   ;;  %v6832_v25 = vld [vmem:[%s8835_s2 + $0x44c] ss:$16 sps:$4 sm:$0xff]  }
 0x129   : > { %1394 = vmatpush1.bf16.msra.mxu0 %v6748_v26  ;;  %1435 = vmatpush1.bf16.msra.mxu1 %v6751_v27  ;;  %v6827_v26 = vld [vmem:[%s8835_s2 + $0x440] ss:$16 sps:$4 sm:$0xff]   ;;  %v6830_v27 = vld [vmem:[%s8835_s2 + $0x448] ss:$16 sps:$4 sm:$0xff]  }
 0x12a   : > { %1395 = vmatprep.subr.bf16.mxu0 %v6756_v28  ;;  %1436 = vmatprep.subr.bf16.mxu1 %v6759_v29  ;;  %v6835_v28 = vld [vmem:[%s8835_s2 + $0x464] ss:$16 sps:$4 sm:$0xff]   ;;  %v6838_v29 = vld [vmem:[%s8835_s2 + $0x46c] ss:$16 sps:$4 sm:$0xff]  }
 0x12d   : > { %1396 = vmatpush1.bf16.msra.mxu0 %v6754_v32  ;;  %1437 = vmatpush1.bf16.msra.mxu1 %v6757_v33  ;;  %v6841_v32 = vld [vmem:[%s8835_s2 + $0x484] ss:$16 sps:$4 sm:$0xff]   ;;  %v6844_v33 = vld [vmem:[%s8835_s2 + $0x48c] ss:$16 sps:$4 sm:$0xff]  }
 0x12e   : > { %1397 = vmatprep.subr.bf16.mxu0 %v6762_v34  ;;  %1438 = vmatprep.subr.bf16.mxu1 %v6765_v36  ;;  %v6839_v34 = vld [vmem:[%s8835_s2 + $0x480] ss:$16 sps:$4 sm:$0xff]   ;;  %v6847_v36 = vld [vmem:[%s8835_s2 + $0x4a4] ss:$16 sps:$4 sm:$0xff]  }
 0x131   : > { %1398 = vmatpush1.bf16.msra.mxu0 %v6760_v37  ;;  %1439 = vmatpush1.bf16.msra.mxu1 %v6763_v38  ;;  %v6850_v37 = vld [vmem:[%s8835_s2 + $0x4ac] ss:$16 sps:$4 sm:$0xff]   ;;  %v6845_v38 = vld [vmem:[%s8835_s2 + $0x4a0] ss:$16 sps:$4 sm:$0xff]  }
 0x132   : > { %1399 = vmatprep.subr.bf16.mxu0 %v6768_v39  ;;  %1440 = vmatprep.subr.bf16.mxu1 %v6771_v40  ;;  %v6848_v39 = vld [vmem:[%s8835_s2 + $0x4a8] ss:$16 sps:$4 sm:$0xff]   ;;  %v6853_v40 = vld [vmem:[%s8835_s2 + $0x4c4] ss:$16 sps:$4 sm:$0xff]  }
 0x135   : > { %1400 = vmatpush1.bf16.msra.mxu0 %v6766_v41  ;;  %1441 = vmatpush1.bf16.msra.mxu1 %v6769_v42  ;;  %v6856_v41 = vld [vmem:[%s8835_s2 + $0x4cc] ss:$16 sps:$4 sm:$0xff]   ;;  %v6851_v42 = vld [vmem:[%s8835_s2 + $0x4c0] ss:$16 sps:$4 sm:$0xff]  }
 0x136   : > { %1401 = vmatprep.subr.bf16.mxu0 %v6774_v43  ;;  %1442 = vmatprep.subr.bf16.mxu1 %v6777_v44  ;;  %v6854_v43 = vld [vmem:[%s8835_s2 + $0x4c8] ss:$16 sps:$4 sm:$0xff]   ;;  %v6859_v44 = vld [vmem:[%s8835_s2 + $0x4e4] ss:$16 sps:$4 sm:$0xff]  }
 0x139   : > { %1402 = vmatpush1.bf16.msra.mxu0 %v6772_v45  ;;  %1443 = vmatpush1.bf16.msra.mxu1 %v6775_v46  ;;  %v6862_v45 = vld [vmem:[%s8835_s2 + $0x4ec] ss:$16 sps:$4 sm:$0xff]   ;;  %v6857_v46 = vld [vmem:[%s8835_s2 + $0x4e0] ss:$16 sps:$4 sm:$0xff]  }
 0x13a   : > { %1403 = vmatprep.subr.bf16.mxu0 %v6780_v47  ;;  %1444 = vmatprep.subr.bf16.mxu1 %v6783_v48  ;;  %v6860_v47 = vld [vmem:[%s8835_s2 + $0x4e8] ss:$16 sps:$4 sm:$0xff]   ;;  %v6865_v48 = vld [vmem:[%s8835_s2 + $0x504] ss:$16 sps:$4 sm:$0xff]  }
 0x13d   : > { %1404 = vmatpush1.bf16.msra.mxu0 %v6778_v49  ;;  %1445 = vmatpush1.bf16.msra.mxu1 %v6781_v50  ;;  %v6868_v49 = vld [vmem:[%s8835_s2 + $0x50c] ss:$16 sps:$4 sm:$0xff]   ;;  %v6863_v50 = vld [vmem:[%s8835_s2 + $0x500] ss:$16 sps:$4 sm:$0xff]  }
 0x13e   : > { %1405 = vmatprep.subr.bf16.mxu0 %v6786_v51  ;;  %1446 = vmatprep.subr.bf16.mxu1 %v6789_v52  ;;  %v6866_v51 = vld [vmem:[%s8835_s2 + $0x508] ss:$16 sps:$4 sm:$0xff]   ;;  %v6871_v52 = vld [vmem:[%s8835_s2 + $0x524] ss:$16 sps:$4 sm:$0xff]  }
 0x141   : > { %1406 = vmatpush1.bf16.msra.mxu0 %v6784_v53  ;;  %1447 = vmatpush1.bf16.msra.mxu1 %v6787_v54  ;;  %v6874_v53 = vld [vmem:[%s8835_s2 + $0x52c] ss:$16 sps:$4 sm:$0xff]   ;;  %v6869_v54 = vld [vmem:[%s8835_s2 + $0x520] ss:$16 sps:$4 sm:$0xff]  }
 0x142   : > { %1407 = vmatprep.subr.bf16.mxu0 %v6792_v55  ;;  %1448 = vmatprep.subr.bf16.mxu1 %v6795_v56  ;;  %v6872_v55 = vld [vmem:[%s8835_s2 + $0x528] ss:$16 sps:$4 sm:$0xff]   ;;  %v6877_v56 = vld [vmem:[%s8835_s2 + $0x544] ss:$16 sps:$4 sm:$0xff]  }
 0x145   : > { %1408 = vmatpush1.bf16.msra.mxu0 %v6790_v57  ;;  %1449 = vmatpush1.bf16.msra.mxu1 %v6793_v59  ;;  %v6880_v57 = vld [vmem:[%s8835_s2 + $0x54c] ss:$16 sps:$4 sm:$0xff]   ;;  %v6875_v59 = vld [vmem:[%s8835_s2 + $0x540] ss:$16 sps:$4 sm:$0xff]  }
 0x146   : > { %1409 = vmatprep.subr.bf16.mxu0 %v6798_v60  ;;  %1450 = vmatprep.subr.bf16.mxu1 %v6801_v61  ;;  %v6878_v60 = vld [vmem:[%s8835_s2 + $0x548] ss:$16 sps:$4 sm:$0xff]   ;;  %v6883_v61 = vld [vmem:[%s8835_s2 + $0x564] ss:$16 sps:$4 sm:$0xff]  }
 0x149   : > { %1410 = vmatpush1.bf16.msra.mxu0 %v6796_v63  ;;  %1451 = vmatpush1.bf16.msra.mxu1 %v6799_v0  ;;  %v6881_v63 = vld [vmem:[%s8835_s2 + $0x560] ss:$16 sps:$4 sm:$0xff]   ;;  %v6884_v0 = vld [vmem:[%s8835_s2 + $0x568] ss:$16 sps:$4 sm:$0xff]  }
 0x14a   : > { %1411 = vmatprep.subr.bf16.mxu0 %v6804_v1  ;;  %1452 = vmatprep.subr.bf16.mxu1 %v6807_v2  ;;  %v6889_v1 = vld [vmem:[%s8835_s2 + $0x584] ss:$16 sps:$4 sm:$0xff]   ;;  %v6892_v2 = vld [vmem:[%s8835_s2 + $0x58c] ss:$16 sps:$4 sm:$0xff]  }
 0x14d   : > { %1412 = vmatpush1.bf16.msra.mxu0 %v6802_v4  ;;  %1453 = vmatpush1.bf16.msra.mxu1 %v6805_v6  ;;  %v6890_v4 = vld [vmem:[%s8835_s2 + $0x588] ss:$16 sps:$4 sm:$0xff]   ;;  %v6895_v6 = vld [vmem:[%s8835_s2 + $0x5a4] ss:$16 sps:$4 sm:$0xff]  }
 0x14e   : > { %1413 = vmatprep.subr.bf16.mxu0 %v6810_v7  ;;  %1454 = vmatprep.subr.bf16.mxu1 %v6813_v8  ;;  %v6898_v7 = vld [vmem:[%s8835_s2 + $0x5ac] ss:$16 sps:$4 sm:$0xff]   ;;  %v6893_v8 = vld [vmem:[%s8835_s2 + $0x5a0] ss:$16 sps:$4 sm:$0xff]  }
 0x151   : > { %1414 = vmatpush1.bf16.msra.mxu0 %v6808_v10  ;;  %1455 = vmatpush1.bf16.msra.mxu1 %v6811_v11  ;;  %v1534_v10 = vpack.c.bf16 %v8514_v58, %v8514_v58  ;;  %v6901_v11 = vld [vmem:[%s8835_s2 + $0x5c4] ss:$16 sps:$4 sm:$0xff]   ;;  %v6902_v58 = vld [vmem:[%s8835_s2 + $0x5c8] ss:$16 sps:$4 sm:$0xff]  }
 0x152   : > { %1872 = vmatprep.subr.bf16.mxu0 %v6817_v12  ;;  %1913 = vmatprep.subr.bf16.mxu1 %v6820_v13  ;;  %v6904_v12 = vld [vmem:[%s8835_s2 + $0x5cc] ss:$16 sps:$4 sm:$0xff]   ;;  %v6899_v13 = vld [vmem:[%s8835_s2 + $0x5c0] ss:$16 sps:$4 sm:$0xff]  }
 0x154   : > { %1416 = vmatmul.mubr.bf16.vlgmr.msra.gmra.mrb[0].mxu0 %v580_v16  ;;  %1457 = vmatmul.mubr.bf16.vlgmr.msra.gmra.mrb[0].mxu1 %v580_v16  ;;  %v1539_v16 = vshll.u32 %v1534_v10, 16 }
 0x155   : > { %1873 = vmatpush1.bf16.msra.mxu0 %v6815_v17  ;;  %1914 = vmatpush1.bf16.msra.mxu1 %v6818_v18  ;;  %v6905_v17 = vld [vmem:[%s8835_s2 + $0x5e0] ss:$16 sps:$4 sm:$0xff]   ;;  %v6908_v18 = vld [vmem:[%s8835_s2 + $0x5e8] ss:$16 sps:$4 sm:$0xff]  }
 0x156   : > { %1874 = vmatprep.subr.bf16.mxu0 %v6823_v19  ;;  %1915 = vmatprep.subr.bf16.mxu1 %v6826_v20  ;;  %v1537_v19 = vshrl.u32 %v1534_v10, 16  ;;  %v1541_v20 = vrot.slane %v1539_v16, 1  ;;  %v6986_v10 = vld [vmem:[#allocation7 + $0x584] ss:$16 sps:$4 sm:$0xff]  }
 0x157   : > { %1904 = vmatprep.mubr.bf16.mxu0 %v1549_v21  ;;  %1945 = vmatprep.mubr.bf16.mxu1 %v1549_v21  ;;  %v6914_v21 = vld [vmem:[#allocation7 + $0x404] ss:$16 sps:$4 sm:$0xff]  }
 0x158   : > { %v6998_v16 = vld [vmem:[#allocation7 + $0x5c4] ss:$16 sps:$4 sm:$0xff]  }
 0x159   : > { %1875 = vmatpush1.bf16.msra.mxu0 %v6821_v22  ;;  %1916 = vmatpush1.bf16.msra.mxu1 %v6824_v23  ;;  %v6917_v22 = vld [vmem:[#allocation7 + $0x40c] ss:$16 sps:$4 sm:$0xff]   ;;  %v6912_v23 = vld [vmem:[#allocation7 + $0x400] ss:$16 sps:$4 sm:$0xff]  }
 0x15a   : > { %1876 = vmatprep.subr.bf16.mxu0 %v6829_v24  ;;  %1917 = vmatprep.subr.bf16.mxu1 %v6832_v25  ;;  %v6915_v24 = vld [vmem:[#allocation7 + $0x408] ss:$16 sps:$4 sm:$0xff]   ;;  %v1542_v25 = vor.u32 %v1541_v20, %v1537_v19  ;;  %v7004_v20 = vld [vmem:[#allocation7 + $0x5e4] ss:$16 sps:$4 sm:$0xff]  }
 0x15b   : > { %v6999_v19 = vld [vmem:[#allocation7 + $0x5c8] ss:$16 sps:$4 sm:$0xff]  }
 0x15d   : > { %1877 = vmatpush1.bf16.msra.mxu0 %v6827_v26  ;;  %1918 = vmatpush1.bf16.msra.mxu1 %v6830_v27  ;;  %v6920_v26 = vld [vmem:[#allocation7 + $0x424] ss:$16 sps:$4 sm:$0xff]   ;;  %v6923_v27 = vld [vmem:[#allocation7 + $0x42c] ss:$16 sps:$4 sm:$0xff]  }
 0x15e   : > { %1878 = vmatprep.subr.bf16.mxu0 %v6835_v28  ;;  %1919 = vmatprep.subr.bf16.mxu1 %v6838_v29  ;;  %v6918_v28 = vld [vmem:[#allocation7 + $0x420] ss:$16 sps:$4 sm:$0xff]   ;;  %v6921_v29 = vld [vmem:[#allocation7 + $0x428] ss:$16 sps:$4 sm:$0xff]  }
 0x161   : > { %1879 = vmatpush1.bf16.msra.mxu0 %v6833_v30  ;;  %1920 = vmatpush1.bf16.msra.mxu1 %v6836_v31  ;;  %v6926_v30 = vld [vmem:[#allocation7 + $0x444] ss:$16 sps:$4 sm:$0xff]   ;;  %v6929_v31 = vld [vmem:[#allocation7 + $0x44c] ss:$16 sps:$4 sm:$0xff]  }
 0x162   : > { %1880 = vmatprep.subr.bf16.mxu0 %v6841_v32  ;;  %1921 = vmatprep.subr.bf16.mxu1 %v6844_v33  ;;  %v6924_v32 = vld [vmem:[#allocation7 + $0x440] ss:$16 sps:$4 sm:$0xff]   ;;  %v6927_v33 = vld [vmem:[#allocation7 + $0x448] ss:$16 sps:$4 sm:$0xff]  }
 0x165   : > { %1881 = vmatpush1.bf16.msra.mxu0 %v6839_v34  ;;  %1922 = vmatpush1.bf16.msra.mxu1 %v6842_v35  ;;  %v6932_v34 = vld [vmem:[#allocation7 + $0x464] ss:$16 sps:$4 sm:$0xff]   ;;  %v6935_v35 = vld [vmem:[#allocation7 + $0x46c] ss:$16 sps:$4 sm:$0xff]  }
 0x166   : > { %1882 = vmatprep.subr.bf16.mxu0 %v6847_v36  ;;  %1923 = vmatprep.subr.bf16.mxu1 %v6850_v37  ;;  %v6930_v36 = vld [vmem:[#allocation7 + $0x460] ss:$16 sps:$4 sm:$0xff]   ;;  %v6933_v37 = vld [vmem:[#allocation7 + $0x468] ss:$16 sps:$4 sm:$0xff]  }
 0x169   : > { %1883 = vmatpush1.bf16.msra.mxu0 %v6845_v38  ;;  %1924 = vmatpush1.bf16.msra.mxu1 %v6848_v39  ;;  %v6938_v38 = vld [vmem:[#allocation7 + $0x484] ss:$16 sps:$4 sm:$0xff]   ;;  %v6941_v39 = vld [vmem:[#allocation7 + $0x48c] ss:$16 sps:$4 sm:$0xff]  }
 0x16a   : > { %1884 = vmatprep.subr.bf16.mxu0 %v6853_v40  ;;  %1925 = vmatprep.subr.bf16.mxu1 %v6856_v41  ;;  %v6936_v40 = vld [vmem:[#allocation7 + $0x480] ss:$16 sps:$4 sm:$0xff]   ;;  %v6939_v41 = vld [vmem:[#allocation7 + $0x488] ss:$16 sps:$4 sm:$0xff]  }
 0x16d   : > { %1885 = vmatpush1.bf16.msra.mxu0 %v6851_v42  ;;  %1926 = vmatpush1.bf16.msra.mxu1 %v6854_v43  ;;  %v6944_v42 = vld [vmem:[#allocation7 + $0x4a4] ss:$16 sps:$4 sm:$0xff]   ;;  %v6947_v43 = vld [vmem:[#allocation7 + $0x4ac] ss:$16 sps:$4 sm:$0xff]  }
 0x16e   : > { %1886 = vmatprep.subr.bf16.mxu0 %v6859_v44  ;;  %1927 = vmatprep.subr.bf16.mxu1 %v6862_v45  ;;  %v6942_v44 = vld [vmem:[#allocation7 + $0x4a0] ss:$16 sps:$4 sm:$0xff]   ;;  %v6945_v45 = vld [vmem:[#allocation7 + $0x4a8] ss:$16 sps:$4 sm:$0xff]  }
 0x171   : > { %1887 = vmatpush1.bf16.msra.mxu0 %v6857_v46  ;;  %1928 = vmatpush1.bf16.msra.mxu1 %v6860_v47  ;;  %v6950_v46 = vld [vmem:[#allocation7 + $0x4c4] ss:$16 sps:$4 sm:$0xff]   ;;  %v6953_v47 = vld [vmem:[#allocation7 + $0x4cc] ss:$16 sps:$4 sm:$0xff]  }
 0x172   : > { %1888 = vmatprep.subr.bf16.mxu0 %v6865_v48  ;;  %1929 = vmatprep.subr.bf16.mxu1 %v6868_v49  ;;  %v6948_v48 = vld [vmem:[#allocation7 + $0x4c0] ss:$16 sps:$4 sm:$0xff]   ;;  %v6951_v49 = vld [vmem:[#allocation7 + $0x4c8] ss:$16 sps:$4 sm:$0xff]  }
 0x175   : > { %1889 = vmatpush1.bf16.msra.mxu0 %v6863_v50  ;;  %1930 = vmatpush1.bf16.msra.mxu1 %v6866_v51  ;;  %v6956_v50 = vld [vmem:[#allocation7 + $0x4e4] ss:$16 sps:$4 sm:$0xff]   ;;  %v6959_v51 = vld [vmem:[#allocation7 + $0x4ec] ss:$16 sps:$4 sm:$0xff]  }
 0x176   : > { %1890 = vmatprep.subr.bf16.mxu0 %v6871_v52  ;;  %1931 = vmatprep.subr.bf16.mxu1 %v6874_v53  ;;  %v6954_v52 = vld [vmem:[#allocation7 + $0x4e0] ss:$16 sps:$4 sm:$0xff]   ;;  %v6957_v53 = vld [vmem:[#allocation7 + $0x4e8] ss:$16 sps:$4 sm:$0xff]  }
 0x179   : > { %1891 = vmatpush1.bf16.msra.mxu0 %v6869_v54  ;;  %1932 = vmatpush1.bf16.msra.mxu1 %v6872_v55  ;;  %v6962_v54 = vld [vmem:[#allocation7 + $0x504] ss:$16 sps:$4 sm:$0xff]   ;;  %v6965_v55 = vld [vmem:[#allocation7 + $0x50c] ss:$16 sps:$4 sm:$0xff]  }
 0x17a   : > { %1892 = vmatprep.subr.bf16.mxu0 %v6877_v56  ;;  %1933 = vmatprep.subr.bf16.mxu1 %v6880_v57  ;;  %v6960_v56 = vld [vmem:[#allocation7 + $0x500] ss:$16 sps:$4 sm:$0xff]   ;;  %v6963_v57 = vld [vmem:[#allocation7 + $0x508] ss:$16 sps:$4 sm:$0xff]  }
 0x17d   : > { %1893 = vmatpush1.bf16.msra.mxu0 %v6875_v59  ;;  %1934 = vmatpush1.bf16.msra.mxu1 %v6878_v60  ;;  %v6968_v59 = vld [vmem:[#allocation7 + $0x524] ss:$16 sps:$4 sm:$0xff]   ;;  %v6971_v60 = vld [vmem:[#allocation7 + $0x52c] ss:$16 sps:$4 sm:$0xff]  }
 0x17e   : > { %1894 = vmatprep.subr.bf16.mxu0 %v6883_v61  ;;  %1935 = vmatprep.subr.bf16.mxu1 %v6886_v62  ;;  %v6966_v61 = vld [vmem:[#allocation7 + $0x520] ss:$16 sps:$4 sm:$0xff]   ;;  %v6969_v62 = vld [vmem:[#allocation7 + $0x528] ss:$16 sps:$4 sm:$0xff]  }
 0x181   : > { %1895 = vmatpush1.bf16.msra.mxu0 %v6881_v63  ;;  %1936 = vmatpush1.bf16.msra.mxu1 %v6884_v0  ;;  %v6974_v63 = vld [vmem:[#allocation7 + $0x544] ss:$16 sps:$4 sm:$0xff]   ;;  %v6977_v0 = vld [vmem:[#allocation7 + $0x54c] ss:$16 sps:$4 sm:$0xff]  }
 0x182   : > { %1896 = vmatprep.subr.bf16.mxu0 %v6889_v1  ;;  %1937 = vmatprep.subr.bf16.mxu1 %v6892_v2  ;;  %v6972_v1 = vld [vmem:[#allocation7 + $0x540] ss:$16 sps:$4 sm:$0xff]   ;;  %v6975_v2 = vld [vmem:[#allocation7 + $0x548] ss:$16 sps:$4 sm:$0xff]  }
 0x185   : > { %1897 = vmatpush1.bf16.msra.mxu0 %v6887_v3  ;;  %1938 = vmatpush1.bf16.msra.mxu1 %v6890_v4  ;;  %v7853_v3 = vmov 0.0   ;;  %v6980_v4 = vld [vmem:[#allocation7 + $0x564] ss:$16 sps:$4 sm:$0xff]  }
 0x186   : > { %1898 = vmatprep.subr.bf16.mxu0 %v6895_v6  ;;  %1939 = vmatprep.subr.bf16.mxu1 %v6898_v7  ;;  %2014 = vst [vmem:[#allocation2] sm:$0xff] %v7853_v3  ;;  %2015 = vst [vmem:[#allocation2 + $0x8] sm:$0xff] %v7853_v3  ;;  %v6983_v6 = vld [vmem:[#allocation7 + $0x56c] ss:$16 sps:$4 sm:$0xff]   ;;  %v6978_v7 = vld [vmem:[#allocation7 + $0x560] ss:$16 sps:$4 sm:$0xff]  }
 0x189   : > { %1899 = vmatpush1.bf16.msra.mxu0 %v6893_v8  ;;  %1940 = vmatpush1.bf16.msra.mxu1 %v6896_v9  ;;  %v6981_v8 = vld [vmem:[#allocation7 + $0x568] ss:$16 sps:$4 sm:$0xff]   ;;  %v6984_v9 = vld [vmem:[#allocation7 + $0x580] ss:$16 sps:$4 sm:$0xff]  }
 0x18a   : > { %1900 = vmatprep.subr.bf16.mxu0 %v6901_v11  ;;  %1941 = vmatprep.subr.bf16.mxu1 %v6904_v12  ;;  %v6987_v11 = vld [vmem:[#allocation7 + $0x588] ss:$16 sps:$4 sm:$0xff]   ;;  %v6989_v12 = vld [vmem:[#allocation7 + $0x58c] ss:$16 sps:$4 sm:$0xff]  }
 0x18d   : > { %1901 = vmatpush1.bf16.msra.mxu0 %v6899_v13  ;;  %1942 = vmatpush1.bf16.msra.mxu1 %v6902_v58  ;;  %v6992_v13 = vld [vmem:[#allocation7 + $0x5a4] ss:$16 sps:$4 sm:$0xff]   ;;  %v6995_v58 = vld [vmem:[#allocation7 + $0x5ac] ss:$16 sps:$4 sm:$0xff]  }
 0x18e   : > { %1902 = vmatprep.subr.bf16.mxu0 %v6907_v14  ;;  %1943 = vmatprep.subr.bf16.mxu1 %v6910_v15  ;;  %v6990_v14 = vld [vmem:[#allocation7 + $0x5a0] ss:$16 sps:$4 sm:$0xff]   ;;  %v6993_v15 = vld [vmem:[#allocation7 + $0x5a8] ss:$16 sps:$4 sm:$0xff]  }
 0x191   : > { %1903 = vmatpush1.bf16.msra.mxu0 %v6905_v17  ;;  %1944 = vmatpush1.bf16.msra.mxu1 %v6908_v18  ;;  %v6996_v17 = vld [vmem:[#allocation7 + $0x5c0] ss:$16 sps:$4 sm:$0xff]   ;;  %v7001_v18 = vld [vmem:[#allocation7 + $0x5cc] ss:$16 sps:$4 sm:$0xff]  }
 0x192   : > { %2981 = vmatprep.subr.bf16.mxu0 %v6914_v21  ;;  %3063 = vmatprep.subr.bf16.mxu1 %v6917_v22  ;;  %v7007_v21 = vld [vmem:[#allocation7 + $0x5ec] ss:$16 sps:$4 sm:$0xff]   ;;  %v7002_v22 = vld [vmem:[#allocation7 + $0x5e0] ss:$16 sps:$4 sm:$0xff]  }
 0x194   : > { %1905 = vmatmul.mubr.bf16.vlgmr.msra.gmra.mrb[0].mxu0 %v1542_v25  ;;  %1946 = vmatmul.mubr.bf16.vlgmr.msra.gmra.mrb[0].mxu1 %v1542_v25  ;;  %v7014_v25 = vld [vmem:[#allocation7 + $0x60c] ss:$16 sps:$4 sm:$0xff]  }
 0x195   : > { %2982 = vmatpush1.bf16.msra.mxu0 %v6912_v23  ;;  %3064 = vmatpush1.bf16.msra.mxu1 %v6915_v24  ;;  %v7005_v23 = vld [vmem:[#allocation7 + $0x5e8] ss:$16 sps:$4 sm:$0xff]   ;;  %v7011_v24 = vld [vmem:[#allocation7 + $0x604] ss:$16 sps:$4 sm:$0xff]  }
 0x196   : > { %2983 = vmatprep.subr.bf16.mxu0 %v6920_v26  ;;  %3065 = vmatprep.subr.bf16.mxu1 %v6923_v27  ;;  %v1960_v26 = vlaneseq }
 0x198   : > { %v8753_v27 = vshrl.u32 %v1960_v26, 7  ;;  %v7016_v26 = vld [vmem:[#allocation7 + $0x620] ss:$16 sps:$4 sm:$0xff]  }
 0x199   : > { %2984 = vmatpush1.bf16.msra.mxu0 %v6918_v28  ;;  %3066 = vmatpush1.bf16.msra.mxu1 %v6921_v29 }
 0x19a   : > { %2985 = vmatprep.subr.bf16.mxu0 %v6926_v30  ;;  %3067 = vmatprep.subr.bf16.mxu1 %v6929_v31  ;;  %v8756_v28 = vsub.s32 0, %v8753_v27  ;;  %v8759_v29 = vsub.s32 2, %v8753_v27  ;;  %v1958_v30 = vld [vmem:[#allocation3] sm:$0xf]  ;;  %v8762_v31 = vsub.s32 1, %v8753_v27 }
 0x19d   : > { %2986 = vmatpush1.bf16.msra.mxu0 %v6924_v32  ;;  %3068 = vmatpush1.bf16.msra.mxu1 %v6927_v33  ;;  %v8765_v32 = vsub.s32 3, %v8753_v27  ;;  %v1984_v33 = vld [vmem:[#allocation5] sm:$0xf] }
 0x19e   : > { %2987 = vmatprep.subr.bf16.mxu0 %v6932_v34  ;;  %3069 = vmatprep.subr.bf16.mxu1 %v6935_v35  ;;  %v1963_v34 = vrot.slane %v1958_v30, %v8756_v28  ;;  %v1971_v35 = vrot.slane %v1958_v30, %v8759_v29 }
 0x1a1   : > { %2988 = vmatpush1.bf16.msra.mxu0 %v6930_v36  ;;  %3070 = vmatpush1.bf16.msra.mxu1 %v6933_v37  ;;  %v1967_v36 = vrot.slane %v1958_v30, %v8762_v31  ;;  %v1975_v37 = vrot.slane %v1958_v30, %v8765_v32  ;;  %v7019_v30 = vld [vmem:[#allocation7 + $0x628] ss:$16 sps:$4 sm:$0xff]  }
 0x1a2   : > { %2989 = vmatprep.subr.bf16.mxu0 %v6938_v38  ;;  %3071 = vmatprep.subr.bf16.mxu1 %v6941_v39  ;;  %v1989_v38 = vrot.slane %v1984_v33, %v8756_v28  ;;  %v1997_v39 = vrot.slane %v1984_v33, %v8759_v29 }
 0x1a5   : > { %2990 = vmatpush1.bf16.msra.mxu0 %v6936_v40  ;;  %3072 = vmatpush1.bf16.msra.mxu1 %v6939_v41 }
 0x1a6   : > { %2991 = vmatprep.subr.bf16.mxu0 %v6944_v42  ;;  %3073 = vmatprep.subr.bf16.mxu1 %v6947_v43  ;;  %v1993_v42 = vrot.slane %v1984_v33, %v8762_v31  ;;  %v2001_v43 = vrot.slane %v1984_v33, %v8765_v32  ;;  %v7024_v33 = vld [vmem:[#allocation7 + $0x644] ss:$16 sps:$4 sm:$0xff]  }
 0x1a9   : > { %2992 = vmatpush1.bf16.msra.mxu0 %v6942_v44  ;;  %3074 = vmatpush1.bf16.msra.mxu1 %v6945_v45 }
 0x1aa   : > { %2993 = vmatprep.subr.bf16.mxu0 %v6950_v46  ;;  %3075 = vmatprep.subr.bf16.mxu1 %v6953_v47 }
 0x1ad   : > { %2994 = vmatpush1.bf16.msra.mxu0 %v6948_v48  ;;  %3076 = vmatpush1.bf16.msra.mxu1 %v6951_v49 }
 0x1ae   : > { %2995 = vmatprep.subr.bf16.mxu0 %v6956_v50  ;;  %3077 = vmatprep.subr.bf16.mxu1 %v6959_v51 }
 0x1b1   : > { %2996 = vmatpush1.bf16.msra.mxu0 %v6954_v52  ;;  %3078 = vmatpush1.bf16.msra.mxu1 %v6957_v53 }
 0x1b2   : > { %2997 = vmatprep.subr.bf16.mxu0 %v6962_v54  ;;  %3079 = vmatprep.subr.bf16.mxu1 %v6965_v55 }
 0x1b5   : > { %2998 = vmatpush1.bf16.msra.mxu0 %v6960_v56  ;;  %3080 = vmatpush1.bf16.msra.mxu1 %v6963_v57 }
 0x1b6   : > { %2999 = vmatprep.subr.bf16.mxu0 %v6968_v59  ;;  %3081 = vmatprep.subr.bf16.mxu1 %v6971_v60 }
 0x1b9   : > { %3000 = vmatpush1.bf16.msra.mxu0 %v6966_v61  ;;  %3082 = vmatpush1.bf16.msra.mxu1 %v6969_v62 }
 0x1ba   : > { %3001 = vmatprep.subr.bf16.mxu0 %v6974_v63  ;;  %3083 = vmatprep.subr.bf16.mxu1 %v6977_v0 }
 0x1bd   : > { %3002 = vmatpush1.bf16.msra.mxu0 %v6972_v1  ;;  %3084 = vmatpush1.bf16.msra.mxu1 %v6975_v2 }
 0x1be   : > { %3003 = vmatprep.subr.bf16.mxu0 %v6980_v4  ;;  %3085 = vmatprep.subr.bf16.mxu1 %v6983_v6 }
 0x1c1   : > { %3004 = vmatpush1.bf16.msra.mxu0 %v6978_v7  ;;  %3086 = vmatpush1.bf16.msra.mxu1 %v6981_v8 }
 0x1c2   : > { %3005 = vmatprep.subr.bf16.mxu0 %v6986_v10  ;;  %3087 = vmatprep.subr.bf16.mxu1 %v6989_v12 }
 0x1c5   : > { %3006 = vmatpush1.bf16.msra.mxu0 %v6984_v9  ;;  %3088 = vmatpush1.bf16.msra.mxu1 %v6987_v11 }
 0x1c6   : > { %3007 = vmatprep.subr.bf16.mxu0 %v6992_v13  ;;  %3089 = vmatprep.subr.bf16.mxu1 %v6995_v58 }
 0x1c9   : > { %3008 = vmatpush1.bf16.msra.mxu0 %v6990_v14  ;;  %3090 = vmatpush1.bf16.msra.mxu1 %v6993_v15 }
 0x1ca   : > { %3009 = vmatprep.subr.bf16.mxu0 %v6998_v16  ;;  %3091 = vmatprep.subr.bf16.mxu1 %v7001_v18 }
 0x1cd   : > { %3010 = vmatpush1.bf16.msra.mxu0 %v6996_v17  ;;  %3092 = vmatpush1.bf16.msra.mxu1 %v6999_v19  ;;  %v7009_v19 = vld [vmem:[#allocation7 + $0x600] ss:$16 sps:$4 sm:$0xff]  }
 0x1ce   : > { %3011 = vmatprep.subr.bf16.mxu0 %v7004_v20  ;;  %3093 = vmatprep.subr.bf16.mxu1 %v7007_v21  ;;  %v7012_v20 = vld [vmem:[#allocation7 + $0x608] ss:$16 sps:$4 sm:$0xff]  }
 0x1d1   : > { %3012 = vmatpush1.bf16.msra.mxu0 %v7002_v22  ;;  %3094 = vmatpush1.bf16.msra.mxu1 %v7005_v23  ;;  %v7018_v23 = vld [vmem:[#allocation7 + $0x624] ss:$16 sps:$4 sm:$0xff]  }
 0x1d2   : > { %3022 = vmatprep.subr.bf16.mxu0 %v7011_v24  ;;  %3104 = vmatprep.subr.bf16.mxu1 %v7014_v25  ;;  %v7021_v24 = vld [vmem:[#allocation7 + $0x62c] ss:$16 sps:$4 sm:$0xff]  }
 0x267   : > { %v1906_v40 = vpop.f32.mrb[0].mxu0  ;;  %v1947_v41 = vpop.f32.mrb[0].mxu1 }
 0x268   : > { %v1980_v44 = vmul.f32 %v1963_v34, %v1906_v40  ;;  %v1982_v45 = vmul.f32 %v1971_v35, %v1947_v41  ;;  %v1908_v46 = vpop.f32.mrb[1].mxu0  ;;  %v1949_v47 = vpop.f32.mrb[1].mxu1  ;;  %v7027_v34 = vld [vmem:[#allocation7 + $0x64c] ss:$16 sps:$4 sm:$0xff]   ;;  %v7022_v35 = vld [vmem:[#allocation7 + $0x640] ss:$16 sps:$4 sm:$0xff]  }
 0x269   : > { %v1981_v48 = vmul.f32 %v1967_v36, %v1908_v46  ;;  %v1983_v49 = vmul.f32 %v1975_v37, %v1949_v47  ;;  %v1910_v50 = vpop.f32.mrb[2].mxu0  ;;  %v1951_v51 = vpop.f32.mrb[2].mxu1  ;;  %v7025_v36 = vld [vmem:[#allocation7 + $0x648] ss:$16 sps:$4 sm:$0xff]   ;;  %v7030_v37 = vld [vmem:[#allocation7 + $0x664] ss:$16 sps:$4 sm:$0xff]  }
 0x26a   : > { %v2006_v52 = vadd.f32 %v1989_v38, %v1980_v44  ;;  %v2008_v53 = vadd.f32 %v1997_v39, %v1982_v45  ;;  %v1911_v54 = vpop.f32.mrb[3].mxu0  ;;  %v1952_v55 = vpop.f32.mrb[3].mxu1  ;;  %v7033_v38 = vld [vmem:[#allocation7 + $0x66c] ss:$16 sps:$4 sm:$0xff]   ;;  %v7028_v39 = vld [vmem:[#allocation7 + $0x660] ss:$16 sps:$4 sm:$0xff]  }
 0x26b   : > { %v2007_v56 = vadd.f32 %v1993_v42, %v1981_v48  ;;  %v2009_v57 = vadd.f32 %v2001_v43, %v1983_v49  ;;  %v7031_v40 = vld [vmem:[#allocation7 + $0x668] ss:$16 sps:$4 sm:$0xff]   ;;  %v7036_v41 = vld [vmem:[#allocation7 + $0x684] ss:$16 sps:$4 sm:$0xff]   ;;  %v7039_v42 = vld [vmem:[#allocation7 + $0x68c] ss:$16 sps:$4 sm:$0xff]  }
 0x26c   : > { %v2010_v59 = vmax.f32 %v2006_v52, 0.0  ;;  %v2012_v60 = vmax.f32 %v2008_v53, 0.0  ;;  %v7034_v43 = vld [vmem:[#allocation7 + $0x680] ss:$16 sps:$4 sm:$0xff]   ;;  %v7037_v44 = vld [vmem:[#allocation7 + $0x688] ss:$16 sps:$4 sm:$0xff]  }
 0x26d   : > { %v2011_v61 = vmax.f32 %v2007_v56, 0.0  ;;  %v2013_v62 = vmax.f32 %v2009_v57, 0.0  ;;  %v7042_v45 = vld [vmem:[#allocation7 + $0x6a4] ss:$16 sps:$4 sm:$0xff]   ;;  %v7045_v46 = vld [vmem:[#allocation7 + $0x6ac] ss:$16 sps:$4 sm:$0xff]  }
 0x26e   : > { %v7040_v47 = vld [vmem:[#allocation7 + $0x6a0] ss:$16 sps:$4 sm:$0xff]   ;;  %v7043_v48 = vld [vmem:[#allocation7 + $0x6a8] ss:$16 sps:$4 sm:$0xff]   ;;  %v7048_v49 = vld [vmem:[#allocation7 + $0x6c4] ss:$16 sps:$4 sm:$0xff]  }
 0x26f   : > { %v2020_v63 = vcombine.low %v2010_v59, %v2011_v61  ;;  %v2021_v0 = vcombine.low %v2012_v60, %v2013_v62  ;;  %v7051_v50 = vld [vmem:[#allocation7 + $0x6cc] ss:$16 sps:$4 sm:$0xff]   ;;  %v7046_v51 = vld [vmem:[#allocation7 + $0x6c0] ss:$16 sps:$4 sm:$0xff]   ;;  %v7049_v52 = vld [vmem:[#allocation7 + $0x6c8] ss:$16 sps:$4 sm:$0xff]  }
 0x270   : > { %v7054_v53 = vld [vmem:[#allocation7 + $0x6e4] ss:$16 sps:$4 sm:$0xff]   ;;  %v7057_v54 = vld [vmem:[#allocation7 + $0x6ec] ss:$16 sps:$4 sm:$0xff]   ;;  %v7052_v55 = vld [vmem:[#allocation7 + $0x6e0] ss:$16 sps:$4 sm:$0xff]  }
 0x271   : > { %v2022_v1 = vrot.slane %v2020_v63, 7  ;;  %v2023_v2 = vrot.slane %v2021_v0, 7  ;;  %v7055_v56 = vld [vmem:[#allocation7 + $0x6e8] ss:$16 sps:$4 sm:$0xff]   ;;  %v7060_v57 = vld [vmem:[#allocation7 + $0x704] ss:$16 sps:$4 sm:$0xff]  }
 0x272   : > { %v7063_v59 = vld [vmem:[#allocation7 + $0x70c] ss:$16 sps:$4 sm:$0xff]   ;;  %v7058_v60 = vld [vmem:[#allocation7 + $0x700] ss:$16 sps:$4 sm:$0xff]   ;;  %v7061_v61 = vld [vmem:[#allocation7 + $0x708] ss:$16 sps:$4 sm:$0xff]  }
 0x273   : > { %2026 = vst [vmem:[#allocation2] sm:$0x66] %v2022_v1  ;;  %2027 = vst [vmem:[#allocation2 + $0x8] sm:$0x66] %v2023_v2  ;;  %v7066_v62 = vld [vmem:[#allocation7 + $0x724] ss:$16 sps:$4 sm:$0xff]  }
 0x274   : > { %v7069_v63 = vld [vmem:[#allocation7 + $0x72c] ss:$16 sps:$4 sm:$0xff]   ;;  %v7064_v0 = vld [vmem:[#allocation7 + $0x720] ss:$16 sps:$4 sm:$0xff]   ;;  %v7067_v1 = vld [vmem:[#allocation7 + $0x728] ss:$16 sps:$4 sm:$0xff]  }
 0x275   : > { %v7072_v2 = vld [vmem:[#allocation7 + $0x744] ss:$16 sps:$4 sm:$0xff]  }
 0x27a   : > { %v2168_v3 = vld [vmem:[#allocation2] sm:$0x66]  ;;  %v8775_v4 = vld [vmem:[#allocation2 + $0x8] sm:$0x66] }
 0x27b   : > { %v2301_v6 = vcombine.high %v2168_v3, %v2168_v3  ;;  %v2305_v7 = vpack.c.bf16 %v2168_v3, %v2168_v3  ;;  %v2302_v8 = vcombine.high %v8775_v4, %v8775_v4  ;;  %v7075_v3 = vld [vmem:[#allocation7 + $0x74c] ss:$16 sps:$4 sm:$0xff]  }
 0x27d   : > { %v2306_v9 = vpack.c.bf16 %v2301_v6, %v2301_v6  ;;  %v2312_v10 = vshll.u32 %v2305_v7, 16  ;;  %v2308_v11 = vpack.c.bf16 %v2302_v8, %v2302_v8  ;;  %v2310_v16 = vshrl.u32 %v2305_v7, 16  ;;  %v7070_v6 = vld [vmem:[#allocation7 + $0x740] ss:$16 sps:$4 sm:$0xff]   ;;  %v7073_v7 = vld [vmem:[#allocation7 + $0x748] ss:$16 sps:$4 sm:$0xff]  }
 0x27e   : > { %v7078_v8 = vld [vmem:[#allocation7 + $0x764] ss:$16 sps:$4 sm:$0xff]  }
 0x27f   : > { %v2319_v12 = vshll.u32 %v2306_v9, 16  ;;  %v2314_v13 = vrot.slane %v2312_v10, 1  ;;  %v2333_v58 = vshll.u32 %v2308_v11, 16  ;;  %v2317_v14 = vshrl.u32 %v2306_v9, 16  ;;  %v7081_v9 = vld [vmem:[#allocation7 + $0x76c] ss:$16 sps:$4 sm:$0xff]  }
 0x280   : > { %v2331_v22 = vshrl.u32 %v2308_v11, 16  ;;  %v7076_v10 = vld [vmem:[#allocation7 + $0x760] ss:$16 sps:$4 sm:$0xff]   ;;  %v7079_v11 = vld [vmem:[#allocation7 + $0x768] ss:$16 sps:$4 sm:$0xff]  }
 0x281   : > { %v2321_v15 = vrot.slane %v2319_v12, 1  ;;  %v2335_v17 = vrot.slane %v2333_v58, 1  ;;  %v2315_v21 = vor.u32 %v2314_v13, %v2310_v16  ;;  %v7084_v12 = vld [vmem:[#allocation7 + $0x784] ss:$16 sps:$4 sm:$0xff]   ;;  %v7087_v13 = vld [vmem:[#allocation7 + $0x78c] ss:$16 sps:$4 sm:$0xff]  }
 0x282   : > { %v7082_v58 = vld [vmem:[#allocation7 + $0x780] ss:$16 sps:$4 sm:$0xff]   ;;  %v7093_v16 = vld [vmem:[#allocation7 + $0x7ac] ss:$16 sps:$4 sm:$0xff]  }
 0x283   : > { %v2322_v18 = vor.u32 %v2321_v15, %v2317_v14  ;;  %v2336_v25 = vor.u32 %v2335_v17, %v2331_v22  ;;  %v7085_v14 = vld [vmem:[#allocation7 + $0x788] ss:$16 sps:$4 sm:$0xff]   ;;  %v7090_v15 = vld [vmem:[#allocation7 + $0x7a4] ss:$16 sps:$4 sm:$0xff]   ;;  %v7088_v17 = vld [vmem:[#allocation7 + $0x7a0] ss:$16 sps:$4 sm:$0xff]  }
 0x284   : > { %v7094_v22 = vld [vmem:[#allocation7 + $0x7c0] ss:$16 sps:$4 sm:$0xff]  }
 0x285   : > { %3013 = vmatprep.mubr.bf16.mxu0 %v2322_v18  ;;  %3095 = vmatprep.mubr.bf16.mxu1 %v2322_v18  ;;  %v7091_v18 = vld [vmem:[#allocation7 + $0x7a8] ss:$16 sps:$4 sm:$0xff]  }
 0x286   : > { %3014 = vmatmul.mubr.bf16.vlgmr.msra.gmra.mrb[4].mxu0 %v2315_v21  ;;  %3096 = vmatmul.mubr.bf16.vlgmr.msra.gmra.mrb[4].mxu1 %v2315_v21  ;;  %v7099_v21 = vld [vmem:[#allocation7 + $0x7cc] ss:$16 sps:$4 sm:$0xff]  }
 0x287   : > { %3023 = vmatpush1.bf16.msra.mxu0 %v7009_v19  ;;  %3105 = vmatpush1.bf16.msra.mxu1 %v7012_v20  ;;  %v2307_v19 = vpack.c.bf16 %v8775_v4, %v8775_v4  ;;  %v7096_v20 = vld [vmem:[#allocation7 + $0x7c4] ss:$16 sps:$4 sm:$0xff]  }
 0x288   : > { %3054 = vmatprep.mubr.bf16.mxu0 %v2336_v25  ;;  %3136 = vmatprep.mubr.bf16.mxu1 %v2336_v25  ;;  %v7105_v25 = vld [vmem:[#allocation7 + $0x7ec] ss:$16 sps:$4 sm:$0xff]  }
 0x289   : > { %3024 = vmatprep.subr.bf16.mxu0 %v7018_v23  ;;  %3106 = vmatprep.subr.bf16.mxu1 %v7021_v24  ;;  %v7097_v23 = vld [vmem:[#allocation7 + $0x7c8] ss:$16 sps:$4 sm:$0xff]   ;;  %v7102_v24 = vld [vmem:[#allocation7 + $0x7e4] ss:$16 sps:$4 sm:$0xff]  }
 0x28b   : > { %3025 = vmatpush1.bf16.msra.mxu0 %v7016_v26  ;;  %3107 = vmatpush1.bf16.msra.mxu1 %v7019_v30  ;;  %v2326_v26 = vshll.u32 %v2307_v19, 16  ;;  %v8781_v30 = vld [vmem:[#allocation2] sm:$0x33] }
 0x28c   : > { %3026 = vmatprep.subr.bf16.mxu0 %v7024_v33  ;;  %3108 = vmatprep.subr.bf16.mxu1 %v7027_v34  ;;  %v7100_v33 = vld [vmem:[#allocation7 + $0x7e0] ss:$16 sps:$4 sm:$0xff]   ;;  %v7103_v34 = vld [vmem:[#allocation7 + $0x7e8] ss:$16 sps:$4 sm:$0xff]  }
 0x28d   : > { %v2328_v4 = vrot.slane %v2326_v26, 1  ;;  %v7184_v26 = vld [vmem:[#allocation7 + $0x18c] ss:$16 sps:$4 sm:$0xff]  }
 0x28f   : > { %3027 = vmatpush1.bf16.msra.mxu0 %v7022_v35  ;;  %3109 = vmatpush1.bf16.msra.mxu1 %v7025_v36  ;;  %v7108_v35 = vld [vmem:[#allocation7 + $0x4] ss:$16 sps:$4 sm:$0xff]   ;;  %v7111_v36 = vld [vmem:[#allocation7 + $0xc] ss:$16 sps:$4 sm:$0xff]  }
 0x290   : > { %3028 = vmatprep.subr.bf16.mxu0 %v7030_v37  ;;  %3110 = vmatprep.subr.bf16.mxu1 %v7033_v38  ;;  %v2160_v37 = vcombine.high %v8781_v30, %v8781_v30  ;;  %v2324_v38 = vshrl.u32 %v2307_v19, 16  ;;  %v7167_v19 = vld [vmem:[#allocation7 + $0x140] ss:$16 sps:$4 sm:$0xff]  }
 0x293   : > { %3029 = vmatpush1.bf16.msra.mxu0 %v7028_v39  ;;  %3111 = vmatpush1.bf16.msra.mxu1 %v7031_v40  ;;  %v7106_v39 = vld [vmem:[#allocation7] ss:$16 sps:$4 sm:$0xff]   ;;  %v2329_v40 = vor.u32 %v2328_v4, %v2324_v38  ;;  %v7187_v4 = vld [vmem:[#allocation7 + $0x1a4] ss:$16 sps:$4 sm:$0xff]  }
 0x294   : > { %3030 = vmatprep.subr.bf16.mxu0 %v7036_v41  ;;  %3112 = vmatprep.subr.bf16.mxu1 %v7039_v42  ;;  %v7109_v41 = vld [vmem:[#allocation7 + $0x8] ss:$16 sps:$4 sm:$0xff]   ;;  %v2165_v42 = vpack.c.bf16 %v2160_v37, %v2160_v37  ;;  %v7193_v38 = vld [vmem:[#allocation7 + $0x1c4] ss:$16 sps:$4 sm:$0xff]  }
 0x295   : > { %v7188_v37 = vld [vmem:[#allocation7 + $0x1a8] ss:$16 sps:$4 sm:$0xff]  }
 0x297   : > { %3031 = vmatpush1.bf16.msra.mxu0 %v7034_v43  ;;  %3113 = vmatpush1.bf16.msra.mxu1 %v7037_v44  ;;  %v7115_v43 = vld [vmem:[#allocation7 + $0x24] ss:$16 sps:$4 sm:$0xff]   ;;  %v7118_v44 = vld [vmem:[#allocation7 + $0x2c] ss:$16 sps:$4 sm:$0xff]  }
 0x298   : > { %3032 = vmatprep.subr.bf16.mxu0 %v7042_v45  ;;  %3114 = vmatprep.subr.bf16.mxu1 %v7045_v46  ;;  %v7113_v45 = vld [vmem:[#allocation7 + $0x20] ss:$16 sps:$4 sm:$0xff]   ;;  %v7116_v46 = vld [vmem:[#allocation7 + $0x28] ss:$16 sps:$4 sm:$0xff]  }
 0x29b   : > { %3033 = vmatpush1.bf16.msra.mxu0 %v7040_v47  ;;  %3115 = vmatpush1.bf16.msra.mxu1 %v7043_v48  ;;  %v7121_v47 = vld [vmem:[#allocation7 + $0x44] ss:$16 sps:$4 sm:$0xff]   ;;  %v7124_v48 = vld [vmem:[#allocation7 + $0x4c] ss:$16 sps:$4 sm:$0xff]  }
 0x29c   : > { %3034 = vmatprep.subr.bf16.mxu0 %v7048_v49  ;;  %3116 = vmatprep.subr.bf16.mxu1 %v7051_v50  ;;  %v7119_v49 = vld [vmem:[#allocation7 + $0x40] ss:$16 sps:$4 sm:$0xff]   ;;  %v7122_v50 = vld [vmem:[#allocation7 + $0x48] ss:$16 sps:$4 sm:$0xff]  }
 0x29f   : > { %3035 = vmatpush1.bf16.msra.mxu0 %v7046_v51  ;;  %3117 = vmatpush1.bf16.msra.mxu1 %v7049_v52  ;;  %v7127_v51 = vld [vmem:[#allocation7 + $0x64] ss:$16 sps:$4 sm:$0xff]   ;;  %v7130_v52 = vld [vmem:[#allocation7 + $0x6c] ss:$16 sps:$4 sm:$0xff]  }
 0x2a0   : > { %3036 = vmatprep.subr.bf16.mxu0 %v7054_v53  ;;  %3118 = vmatprep.subr.bf16.mxu1 %v7057_v54  ;;  %v7125_v53 = vld [vmem:[#allocation7 + $0x60] ss:$16 sps:$4 sm:$0xff]   ;;  %v7128_v54 = vld [vmem:[#allocation7 + $0x68] ss:$16 sps:$4 sm:$0xff]  }
 0x2a3   : > { %3037 = vmatpush1.bf16.msra.mxu0 %v7052_v55  ;;  %3119 = vmatpush1.bf16.msra.mxu1 %v7055_v56  ;;  %v7133_v55 = vld [vmem:[#allocation7 + $0x84] ss:$16 sps:$4 sm:$0xff]   ;;  %v7136_v56 = vld [vmem:[#allocation7 + $0x8c] ss:$16 sps:$4 sm:$0xff]  }
 0x2a4   : > { %3038 = vmatprep.subr.bf16.mxu0 %v7060_v57  ;;  %3120 = vmatprep.subr.bf16.mxu1 %v7063_v59  ;;  %v7131_v57 = vld [vmem:[#allocation7 + $0x80] ss:$16 sps:$4 sm:$0xff]   ;;  %v7134_v59 = vld [vmem:[#allocation7 + $0x88] ss:$16 sps:$4 sm:$0xff]  }
 0x2a7   : > { %3039 = vmatpush1.bf16.msra.mxu0 %v7058_v60  ;;  %3121 = vmatpush1.bf16.msra.mxu1 %v7061_v61  ;;  %v7139_v60 = vld [vmem:[#allocation7 + $0xa4] ss:$16 sps:$4 sm:$0xff]   ;;  %v7142_v61 = vld [vmem:[#allocation7 + $0xac] ss:$16 sps:$4 sm:$0xff]  }
 0x2a8   : > { %3040 = vmatprep.subr.bf16.mxu0 %v7066_v62  ;;  %3122 = vmatprep.subr.bf16.mxu1 %v7069_v63  ;;  %v7137_v62 = vld [vmem:[#allocation7 + $0xa0] ss:$16 sps:$4 sm:$0xff]   ;;  %v7140_v63 = vld [vmem:[#allocation7 + $0xa8] ss:$16 sps:$4 sm:$0xff]  }
 0x2ab   : > { %3041 = vmatpush1.bf16.msra.mxu0 %v7064_v0  ;;  %3123 = vmatpush1.bf16.msra.mxu1 %v7067_v1  ;;  %v7145_v0 = vld [vmem:[#allocation7 + $0xc4] ss:$16 sps:$4 sm:$0xff]   ;;  %v7148_v1 = vld [vmem:[#allocation7 + $0xcc] ss:$16 sps:$4 sm:$0xff]  }
 0x2ac   : > { %3042 = vmatprep.subr.bf16.mxu0 %v7072_v2  ;;  %3124 = vmatprep.subr.bf16.mxu1 %v7075_v3  ;;  %v7143_v2 = vld [vmem:[#allocation7 + $0xc0] ss:$16 sps:$4 sm:$0xff]   ;;  %v7146_v3 = vld [vmem:[#allocation7 + $0xc8] ss:$16 sps:$4 sm:$0xff]  }
 0x2af   : > { %3043 = vmatpush1.bf16.msra.mxu0 %v7070_v6  ;;  %3125 = vmatpush1.bf16.msra.mxu1 %v7073_v7  ;;  %v7151_v6 = vld [vmem:[#allocation7 + $0xe4] ss:$16 sps:$4 sm:$0xff]   ;;  %v7154_v7 = vld [vmem:[#allocation7 + $0xec] ss:$16 sps:$4 sm:$0xff]  }
 0x2b0   : > { %3044 = vmatprep.subr.bf16.mxu0 %v7078_v8  ;;  %3126 = vmatprep.subr.bf16.mxu1 %v7081_v9  ;;  %v7149_v8 = vld [vmem:[#allocation7 + $0xe0] ss:$16 sps:$4 sm:$0xff]   ;;  %v7152_v9 = vld [vmem:[#allocation7 + $0xe8] ss:$16 sps:$4 sm:$0xff]  }
 0x2b3   : > { %3045 = vmatpush1.bf16.msra.mxu0 %v7076_v10  ;;  %3127 = vmatpush1.bf16.msra.mxu1 %v7079_v11  ;;  %v7157_v10 = vld [vmem:[#allocation7 + $0x104] ss:$16 sps:$4 sm:$0xff]   ;;  %v7160_v11 = vld [vmem:[#allocation7 + $0x10c] ss:$16 sps:$4 sm:$0xff]  }
 0x2b4   : > { %3046 = vmatprep.subr.bf16.mxu0 %v7084_v12  ;;  %3128 = vmatprep.subr.bf16.mxu1 %v7087_v13  ;;  %v7155_v12 = vld [vmem:[#allocation7 + $0x100] ss:$16 sps:$4 sm:$0xff]   ;;  %v7158_v13 = vld [vmem:[#allocation7 + $0x108] ss:$16 sps:$4 sm:$0xff]  }
 0x2b7   : > { %3047 = vmatpush1.bf16.msra.mxu0 %v7082_v58  ;;  %3129 = vmatpush1.bf16.msra.mxu1 %v7085_v14  ;;  %v7163_v58 = vld [vmem:[#allocation7 + $0x124] ss:$16 sps:$4 sm:$0xff]   ;;  %v7166_v14 = vld [vmem:[#allocation7 + $0x12c] ss:$16 sps:$4 sm:$0xff]  }
 0x2b8   : > { %3048 = vmatprep.subr.bf16.mxu0 %v7090_v15  ;;  %3130 = vmatprep.subr.bf16.mxu1 %v7093_v16  ;;  %v7161_v15 = vld [vmem:[#allocation7 + $0x120] ss:$16 sps:$4 sm:$0xff]   ;;  %v7164_v16 = vld [vmem:[#allocation7 + $0x128] ss:$16 sps:$4 sm:$0xff]  }
 0x2bb   : > { %3049 = vmatpush1.bf16.msra.mxu0 %v7088_v17  ;;  %3131 = vmatpush1.bf16.msra.mxu1 %v7091_v18  ;;  %v7169_v17 = vld [vmem:[#allocation7 + $0x144] ss:$16 sps:$4 sm:$0xff]   ;;  %v7172_v18 = vld [vmem:[#allocation7 + $0x14c] ss:$16 sps:$4 sm:$0xff]  }
 0x2bc   : > { %3050 = vmatprep.subr.bf16.mxu0 %v7096_v20  ;;  %3132 = vmatprep.subr.bf16.mxu1 %v7099_v21  ;;  %v7170_v20 = vld [vmem:[#allocation7 + $0x148] ss:$16 sps:$4 sm:$0xff]   ;;  %v7175_v21 = vld [vmem:[#allocation7 + $0x164] ss:$16 sps:$4 sm:$0xff]  }
 0x2bf   : > { %3051 = vmatpush1.bf16.msra.mxu0 %v7094_v22  ;;  %3133 = vmatpush1.bf16.msra.mxu1 %v7097_v23  ;;  %v7178_v22 = vld [vmem:[#allocation7 + $0x16c] ss:$16 sps:$4 sm:$0xff]   ;;  %v7173_v23 = vld [vmem:[#allocation7 + $0x160] ss:$16 sps:$4 sm:$0xff]  }
 0x2c0   : > { %3052 = vmatprep.subr.bf16.mxu0 %v7102_v24  ;;  %3134 = vmatprep.subr.bf16.mxu1 %v7105_v25  ;;  %v7176_v24 = vld [vmem:[#allocation7 + $0x168] ss:$16 sps:$4 sm:$0xff]   ;;  %v7181_v25 = vld [vmem:[#allocation7 + $0x184] ss:$16 sps:$4 sm:$0xff]  }
 0x2c3   : > { %3053 = vmatpush1.bf16.msra.mxu0 %v7100_v33  ;;  %3135 = vmatpush1.bf16.msra.mxu1 %v7103_v34  ;;  %v7179_v33 = vld [vmem:[#allocation7 + $0x180] ss:$16 sps:$4 sm:$0xff]   ;;  %v7182_v34 = vld [vmem:[#allocation7 + $0x188] ss:$16 sps:$4 sm:$0xff]  }
 0x2c4   : > { %3785 = vmatprep.subr.bf16.mxu0 %v7108_v35  ;;  %3867 = vmatprep.subr.bf16.mxu1 %v7111_v36  ;;  %v7190_v35 = vld [vmem:[#allocation7 + $0x1ac] ss:$16 sps:$4 sm:$0xff]   ;;  %v7185_v36 = vld [vmem:[#allocation7 + $0x1a0] ss:$16 sps:$4 sm:$0xff]  }
 0x2c6   : > { %3055 = vmatmul.mubr.bf16.vlgmr.msra.gmra.mrb[4].mxu0 %v2329_v40  ;;  %3137 = vmatmul.mubr.bf16.vlgmr.msra.gmra.mrb[4].mxu1 %v2329_v40  ;;  %v7191_v40 = vld [vmem:[#allocation7 + $0x1c0] ss:$16 sps:$4 sm:$0xff]  }
 0x2c7   : > { %3786 = vmatpush1.bf16.msra.mxu0 %v7106_v39  ;;  %3817 = vmatprep.mubr.bf16.mxu0 %v2165_v42  ;;  %v7196_v39 = vld [vmem:[#allocation7 + $0x1cc] ss:$16 sps:$4 sm:$0xff]  }
 0x2c8   : > { %3868 = vmatpush1.bf16.msra.mxu1 %v7109_v41  ;;  %3899 = vmatprep.mubr.bf16.mxu1 %v2165_v42  ;;  %v7194_v41 = vld [vmem:[#allocation7 + $0x1c8] ss:$16 sps:$4 sm:$0xff]   ;;  %v7199_v42 = vld [vmem:[#allocation7 + $0x1e4] ss:$16 sps:$4 sm:$0xff]  }
 0x2c9   : > { %3787 = vmatprep.subr.bf16.mxu0 %v7115_v43  ;;  %3869 = vmatprep.subr.bf16.mxu1 %v7118_v44  ;;  %v7202_v43 = vld [vmem:[#allocation7 + $0x1ec] ss:$16 sps:$4 sm:$0xff]   ;;  %v7197_v44 = vld [vmem:[#allocation7 + $0x1e0] ss:$16 sps:$4 sm:$0xff]  }
 0x2cb   : > { %3788 = vmatpush1.bf16.msra.mxu0 %v7113_v45  ;;  %v8785_v45 = vld [vmem:[#allocation2 + $0x8] sm:$0x33] }
 0x2cc   : > { %3870 = vmatpush1.bf16.msra.mxu1 %v7116_v46  ;;  %3789 = vmatprep.subr.bf16.mxu0 %v7121_v47  ;;  %v7200_v46 = vld [vmem:[#allocation7 + $0x1e8] ss:$16 sps:$4 sm:$0xff]   ;;  %v7205_v47 = vld [vmem:[#allocation7 + $0x204] ss:$16 sps:$4 sm:$0xff]  }
 0x2cd   : > { %3871 = vmatprep.subr.bf16.mxu1 %v7124_v48  ;;  %v7208_v48 = vld [vmem:[#allocation7 + $0x20c] ss:$16 sps:$4 sm:$0xff]  }
 0x2cf   : > { %3790 = vmatpush1.bf16.msra.mxu0 %v7119_v49  ;;  %v2161_v49 = vcombine.high %v8785_v45, %v8785_v45 }
 0x2d0   : > { %3872 = vmatpush1.bf16.msra.mxu1 %v7122_v50  ;;  %3791 = vmatprep.subr.bf16.mxu0 %v7127_v51  ;;  %v7203_v50 = vld [vmem:[#allocation7 + $0x200] ss:$16 sps:$4 sm:$0xff]   ;;  %v2164_v51 = vpack.c.bf16 %v8781_v30, %v8781_v30 }
 0x2d1   : > { %3873 = vmatprep.subr.bf16.mxu1 %v7130_v52  ;;  %v7206_v52 = vld [vmem:[#allocation7 + $0x208] ss:$16 sps:$4 sm:$0xff]   ;;  %v7216_v30 = vld [vmem:[#allocation7 + $0x240] ss:$16 sps:$4 sm:$0xff]  }
 0x2d3   : > { %3792 = vmatpush1.bf16.msra.mxu0 %v7125_v53  ;;  %v7212_v53 = vld [vmem:[#allocation7 + $0x224] ss:$16 sps:$4 sm:$0xff]  }
 0x2d4   : > { %3874 = vmatpush1.bf16.msra.mxu1 %v7128_v54  ;;  %3793 = vmatprep.subr.bf16.mxu0 %v7133_v55  ;;  %v2167_v54 = vpack.c.bf16 %v2161_v49, %v2161_v49  ;;  %v7215_v55 = vld [vmem:[#allocation7 + $0x22c] ss:$16 sps:$4 sm:$0xff]   ;;  %v7290_v49 = vld [vmem:[#allocation7 + $0x3c4] ss:$16 sps:$4 sm:$0xff]  }
 0x2d5   : > { %3875 = vmatprep.subr.bf16.mxu1 %v7136_v56  ;;  %v7210_v56 = vld [vmem:[#allocation7 + $0x220] ss:$16 sps:$4 sm:$0xff]  }
 0x2d7   : > { %3794 = vmatpush1.bf16.msra.mxu0 %v7131_v57  ;;  %v7213_v57 = vld [vmem:[#allocation7 + $0x228] ss:$16 sps:$4 sm:$0xff]  }
 0x2d8   : > { %3876 = vmatpush1.bf16.msra.mxu1 %v7134_v59  ;;  %3795 = vmatprep.subr.bf16.mxu0 %v7139_v60  ;;  %v7218_v59 = vld [vmem:[#allocation7 + $0x244] ss:$16 sps:$4 sm:$0xff]   ;;  %v7221_v60 = vld [vmem:[#allocation7 + $0x24c] ss:$16 sps:$4 sm:$0xff]  }
 0x2d9   : > { %3877 = vmatprep.subr.bf16.mxu1 %v7142_v61  ;;  %v7219_v61 = vld [vmem:[#allocation7 + $0x248] ss:$16 sps:$4 sm:$0xff]  }
 0x2db   : > { %3796 = vmatpush1.bf16.msra.mxu0 %v7137_v62  ;;  %v7224_v62 = vld [vmem:[#allocation7 + $0x264] ss:$16 sps:$4 sm:$0xff]  }
 0x2dc   : > { %3878 = vmatpush1.bf16.msra.mxu1 %v7140_v63  ;;  %3797 = vmatprep.subr.bf16.mxu0 %v7145_v0  ;;  %v7227_v63 = vld [vmem:[#allocation7 + $0x26c] ss:$16 sps:$4 sm:$0xff]   ;;  %v7222_v0 = vld [vmem:[#allocation7 + $0x260] ss:$16 sps:$4 sm:$0xff]  }
 0x2dd   : > { %3879 = vmatprep.subr.bf16.mxu1 %v7148_v1  ;;  %v7225_v1 = vld [vmem:[#allocation7 + $0x268] ss:$16 sps:$4 sm:$0xff]  }
 0x2df   : > { %3798 = vmatpush1.bf16.msra.mxu0 %v7143_v2  ;;  %v7230_v2 = vld [vmem:[#allocation7 + $0x284] ss:$16 sps:$4 sm:$0xff]  }
 0x2e0   : > { %3880 = vmatpush1.bf16.msra.mxu1 %v7146_v3  ;;  %3799 = vmatprep.subr.bf16.mxu0 %v7151_v6  ;;  %v7233_v3 = vld [vmem:[#allocation7 + $0x28c] ss:$16 sps:$4 sm:$0xff]   ;;  %v7228_v6 = vld [vmem:[#allocation7 + $0x280] ss:$16 sps:$4 sm:$0xff]  }
 0x2e1   : > { %3881 = vmatprep.subr.bf16.mxu1 %v7154_v7  ;;  %v7231_v7 = vld [vmem:[#allocation7 + $0x288] ss:$16 sps:$4 sm:$0xff]  }
 0x2e3   : > { %3800 = vmatpush1.bf16.msra.mxu0 %v7149_v8  ;;  %v7236_v8 = vld [vmem:[#allocation7 + $0x2a4] ss:$16 sps:$4 sm:$0xff]  }
 0x2e4   : > { %3882 = vmatpush1.bf16.msra.mxu1 %v7152_v9  ;;  %3801 = vmatprep.subr.bf16.mxu0 %v7157_v10  ;;  %v7239_v9 = vld [vmem:[#allocation7 + $0x2ac] ss:$16 sps:$4 sm:$0xff]   ;;  %v7234_v10 = vld [vmem:[#allocation7 + $0x2a0] ss:$16 sps:$4 sm:$0xff]  }
 0x2e5   : > { %3883 = vmatprep.subr.bf16.mxu1 %v7160_v11  ;;  %v7237_v11 = vld [vmem:[#allocation7 + $0x2a8] ss:$16 sps:$4 sm:$0xff]  }
 0x2e7   : > { %3802 = vmatpush1.bf16.msra.mxu0 %v7155_v12  ;;  %v7242_v12 = vld [vmem:[#allocation7 + $0x2c4] ss:$16 sps:$4 sm:$0xff]  }
 0x2e8   : > { %3884 = vmatpush1.bf16.msra.mxu1 %v7158_v13  ;;  %3803 = vmatprep.subr.bf16.mxu0 %v7163_v58  ;;  %v7245_v13 = vld [vmem:[#allocation7 + $0x2cc] ss:$16 sps:$4 sm:$0xff]   ;;  %v7240_v58 = vld [vmem:[#allocation7 + $0x2c0] ss:$16 sps:$4 sm:$0xff]  }
 0x2e9   : > { %3885 = vmatprep.subr.bf16.mxu1 %v7166_v14  ;;  %v7243_v14 = vld [vmem:[#allocation7 + $0x2c8] ss:$16 sps:$4 sm:$0xff]  }
 0x2eb   : > { %3804 = vmatpush1.bf16.msra.mxu0 %v7161_v15  ;;  %v7248_v15 = vld [vmem:[#allocation7 + $0x2e4] ss:$16 sps:$4 sm:$0xff]  }
 0x2ec   : > { %3886 = vmatpush1.bf16.msra.mxu1 %v7164_v16  ;;  %3805 = vmatprep.subr.bf16.mxu0 %v7169_v17  ;;  %v7251_v16 = vld [vmem:[#allocation7 + $0x2ec] ss:$16 sps:$4 sm:$0xff]   ;;  %v7246_v17 = vld [vmem:[#allocation7 + $0x2e0] ss:$16 sps:$4 sm:$0xff]  }
 0x2ed   : > { %3887 = vmatprep.subr.bf16.mxu1 %v7172_v18  ;;  %v7249_v18 = vld [vmem:[#allocation7 + $0x2e8] ss:$16 sps:$4 sm:$0xff]  }
 0x2ef   : > { %3806 = vmatpush1.bf16.msra.mxu0 %v7167_v19  ;;  %v7254_v19 = vld [vmem:[#allocation7 + $0x304] ss:$16 sps:$4 sm:$0xff]  }
 0x2f0   : > { %3888 = vmatpush1.bf16.msra.mxu1 %v7170_v20  ;;  %3807 = vmatprep.subr.bf16.mxu0 %v7175_v21  ;;  %v7257_v20 = vld [vmem:[#allocation7 + $0x30c] ss:$16 sps:$4 sm:$0xff]   ;;  %v7252_v21 = vld [vmem:[#allocation7 + $0x300] ss:$16 sps:$4 sm:$0xff]  }
 0x2f1   : > { %3889 = vmatprep.subr.bf16.mxu1 %v7178_v22  ;;  %v7255_v22 = vld [vmem:[#allocation7 + $0x308] ss:$16 sps:$4 sm:$0xff]  }
 0x2f3   : > { %3808 = vmatpush1.bf16.msra.mxu0 %v7173_v23  ;;  %v7260_v23 = vld [vmem:[#allocation7 + $0x324] ss:$16 sps:$4 sm:$0xff]  }
 0x2f4   : > { %3890 = vmatpush1.bf16.msra.mxu1 %v7176_v24  ;;  %3809 = vmatprep.subr.bf16.mxu0 %v7181_v25  ;;  %v7263_v24 = vld [vmem:[#allocation7 + $0x32c] ss:$16 sps:$4 sm:$0xff]   ;;  %v7258_v25 = vld [vmem:[#allocation7 + $0x320] ss:$16 sps:$4 sm:$0xff]  }
 0x2f5   : > { %3891 = vmatprep.subr.bf16.mxu1 %v7184_v26  ;;  %v7261_v26 = vld [vmem:[#allocation7 + $0x328] ss:$16 sps:$4 sm:$0xff]  }
 0x2f7   : > { %3810 = vmatpush1.bf16.msra.mxu0 %v7179_v33  ;;  %v7266_v33 = vld [vmem:[#allocation7 + $0x344] ss:$16 sps:$4 sm:$0xff]  }
 0x2f8   : > { %3892 = vmatpush1.bf16.msra.mxu1 %v7182_v34  ;;  %3811 = vmatprep.subr.bf16.mxu0 %v7187_v4  ;;  %v7269_v34 = vld [vmem:[#allocation7 + $0x34c] ss:$16 sps:$4 sm:$0xff]   ;;  %v7264_v4 = vld [vmem:[#allocation7 + $0x340] ss:$16 sps:$4 sm:$0xff]  }
 0x2f9   : > { %3893 = vmatprep.subr.bf16.mxu1 %v7190_v35  ;;  %v7267_v35 = vld [vmem:[#allocation7 + $0x348] ss:$16 sps:$4 sm:$0xff]  }
 0x2fb   : > { %3812 = vmatpush1.bf16.msra.mxu0 %v7185_v36  ;;  %v7272_v36 = vld [vmem:[#allocation7 + $0x364] ss:$16 sps:$4 sm:$0xff]  }
 0x2fc   : > { %3894 = vmatpush1.bf16.msra.mxu1 %v7188_v37  ;;  %3813 = vmatprep.subr.bf16.mxu0 %v7193_v38  ;;  %v7275_v37 = vld [vmem:[#allocation7 + $0x36c] ss:$16 sps:$4 sm:$0xff]   ;;  %v7270_v38 = vld [vmem:[#allocation7 + $0x360] ss:$16 sps:$4 sm:$0xff]  }
 0x2fd   : > { %3895 = vmatprep.subr.bf16.mxu1 %v7196_v39  ;;  %v7273_v39 = vld [vmem:[#allocation7 + $0x368] ss:$16 sps:$4 sm:$0xff]  }
 0x2ff   : > { %3814 = vmatpush1.bf16.msra.mxu0 %v7191_v40  ;;  %v7278_v40 = vld [vmem:[#allocation7 + $0x384] ss:$16 sps:$4 sm:$0xff]  }
 0x300   : > { %3896 = vmatpush1.bf16.msra.mxu1 %v7194_v41  ;;  %3815 = vmatprep.subr.bf16.mxu0 %v7199_v42  ;;  %v7281_v41 = vld [vmem:[#allocation7 + $0x38c] ss:$16 sps:$4 sm:$0xff]   ;;  %v7276_v42 = vld [vmem:[#allocation7 + $0x380] ss:$16 sps:$4 sm:$0xff]  }
 0x301   : > { %3897 = vmatprep.subr.bf16.mxu1 %v7202_v43  ;;  %v7279_v43 = vld [vmem:[#allocation7 + $0x388] ss:$16 sps:$4 sm:$0xff]  }
 0x303   : > { %3816 = vmatpush1.bf16.msra.mxu0 %v7197_v44  ;;  %v7284_v44 = vld [vmem:[#allocation7 + $0x3a4] ss:$16 sps:$4 sm:$0xff]  }
 0x304   : > { %3898 = vmatpush1.bf16.msra.mxu1 %v7200_v46  ;;  %3826 = vmatprep.subr.bf16.mxu0 %v7205_v47  ;;  %v7287_v46 = vld [vmem:[#allocation7 + $0x3ac] ss:$16 sps:$4 sm:$0xff]   ;;  %v7282_v47 = vld [vmem:[#allocation7 + $0x3a0] ss:$16 sps:$4 sm:$0xff]  }
 0x305   : > { %3908 = vmatprep.subr.bf16.mxu1 %v7208_v48  ;;  %v7285_v48 = vld [vmem:[#allocation7 + $0x3a8] ss:$16 sps:$4 sm:$0xff]  }
 0x306   : > { %3818 = vmatmul.mubr.bf16.vlgmr.msra.gmra.mrb[4].mxu0 %v2164_v51 }
 0x307   : > { %3900 = vmatmul.mubr.bf16.vlgmr.msra.gmra.mrb[4].mxu1 %v2164_v51  ;;  %3827 = vmatpush1.bf16.msra.mxu0 %v7203_v50  ;;  %v7293_v50 = vld [vmem:[#allocation7 + $0x3cc] ss:$16 sps:$4 sm:$0xff]   ;;  %v7288_v51 = vld [vmem:[#allocation7 + $0x3c0] ss:$16 sps:$4 sm:$0xff]  }
 0x308   : > { %3858 = vmatprep.mubr.bf16.mxu0 %v2167_v54  ;;  %3909 = vmatpush1.bf16.msra.mxu1 %v7206_v52  ;;  %v8791_v52 = vld [vmem:[#allocation2] sm:$0xcc] }
 0x309   : > { %3940 = vmatprep.mubr.bf16.mxu1 %v2167_v54  ;;  %3828 = vmatprep.subr.bf16.mxu0 %v7212_v53  ;;  %v7291_v53 = vld [vmem:[#allocation7 + $0x3c8] ss:$16 sps:$4 sm:$0xff]   ;;  %v7296_v54 = vld [vmem:[#allocation7 + $0x3e4] ss:$16 sps:$4 sm:$0xff]  }
 0x30a   : > { %3910 = vmatprep.subr.bf16.mxu1 %v7215_v55  ;;  %v7299_v55 = vld [vmem:[#allocation7 + $0x3ec] ss:$16 sps:$4 sm:$0xff]  }
 0x30b   : > { %3829 = vmatpush1.bf16.msra.mxu0 %v7210_v56  ;;  %v4082_v56 = vcombine.high %v8791_v52, %v8791_v52 }
 0x30c   : > { %3911 = vmatpush1.bf16.msra.mxu1 %v7213_v57  ;;  %3830 = vmatprep.subr.bf16.mxu0 %v7218_v59  ;;  %v7294_v57 = vld [vmem:[#allocation7 + $0x3e0] ss:$16 sps:$4 sm:$0xff]   ;;  %v7297_v59 = vld [vmem:[#allocation7 + $0x3e8] ss:$16 sps:$4 sm:$0xff]  }
 0x30d   : > { %3912 = vmatprep.subr.bf16.mxu1 %v7221_v60  ;;  %v7302_v60 = vld [vmem:[#allocation7 + $0x804] ss:$16 sps:$4 sm:$0xff]  }
 0x30f   : > { %3831 = vmatpush1.bf16.msra.mxu0 %v7216_v30  ;;  %v7305_v30 = vld [vmem:[#allocation7 + $0x80c] ss:$16 sps:$4 sm:$0xff]  }
 0x310   : > { %3913 = vmatpush1.bf16.msra.mxu1 %v7219_v61  ;;  %3832 = vmatprep.subr.bf16.mxu0 %v7224_v62  ;;  %v4087_v61 = vpack.c.bf16 %v4082_v56, %v4082_v56  ;;  %v7300_v62 = vld [vmem:[#allocation7 + $0x800] ss:$16 sps:$4 sm:$0xff]   ;;  %v7376_v56 = vld [vmem:[#allocation7 + $0x988] ss:$16 sps:$4 sm:$0xff]  }
 0x311   : > { %3914 = vmatprep.subr.bf16.mxu1 %v7227_v63  ;;  %v2166_v63 = vpack.c.bf16 %v8785_v45, %v8785_v45  ;;  %v7313_v45 = vld [vmem:[#allocation7 + $0x840] ss:$16 sps:$4 sm:$0xff]  }
 0x313   : > { %3833 = vmatpush1.bf16.msra.mxu0 %v7222_v0  ;;  %v7303_v0 = vld [vmem:[#allocation7 + $0x808] ss:$16 sps:$4 sm:$0xff]  }
 0x314   : > { %3915 = vmatpush1.bf16.msra.mxu1 %v7225_v1  ;;  %3834 = vmatprep.subr.bf16.mxu0 %v7230_v2  ;;  %v7309_v1 = vld [vmem:[#allocation7 + $0x824] ss:$16 sps:$4 sm:$0xff]   ;;  %v4095_v2 = vrot.slane %v4087_v61, 1 }
 0x315   : > { %3916 = vmatprep.subr.bf16.mxu1 %v7233_v3  ;;  %v7312_v3 = vld [vmem:[#allocation7 + $0x82c] ss:$16 sps:$4 sm:$0xff]   ;;  %v7387_v61 = vld [vmem:[#allocation7 + $0x9c4] ss:$16 sps:$4 sm:$0xff]  }
 0x317   : > { %3835 = vmatpush1.bf16.msra.mxu0 %v7228_v6  ;;  %v7307_v6 = vld [vmem:[#allocation7 + $0x820] ss:$16 sps:$4 sm:$0xff]  }
 0x318   : > { %3917 = vmatpush1.bf16.msra.mxu1 %v7231_v7  ;;  %3836 = vmatprep.subr.bf16.mxu0 %v7236_v8  ;;  %v7310_v7 = vld [vmem:[#allocation7 + $0x828] ss:$16 sps:$4 sm:$0xff]   ;;  %v7315_v8 = vld [vmem:[#allocation7 + $0x844] ss:$16 sps:$4 sm:$0xff]  }
 0x319   : > { %3918 = vmatprep.subr.bf16.mxu1 %v7239_v9  ;;  %v7318_v9 = vld [vmem:[#allocation7 + $0x84c] ss:$16 sps:$4 sm:$0xff]  }
 0x31b   : > { %3837 = vmatpush1.bf16.msra.mxu0 %v7234_v10  ;;  %v7316_v10 = vld [vmem:[#allocation7 + $0x848] ss:$16 sps:$4 sm:$0xff]  }
 0x31c   : > { %3919 = vmatpush1.bf16.msra.mxu1 %v7237_v11  ;;  %3838 = vmatprep.subr.bf16.mxu0 %v7242_v12  ;;  %v7321_v11 = vld [vmem:[#allocation7 + $0x864] ss:$16 sps:$4 sm:$0xff]   ;;  %v7324_v12 = vld [vmem:[#allocation7 + $0x86c] ss:$16 sps:$4 sm:$0xff]  }
 0x31d   : > { %3920 = vmatprep.subr.bf16.mxu1 %v7245_v13  ;;  %v7319_v13 = vld [vmem:[#allocation7 + $0x860] ss:$16 sps:$4 sm:$0xff]  }
 0x31f   : > { %3839 = vmatpush1.bf16.msra.mxu0 %v7240_v58  ;;  %v7322_v58 = vld [vmem:[#allocation7 + $0x868] ss:$16 sps:$4 sm:$0xff]  }
 0x320   : > { %3921 = vmatpush1.bf16.msra.mxu1 %v7243_v14  ;;  %3840 = vmatprep.subr.bf16.mxu0 %v7248_v15  ;;  %v7327_v14 = vld [vmem:[#allocation7 + $0x884] ss:$16 sps:$4 sm:$0xff]   ;;  %v7330_v15 = vld [vmem:[#allocation7 + $0x88c] ss:$16 sps:$4 sm:$0xff]  }
 0x321   : > { %3922 = vmatprep.subr.bf16.mxu1 %v7251_v16  ;;  %v7325_v16 = vld [vmem:[#allocation7 + $0x880] ss:$16 sps:$4 sm:$0xff]  }
 0x323   : > { %3841 = vmatpush1.bf16.msra.mxu0 %v7246_v17  ;;  %v7328_v17 = vld [vmem:[#allocation7 + $0x888] ss:$16 sps:$4 sm:$0xff]  }
 0x324   : > { %3923 = vmatpush1.bf16.msra.mxu1 %v7249_v18  ;;  %3842 = vmatprep.subr.bf16.mxu0 %v7254_v19  ;;  %v7333_v18 = vld [vmem:[#allocation7 + $0x8a4] ss:$16 sps:$4 sm:$0xff]   ;;  %v7336_v19 = vld [vmem:[#allocation7 + $0x8ac] ss:$16 sps:$4 sm:$0xff]  }
 0x325   : > { %3924 = vmatprep.subr.bf16.mxu1 %v7257_v20  ;;  %v7331_v20 = vld [vmem:[#allocation7 + $0x8a0] ss:$16 sps:$4 sm:$0xff]  }
 0x327   : > { %3843 = vmatpush1.bf16.msra.mxu0 %v7252_v21  ;;  %v7334_v21 = vld [vmem:[#allocation7 + $0x8a8] ss:$16 sps:$4 sm:$0xff]  }
 0x328   : > { %3925 = vmatpush1.bf16.msra.mxu1 %v7255_v22  ;;  %3844 = vmatprep.subr.bf16.mxu0 %v7260_v23  ;;  %v7339_v22 = vld [vmem:[#allocation7 + $0x8c4] ss:$16 sps:$4 sm:$0xff]   ;;  %v7342_v23 = vld [vmem:[#allocation7 + $0x8cc] ss:$16 sps:$4 sm:$0xff]  }
 0x329   : > { %3926 = vmatprep.subr.bf16.mxu1 %v7263_v24  ;;  %v7337_v24 = vld [vmem:[#allocation7 + $0x8c0] ss:$16 sps:$4 sm:$0xff]  }
 0x32b   : > { %3845 = vmatpush1.bf16.msra.mxu0 %v7258_v25  ;;  %v7340_v25 = vld [vmem:[#allocation7 + $0x8c8] ss:$16 sps:$4 sm:$0xff]  }
 0x32c   : > { %3927 = vmatpush1.bf16.msra.mxu1 %v7261_v26  ;;  %3846 = vmatprep.subr.bf16.mxu0 %v7266_v33  ;;  %v7345_v26 = vld [vmem:[#allocation7 + $0x8e4] ss:$16 sps:$4 sm:$0xff]   ;;  %v7348_v33 = vld [vmem:[#allocation7 + $0x8ec] ss:$16 sps:$4 sm:$0xff]  }
 0x32d   : > { %3928 = vmatprep.subr.bf16.mxu1 %v7269_v34  ;;  %v7343_v34 = vld [vmem:[#allocation7 + $0x8e0] ss:$16 sps:$4 sm:$0xff]  }
 0x32f   : > { %3847 = vmatpush1.bf16.msra.mxu0 %v7264_v4  ;;  %v7346_v4 = vld [vmem:[#allocation7 + $0x8e8] ss:$16 sps:$4 sm:$0xff]  }
 0x330   : > { %3929 = vmatpush1.bf16.msra.mxu1 %v7267_v35  ;;  %3848 = vmatprep.subr.bf16.mxu0 %v7272_v36  ;;  %v7351_v35 = vld [vmem:[#allocation7 + $0x904] ss:$16 sps:$4 sm:$0xff]   ;;  %v7354_v36 = vld [vmem:[#allocation7 + $0x90c] ss:$16 sps:$4 sm:$0xff]  }
 0x331   : > { %3930 = vmatprep.subr.bf16.mxu1 %v7275_v37  ;;  %v7349_v37 = vld [vmem:[#allocation7 + $0x900] ss:$16 sps:$4 sm:$0xff]  }
 0x333   : > { %3849 = vmatpush1.bf16.msra.mxu0 %v7270_v38  ;;  %v7352_v38 = vld [vmem:[#allocation7 + $0x908] ss:$16 sps:$4 sm:$0xff]  }
 0x334   : > { %3931 = vmatpush1.bf16.msra.mxu1 %v7273_v39  ;;  %3850 = vmatprep.subr.bf16.mxu0 %v7278_v40  ;;  %v7357_v39 = vld [vmem:[#allocation7 + $0x924] ss:$16 sps:$4 sm:$0xff]   ;;  %v7360_v40 = vld [vmem:[#allocation7 + $0x92c] ss:$16 sps:$4 sm:$0xff]  }
 0x335   : > { %3932 = vmatprep.subr.bf16.mxu1 %v7281_v41  ;;  %v7355_v41 = vld [vmem:[#allocation7 + $0x920] ss:$16 sps:$4 sm:$0xff]  }
 0x337   : > { %3851 = vmatpush1.bf16.msra.mxu0 %v7276_v42  ;;  %v7358_v42 = vld [vmem:[#allocation7 + $0x928] ss:$16 sps:$4 sm:$0xff]  }
 0x338   : > { %3933 = vmatpush1.bf16.msra.mxu1 %v7279_v43  ;;  %3852 = vmatprep.subr.bf16.mxu0 %v7284_v44  ;;  %v7363_v43 = vld [vmem:[#allocation7 + $0x944] ss:$16 sps:$4 sm:$0xff]   ;;  %v7366_v44 = vld [vmem:[#allocation7 + $0x94c] ss:$16 sps:$4 sm:$0xff]  }
 0x339   : > { %3934 = vmatprep.subr.bf16.mxu1 %v7287_v46  ;;  %v7361_v46 = vld [vmem:[#allocation7 + $0x940] ss:$16 sps:$4 sm:$0xff]  }
 0x33b   : > { %3853 = vmatpush1.bf16.msra.mxu0 %v7282_v47  ;;  %v7364_v47 = vld [vmem:[#allocation7 + $0x948] ss:$16 sps:$4 sm:$0xff]  }
 0x33c   : > { %3935 = vmatpush1.bf16.msra.mxu1 %v7285_v48  ;;  %3854 = vmatprep.subr.bf16.mxu0 %v7290_v49  ;;  %v7369_v48 = vld [vmem:[#allocation7 + $0x964] ss:$16 sps:$4 sm:$0xff]   ;;  %v7372_v49 = vld [vmem:[#allocation7 + $0x96c] ss:$16 sps:$4 sm:$0xff]  }
 0x33d   : > { %3936 = vmatprep.subr.bf16.mxu1 %v7293_v50  ;;  %v7367_v50 = vld [vmem:[#allocation7 + $0x960] ss:$16 sps:$4 sm:$0xff]  }
 0x33f   : > { %3855 = vmatpush1.bf16.msra.mxu0 %v7288_v51  ;;  %v7370_v51 = vld [vmem:[#allocation7 + $0x968] ss:$16 sps:$4 sm:$0xff]  }
 0x340   : > { %3937 = vmatpush1.bf16.msra.mxu1 %v7291_v53  ;;  %3856 = vmatprep.subr.bf16.mxu0 %v7296_v54  ;;  %v7375_v53 = vld [vmem:[#allocation7 + $0x984] ss:$16 sps:$4 sm:$0xff]   ;;  %v7378_v54 = vld [vmem:[#allocation7 + $0x98c] ss:$16 sps:$4 sm:$0xff]  }
 0x341   : > { %3938 = vmatprep.subr.bf16.mxu1 %v7299_v55  ;;  %v7373_v55 = vld [vmem:[#allocation7 + $0x980] ss:$16 sps:$4 sm:$0xff]  }
 0x343   : > { %3857 = vmatpush1.bf16.msra.mxu0 %v7294_v57  ;;  %v7381_v57 = vld [vmem:[#allocation7 + $0x9a4] ss:$16 sps:$4 sm:$0xff]  }
 0x344   : > { %3939 = vmatpush1.bf16.msra.mxu1 %v7297_v59  ;;  %4742 = vmatprep.subr.bf16.mxu0 %v7302_v60  ;;  %v7384_v59 = vld [vmem:[#allocation7 + $0x9ac] ss:$16 sps:$4 sm:$0xff]   ;;  %v7379_v60 = vld [vmem:[#allocation7 + $0x9a0] ss:$16 sps:$4 sm:$0xff]  }
 0x345   : > { %4824 = vmatprep.subr.bf16.mxu1 %v7305_v30  ;;  %v7382_v30 = vld [vmem:[#allocation7 + $0x9a8] ss:$16 sps:$4 sm:$0xff]  }
 0x346   : > { %3859 = vmatmul.mubr.bf16.vlgmr.msra.gmra.mrb[4].mxu0 %v2166_v63 }
 0x347   : > { %3941 = vmatmul.mubr.bf16.vlgmr.msra.gmra.mrb[4].mxu1 %v2166_v63  ;;  %4743 = vmatpush1.bf16.msra.mxu0 %v7300_v62  ;;  %v7390_v62 = vld [vmem:[#allocation7 + $0x9cc] ss:$16 sps:$4 sm:$0xff]   ;;  %v7385_v63 = vld [vmem:[#allocation7 + $0x9c0] ss:$16 sps:$4 sm:$0xff]  }
 0x348   : > { %4774 = vmatprep.mubr.bf16.mxu0 %v4095_v2  ;;  %4825 = vmatpush1.bf16.msra.mxu1 %v7303_v0  ;;  %v8797_v0 = vld [vmem:[#allocation2 + $0x8] sm:$0xcc] }
 0x349   : > { %4856 = vmatprep.mubr.bf16.mxu1 %v4095_v2  ;;  %4744 = vmatprep.subr.bf16.mxu0 %v7309_v1  ;;  %v7388_v1 = vld [vmem:[#allocation7 + $0x9c8] ss:$16 sps:$4 sm:$0xff]   ;;  %v7393_v2 = vld [vmem:[#allocation7 + $0x9e4] ss:$16 sps:$4 sm:$0xff]  }
 0x34a   : > { %4826 = vmatprep.subr.bf16.mxu1 %v7312_v3  ;;  %v7396_v3 = vld [vmem:[#allocation7 + $0x9ec] ss:$16 sps:$4 sm:$0xff]  }
 0x34b   : > { %4745 = vmatpush1.bf16.msra.mxu0 %v7307_v6  ;;  %v4083_v6 = vcombine.high %v8797_v0, %v8797_v0 }
 0x34c   : > { %4827 = vmatpush1.bf16.msra.mxu1 %v7310_v7  ;;  %4746 = vmatprep.subr.bf16.mxu0 %v7315_v8  ;;  %v7391_v7 = vld [vmem:[#allocation7 + $0x9e0] ss:$16 sps:$4 sm:$0xff]   ;;  %v4086_v8 = vpack.c.bf16 %v8791_v52, %v8791_v52 }
 0x34d   : > { %4828 = vmatprep.subr.bf16.mxu1 %v7318_v9  ;;  %v7394_v9 = vld [vmem:[#allocation7 + $0x9e8] ss:$16 sps:$4 sm:$0xff]   ;;  %v7404_v52 = vld [vmem:[#allocation7 + $0xa20] ss:$16 sps:$4 sm:$0xff]  }
 0x34f   : > { %4747 = vmatpush1.bf16.msra.mxu0 %v7313_v45  ;;  %v7399_v45 = vld [vmem:[#allocation7 + $0xa04] ss:$16 sps:$4 sm:$0xff]  }
 0x350   : > { %4829 = vmatpush1.bf16.msra.mxu1 %v7316_v10  ;;  %4748 = vmatprep.subr.bf16.mxu0 %v7321_v11  ;;  %v7402_v10 = vld [vmem:[#allocation7 + $0xa0c] ss:$16 sps:$4 sm:$0xff]   ;;  %v4089_v11 = vpack.c.bf16 %v4083_v6, %v4083_v6  ;;  %v7470_v6 = vld [vmem:[#allocation7 + $0xb80] ss:$16 sps:$4 sm:$0xff]  }
 0x351   : > { %4830 = vmatprep.subr.bf16.mxu1 %v7324_v12  ;;  %v7397_v12 = vld [vmem:[#allocation7 + $0xa00] ss:$16 sps:$4 sm:$0xff]  }
 0x353   : > { %4749 = vmatpush1.bf16.msra.mxu0 %v7319_v13  ;;  %v4094_v13 = vrot.slane %v4086_v8, 1  ;;  %v7478_v8 = vld [vmem:[#allocation7 + $0xba4] ss:$16 sps:$4 sm:$0xff]  }
 0x354   : > { %4831 = vmatpush1.bf16.msra.mxu1 %v7322_v58  ;;  %4750 = vmatprep.subr.bf16.mxu0 %v7327_v14  ;;  %v7400_v58 = vld [vmem:[#allocation7 + $0xa08] ss:$16 sps:$4 sm:$0xff]   ;;  %v7406_v14 = vld [vmem:[#allocation7 + $0xa24] ss:$16 sps:$4 sm:$0xff]  }
 0x355   : > { %4832 = vmatprep.subr.bf16.mxu1 %v7330_v15  ;;  %v4097_v15 = vrot.slane %v4089_v11, 1  ;;  %v7484_v11 = vld [vmem:[#allocation7 + $0xbc4] ss:$16 sps:$4 sm:$0xff]  }
 0x357   : > { %4751 = vmatpush1.bf16.msra.mxu0 %v7325_v16  ;;  %v7409_v16 = vld [vmem:[#allocation7 + $0xa2c] ss:$16 sps:$4 sm:$0xff]  }
 0x358   : > { %4833 = vmatpush1.bf16.msra.mxu1 %v7328_v17  ;;  %4752 = vmatprep.subr.bf16.mxu0 %v7333_v18  ;;  %v7407_v17 = vld [vmem:[#allocation7 + $0xa28] ss:$16 sps:$4 sm:$0xff]   ;;  %v7412_v18 = vld [vmem:[#allocation7 + $0xa44] ss:$16 sps:$4 sm:$0xff]  }
 0x359   : > { %4834 = vmatprep.subr.bf16.mxu1 %v7336_v19  ;;  %v7415_v19 = vld [vmem:[#allocation7 + $0xa4c] ss:$16 sps:$4 sm:$0xff]  }
 0x35b   : > { %4753 = vmatpush1.bf16.msra.mxu0 %v7331_v20  ;;  %v7410_v20 = vld [vmem:[#allocation7 + $0xa40] ss:$16 sps:$4 sm:$0xff]  }
 0x35c   : > { %4835 = vmatpush1.bf16.msra.mxu1 %v7334_v21  ;;  %4754 = vmatprep.subr.bf16.mxu0 %v7339_v22  ;;  %v7413_v21 = vld [vmem:[#allocation7 + $0xa48] ss:$16 sps:$4 sm:$0xff]   ;;  %v7418_v22 = vld [vmem:[#allocation7 + $0xa64] ss:$16 sps:$4 sm:$0xff]  }
 0x35d   : > { %4836 = vmatprep.subr.bf16.mxu1 %v7342_v23  ;;  %v7421_v23 = vld [vmem:[#allocation7 + $0xa6c] ss:$16 sps:$4 sm:$0xff]  }
 0x35f   : > { %4755 = vmatpush1.bf16.msra.mxu0 %v7337_v24  ;;  %v7416_v24 = vld [vmem:[#allocation7 + $0xa60] ss:$16 sps:$4 sm:$0xff]  }
 0x360   : > { %4837 = vmatpush1.bf16.msra.mxu1 %v7340_v25  ;;  %4756 = vmatprep.subr.bf16.mxu0 %v7345_v26  ;;  %v7419_v25 = vld [vmem:[#allocation7 + $0xa68] ss:$16 sps:$4 sm:$0xff]   ;;  %v7424_v26 = vld [vmem:[#allocation7 + $0xa84] ss:$16 sps:$4 sm:$0xff]  }
 0x361   : > { %4838 = vmatprep.subr.bf16.mxu1 %v7348_v33  ;;  %v7427_v33 = vld [vmem:[#allocation7 + $0xa8c] ss:$16 sps:$4 sm:$0xff]  }
 0x363   : > { %4757 = vmatpush1.bf16.msra.mxu0 %v7343_v34  ;;  %v7422_v34 = vld [vmem:[#allocation7 + $0xa80] ss:$16 sps:$4 sm:$0xff]  }
 0x364   : > { %4839 = vmatpush1.bf16.msra.mxu1 %v7346_v4  ;;  %4758 = vmatprep.subr.bf16.mxu0 %v7351_v35  ;;  %v7425_v4 = vld [vmem:[#allocation7 + $0xa88] ss:$16 sps:$4 sm:$0xff]   ;;  %v7430_v35 = vld [vmem:[#allocation7 + $0xaa4] ss:$16 sps:$4 sm:$0xff]  }
 0x365   : > { %4840 = vmatprep.subr.bf16.mxu1 %v7354_v36  ;;  %v7433_v36 = vld [vmem:[#allocation7 + $0xaac] ss:$16 sps:$4 sm:$0xff]  }
 0x367   : > { %4759 = vmatpush1.bf16.msra.mxu0 %v7349_v37  ;;  %v7428_v37 = vld [vmem:[#allocation7 + $0xaa0] ss:$16 sps:$4 sm:$0xff]  }
 0x368   : > { %4841 = vmatpush1.bf16.msra.mxu1 %v7352_v38  ;;  %4760 = vmatprep.subr.bf16.mxu0 %v7357_v39  ;;  %v7431_v38 = vld [vmem:[#allocation7 + $0xaa8] ss:$16 sps:$4 sm:$0xff]   ;;  %v7436_v39 = vld [vmem:[#allocation7 + $0xac4] ss:$16 sps:$4 sm:$0xff]  }
 0x369   : > { %4842 = vmatprep.subr.bf16.mxu1 %v7360_v40  ;;  %v7439_v40 = vld [vmem:[#allocation7 + $0xacc] ss:$16 sps:$4 sm:$0xff]  }
 0x36b   : > { %4761 = vmatpush1.bf16.msra.mxu0 %v7355_v41  ;;  %v7434_v41 = vld [vmem:[#allocation7 + $0xac0] ss:$16 sps:$4 sm:$0xff]  }
 0x36c   : > { %4843 = vmatpush1.bf16.msra.mxu1 %v7358_v42  ;;  %4762 = vmatprep.subr.bf16.mxu0 %v7363_v43  ;;  %v7437_v42 = vld [vmem:[#allocation7 + $0xac8] ss:$16 sps:$4 sm:$0xff]   ;;  %v7442_v43 = vld [vmem:[#allocation7 + $0xae4] ss:$16 sps:$4 sm:$0xff]  }
 0x36d   : > { %4844 = vmatprep.subr.bf16.mxu1 %v7366_v44  ;;  %v7445_v44 = vld [vmem:[#allocation7 + $0xaec] ss:$16 sps:$4 sm:$0xff]  }
 0x36f   : > { %4763 = vmatpush1.bf16.msra.mxu0 %v7361_v46  ;;  %v7440_v46 = vld [vmem:[#allocation7 + $0xae0] ss:$16 sps:$4 sm:$0xff]  }
 0x370   : > { %4845 = vmatpush1.bf16.msra.mxu1 %v7364_v47  ;;  %4764 = vmatprep.subr.bf16.mxu0 %v7369_v48  ;;  %v7443_v47 = vld [vmem:[#allocation7 + $0xae8] ss:$16 sps:$4 sm:$0xff]   ;;  %v7448_v48 = vld [vmem:[#allocation7 + $0xb04] ss:$16 sps:$4 sm:$0xff]  }
 0x371   : > { %4846 = vmatprep.subr.bf16.mxu1 %v7372_v49  ;;  %v7451_v49 = vld [vmem:[#allocation7 + $0xb0c] ss:$16 sps:$4 sm:$0xff]  }
 0x373   : > { %4765 = vmatpush1.bf16.msra.mxu0 %v7367_v50  ;;  %v7446_v50 = vld [vmem:[#allocation7 + $0xb00] ss:$16 sps:$4 sm:$0xff]  }
 0x374   : > { %4847 = vmatpush1.bf16.msra.mxu1 %v7370_v51  ;;  %4766 = vmatprep.subr.bf16.mxu0 %v7375_v53  ;;  %v7449_v51 = vld [vmem:[#allocation7 + $0xb08] ss:$16 sps:$4 sm:$0xff]   ;;  %v7454_v53 = vld [vmem:[#allocation7 + $0xb24] ss:$16 sps:$4 sm:$0xff]  }
 0x375   : > { %4848 = vmatprep.subr.bf16.mxu1 %v7378_v54  ;;  %v7457_v54 = vld [vmem:[#allocation7 + $0xb2c] ss:$16 sps:$4 sm:$0xff]  }
 0x377   : > { %4767 = vmatpush1.bf16.msra.mxu0 %v7373_v55  ;;  %v7452_v55 = vld [vmem:[#allocation7 + $0xb20] ss:$16 sps:$4 sm:$0xff]  }
 0x378   : > { %4849 = vmatpush1.bf16.msra.mxu1 %v7376_v56  ;;  %4768 = vmatprep.subr.bf16.mxu0 %v7381_v57  ;;  %v7455_v56 = vld [vmem:[#allocation7 + $0xb28] ss:$16 sps:$4 sm:$0xff]   ;;  %v7460_v57 = vld [vmem:[#allocation7 + $0xb44] ss:$16 sps:$4 sm:$0xff]  }
 0x379   : > { %4850 = vmatprep.subr.bf16.mxu1 %v7384_v59  ;;  %v7463_v59 = vld [vmem:[#allocation7 + $0xb4c] ss:$16 sps:$4 sm:$0xff]  }
 0x37b   : > { %4769 = vmatpush1.bf16.msra.mxu0 %v7379_v60  ;;  %v7458_v60 = vld [vmem:[#allocation7 + $0xb40] ss:$16 sps:$4 sm:$0xff]  }
 0x37c   : > { %4851 = vmatpush1.bf16.msra.mxu1 %v7382_v30  ;;  %4770 = vmatprep.subr.bf16.mxu0 %v7387_v61  ;;  %v7461_v30 = vld [vmem:[#allocation7 + $0xb48] ss:$16 sps:$4 sm:$0xff]   ;;  %v7466_v61 = vld [vmem:[#allocation7 + $0xb64] ss:$16 sps:$4 sm:$0xff]  }
 0x37d   : > { %4852 = vmatprep.subr.bf16.mxu1 %v7390_v62  ;;  %v7469_v62 = vld [vmem:[#allocation7 + $0xb6c] ss:$16 sps:$4 sm:$0xff]  }
 0x37f   : > { %4771 = vmatpush1.bf16.msra.mxu0 %v7385_v63  ;;  %v7464_v63 = vld [vmem:[#allocation7 + $0xb60] ss:$16 sps:$4 sm:$0xff]  }
 0x380   : > { %4853 = vmatpush1.bf16.msra.mxu1 %v7388_v1  ;;  %4772 = vmatprep.subr.bf16.mxu0 %v7393_v2  ;;  %v7467_v1 = vld [vmem:[#allocation7 + $0xb68] ss:$16 sps:$4 sm:$0xff]   ;;  %v7472_v2 = vld [vmem:[#allocation7 + $0xb84] ss:$16 sps:$4 sm:$0xff]  }
 0x381   : > { %4854 = vmatprep.subr.bf16.mxu1 %v7396_v3  ;;  %v7475_v3 = vld [vmem:[#allocation7 + $0xb8c] ss:$16 sps:$4 sm:$0xff]  }
 0x383   : > { %4773 = vmatpush1.bf16.msra.mxu0 %v7391_v7  ;;  %v7473_v7 = vld [vmem:[#allocation7 + $0xb88] ss:$16 sps:$4 sm:$0xff]  }
 0x384   : > { %4855 = vmatpush1.bf16.msra.mxu1 %v7394_v9  ;;  %4783 = vmatprep.subr.bf16.mxu0 %v7399_v45  ;;  %v7481_v9 = vld [vmem:[#allocation7 + $0xbac] ss:$16 sps:$4 sm:$0xff]   ;;  %v7476_v45 = vld [vmem:[#allocation7 + $0xba0] ss:$16 sps:$4 sm:$0xff]  }
 0x385   : > { %4865 = vmatprep.subr.bf16.mxu1 %v7402_v10  ;;  %v7479_v10 = vld [vmem:[#allocation7 + $0xba8] ss:$16 sps:$4 sm:$0xff]  }
 0x386   : > { %4775 = vmatmul.mubr.bf16.vlgmr.msra.gmra.mrb[4].mxu0 %v4094_v13 }
 0x387   : > { %4857 = vmatmul.mubr.bf16.vlgmr.msra.gmra.mrb[4].mxu1 %v4094_v13  ;;  %4784 = vmatpush1.bf16.msra.mxu0 %v7397_v12  ;;  %v7487_v12 = vld [vmem:[#allocation7 + $0xbcc] ss:$16 sps:$4 sm:$0xff]   ;;  %v7482_v13 = vld [vmem:[#allocation7 + $0xbc0] ss:$16 sps:$4 sm:$0xff]  }
 0x388   : > { %4815 = vmatprep.mubr.bf16.mxu0 %v4097_v15  ;;  %4866 = vmatpush1.bf16.msra.mxu1 %v7400_v58  ;;  %v7485_v58 = vld [vmem:[#allocation7 + $0xbc8] ss:$16 sps:$4 sm:$0xff]  }
 0x389   : > { %4897 = vmatprep.mubr.bf16.mxu1 %v4097_v15  ;;  %4785 = vmatprep.subr.bf16.mxu0 %v7406_v14  ;;  %v7490_v14 = vld [vmem:[#allocation7 + $0xbe4] ss:$16 sps:$4 sm:$0xff]   ;;  %v7493_v15 = vld [vmem:[#allocation7 + $0xbec] ss:$16 sps:$4 sm:$0xff]  }
 0x38a   : > { %4867 = vmatprep.subr.bf16.mxu1 %v7409_v16  ;;  %v7488_v16 = vld [vmem:[#allocation7 + $0xbe0] ss:$16 sps:$4 sm:$0xff]  }
 0x38b   : > { %4786 = vmatpush1.bf16.msra.mxu0 %v7404_v52  ;;  %v4088_v52 = vpack.c.bf16 %v8797_v0, %v8797_v0  ;;  %v7500_v0 = vld [vmem:[#allocation11 + $0x20] ss:$16 sps:$4 sm:$0xff]  }
 0x38c   : > { %4868 = vmatpush1.bf16.msra.mxu1 %v7407_v17  ;;  %4787 = vmatprep.subr.bf16.mxu0 %v7412_v18  ;;  %v7491_v17 = vld [vmem:[#allocation7 + $0xbe8] ss:$16 sps:$4 sm:$0xff]   ;;  %v7496_v18 = vld [vmem:[#allocation11 + $0x4] ss:$16 sps:$4 sm:$0xff]  }
 0x38d   : > { %4869 = vmatprep.subr.bf16.mxu1 %v7415_v19  ;;  %v7499_v19 = vld [vmem:[#allocation11 + $0xc] ss:$16 sps:$4 sm:$0xff]  }
 0x38f   : > { %4788 = vmatpush1.bf16.msra.mxu0 %v7410_v20  ;;  %v7590_v20 = vld.sshfl [vmem:[%s8283_s25] sm:$0x33 pattern:$0x76325410] }
 0x390   : > { %4870 = vmatpush1.bf16.msra.mxu1 %v7413_v21  ;;  %4789 = vmatprep.subr.bf16.mxu0 %v7418_v22  ;;  %v5035_v21 = vcombine.high %v7590_v20, %v7590_v20  ;;  %v7494_v22 = vld [vmem:[#allocation11] ss:$16 sps:$4 sm:$0xff]   ;;  %v7580_v20 = vld [vmem:[#allocation11 + $0x1c4] ss:$16 sps:$4 sm:$0xff]  }
 0x391   : > { %4871 = vmatprep.subr.bf16.mxu1 %v7421_v23  ;;  %v4096_v23 = vrot.slane %v4088_v52, 1  ;;  %v7574_v52 = vld [vmem:[#allocation11 + $0x1a4] ss:$16 sps:$4 sm:$0xff]  }
 0x393   : > { %4790 = vmatpush1.bf16.msra.mxu0 %v7416_v24  ;;  %v7497_v24 = vld [vmem:[#allocation11 + $0x8] ss:$16 sps:$4 sm:$0xff]  }
 0x394   : > { %4872 = vmatpush1.bf16.msra.mxu1 %v7419_v25  ;;  %4791 = vmatprep.subr.bf16.mxu0 %v7424_v26  ;;  %v7502_v25 = vld [vmem:[#allocation11 + $0x24] ss:$16 sps:$4 sm:$0xff]   ;;  %v7505_v26 = vld [vmem:[#allocation11 + $0x2c] ss:$16 sps:$4 sm:$0xff]  }
 0x395   : > { %4873 = vmatprep.subr.bf16.mxu1 %v7427_v33  ;;  %v5039_v33 = vpack.c.bf16 %v5035_v21, %v5035_v21  ;;  %v7583_v21 = vld [vmem:[#allocation11 + $0x1cc] ss:$16 sps:$4 sm:$0xff]  }
 0x397   : > { %4792 = vmatpush1.bf16.msra.mxu0 %v7422_v34  ;;  %v7503_v34 = vld [vmem:[#allocation11 + $0x28] ss:$16 sps:$4 sm:$0xff]  }
 0x398   : > { %4874 = vmatpush1.bf16.msra.mxu1 %v7425_v4  ;;  %4793 = vmatprep.subr.bf16.mxu0 %v7430_v35  ;;  %v7508_v4 = vld [vmem:[#allocation11 + $0x44] ss:$16 sps:$4 sm:$0xff]   ;;  %v7511_v35 = vld [vmem:[#allocation11 + $0x4c] ss:$16 sps:$4 sm:$0xff]  }
 0x399   : > { %4875 = vmatprep.subr.bf16.mxu1 %v7433_v36  ;;  %v7506_v36 = vld [vmem:[#allocation11 + $0x40] ss:$16 sps:$4 sm:$0xff]  }
 0x39b   : > { %4794 = vmatpush1.bf16.msra.mxu0 %v7428_v37  ;;  %v7509_v37 = vld [vmem:[#allocation11 + $0x48] ss:$16 sps:$4 sm:$0xff]  }
 0x39c   : > { %4876 = vmatpush1.bf16.msra.mxu1 %v7431_v38  ;;  %4795 = vmatprep.subr.bf16.mxu0 %v7436_v39  ;;  %v7514_v38 = vld [vmem:[#allocation11 + $0x64] ss:$16 sps:$4 sm:$0xff]   ;;  %v7517_v39 = vld [vmem:[#allocation11 + $0x6c] ss:$16 sps:$4 sm:$0xff]  }
 0x39d   : > { %4877 = vmatprep.subr.bf16.mxu1 %v7439_v40  ;;  %v7512_v40 = vld [vmem:[#allocation11 + $0x60] ss:$16 sps:$4 sm:$0xff]  }
 0x39f   : > { %4796 = vmatpush1.bf16.msra.mxu0 %v7434_v41  ;;  %v7515_v41 = vld [vmem:[#allocation11 + $0x68] ss:$16 sps:$4 sm:$0xff]  }
 0x3a0   : > { %4878 = vmatpush1.bf16.msra.mxu1 %v7437_v42  ;;  %4797 = vmatprep.subr.bf16.mxu0 %v7442_v43  ;;  %v7520_v42 = vld [vmem:[#allocation11 + $0x84] ss:$16 sps:$4 sm:$0xff]   ;;  %v7523_v43 = vld [vmem:[#allocation11 + $0x8c] ss:$16 sps:$4 sm:$0xff]  }
 0x3a1   : > { %4879 = vmatprep.subr.bf16.mxu1 %v7445_v44  ;;  %v7518_v44 = vld [vmem:[#allocation11 + $0x80] ss:$16 sps:$4 sm:$0xff]  }
 0x3a3   : > { %4798 = vmatpush1.bf16.msra.mxu0 %v7440_v46  ;;  %v7521_v46 = vld [vmem:[#allocation11 + $0x88] ss:$16 sps:$4 sm:$0xff]  }
 0x3a4   : > { %4880 = vmatpush1.bf16.msra.mxu1 %v7443_v47  ;;  %4799 = vmatprep.subr.bf16.mxu0 %v7448_v48  ;;  %v7526_v47 = vld [vmem:[#allocation11 + $0xa4] ss:$16 sps:$4 sm:$0xff]   ;;  %v7529_v48 = vld [vmem:[#allocation11 + $0xac] ss:$16 sps:$4 sm:$0xff]  }
 0x3a5   : > { %4881 = vmatprep.subr.bf16.mxu1 %v7451_v49  ;;  %v7524_v49 = vld [vmem:[#allocation11 + $0xa0] ss:$16 sps:$4 sm:$0xff]  }
 0x3a7   : > { %4800 = vmatpush1.bf16.msra.mxu0 %v7446_v50  ;;  %v7527_v50 = vld [vmem:[#allocation11 + $0xa8] ss:$16 sps:$4 sm:$0xff]  }
 0x3a8   : > { %4882 = vmatpush1.bf16.msra.mxu1 %v7449_v51  ;;  %4801 = vmatprep.subr.bf16.mxu0 %v7454_v53  ;;  %v7532_v51 = vld [vmem:[#allocation11 + $0xc4] ss:$16 sps:$4 sm:$0xff]   ;;  %v7535_v53 = vld [vmem:[#allocation11 + $0xcc] ss:$16 sps:$4 sm:$0xff]  }
 0x3a9   : > { %4883 = vmatprep.subr.bf16.mxu1 %v7457_v54  ;;  %v7530_v54 = vld [vmem:[#allocation11 + $0xc0] ss:$16 sps:$4 sm:$0xff]  }
 0x3ab   : > { %4802 = vmatpush1.bf16.msra.mxu0 %v7452_v55  ;;  %v7533_v55 = vld [vmem:[#allocation11 + $0xc8] ss:$16 sps:$4 sm:$0xff]  }
 0x3ac   : > { %4884 = vmatpush1.bf16.msra.mxu1 %v7455_v56  ;;  %4803 = vmatprep.subr.bf16.mxu0 %v7460_v57  ;;  %v7538_v56 = vld [vmem:[#allocation11 + $0xe4] ss:$16 sps:$4 sm:$0xff]   ;;  %v7541_v57 = vld [vmem:[#allocation11 + $0xec] ss:$16 sps:$4 sm:$0xff]  }
 0x3ad   : > { %4885 = vmatprep.subr.bf16.mxu1 %v7463_v59  ;;  %v7536_v59 = vld [vmem:[#allocation11 + $0xe0] ss:$16 sps:$4 sm:$0xff]  }
 0x3af   : > { %4804 = vmatpush1.bf16.msra.mxu0 %v7458_v60  ;;  %v7539_v60 = vld [vmem:[#allocation11 + $0xe8] ss:$16 sps:$4 sm:$0xff]  }
 0x3b0   : > { %4886 = vmatpush1.bf16.msra.mxu1 %v7461_v30  ;;  %4805 = vmatprep.subr.bf16.mxu0 %v7466_v61  ;;  %v7544_v30 = vld [vmem:[#allocation11 + $0x104] ss:$16 sps:$4 sm:$0xff]   ;;  %v7547_v61 = vld [vmem:[#allocation11 + $0x10c] ss:$16 sps:$4 sm:$0xff]  }
 0x3b1   : > { %4887 = vmatprep.subr.bf16.mxu1 %v7469_v62  ;;  %v7542_v62 = vld [vmem:[#allocation11 + $0x100] ss:$16 sps:$4 sm:$0xff]  }
 0x3b3   : > { %4806 = vmatpush1.bf16.msra.mxu0 %v7464_v63  ;;  %v7545_v63 = vld [vmem:[#allocation11 + $0x108] ss:$16 sps:$4 sm:$0xff]  }
 0x3b4   : > { %4888 = vmatpush1.bf16.msra.mxu1 %v7467_v1  ;;  %4807 = vmatprep.subr.bf16.mxu0 %v7472_v2  ;;  %v7550_v1 = vld [vmem:[#allocation11 + $0x124] ss:$16 sps:$4 sm:$0xff]   ;;  %v7553_v2 = vld [vmem:[#allocation11 + $0x12c] ss:$16 sps:$4 sm:$0xff]  }
 0x3b5   : > { %4889 = vmatprep.subr.bf16.mxu1 %v7475_v3  ;;  %v7548_v3 = vld [vmem:[#allocation11 + $0x120] ss:$16 sps:$4 sm:$0xff]  }
 0x3b7   : > { %4808 = vmatpush1.bf16.msra.mxu0 %v7470_v6  ;;  %v7551_v6 = vld [vmem:[#allocation11 + $0x128] ss:$16 sps:$4 sm:$0xff]  }
 0x3b8   : > { %4890 = vmatpush1.bf16.msra.mxu1 %v7473_v7  ;;  %4809 = vmatprep.subr.bf16.mxu0 %v7478_v8  ;;  %v7556_v7 = vld [vmem:[#allocation11 + $0x144] ss:$16 sps:$4 sm:$0xff]   ;;  %v7559_v8 = vld [vmem:[#allocation11 + $0x14c] ss:$16 sps:$4 sm:$0xff]  }
 0x3b9   : > { %4891 = vmatprep.subr.bf16.mxu1 %v7481_v9  ;;  %v7554_v9 = vld [vmem:[#allocation11 + $0x140] ss:$16 sps:$4 sm:$0xff]  }
 0x3bb   : > { %4810 = vmatpush1.bf16.msra.mxu0 %v7476_v45  ;;  %v7557_v45 = vld [vmem:[#allocation11 + $0x148] ss:$16 sps:$4 sm:$0xff]  }
 0x3bc   : > { %4892 = vmatpush1.bf16.msra.mxu1 %v7479_v10  ;;  %4811 = vmatprep.subr.bf16.mxu0 %v7484_v11  ;;  %v7562_v10 = vld [vmem:[#allocation11 + $0x164] ss:$16 sps:$4 sm:$0xff]   ;;  %v7565_v11 = vld [vmem:[#allocation11 + $0x16c] ss:$16 sps:$4 sm:$0xff]  }
 0x3bd   : > { %4893 = vmatprep.subr.bf16.mxu1 %v7487_v12  ;;  %v7560_v12 = vld [vmem:[#allocation11 + $0x160] ss:$16 sps:$4 sm:$0xff]  }
 0x3bf   : > { %4812 = vmatpush1.bf16.msra.mxu0 %v7482_v13  ;;  %v7563_v13 = vld [vmem:[#allocation11 + $0x168] ss:$16 sps:$4 sm:$0xff]  }
 0x3c0   : > { %4894 = vmatpush1.bf16.msra.mxu1 %v7485_v58  ;;  %4813 = vmatprep.subr.bf16.mxu0 %v7490_v14  ;;  %v7568_v58 = vld [vmem:[#allocation11 + $0x184] ss:$16 sps:$4 sm:$0xff]   ;;  %v7571_v14 = vld [vmem:[#allocation11 + $0x18c] ss:$16 sps:$4 sm:$0xff]  }
 0x3c1   : > { %4895 = vmatprep.subr.bf16.mxu1 %v7493_v15  ;;  %v7566_v15 = vld [vmem:[#allocation11 + $0x180] ss:$16 sps:$4 sm:$0xff]  }
 0x3c3   : > { %4814 = vmatpush1.bf16.msra.mxu0 %v7488_v16  ;;  %v7569_v16 = vld [vmem:[#allocation11 + $0x188] ss:$16 sps:$4 sm:$0xff]  }
 0x3c4   : > { %4896 = vmatpush1.bf16.msra.mxu1 %v7491_v17  ;;  %5360 = vmatprep.subr.bf16.mxu0 %v7496_v18  ;;  %v7577_v17 = vld [vmem:[#allocation11 + $0x1ac] ss:$16 sps:$4 sm:$0xff]   ;;  %v7572_v18 = vld [vmem:[#allocation11 + $0x1a0] ss:$16 sps:$4 sm:$0xff]  }
 0x3c5   : > { %5401 = vmatprep.subr.bf16.mxu1 %v7499_v19  ;;  %v7575_v19 = vld [vmem:[#allocation11 + $0x1a8] ss:$16 sps:$4 sm:$0xff]  }
 0x3c6   : > { %4816 = vmatmul.mubr.bf16.vlgmr.msra.gmra.mrb[4].mxu0 %v4096_v23 }
 0x3c7   : > { %4898 = vmatmul.mubr.bf16.vlgmr.msra.gmra.mrb[4].mxu1 %v4096_v23  ;;  %5361 = vmatpush1.bf16.msra.mxu0 %v7494_v22  ;;  %v7578_v22 = vld [vmem:[#allocation11 + $0x1c0] ss:$16 sps:$4 sm:$0xff]   ;;  %v7581_v23 = vld [vmem:[#allocation11 + $0x1c8] ss:$16 sps:$4 sm:$0xff]  }
 0x3c8   : > { %5402 = vmatpush1.bf16.msra.mxu1 %v7497_v24  ;;  %5362 = vmatprep.subr.bf16.mxu0 %v7502_v25  ;;  %v7586_v24 = vld [vmem:[#allocation11 + $0x1e4] ss:$16 sps:$4 sm:$0xff]   ;;  %v7589_v25 = vld [vmem:[#allocation11 + $0x1ec] ss:$16 sps:$4 sm:$0xff]  }
 0x3c9   : > { %5403 = vmatprep.subr.bf16.mxu1 %v7505_v26  ;;  %5392 = vmatprep.mubr.bf16.mxu0 %v5039_v33  ;;  %v7584_v26 = vld [vmem:[#allocation11 + $0x1e0] ss:$16 sps:$4 sm:$0xff]  }
 0x3ca   : > { %5433 = vmatprep.mubr.bf16.mxu1 %v5039_v33  ;;  %v7587_v33 = vld [vmem:[#allocation11 + $0x1e8] ss:$16 sps:$4 sm:$0xff]  }
 0x3cb   : > { %5363 = vmatpush1.bf16.msra.mxu0 %v7500_v0 }
 0x3cc   : > { %5404 = vmatpush1.bf16.msra.mxu1 %v7503_v34  ;;  %5364 = vmatprep.subr.bf16.mxu0 %v7508_v4 }
 0x3cd   : > { %5405 = vmatprep.subr.bf16.mxu1 %v7511_v35 }
 0x3cf   : > { %5365 = vmatpush1.bf16.msra.mxu0 %v7506_v36 }
 0x3d0   : > { %5406 = vmatpush1.bf16.msra.mxu1 %v7509_v37  ;;  %5366 = vmatprep.subr.bf16.mxu0 %v7514_v38 }
 0x3d1   : > { %5407 = vmatprep.subr.bf16.mxu1 %v7517_v39 }
 0x3d3   : > { %5367 = vmatpush1.bf16.msra.mxu0 %v7512_v40  ;;  %v4910_v40 = vld [vmem:[#allocation8] sm:$0xf] }
 0x3d4   : > { %5408 = vmatpush1.bf16.msra.mxu1 %v7515_v41  ;;  %5368 = vmatprep.subr.bf16.mxu0 %v7520_v42  ;;  %v4936_v41 = vld [vmem:[#allocation10] sm:$0xf]  ;;  %v5442_v42 = vld [vmem:[#allocation13] sm:$0xf] }
 0x3d5   : > { %5409 = vmatprep.subr.bf16.mxu1 %v7523_v43  ;;  %v4915_v43 = vrot.slane %v4910_v40, %v8756_v28 }
 0x3d7   : > { %5369 = vmatpush1.bf16.msra.mxu0 %v7518_v44  ;;  %v4923_v44 = vrot.slane %v4910_v40, %v8759_v29 }
 0x3d8   : > { %5410 = vmatpush1.bf16.msra.mxu1 %v7521_v46  ;;  %5370 = vmatprep.subr.bf16.mxu0 %v7526_v47  ;;  %v4919_v46 = vrot.slane %v4910_v40, %v8762_v31  ;;  %v5468_v47 = vld [vmem:[#allocation14] sm:$0xf] }
 0x3d9   : > { %5411 = vmatprep.subr.bf16.mxu1 %v7529_v48  ;;  %v4927_v48 = vrot.slane %v4910_v40, %v8765_v32 }
 0x3db   : > { %5371 = vmatpush1.bf16.msra.mxu0 %v7524_v49  ;;  %v5447_v49 = vrot.slane %v5442_v42, %v8756_v28 }
 0x3dc   : > { %5412 = vmatpush1.bf16.msra.mxu1 %v7527_v50  ;;  %5372 = vmatprep.subr.bf16.mxu0 %v7532_v51  ;;  %v4949_v50 = vrot.slane %v4936_v41, %v8759_v29  ;;  %v4945_v51 = vrot.slane %v4936_v41, %v8762_v31 }
 0x3dd   : > { %5413 = vmatprep.subr.bf16.mxu1 %v7535_v53  ;;  %v5455_v53 = vrot.slane %v5442_v42, %v8759_v29 }
 0x3df   : > { %5373 = vmatpush1.bf16.msra.mxu0 %v7530_v54  ;;  %v5451_v54 = vrot.slane %v5442_v42, %v8762_v31 }
 0x3e0   : > { %5414 = vmatpush1.bf16.msra.mxu1 %v7533_v55  ;;  %5374 = vmatprep.subr.bf16.mxu0 %v7538_v56  ;;  %v5473_v56 = vrot.slane %v5468_v47, %v8756_v28 }
 0x3e1   : > { %5415 = vmatprep.subr.bf16.mxu1 %v7541_v57  ;;  %v7854_v57 = vmov 1983009808  }
 0x3e3   : > { %5375 = vmatpush1.bf16.msra.mxu0 %v7536_v59  ;;  %v5509_v59 = vunpack.c.l.s4 %v7854_v57 }
 0x3e4   : > { %5416 = vmatpush1.bf16.msra.mxu1 %v7539_v60  ;;  %5376 = vmatprep.subr.bf16.mxu0 %v7544_v30  ;;  %v5459_v60 = vrot.slane %v5442_v42, %v8765_v32 }
 0x3e5   : > { %5417 = vmatprep.subr.bf16.mxu1 %v7547_v61 }
 0x3e7   : > { %5377 = vmatpush1.bf16.msra.mxu0 %v7542_v62 }
 0x3e8   : > { %5418 = vmatpush1.bf16.msra.mxu1 %v7545_v63  ;;  %5378 = vmatprep.subr.bf16.mxu0 %v7550_v1  ;;  %v5481_v63 = vrot.slane %v5468_v47, %v8759_v29  ;;  %v5477_v1 = vrot.slane %v5468_v47, %v8762_v31 }
 0x3e9   : > { %5419 = vmatprep.subr.bf16.mxu1 %v7553_v2 }
 0x3eb   : > { %5379 = vmatpush1.bf16.msra.mxu0 %v7548_v3  ;;  %v4953_v3 = vrot.slane %v4936_v41, %v8765_v32 }
 0x3ec   : > { %5420 = vmatpush1.bf16.msra.mxu1 %v7551_v6  ;;  %5380 = vmatprep.subr.bf16.mxu0 %v7556_v7 }
 0x3ed   : > { %5421 = vmatprep.subr.bf16.mxu1 %v7559_v8 }
 0x3ef   : > { %5381 = vmatpush1.bf16.msra.mxu0 %v7554_v9  ;;  %v5485_v9 = vrot.slane %v5468_v47, %v8765_v32 }
 0x3f0   : > { %5422 = vmatpush1.bf16.msra.mxu1 %v7557_v45  ;;  %5382 = vmatprep.subr.bf16.mxu0 %v7562_v10 }
 0x3f1   : > { %5423 = vmatprep.subr.bf16.mxu1 %v7565_v11 }
 0x3f3   : > { %5383 = vmatpush1.bf16.msra.mxu0 %v7560_v12 }
 0x3f4   : > { %5424 = vmatpush1.bf16.msra.mxu1 %v7563_v13  ;;  %5384 = vmatprep.subr.bf16.mxu0 %v7568_v58  ;;  %v5510_v58 = vunpack.c.0.s8 %v5509_v59 }
 0x3f5   : > { %5425 = vmatprep.subr.bf16.mxu1 %v7571_v14 }
 0x3f7   : > { %5385 = vmatpush1.bf16.msra.mxu0 %v7566_v15 }
 0x3f8   : > { %5426 = vmatpush1.bf16.msra.mxu1 %v7569_v16  ;;  %5386 = vmatprep.subr.bf16.mxu0 %v7574_v52 }
 0x3f9   : > { %5427 = vmatprep.subr.bf16.mxu1 %v7577_v17 }
 0x3fb   : > { %5387 = vmatpush1.bf16.msra.mxu0 %v7572_v18 }
 0x3fc   : > { %5428 = vmatpush1.bf16.msra.mxu1 %v7575_v19  ;;  %5388 = vmatprep.subr.bf16.mxu0 %v7580_v20 }
 0x3fd   : > { %5429 = vmatprep.subr.bf16.mxu1 %v7583_v21 }
 0x3ff   : > { %5389 = vmatpush1.bf16.msra.mxu0 %v7578_v22 }
 0x400   : > { %5430 = vmatpush1.bf16.msra.mxu1 %v7581_v23  ;;  %5390 = vmatprep.subr.bf16.mxu0 %v7586_v24 }
 0x401   : > { %5431 = vmatprep.subr.bf16.mxu1 %v7589_v25 }
 0x403   : > { %5391 = vmatpush1.bf16.msra.mxu0 %v7584_v26 }
 0x404   : > { %5432 = vmatpush1.bf16.msra.mxu1 %v7587_v33  ;;  %v5513_v33 = vsub.s32 %v5510_v58, %v8753_v27 }
 0x406   : > { %5393 = vmatmul.mubr.bf16.vlgmr.msra.gmra.mrb[8].mxu0 %v8349_v5 }
 0x407   : > { %5434 = vmatmul.mubr.bf16.vlgmr.msra.gmra.mrb[8].mxu1 %v8349_v5  ;;  %v4941_v5 = vrot.slane %v4936_v41, %v8756_v28 }
 0x499   : > { %v4817_v0 = vpop.f32.mrb[4].mxu0 }
 0x49a   : > { %v4899_v34 = vpop.f32.mrb[4].mxu1  ;;  %v4819_v4 = vpop.f32.mrb[5].mxu0  ;;  %v4932_v55 = vmul.f32 %v4915_v43, %v4817_v0 }
 0x49b   : > { %v4901_v35 = vpop.f32.mrb[5].mxu1  ;;  %v4821_v36 = vpop.f32.mrb[6].mxu0  ;;  %v4934_v30 = vmul.f32 %v4923_v44, %v4899_v34  ;;  %v4933_v61 = vmul.f32 %v4919_v46, %v4819_v4 }
 0x49c   : > { %v4903_v37 = vpop.f32.mrb[6].mxu1  ;;  %v4822_v38 = vpop.f32.mrb[7].mxu0  ;;  %v4935_v2 = vmul.f32 %v4927_v48, %v4901_v35  ;;  %v4958_v12 = vadd.f32 %v4941_v5, %v4932_v55 }
 0x49d   : > { %v4904_v39 = vpop.f32.mrb[7].mxu1  ;;  %v4960_v16 = vadd.f32 %v4949_v50, %v4934_v30  ;;  %v4959_v31 = vadd.f32 %v4945_v51, %v4933_v61 }
 0x49e   : > { %v4961_v19 = vadd.f32 %v4953_v3, %v4935_v2 }
 0x4d9   : > { %v5394_v62 = vpop.f32.mrb[8].mxu0 }
 0x4da   : > { %v5464_v6 = vmul.f32 %v5447_v49, %v5394_v62  ;;  %v5435_v7 = vpop.f32.mrb[8].mxu1  ;;  %v5396_v8 = vpop.f32.mrb[9].mxu0 }
 0x4db   : > { %v5466_v28 = vmul.f32 %v5455_v53, %v5435_v7  ;;  %v5465_v45 = vmul.f32 %v5451_v54, %v5396_v8  ;;  %v5437_v10 = vpop.f32.mrb[9].mxu1  ;;  %v5398_v11 = vpop.f32.mrb[10].mxu0 }
 0x4dc   : > { %v5490_v13 = vadd.f32 %v5473_v56, %v5464_v6  ;;  %v5467_v14 = vmul.f32 %v5459_v60, %v5437_v10  ;;  %v5439_v15 = vpop.f32.mrb[10].mxu1  ;;  %v5399_v29 = vpop.f32.mrb[11].mxu0 }
 0x4dd   : > { %v5492_v52 = vadd.f32 %v5481_v63, %v5466_v28  ;;  %v5491_v17 = vadd.f32 %v5477_v1, %v5465_v45  ;;  %v5440_v18 = vpop.f32.mrb[11].mxu1 }
 0x4de   : > { %v5494_v20 = vadd.f32 %v5490_v13, %v4958_v12  ;;  %v5493_v21 = vadd.f32 %v5485_v9, %v5467_v14 }
 0x4df   : > { %v5496_v32 = vadd.f32 %v5492_v52, %v4960_v16  ;;  %v5495_v22 = vadd.f32 %v5491_v17, %v4959_v31 }
 0x4e0   : > { %v5498_v23 = vmax.f32 %v5494_v20, 0.0  ;;  %v5497_v24 = vadd.f32 %v5493_v21, %v4961_v19 }
 0x4e1   : > { %v5500_v25 = vmax.f32 %v5496_v32, 0.0  ;;  %v5499_v26 = vmax.f32 %v5495_v22, 0.0 }
 0x4e2   : > { %v5501_v0 = vmax.f32 %v5497_v24, 0.0 }
 0x4e3   : > { %v5506_v34 = vcombine.low %v5498_v23, %v5499_v26 }
 0x4e4   : > { %v5507_v4 = vcombine.low %v5500_v25, %v5501_v0 }
 0x4e5   : > { %v5514_v35 = vrot.slane %v5506_v34, %v5513_v33 }
 0x4e6   : > { %v5521_v36 = vrot.slane %v5507_v4, %v5513_v33 }
 0x4e8   : > { %v5522_v37 = vcombine.low %v5514_v35, %v5521_v36 }
 0x4ea   : > { %5524 = vst [vmem:[%s511_s27] sm:$0xff] %v5522_v37 }
 0x4eb PF: > { %s26_s17 = sadd.s32 1, %s7841_s17  }
 0x4ec   : > { %p23_p11 = scmp.ge.s32.totalorder %s26_s17, 4  }
 0x4ee   :  { %25 = sbr.rel (!%p23_p11) target bundleno = 5 (0x5), region = 134 }
 0x4f5   :  { %5546 = vsyncpa [#allocation4], 1 }
 0x4f6   :  { %5548 = vsyncpa [#allocation4 + $0x1], 1 }
 0x4f7   :  { %5549 = vsyncpa [#allocation6], 1 }
 0x4f8   :  { %5550 = vsyncpa [#allocation9], 1 }
 0x4f9   :  { %5551 = vsyncpa [#allocation12], 1 }
 0x4fa   :  { %5552 = vsyncpa [#allocation15], 1 }

</bundles_post_ra>
